<compile_context>
chip_gen: v7x
topology: tpu7x:2x2x1
jax: 0.10.0
libtpu: 0.0.40
codegen_flags: <defaults>
</compile_context>

<pallas_src>
import jax
import jax.numpy as jnp
from jax import lax
from jax.experimental import pallas as pl
from jax.experimental.pallas import tpu as pltpu

# ---------------- problem constants (fixed by the module's expand()) --------
H, W = 75, 100                    # output spatial size forced by forward()
HP, WP = H + 2, W + 2             # zero-padded grid 77 x 102
C_IN, C_MID = 3, 64
KH = KW = 3
NTAP = KH * KW                    # 9 conv taps
NTAPP = 16                        # sublane-padded tap rows for conv2 weights

# ---------------- lane-aligned layout ---------------------------------------
WS = 128                          # padded-grid row stride (lane aligned)
GRID_ROWS = 80                    # 77 padded rows + 3 junk rows (even chunking)
GRID_COLS = GRID_ROWS * WS        # 10240 grid columns held in the taps scratch
GUARD = 256                       # zero guard so dy=-1 / dx=-1 reads stay in-bounds
TAIL = 256                        # zero tail so dy=+1 / dx=+1 reads stay in-bounds
WIDTH = GUARD + GRID_COLS + TAIL  # 10752 = 84 * 128 slab width
NOUT = H * WS                     # 9600 flat output columns (75 rows x 128)
KROWS = 8                         # slab rows: 3 channels + mask + antimask + 3 zero
K_ALL = NTAP * KROWS              # 72 = contraction size of the fused conv1 matmul
CHUNK = 2048                      # fused conv1->relu->conv2 column chunk
N_CHUNKS = GRID_COLS // CHUNK     # 5
NEG_BIG = -1e30                   # finite (never -inf: 0 * inf = nan); ReLU kills it


def light_point_kernel(xs_ref, w1_ref, w2_ref, b2_ref, o_ref, taps_ref):
    """One image per grid step.

    xs_ref  : (1, KROWS, WIDTH) stride-128 padded-image slab.
              rows 0..2 = channels, row 3 = interior mask (carries the folded
              conv1 bias + BN shift), row 4 = border/padding mask (weighted
              -1e30 so ReLU zeroes those columns), rows 5..7 = zero.
    w1_ref  : (C_MID, K_ALL) conv1 weights with BN scale folded in; column
              8*tap + k multiplies slab row k at the tap's shifted offset.
    w2_ref  : (NTAPP, C_MID) conv2 weights, row = dy*3 + dx (rows 9..15 zero).
    b2_ref  : (1, 1) SMEM    conv2 bias.
    o_ref   : (1, 1, NOUT)   sigmoid(conv2) flattened as r = y*WS + x.
    taps_ref: (NTAPP, GRID_COLS) VMEM scratch of per-tap conv2 contributions.
    """
    w1 = w1_ref[...]                                          # (64, 72)
    w2 = w2_ref[...]                                          # (16, 64)

    # fused conv1 -> ReLU -> conv2 channel contraction, one lane chunk at a time
    for ci in range(N_CHUNKS):
        c0 = ci * CHUNK
        base = GUARD + c0
        # Build the (72, CHUNK) im2col tile from 9 shifted slices of the 8-row
        # slab.  dy shifts are whole-vreg (multiples of 128); only dx in {0,2}
        # is lane-unaligned.
        pieces = []
        for tap in range(NTAP):
            dy, dx = divmod(tap, KW)
            start = base + (dy - 1) * WS + (dx - 1)
            pieces.append(xs_ref[0, :, start:start + CHUNK])  # (8, CHUNK)
        xtile = jnp.concatenate(pieces, axis=0)               # (72, CHUNK)

        # conv1 (+ folded BN scale, bias via mask row, -BIG on border row)
        z = jnp.dot(w1, xtile, preferred_element_type=jnp.float32)   # (64, CHUNK)
        act = jnp.maximum(z, 0.0)        # Dropout2d == identity (inference)
        # conv2 channel contraction
        taps = jnp.dot(w2, act, preferred_element_type=jnp.float32)  # (16, CHUNK)
        taps_ref[:, c0:c0 + CHUNK] = taps

    # conv2 spatial accumulation: 9 shifted adds on the stride-128 grid.
    # out[y*WS + x] = sum_{dy,dx} taps[dy*3+dx, (y+dy)*WS + (x+dx)]
    acc = taps_ref[0:1, 0:NOUT]                                # tap (0, 0)
    for tap in range(1, NTAP):
        dy, dx = divmod(tap, KW)
        off = dy * WS + dx
        acc = acc + taps_ref[tap:tap + 1, off:off + NOUT]      # (1, NOUT)

    out = jax.nn.sigmoid(acc + b2_ref[0, 0])                   # (1, NOUT)
    o_ref[...] = out.reshape(1, 1, NOUT).astype(o_ref.dtype)


def init_params(key):
    k1, k2, k3, k4, k5, k6 = jax.random.split(key, 6)
    fan1 = KH * KW * C_IN
    fan2 = KH * KW * C_MID
    return dict(
        w1=jax.random.normal(k1, (KH, KW, C_IN, C_MID), jnp.float32)
        * (2.0 / fan1) ** 0.5,                       # HWIO
        b1=0.05 * jax.random.normal(k2, (C_MID,), jnp.float32),
        gamma=1.0 + 0.1 * jax.random.normal(k3, (C_MID,), jnp.float32),
        beta=0.1 * jax.random.normal(k4, (C_MID,), jnp.float32),
        mean=jnp.zeros((C_MID,), jnp.float32),       # BN running mean
        var=jnp.ones((C_MID,), jnp.float32),         # BN running var
        w2=jax.random.normal(k5, (KH, KW, C_MID), jnp.float32)
        * (2.0 / fan2) ** 0.5,                       # (kh, kw, cin), cout == 1
        b2=0.05 * jax.random.normal(k6, (), jnp.float32),
    )


def _build_slab(x_nchw):
    """(B, 3, 75, 100) -> (B, KROWS, WIDTH) stride-128 padded-grid slab."""
    B = x_nchw.shape[0]
    # rows: 1 zero pad row, 75 image rows, 1 zero pad row, 3 junk zero rows
    # cols: 1 zero pad col, 100 image cols, 1 zero pad col, 26 stride-pad cols
    xp = jnp.pad(x_nchw.astype(jnp.float32),
                 ((0, 0), (0, 0),
                  (1, GRID_ROWS - H - 1), (1, WS - W - 1)))     # (B,3,80,128)
    flat = xp.reshape(B, C_IN, GRID_COLS)
    flat = jnp.pad(flat, ((0, 0), (0, 0), (GUARD, TAIL)))       # (B,3,WIDTH)

    # interior mask (1 exactly where real image pixels sit on the padded grid)
    m = jnp.pad(jnp.ones((H, W), jnp.float32),
                ((1, GRID_ROWS - H - 1), (1, WS - W - 1)))      # (80, 128)
    m = jnp.pad(m.reshape(1, GRID_COLS), ((0, 0), (GUARD, TAIL)))   # (1, WIDTH)
    rows = jnp.concatenate(
        [m, 1.0 - m, jnp.zeros((KROWS - C_IN - 2, WIDTH), jnp.float32)], axis=0)
    rows = jnp.broadcast_to(rows[None], (B, KROWS - C_IN, WIDTH))
    return jnp.concatenate([flat, rows], axis=1)                # (B,8,WIDTH)


def _fold_weights(params, eps):
    """Fold BN scale/shift and conv1 bias into the conv1 weight matrix."""
    s = params["gamma"] / jnp.sqrt(params["var"] + eps)          # (64,)
    t = (params["b1"] - params["mean"]) * s + params["beta"]     # (64,)
    w1s = params["w1"] * s[None, None, None, :]                  # (3,3,3,64)
    w1t = jnp.transpose(w1s, (0, 1, 3, 2)).reshape(NTAP, C_MID, C_IN)
    w1t = jnp.pad(w1t, ((0, 0), (0, 0), (0, KROWS - C_IN)))      # (9,64,8)
    # centre tap (dy=1, dx=1): mask row carries t, anti-mask row carries -BIG
    centre = w1t[NTAP // 2].at[:, C_IN].set(t).at[:, C_IN + 1].set(NEG_BIG)
    w1t = w1t.at[NTAP // 2].set(centre)
    w1_all = jnp.transpose(w1t, (1, 0, 2)).reshape(C_MID, K_ALL)  # (64,72)

    w2p = jnp.pad(params["w2"].reshape(NTAP, C_MID),
                  ((0, NTAPP - NTAP), (0, 0)))                   # (16,64)
    b2 = params["b2"].reshape(1, 1)
    return w1_all, w2p, b2


def light_point_net_forward(x_nchw, params, eps=1e-5):
    B, C, h, w = x_nchw.shape
    assert (C, h, w) == (C_IN, H, W), \
        "forward's expand() implies input (B, 3, 75, 100)"

    slab = _build_slab(x_nchw)                                   # (B,8,WIDTH)
    w1_all, w2p, b2 = _fold_weights(params, eps)

    out = pl.pallas_call(
        light_point_kernel,
        out_shape=jax.ShapeDtypeStruct((B, 1, NOUT), jnp.float32),
        grid_spec=pltpu.PrefetchScalarGridSpec(
            num_scalar_prefetch=0,
            grid=(B,),
            in_specs=[
                pl.BlockSpec((1, KROWS, WIDTH), lambda b: (b, 0, 0)),   # slab
                pl.BlockSpec((C_MID, K_ALL), lambda b: (0, 0)),         # w1
                pl.BlockSpec((NTAPP, C_MID), lambda b: (0, 0)),         # w2
                pl.BlockSpec(memory_space=pltpu.MemorySpace.SMEM),      # b2
            ],
            out_specs=pl.BlockSpec((1, 1, NOUT), lambda b: (b, 0, 0)),
            scratch_shapes=[pltpu.VMEM((NTAPP, GRID_COLS), jnp.float32)],
        ),
        compiler_params=pltpu.CompilerParams(
            dimension_semantics=("parallel",),        # batch is data-parallel
            vmem_limit_bytes=24 * 1024 * 1024,
        ),
    )(slab, w1_all, w2p, b2)                                     # (B, 1, NOUT)

    # un-flatten: r = y*WS + x ; drop the stride-pad columns x in [100, 128)
    y = out[:, 0, :].reshape(B, H, WS)[:, :, :W]                 # (B, 75, 100)
    # layer.expand(batch, 3, 75, 100): broadcast single channel to 3, NCHW out
    return jnp.broadcast_to(y[:, None, :, :], (B, 3, H, W))


def reference_forward(x_nchw, params, eps=1e-5):
    """Pure-JAX reference (same inference semantics) for verification."""
    w1_oihw = jnp.transpose(params["w1"], (3, 2, 0, 1))          # (64,3,3,3)
    y = lax.conv_general_dilated(
        x_nchw, w1_oihw, (1, 1), ((1, 1), (1, 1)),
        dimension_numbers=("NCHW", "OIHW", "NCHW"),
        precision=lax.Precision.HIGHEST)
    y = y + params["b1"][None, :, None, None]
    s = params["gamma"] / jnp.sqrt(params["var"] + eps)
    y = (y - params["mean"][None, :, None, None]) * s[None, :, None, None] \
        + params["beta"][None, :, None, None]
    y = jnp.maximum(y, 0.0)
    w2_oihw = jnp.transpose(params["w2"], (2, 0, 1))[None]       # (1,64,3,3)
    z = lax.conv_general_dilated(
        y, w2_oihw, (1, 1), ((1, 1), (1, 1)),
        dimension_numbers=("NCHW", "OIHW", "NCHW"),
        precision=lax.Precision.HIGHEST)
    z = jax.nn.sigmoid(z + params["b2"])
    return jnp.broadcast_to(z, (x_nchw.shape[0], 3, H, W))


if __name__ == "__main__":
    key = jax.random.PRNGKey(0)
    pkey, xkey = jax.random.split(key)
    params = init_params(pkey)

    # Small batch; spatial dims are fixed to 75x100 by the module's expand().
    x = jax.random.normal(xkey, (2, C_IN, H, W), jnp.float32)    # NCHW input

    y = light_point_net_forward(x, params)
    y = jax.block_until_ready(y)
    assert y.shape == (2, 3, H, W) and y.dtype == jnp.float32

    y_ref = reference_forward(x, params)
    err = float(jnp.max(jnp.abs(y - y_ref)))
    assert jnp.allclose(y, y_ref, atol=2e-3, rtol=2e-3), err

    print("KERNEL_OK")
</pallas_src>

<mosaic_0001>
module attributes {stable_mosaic.version = 11 : i64} {
  func.func @light_point_kernel(%arg0: i32, %arg1: memref<1x8x10752xf32, #tpu.memory_space<vmem>>, %arg2: memref<64x72xf32, #tpu.memory_space<vmem>>, %arg3: memref<16x64xf32, #tpu.memory_space<vmem>>, %arg4: memref<1x1xf32, #tpu.memory_space<smem>>, %arg5: memref<1x1x9600xf32, #tpu.memory_space<vmem>>, %arg6: memref<16x10240xf32, #tpu.memory_space<vmem>>) attributes {dimension_semantics = [#tpu.dimension_semantics<parallel>], iteration_bounds = array<i64: 2>, scalar_prefetch = 0 : i64, scratch_operands = 1 : i64, tpu.core_type = #tpu.core_type<tc>, window_params = [{transform_indices = @transform_0, window_bounds = array<i64: 1, 8, 10752>}, {pipeline_mode = #tpu.pipeline_mode<synchronous>, transform_indices = @transform_1, window_bounds = array<i64: 64, 72>}, {pipeline_mode = #tpu.pipeline_mode<synchronous>, transform_indices = @transform_2, window_bounds = array<i64: 16, 64>}, {transform_indices = @transform_3, window_bounds = array<i64: 1, 1>}, {transform_indices = @transform_4, window_bounds = array<i64: 1, 1, 9600>}]} {
    %c0 = arith.constant 0 : index
    %c0_0 = arith.constant 0 : index
    %0 = vector.load %arg2[%c0, %c0_0] : memref<64x72xf32, #tpu.memory_space<vmem>>, vector<64x72xf32>
    %c0_1 = arith.constant 0 : index
    %c0_2 = arith.constant 0 : index
    %1 = vector.load %arg3[%c0_1, %c0_2] : memref<16x64xf32, #tpu.memory_space<vmem>>, vector<16x64xf32>
    %c0_3 = arith.constant 0 : index
    %c0_4 = arith.constant 0 : index
    %c127 = arith.constant 127 : index
    %2 = vector.load %arg1[%c0_3, %c0_4, %c127] : memref<1x8x10752xf32, #tpu.memory_space<vmem>>, vector<1x8x2048xf32>
    %3 = vector.shape_cast %2 : vector<1x8x2048xf32> to vector<8x2048xf32>
    %c0_5 = arith.constant 0 : index
    %c0_6 = arith.constant 0 : index
    %c128 = arith.constant 128 : index
    %4 = vector.load %arg1[%c0_5, %c0_6, %c128] : memref<1x8x10752xf32, #tpu.memory_space<vmem>>, vector<1x8x2048xf32>
    %5 = vector.shape_cast %4 : vector<1x8x2048xf32> to vector<8x2048xf32>
    %c0_7 = arith.constant 0 : index
    %c0_8 = arith.constant 0 : index
    %c129 = arith.constant 129 : index
    %6 = vector.load %arg1[%c0_7, %c0_8, %c129] : memref<1x8x10752xf32, #tpu.memory_space<vmem>>, vector<1x8x2048xf32>
    %7 = vector.shape_cast %6 : vector<1x8x2048xf32> to vector<8x2048xf32>
    %c0_9 = arith.constant 0 : index
    %c0_10 = arith.constant 0 : index
    %c255 = arith.constant 255 : index
    %8 = vector.load %arg1[%c0_9, %c0_10, %c255] : memref<1x8x10752xf32, #tpu.memory_space<vmem>>, vector<1x8x2048xf32>
    %9 = vector.shape_cast %8 : vector<1x8x2048xf32> to vector<8x2048xf32>
    %c0_11 = arith.constant 0 : index
    %c0_12 = arith.constant 0 : index
    %c256 = arith.constant 256 : index
    %10 = vector.load %arg1[%c0_11, %c0_12, %c256] : memref<1x8x10752xf32, #tpu.memory_space<vmem>>, vector<1x8x2048xf32>
    %11 = vector.shape_cast %10 : vector<1x8x2048xf32> to vector<8x2048xf32>
    %c0_13 = arith.constant 0 : index
    %c0_14 = arith.constant 0 : index
    %c257 = arith.constant 257 : index
    %12 = vector.load %arg1[%c0_13, %c0_14, %c257] : memref<1x8x10752xf32, #tpu.memory_space<vmem>>, vector<1x8x2048xf32>
    %13 = vector.shape_cast %12 : vector<1x8x2048xf32> to vector<8x2048xf32>
    %c0_15 = arith.constant 0 : index
    %c0_16 = arith.constant 0 : index
    %c383 = arith.constant 383 : index
    %14 = vector.load %arg1[%c0_15, %c0_16, %c383] : memref<1x8x10752xf32, #tpu.memory_space<vmem>>, vector<1x8x2048xf32>
    %15 = vector.shape_cast %14 : vector<1x8x2048xf32> to vector<8x2048xf32>
    %c0_17 = arith.constant 0 : index
    %c0_18 = arith.constant 0 : index
    %c384 = arith.constant 384 : index
    %16 = vector.load %arg1[%c0_17, %c0_18, %c384] : memref<1x8x10752xf32, #tpu.memory_space<vmem>>, vector<1x8x2048xf32>
    %17 = vector.shape_cast %16 : vector<1x8x2048xf32> to vector<8x2048xf32>
    %c0_19 = arith.constant 0 : index
    %c0_20 = arith.constant 0 : index
    %c385 = arith.constant 385 : index
    %18 = vector.load %arg1[%c0_19, %c0_20, %c385] : memref<1x8x10752xf32, #tpu.memory_space<vmem>>, vector<1x8x2048xf32>
    %19 = vector.shape_cast %18 : vector<1x8x2048xf32> to vector<8x2048xf32>
    %20 = tpu.concatenate %3, %5, %7, %9, %11, %13, %15, %17, %19 in 0 : vector<8x2048xf32>, vector<8x2048xf32>, vector<8x2048xf32>, vector<8x2048xf32>, vector<8x2048xf32>, vector<8x2048xf32>, vector<8x2048xf32>, vector<8x2048xf32>, vector<8x2048xf32> -> vector<72x2048xf32>
    %cst = arith.constant dense<0.000000e+00> : vector<64x2048xf32>
    %21 = tpu.matmul %0, %20, %cst {dimension_numbers = #tpu.dot_dimension_numbers<[1], [0], [0], [1], [0, 0, 1, 1], [], []>} : vector<64x72xf32>, vector<72x2048xf32>, vector<64x2048xf32> -> vector<64x2048xf32>
    %cst_21 = arith.constant 0.000000e+00 : f32
    %22 = vector.broadcast %cst_21 : f32 to vector<64x2048xf32>
    %23 = arith.maximumf %21, %22 : vector<64x2048xf32>
    %cst_22 = arith.constant dense<0.000000e+00> : vector<16x2048xf32>
    %24 = tpu.matmul %1, %23, %cst_22 {dimension_numbers = #tpu.dot_dimension_numbers<[1], [0], [0], [1], [0, 0, 1, 1], [], []>} : vector<16x64xf32>, vector<64x2048xf32>, vector<16x2048xf32> -> vector<16x2048xf32>
    %c0_23 = arith.constant 0 : index
    %c0_24 = arith.constant 0 : index
    %25 = vector.load %arg6[%c0_23, %c0_24] : memref<16x10240xf32, #tpu.memory_space<vmem>>, vector<16x2048xf32>
    tpu.vector_store %arg6[%c0_23, %c0_24], %24 {strides = array<i32>} : memref<16x10240xf32, #tpu.memory_space<vmem>>, vector<16x2048xf32>,
    %c0_25 = arith.constant 0 : index
    %c0_26 = arith.constant 0 : index
    %c2175 = arith.constant 2175 : index
    %26 = vector.load %arg1[%c0_25, %c0_26, %c2175] : memref<1x8x10752xf32, #tpu.memory_space<vmem>>, vector<1x8x2048xf32>
    %27 = vector.shape_cast %26 : vector<1x8x2048xf32> to vector<8x2048xf32>
    %c0_27 = arith.constant 0 : index
    %c0_28 = arith.constant 0 : index
    %c2176 = arith.constant 2176 : index
    %28 = vector.load %arg1[%c0_27, %c0_28, %c2176] : memref<1x8x10752xf32, #tpu.memory_space<vmem>>, vector<1x8x2048xf32>
    %29 = vector.shape_cast %28 : vector<1x8x2048xf32> to vector<8x2048xf32>
    %c0_29 = arith.constant 0 : index
    %c0_30 = arith.constant 0 : index
    %c2177 = arith.constant 2177 : index
    %30 = vector.load %arg1[%c0_29, %c0_30, %c2177] : memref<1x8x10752xf32, #tpu.memory_space<vmem>>, vector<1x8x2048xf32>
    %31 = vector.shape_cast %30 : vector<1x8x2048xf32> to vector<8x2048xf32>
    %c0_31 = arith.constant 0 : index
    %c0_32 = arith.constant 0 : index
    %c2303 = arith.constant 2303 : index
    %32 = vector.load %arg1[%c0_31, %c0_32, %c2303] : memref<1x8x10752xf32, #tpu.memory_space<vmem>>, vector<1x8x2048xf32>
    %33 = vector.shape_cast %32 : vector<1x8x2048xf32> to vector<8x2048xf32>
    %c0_33 = arith.constant 0 : index
    %c0_34 = arith.constant 0 : index
    %c2304 = arith.constant 2304 : index
    %34 = vector.load %arg1[%c0_33, %c0_34, %c2304] : memref<1x8x10752xf32, #tpu.memory_space<vmem>>, vector<1x8x2048xf32>
    %35 = vector.shape_cast %34 : vector<1x8x2048xf32> to vector<8x2048xf32>
    %c0_35 = arith.constant 0 : index
    %c0_36 = arith.constant 0 : index
    %c2305 = arith.constant 2305 : index
    %36 = vector.load %arg1[%c0_35, %c0_36, %c2305] : memref<1x8x10752xf32, #tpu.memory_space<vmem>>, vector<1x8x2048xf32>
    %37 = vector.shape_cast %36 : vector<1x8x2048xf32> to vector<8x2048xf32>
    %c0_37 = arith.constant 0 : index
    %c0_38 = arith.constant 0 : index
    %c2431 = arith.constant 2431 : index
    %38 = vector.load %arg1[%c0_37, %c0_38, %c2431] : memref<1x8x10752xf32, #tpu.memory_space<vmem>>, vector<1x8x2048xf32>
    %39 = vector.shape_cast %38 : vector<1x8x2048xf32> to vector<8x2048xf32>
    %c0_39 = arith.constant 0 : index
    %c0_40 = arith.constant 0 : index
    %c2432 = arith.constant 2432 : index
    %40 = vector.load %arg1[%c0_39, %c0_40, %c2432] : memref<1x8x10752xf32, #tpu.memory_space<vmem>>, vector<1x8x2048xf32>
    %41 = vector.shape_cast %40 : vector<1x8x2048xf32> to vector<8x2048xf32>
    %c0_41 = arith.constant 0 : index
    %c0_42 = arith.constant 0 : index
    %c2433 = arith.constant 2433 : index
    %42 = vector.load %arg1[%c0_41, %c0_42, %c2433] : memref<1x8x10752xf32, #tpu.memory_space<vmem>>, vector<1x8x2048xf32>
    %43 = vector.shape_cast %42 : vector<1x8x2048xf32> to vector<8x2048xf32>
    %44 = tpu.concatenate %27, %29, %31, %33, %35, %37, %39, %41, %43 in 0 : vector<8x2048xf32>, vector<8x2048xf32>, vector<8x2048xf32>, vector<8x2048xf32>, vector<8x2048xf32>, vector<8x2048xf32>, vector<8x2048xf32>, vector<8x2048xf32>, vector<8x2048xf32> -> vector<72x2048xf32>
    %cst_43 = arith.constant dense<0.000000e+00> : vector<64x2048xf32>
    %45 = tpu.matmul %0, %44, %cst_43 {dimension_numbers = #tpu.dot_dimension_numbers<[1], [0], [0], [1], [0, 0, 1, 1], [], []>} : vector<64x72xf32>, vector<72x2048xf32>, vector<64x2048xf32> -> vector<64x2048xf32>
    %cst_44 = arith.constant 0.000000e+00 : f32
    %46 = vector.broadcast %cst_44 : f32 to vector<64x2048xf32>
    %47 = arith.maximumf %45, %46 : vector<64x2048xf32>
    %cst_45 = arith.constant dense<0.000000e+00> : vector<16x2048xf32>
    %48 = tpu.matmul %1, %47, %cst_45 {dimension_numbers = #tpu.dot_dimension_numbers<[1], [0], [0], [1], [0, 0, 1, 1], [], []>} : vector<16x64xf32>, vector<64x2048xf32>, vector<16x2048xf32> -> vector<16x2048xf32>
    %c0_46 = arith.constant 0 : index
    %c2048 = arith.constant 2048 : index
    %49 = vector.load %arg6[%c0_46, %c2048] : memref<16x10240xf32, #tpu.memory_space<vmem>>, vector<16x2048xf32>
    tpu.vector_store %arg6[%c0_46, %c2048], %48 {strides = array<i32>} : memref<16x10240xf32, #tpu.memory_space<vmem>>, vector<16x2048xf32>,
    %c0_47 = arith.constant 0 : index
    %c0_48 = arith.constant 0 : index
    %c4223 = arith.constant 4223 : index
    %50 = vector.load %arg1[%c0_47, %c0_48, %c4223] : memref<1x8x10752xf32, #tpu.memory_space<vmem>>, vector<1x8x2048xf32>
    %51 = vector.shape_cast %50 : vector<1x8x2048xf32> to vector<8x2048xf32>
    %c0_49 = arith.constant 0 : index
    %c0_50 = arith.constant 0 : index
    %c4224 = arith.constant 4224 : index
    %52 = vector.load %arg1[%c0_49, %c0_50, %c4224] : memref<1x8x10752xf32, #tpu.memory_space<vmem>>, vector<1x8x2048xf32>
    %53 = vector.shape_cast %52 : vector<1x8x2048xf32> to vector<8x2048xf32>
    %c0_51 = arith.constant 0 : index
    %c0_52 = arith.constant 0 : index
    %c4225 = arith.constant 4225 : index
    %54 = vector.load %arg1[%c0_51, %c0_52, %c4225] : memref<1x8x10752xf32, #tpu.memory_space<vmem>>, vector<1x8x2048xf32>
    %55 = vector.shape_cast %54 : vector<1x8x2048xf32> to vector<8x2048xf32>
    %c0_53 = arith.constant 0 : index
    %c0_54 = arith.constant 0 : index
    %c4351 = arith.constant 4351 : index
    %56 = vector.load %arg1[%c0_53, %c0_54, %c4351] : memref<1x8x10752xf32, #tpu.memory_space<vmem>>, vector<1x8x2048xf32>
    %57 = vector.shape_cast %56 : vector<1x8x2048xf32> to vector<8x2048xf32>
    %c0_55 = arith.constant 0 : index
    %c0_56 = arith.constant 0 : index
    %c4352 = arith.constant 4352 : index
    %58 = vector.load %arg1[%c0_55, %c0_56, %c4352] : memref<1x8x10752xf32, #tpu.memory_space<vmem>>, vector<1x8x2048xf32>
    %59 = vector.shape_cast %58 : vector<1x8x2048xf32> to vector<8x2048xf32>
    %c0_57 = arith.constant 0 : index
    %c0_58 = arith.constant 0 : index
    %c4353 = arith.constant 4353 : index
    %60 = vector.load %arg1[%c0_57, %c0_58, %c4353] : memref<1x8x10752xf32, #tpu.memory_space<vmem>>, vector<1x8x2048xf32>
    %61 = vector.shape_cast %60 : vector<1x8x2048xf32> to vector<8x2048xf32>
    %c0_59 = arith.constant 0 : index
    %c0_60 = arith.constant 0 : index
    %c4479 = arith.constant 4479 : index
    %62 = vector.load %arg1[%c0_59, %c0_60, %c4479] : memref<1x8x10752xf32, #tpu.memory_space<vmem>>, vector<1x8x2048xf32>
    %63 = vector.shape_cast %62 : vector<1x8x2048xf32> to vector<8x2048xf32>
    %c0_61 = arith.constant 0 : index
    %c0_62 = arith.constant 0 : index
    %c4480 = arith.constant 4480 : index
    %64 = vector.load %arg1[%c0_61, %c0_62, %c4480] : memref<1x8x10752xf32, #tpu.memory_space<vmem>>, vector<1x8x2048xf32>
    %65 = vector.shape_cast %64 : vector<1x8x2048xf32> to vector<8x2048xf32>
    %c0_63 = arith.constant 0 : index
    %c0_64 = arith.constant 0 : index
    %c4481 = arith.constant 4481 : index
    %66 = vector.load %arg1[%c0_63, %c0_64, %c4481] : memref<1x8x10752xf32, #tpu.memory_space<vmem>>, vector<1x8x2048xf32>
    %67 = vector.shape_cast %66 : vector<1x8x2048xf32> to vector<8x2048xf32>
    %68 = tpu.concatenate %51, %53, %55, %57, %59, %61, %63, %65, %67 in 0 : vector<8x2048xf32>, vector<8x2048xf32>, vector<8x2048xf32>, vector<8x2048xf32>, vector<8x2048xf32>, vector<8x2048xf32>, vector<8x2048xf32>, vector<8x2048xf32>, vector<8x2048xf32> -> vector<72x2048xf32>
    %cst_65 = arith.constant dense<0.000000e+00> : vector<64x2048xf32>
    %69 = tpu.matmul %0, %68, %cst_65 {dimension_numbers = #tpu.dot_dimension_numbers<[1], [0], [0], [1], [0, 0, 1, 1], [], []>} : vector<64x72xf32>, vector<72x2048xf32>, vector<64x2048xf32> -> vector<64x2048xf32>
    %cst_66 = arith.constant 0.000000e+00 : f32
    %70 = vector.broadcast %cst_66 : f32 to vector<64x2048xf32>
    %71 = arith.maximumf %69, %70 : vector<64x2048xf32>
    %cst_67 = arith.constant dense<0.000000e+00> : vector<16x2048xf32>
    %72 = tpu.matmul %1, %71, %cst_67 {dimension_numbers = #tpu.dot_dimension_numbers<[1], [0], [0], [1], [0, 0, 1, 1], [], []>} : vector<16x64xf32>, vector<64x2048xf32>, vector<16x2048xf32> -> vector<16x2048xf32>
    %c0_68 = arith.constant 0 : index
    %c4096 = arith.constant 4096 : index
    %73 = vector.load %arg6[%c0_68, %c4096] : memref<16x10240xf32, #tpu.memory_space<vmem>>, vector<16x2048xf32>
    tpu.vector_store %arg6[%c0_68, %c4096], %72 {strides = array<i32>} : memref<16x10240xf32, #tpu.memory_space<vmem>>, vector<16x2048xf32>,
    %c0_69 = arith.constant 0 : index
    %c0_70 = arith.constant 0 : index
    %c6271 = arith.constant 6271 : index
    %74 = vector.load %arg1[%c0_69, %c0_70, %c6271] : memref<1x8x10752xf32, #tpu.memory_space<vmem>>, vector<1x8x2048xf32>
    %75 = vector.shape_cast %74 : vector<1x8x2048xf32> to vector<8x2048xf32>
    %c0_71 = arith.constant 0 : index
    %c0_72 = arith.constant 0 : index
    %c6272 = arith.constant 6272 : index
    %76 = vector.load %arg1[%c0_71, %c0_72, %c6272] : memref<1x8x10752xf32, #tpu.memory_space<vmem>>, vector<1x8x2048xf32>
    %77 = vector.shape_cast %76 : vector<1x8x2048xf32> to vector<8x2048xf32>
    %c0_73 = arith.constant 0 : index
    %c0_74 = arith.constant 0 : index
    %c6273 = arith.constant 6273 : index
    %78 = vector.load %arg1[%c0_73, %c0_74, %c6273] : memref<1x8x10752xf32, #tpu.memory_space<vmem>>, vector<1x8x2048xf32>
    %79 = vector.shape_cast %78 : vector<1x8x2048xf32> to vector<8x2048xf32>
    %c0_75 = arith.constant 0 : index
    %c0_76 = arith.constant 0 : index
    %c6399 = arith.constant 6399 : index
    %80 = vector.load %arg1[%c0_75, %c0_76, %c6399] : memref<1x8x10752xf32, #tpu.memory_space<vmem>>, vector<1x8x2048xf32>
    %81 = vector.shape_cast %80 : vector<1x8x2048xf32> to vector<8x2048xf32>
    %c0_77 = arith.constant 0 : index
    %c0_78 = arith.constant 0 : index
    %c6400 = arith.constant 6400 : index
    %82 = vector.load %arg1[%c0_77, %c0_78, %c6400] : memref<1x8x10752xf32, #tpu.memory_space<vmem>>, vector<1x8x2048xf32>
    %83 = vector.shape_cast %82 : vector<1x8x2048xf32> to vector<8x2048xf32>
    %c0_79 = arith.constant 0 : index
    %c0_80 = arith.constant 0 : index
    %c6401 = arith.constant 6401 : index
    %84 = vector.load %arg1[%c0_79, %c0_80, %c6401] : memref<1x8x10752xf32, #tpu.memory_space<vmem>>, vector<1x8x2048xf32>
    %85 = vector.shape_cast %84 : vector<1x8x2048xf32> to vector<8x2048xf32>
    %c0_81 = arith.constant 0 : index
    %c0_82 = arith.constant 0 : index
    %c6527 = arith.constant 6527 : index
    %86 = vector.load %arg1[%c0_81, %c0_82, %c6527] : memref<1x8x10752xf32, #tpu.memory_space<vmem>>, vector<1x8x2048xf32>
    %87 = vector.shape_cast %86 : vector<1x8x2048xf32> to vector<8x2048xf32>
    %c0_83 = arith.constant 0 : index
    %c0_84 = arith.constant 0 : index
    %c6528 = arith.constant 6528 : index
    %88 = vector.load %arg1[%c0_83, %c0_84, %c6528] : memref<1x8x10752xf32, #tpu.memory_space<vmem>>, vector<1x8x2048xf32>
    %89 = vector.shape_cast %88 : vector<1x8x2048xf32> to vector<8x2048xf32>
    %c0_85 = arith.constant 0 : index
    %c0_86 = arith.constant 0 : index
    %c6529 = arith.constant 6529 : index
    %90 = vector.load %arg1[%c0_85, %c0_86, %c6529] : memref<1x8x10752xf32, #tpu.memory_space<vmem>>, vector<1x8x2048xf32>
    %91 = vector.shape_cast %90 : vector<1x8x2048xf32> to vector<8x2048xf32>
    %92 = tpu.concatenate %75, %77, %79, %81, %83, %85, %87, %89, %91 in 0 : vector<8x2048xf32>, vector<8x2048xf32>, vector<8x2048xf32>, vector<8x2048xf32>, vector<8x2048xf32>, vector<8x2048xf32>, vector<8x2048xf32>, vector<8x2048xf32>, vector<8x2048xf32> -> vector<72x2048xf32>
    %cst_87 = arith.constant dense<0.000000e+00> : vector<64x2048xf32>
    %93 = tpu.matmul %0, %92, %cst_87 {dimension_numbers = #tpu.dot_dimension_numbers<[1], [0], [0], [1], [0, 0, 1, 1], [], []>} : vector<64x72xf32>, vector<72x2048xf32>, vector<64x2048xf32> -> vector<64x2048xf32>
    %cst_88 = arith.constant 0.000000e+00 : f32
    %94 = vector.broadcast %cst_88 : f32 to vector<64x2048xf32>
    %95 = arith.maximumf %93, %94 : vector<64x2048xf32>
    %cst_89 = arith.constant dense<0.000000e+00> : vector<16x2048xf32>
    %96 = tpu.matmul %1, %95, %cst_89 {dimension_numbers = #tpu.dot_dimension_numbers<[1], [0], [0], [1], [0, 0, 1, 1], [], []>} : vector<16x64xf32>, vector<64x2048xf32>, vector<16x2048xf32> -> vector<16x2048xf32>
    %c0_90 = arith.constant 0 : index
    %c6144 = arith.constant 6144 : index
    %97 = vector.load %arg6[%c0_90, %c6144] : memref<16x10240xf32, #tpu.memory_space<vmem>>, vector<16x2048xf32>
    tpu.vector_store %arg6[%c0_90, %c6144], %96 {strides = array<i32>} : memref<16x10240xf32, #tpu.memory_space<vmem>>, vector<16x2048xf32>,
    %c0_91 = arith.constant 0 : index
    %c0_92 = arith.constant 0 : index
    %c8319 = arith.constant 8319 : index
    %98 = vector.load %arg1[%c0_91, %c0_92, %c8319] : memref<1x8x10752xf32, #tpu.memory_space<vmem>>, vector<1x8x2048xf32>
    %99 = vector.shape_cast %98 : vector<1x8x2048xf32> to vector<8x2048xf32>
    %c0_93 = arith.constant 0 : index
    %c0_94 = arith.constant 0 : index
    %c8320 = arith.constant 8320 : index
    %100 = vector.load %arg1[%c0_93, %c0_94, %c8320] : memref<1x8x10752xf32, #tpu.memory_space<vmem>>, vector<1x8x2048xf32>
    %101 = vector.shape_cast %100 : vector<1x8x2048xf32> to vector<8x2048xf32>
    %c0_95 = arith.constant 0 : index
    %c0_96 = arith.constant 0 : index
    %c8321 = arith.constant 8321 : index
    %102 = vector.load %arg1[%c0_95, %c0_96, %c8321] : memref<1x8x10752xf32, #tpu.memory_space<vmem>>, vector<1x8x2048xf32>
    %103 = vector.shape_cast %102 : vector<1x8x2048xf32> to vector<8x2048xf32>
    %c0_97 = arith.constant 0 : index
    %c0_98 = arith.constant 0 : index
    %c8447 = arith.constant 8447 : index
    %104 = vector.load %arg1[%c0_97, %c0_98, %c8447] : memref<1x8x10752xf32, #tpu.memory_space<vmem>>, vector<1x8x2048xf32>
    %105 = vector.shape_cast %104 : vector<1x8x2048xf32> to vector<8x2048xf32>
    %c0_99 = arith.constant 0 : index
    %c0_100 = arith.constant 0 : index
    %c8448 = arith.constant 8448 : index
    %106 = vector.load %arg1[%c0_99, %c0_100, %c8448] : memref<1x8x10752xf32, #tpu.memory_space<vmem>>, vector<1x8x2048xf32>
    %107 = vector.shape_cast %106 : vector<1x8x2048xf32> to vector<8x2048xf32>
    %c0_101 = arith.constant 0 : index
    %c0_102 = arith.constant 0 : index
    %c8449 = arith.constant 8449 : index
    %108 = vector.load %arg1[%c0_101, %c0_102, %c8449] : memref<1x8x10752xf32, #tpu.memory_space<vmem>>, vector<1x8x2048xf32>
    %109 = vector.shape_cast %108 : vector<1x8x2048xf32> to vector<8x2048xf32>
    %c0_103 = arith.constant 0 : index
    %c0_104 = arith.constant 0 : index
    %c8575 = arith.constant 8575 : index
    %110 = vector.load %arg1[%c0_103, %c0_104, %c8575] : memref<1x8x10752xf32, #tpu.memory_space<vmem>>, vector<1x8x2048xf32>
    %111 = vector.shape_cast %110 : vector<1x8x2048xf32> to vector<8x2048xf32>
    %c0_105 = arith.constant 0 : index
    %c0_106 = arith.constant 0 : index
    %c8576 = arith.constant 8576 : index
    %112 = vector.load %arg1[%c0_105, %c0_106, %c8576] : memref<1x8x10752xf32, #tpu.memory_space<vmem>>, vector<1x8x2048xf32>
    %113 = vector.shape_cast %112 : vector<1x8x2048xf32> to vector<8x2048xf32>
    %c0_107 = arith.constant 0 : index
    %c0_108 = arith.constant 0 : index
    %c8577 = arith.constant 8577 : index
    %114 = vector.load %arg1[%c0_107, %c0_108, %c8577] : memref<1x8x10752xf32, #tpu.memory_space<vmem>>, vector<1x8x2048xf32>
    %115 = vector.shape_cast %114 : vector<1x8x2048xf32> to vector<8x2048xf32>
    %116 = tpu.concatenate %99, %101, %103, %105, %107, %109, %111, %113, %115 in 0 : vector<8x2048xf32>, vector<8x2048xf32>, vector<8x2048xf32>, vector<8x2048xf32>, vector<8x2048xf32>, vector<8x2048xf32>, vector<8x2048xf32>, vector<8x2048xf32>, vector<8x2048xf32> -> vector<72x2048xf32>
    %cst_109 = arith.constant dense<0.000000e+00> : vector<64x2048xf32>
    %117 = tpu.matmul %0, %116, %cst_109 {dimension_numbers = #tpu.dot_dimension_numbers<[1], [0], [0], [1], [0, 0, 1, 1], [], []>} : vector<64x72xf32>, vector<72x2048xf32>, vector<64x2048xf32> -> vector<64x2048xf32>
    %cst_110 = arith.constant 0.000000e+00 : f32
    %118 = vector.broadcast %cst_110 : f32 to vector<64x2048xf32>
    %119 = arith.maximumf %117, %118 : vector<64x2048xf32>
    %cst_111 = arith.constant dense<0.000000e+00> : vector<16x2048xf32>
    %120 = tpu.matmul %1, %119, %cst_111 {dimension_numbers = #tpu.dot_dimension_numbers<[1], [0], [0], [1], [0, 0, 1, 1], [], []>} : vector<16x64xf32>, vector<64x2048xf32>, vector<16x2048xf32> -> vector<16x2048xf32>
    %c0_112 = arith.constant 0 : index
    %c8192 = arith.constant 8192 : index
    %121 = vector.load %arg6[%c0_112, %c8192] : memref<16x10240xf32, #tpu.memory_space<vmem>>, vector<16x2048xf32>
    tpu.vector_store %arg6[%c0_112, %c8192], %120 {strides = array<i32>} : memref<16x10240xf32, #tpu.memory_space<vmem>>, vector<16x2048xf32>,
    %c0_113 = arith.constant 0 : index
    %c0_114 = arith.constant 0 : index
    %122 = vector.load %arg6[%c0_113, %c0_114] : memref<16x10240xf32, #tpu.memory_space<vmem>>, vector<1x9600xf32>
    %c1 = arith.constant 1 : index
    %c1_115 = arith.constant 1 : index
    %123 = vector.load %arg6[%c1, %c1_115] : memref<16x10240xf32, #tpu.memory_space<vmem>>, vector<1x9600xf32>
    %124 = arith.addf %122, %123 : vector<1x9600xf32>
    %c2 = arith.constant 2 : index
    %c2_116 = arith.constant 2 : index
    %125 = vector.load %arg6[%c2, %c2_116] : memref<16x10240xf32, #tpu.memory_space<vmem>>, vector<1x9600xf32>
    %126 = arith.addf %124, %125 : vector<1x9600xf32>
    %c3 = arith.constant 3 : index
    %c128_117 = arith.constant 128 : index
    %127 = vector.load %arg6[%c3, %c128_117] : memref<16x10240xf32, #tpu.memory_space<vmem>>, vector<1x9600xf32>
    %128 = arith.addf %126, %127 : vector<1x9600xf32>
    %c4 = arith.constant 4 : index
    %c129_118 = arith.constant 129 : index
    %129 = vector.load %arg6[%c4, %c129_118] : memref<16x10240xf32, #tpu.memory_space<vmem>>, vector<1x9600xf32>
    %130 = arith.addf %128, %129 : vector<1x9600xf32>
    %c5 = arith.constant 5 : index
    %c130 = arith.constant 130 : index
    %131 = vector.load %arg6[%c5, %c130] : memref<16x10240xf32, #tpu.memory_space<vmem>>, vector<1x9600xf32>
    %132 = arith.addf %130, %131 : vector<1x9600xf32>
    %c6 = arith.constant 6 : index
    %c256_119 = arith.constant 256 : index
    %133 = vector.load %arg6[%c6, %c256_119] : memref<16x10240xf32, #tpu.memory_space<vmem>>, vector<1x9600xf32>
    %134 = arith.addf %132, %133 : vector<1x9600xf32>
    %c7 = arith.constant 7 : index
    %c257_120 = arith.constant 257 : index
    %135 = vector.load %arg6[%c7, %c257_120] : memref<16x10240xf32, #tpu.memory_space<vmem>>, vector<1x9600xf32>
    %136 = arith.addf %134, %135 : vector<1x9600xf32>
    %c8 = arith.constant 8 : index
    %c258 = arith.constant 258 : index
    %137 = vector.load %arg6[%c8, %c258] : memref<16x10240xf32, #tpu.memory_space<vmem>>, vector<1x9600xf32>
    %138 = arith.addf %136, %137 : vector<1x9600xf32>
    %c0_121 = arith.constant 0 : index
    %c0_122 = arith.constant 0 : index
    %139 = memref.load %arg4[%c0_121, %c0_122] : memref<1x1xf32, #tpu.memory_space<smem>>
    %140 = vector.broadcast %139 : f32 to vector<1x9600xf32>
    %141 = arith.addf %138, %140 : vector<1x9600xf32>
    %142 = arith.negf %141 : vector<1x9600xf32>
    %143 = math.exp %142 : vector<1x9600xf32>
    %cst_123 = arith.constant 1.000000e+00 : f32
    %144 = vector.broadcast %cst_123 : f32 to vector<1x9600xf32>
    %145 = arith.addf %144, %143 : vector<1x9600xf32>
    %146 = arith.divf %144, %145 : vector<1x9600xf32>
    %147 = vector.shape_cast %146 : vector<1x9600xf32> to vector<1x1x9600xf32>
    %c0_124 = arith.constant 0 : index
    %c0_125 = arith.constant 0 : index
    %c0_126 = arith.constant 0 : index
    %148 = vector.load %arg5[%c0_124, %c0_125, %c0_126] : memref<1x1x9600xf32, #tpu.memory_space<vmem>>, vector<1x1x9600xf32>
    tpu.vector_store %arg5[%c0_124, %c0_125, %c0_126], %147 {strides = array<i32>} : memref<1x1x9600xf32, #tpu.memory_space<vmem>>, vector<1x1x9600xf32>,
    return
  }
  func.func @transform_0(%arg0: i32) -> (i32, i32, i32) {
    %c0_i32 = arith.constant 0 : i32
    %c0_i32_0 = arith.constant 0 : i32
    %c0_i32_1 = arith.constant 0 : i32
    return %arg0, %c0_i32, %c0_i32_0 : i32, i32, i32
  }
  func.func @transform_1(%arg0: i32) -> (i32, i32) {
    %c0_i32 = arith.constant 0 : i32
    %c0_i32_0 = arith.constant 0 : i32
    %c0_i32_1 = arith.constant 0 : i32
    return %c0_i32, %c0_i32_0 : i32, i32
  }
  func.func @transform_2(%arg0: i32) -> (i32, i32) {
    %c0_i32 = arith.constant 0 : i32
    %c0_i32_0 = arith.constant 0 : i32
    %c0_i32_1 = arith.constant 0 : i32
    return %c0_i32, %c0_i32_0 : i32, i32
  }
  func.func @transform_3(%arg0: i32) -> (i32, i32) {
    %c0_i32 = arith.constant 0 : i32
    %c0_i32_0 = arith.constant 0 : i32
    %c0_i32_1 = arith.constant 0 : i32
    return %c0_i32, %c0_i32_0 : i32, i32
  }
  func.func @transform_4(%arg0: i32) -> (i32, i32, i32) {
    %c0_i32 = arith.constant 0 : i32
    %c0_i32_0 = arith.constant 0 : i32
    %c0_i32_1 = arith.constant 0 : i32
    return %arg0, %c0_i32, %c0_i32_0 : i32, i32, i32
  }
}

</mosaic_0001>

<bundles_post_ra>
// kernel: tpu_custom_call.1
= control target key start
LH: loop header
LB: loop body
LE: loop exit
PB: predicated region body
PF: predicated region fallthrough
CT: control target
= control target key end

     0   :  { %s19880_s0 = inlined_call_operand.hbm [shape: f32[2,8,10752], index: 0, kind: input, shape index: {}]   ;;  %s19881_s1 = inlined_call_operand.hbm [shape: f32[64,72], index: 1, kind: input, shape index: {}]   ;;  %s19882_s2 = inlined_call_operand.hbm [shape: f32[16,64], index: 2, kind: input, shape index: {}]   ;;  %s19883_s3 = inlined_call_operand.<no memory space> [shape: f32[1,1], index: 3, kind: input, shape index: {}]   ;;  %s19884_s4 = inlined_call_operand.hbm [shape: f32[2,1,9600], index: 4, kind: output, shape index: {}]  }
   0x1   :  { %9 = sst [smem:[#allocation3]] %s19883_s3 }
   0x2   :  { %10 = vsyncpa [#allocation5], 0 }
   0x3   :  { %12 = vsyncpa [#allocation5 + $0x1], 0 }
   0x4   :  { %13 = vsyncpa [#allocation8], 0 }
   0x5   :  { %14 = vsyncpa [#allocation6], 0 }
   0x6   :  { %16 = vsyncpa [#allocation6 + $0x1], 0  ;;  %s14734_s17 = smov 0   ;;  %s14736_s18 = smov 0  }
   0x7   :  { %s14738_s19 = smov 0   ;;  %s14740_s20 = smov 0  }
   0x8 LB: > { %s14755_s3 = sadd.s32 4294967295, %s14694_s20   ;;  %s11827_s21 = sadd.s32 4294967294, %s14694_s20   ;;  %s14694_s20 = sphi %s14740_s20, %s19908_s20   ;;  %s14690_s19 = sphi %s14738_s19, %s19907_s19   ;;  %s14686_s18 = sphi %s14736_s18, %s19906_s18   ;;  %s14682_s17 = sphi %s14734_s17, %s19905_s17  }
   0x9   : > { %p42_p0 = scmp.ne.s32.totalorder %s14686_s18, %s14682_s17  ;;  %p19885_p1 = scmp.eq.s32.totalorder %s14755_s3, 0 }
   0xa   : > { %p135_p3 = scmp.eq.s32.totalorder %s11827_s21, 1  ;;  %p11828_p5 = scmp.ge.s32.totalorder %s14694_s20, 1 }
   0xb   : > { %p14764_p4 = por %p19885_p1, %p42_p0  ;;  %p142_p7 = scmp.lt.s32.totalorder %s14694_s20, 3 }
   0xc   : > { %p14769_p6 = por %p135_p3, %p42_p0  ;;  %s14696_s25 = smov [#allocation7]  }
   0xd   : > { %s19889_s22 = scalar_select %p14764_p4, 1, 0 }
   0xe   : > { %s19890_s23 = scalar_select %p14769_p6, 1, 0 }
   0xf   : > { %p14774_p8 = pnand %p11828_p5, %p142_p7  ;;  %s154_s26 = sshll.u32 %s14696_s25, 4  ;;  %s14778_s26 = int_to_ptr.vmem [resolvable:$true] %s154_s26 }
  0x10   : > { %s14697_s28 = smov [#allocation9]   ;;  %s14538_s6 = scalar_lea.hbm %s19881_s1, 1024 }
  0x11   : > { %p13546_p9 = pneg %p14774_p8  ;;  %s167_s29 = sshll.u32 %s14697_s28, 4  ;;  %s14789_s29 = int_to_ptr.vmem [resolvable:$true] %s167_s29 }
  0x12   : > { %p14539_p12 = scmp.ne.s32.totalorder %s19881_s1, %s14538_s6  ;;  %p14545_p5 = scmp.lt.u32.totalorder %s14538_s6, %s19881_s1 }
  0x13   : > { %p14785_p11 = pnand %p13546_p9, %p19885_p1 }
  0x15   : > { %p14540_p13 = pneg %p14785_p11 }
  0x17   : > { %p14541_p0 = pnand %p14540_p13, %p14539_p12 }
  0x19   : > { %p14542_p3 = pneg %p14541_p0 }
  0x1b   : > { %p14547_p7 = pnand %p14545_p5, %p14542_p3 }
  0x1d   : > { %14550 = shalt.err (!%p14547_p7)
}
  0x1e   : > { %s14551_s11 = scalar_lea.vmem %s14778_s26, 1024  ;;  %p14559_p2 = scmp.lt.s32.totalorder %s14778_s26, %s14778_s26 }
  0x1f   : > { %p14552_p9 = scmp.ne.s32.totalorder %s14778_s26, %s14551_s11  ;;  %p14560_p12 = scmp.lt.s32.totalorder %s14551_s11, %s14551_s11 }
  0x21   : > { %p14554_p10 = pnand %p14552_p9, %p14540_p13  ;;  %p14561_p0 = por %p14560_p12, %p14559_p2 }
  0x23   : > { %p14555_p1 = pneg %p14554_p10 }
  0x25   : > { %p14562_p6 = pnand %p14561_p0, %p14555_p1 }
  0x27   : > { %14565 = shalt.err (!%p14562_p6)
}
  0x28   : > { %s14698_s12 = smov 128   ;;  %s14699_s13 = smov 8  }
  0x29   : > { %13549 = dma.hbm_to_vmem [thread:$0]  (!%p14785_p11), %s19881_s1, 1024, %s14778_s26, [#allocation8], %s14698_s12, %s14698_s12, %s14699_s13  }
  0x2a   : > { %s14566_s25 = scalar_lea.hbm %s19882_s2, 256 }
  0x2b   : > { %p14567_p2 = scmp.ne.s32.totalorder %s19882_s2, %s14566_s25  ;;  %p14573_p10 = scmp.lt.u32.totalorder %s14566_s25, %s19882_s2 }
  0x2d   : > { %p14569_p1 = pnand %p14567_p2, %p14540_p13 }
  0x2f   : > { %p14570_p6 = pneg %p14569_p1 }
  0x31   : > { %p14575_p3 = pnand %p14573_p10, %p14570_p6 }
  0x33   : > { %14578 = shalt.err (!%p14575_p3)
}
  0x34   : > { %s14579_s26 = scalar_lea.vmem %s14789_s29, 256  ;;  %p14587_p12 = scmp.lt.s32.totalorder %s14789_s29, %s14789_s29 }
  0x35   : > { %p14580_p5 = scmp.ne.s32.totalorder %s14789_s29, %s14579_s26  ;;  %p14588_p0 = scmp.lt.s32.totalorder %s14579_s26, %s14579_s26 }
  0x37   : > { %p14582_p7 = pnand %p14580_p5, %p14540_p13  ;;  %p14589_p2 = por %p14588_p0, %p14587_p12 }
  0x39   : > { %p14583_p9 = pneg %p14582_p7 }
  0x3b   : > { %p14590_p1 = pnand %p14589_p2, %p14583_p9 }
  0x3d   : > { %14593 = shalt.err (!%p14590_p1)
}
  0x3e   : > { %13552 = dma.hbm_to_vmem [thread:$0]  (!%p14785_p11), %s19882_s2, 256, %s14789_s29, [#allocation8], %s14698_s12, %s14698_s12, %s14699_s13  }
  0x3f   : > { %s14844_s9 = sadd.s32 1, %s14694_s20   ;;  %s29_s27 = sadd.s32 1, %s14690_s19 }
  0x40   : > { %s26_s10 = ssub.s32 %s14694_s20, %s14844_s9  ;;  %p36_p13 = scmp.ne.s32.totalorder %s14690_s19, %s14686_s18 }
  0x41   : > { %p27_p6 = scmp.eq.s32.totalorder %s26_s10, 0  ;;  %p37_p10 = scmp.eq.s32.totalorder %s14694_s20, 0 }
  0x42   : > { %p19893_p3 = scmp.eq.s32.totalorder %s14755_s3, 1  ;;  %p13563_p7 = scmp.lt.s32.totalorder %s14694_s20, 2 }
  0x43   : > { %s14860_s14 = scalar_select %p27_p6, %s14690_s19, %s29_s27  }
  0x44   : > { %p14854_p5 = por %p19893_p3, %p36_p13  ;;  %p38_p9 = por %p37_p10, %p36_p13 }
  0x45   : > { %s184_s15 = sand.u32 1, %s14690_s19   ;;  %s13530_s29 = smul.u32 10752, %s14694_s20 }
  0x46   : > { %s19894_s11 = scalar_select %p14854_p5, 1, 0 }
  0x47   : > { %s13529_s16 = smul.u32 672, %s184_s15  ;;  %p14864_p11 = pnand %p13563_p7, %p38_p9 }
  0x48   : > { %s14871_s25 = scalar_lea.hbm %s19880_s0, %s13530_s29  ;;  %s185_s5 = scalar_lea.sflag [#allocation5], %s184_s15 }
  0x49   : > { %s188_s28 = scalar_lea.vmem [#allocation4], %s13529_s16  ;;  %s14594_s6 = scalar_lea.hbm %s14871_s25, 10752 }
  0x4a   : > { %s196_s30 = sshll.u32 %s188_s28, 4  ;;  %p14595_p12 = scmp.ne.s32.totalorder %s14871_s25, %s14594_s6  ;;  %s14873_s30 = int_to_ptr.vmem [resolvable:$true] %s196_s30 }
  0x4b   : > { %p14596_p0 = pneg %p14864_p11  ;;  %s14599_s8 = scalar_lea.hbm %s19880_s0, 21504 }
  0x4c   : > { %p14600_p13 = scmp.lt.u32.totalorder %s14871_s25, %s19880_s0  ;;  %p14601_p6 = scmp.lt.u32.totalorder %s14599_s8, %s14594_s6 }
  0x4d   : > { %p14597_p2 = pnand %p14596_p0, %p14595_p12  ;;  %p14603_p3 = scmp.lt.u32.totalorder %s14594_s6, %s14871_s25 }
  0x4e   : > { %p14602_p10 = por %p14601_p6, %p14600_p13 }
  0x4f   : > { %p14598_p1 = pneg %p14597_p2 }
  0x50   : > { %p14604_p7 = por %p14603_p3, %p14602_p10 }
  0x52   : > { %p14605_p9 = pnand %p14604_p7, %p14598_p1 }
  0x54   : > { %14608 = shalt.err (!%p14605_p9)
}
  0x55   : > { %s14609_s15 = scalar_lea.vmem %s14873_s30, 10752  ;;  %s14700_s16 = smov [#allocation4]  }
  0x56   : > { %p14610_p12 = scmp.ne.s32.totalorder %s14873_s30, %s14609_s15  ;;  %s14614_s29 = sshll.u32 %s14700_s16, 4  ;;  %s14615_s29 = int_to_ptr.vmem [resolvable:$false] %s14614_s29 }
  0x57   : > { %s14616_s13 = scalar_lea.vmem %s14615_s29, 21504  ;;  %p14617_p4 = scmp.lt.s32.totalorder %s14873_s30, %s14615_s29 }
  0x58   : > { %p14612_p2 = pnand %p14610_p12, %p14596_p0  ;;  %p14618_p13 = scmp.lt.s32.totalorder %s14616_s13, %s14609_s15 }
  0x5a   : > { %p14613_p5 = pneg %p14612_p2  ;;  %p14619_p6 = por %p14618_p13, %p14617_p4 }
  0x5c   : > { %p14620_p10 = pnand %p14619_p6, %p14613_p5 }
  0x5e   : > { %14623 = shalt.err (!%p14620_p10)
}
  0x5f   : > { %13556 = dma.hbm_to_vmem [thread:$0]  (!%p14864_p11), %s14871_s25, 10752, %s14873_s30, %s185_s5  }
  0x60   : > { %205 = sbr.rel (%p14774_p8) target bundleno = 2684 (0xa7c), region = 36  ;;  %s14903_s21 = sand.u32 (!%p14774_p8), 1, %s14686_s18  }
  0x61   : > { %s13531_s28 = smul.u32 (!%p14774_p8), 672, %s14903_s21  ;;  %s208_s6 = scalar_lea.sflag (!%p14774_p8), [#allocation5], %s14903_s21 }
  0x62   : > { %p19896_p4 = scmp.ne.s32.totalorder (!%p14774_p8), %s19889_s22, 0 }
  0x63   : > { %s14907_s26 = scalar_lea.vmem (!%p14774_p8), [#allocation4], %s13531_s28 }
  0x67   : > { %14669 = dma.done.wait (%p19896_p4), %s208_s6, 10752  }
  0x68   : > { %14671 = vsyncadd (%p19896_p4), %s208_s6, 4294956544  ;;  %p19897_p5 = scmp.eq.s32.totalorder %s14755_s3, 0 }
  0x6a   : > { %14673 = dma.done.wait (%p19897_p5), [#allocation8], 1280   ;;  %p19898_p8 = pmov %p19897_p5 }
  0x6b   : > { %v255_v0 = vld [vmem:[%s14907_s26 + $0x8] sm:$0xff]  ;;  %v256_v1 = vld [vmem:[%s14907_s26 + $0x10] sm:$0xff]  ;;  %v14920_v2 = vld [vmem:[%s14907_s26 + $0x18] sm:$0xff]  ;;  %s14701_s22 = smov 126   ;;  %s14702_s24 = smov 127   ;;  %vm373_vm0 = vcmask 1031168  }
  0x6c   : > { %14675 = vsyncadd (%p19898_p8), [#allocation8], 4294966016  ;;  %v13617_v3 = vpack.i.bf16 %v256_v1, %v255_v0  ;;  %v14923_v4 = vld [vmem:[%s14907_s26 + $0x20] sm:$0xff]  ;;  %v259_v6 = vld [vmem:[%s14907_s26 + $0x28] sm:$0xff]  ;;  %s14703_s12 = smov 1   ;;  %vm322_vm1 = vcmask 1039360  }
  0x6d   : > { %v13612_v5 = vpack.i.bf16 %v14923_v4, %v14920_v2  ;;  %v260_v7 = vld [vmem:[%s14907_s26 + $0x30] sm:$0xff]  ;;  %v14937_v9 = vld [vmem:[%s14907_s26 + $0x38] sm:$0xff]  ;;  %v14940_v10 = vld [vmem:[%s14907_s26 + $0x40] sm:$0xff]  ;;  %v14704_v47 = vmov 0.0   ;;  %vm531_vm2 = vcmask 7168   ;;  %vm652_vm3 = vcmask 588800  }
  0x6e   : > { %13618 = vrot.lane.b32.xlu1 %v13617_v3, %s14701_s22  ;;  %13608 = vrot.lane.b32.xlu0 %v13617_v3, %s14702_s24  ;;  %v14934_v8 = vpack.i.bf16 %v260_v7, %v259_v6  ;;  %v13627_v11 = vpack.i.bf16 %v14940_v10, %v14937_v9  ;;  %v263_v12 = vld [vmem:[%s14907_s26 + $0x48] sm:$0xff]  ;;  %v264_v13 = vld [vmem:[%s14907_s26 + $0x50] sm:$0xff]  ;;  %vm1709_vm4 = vcmask 523264   ;;  %vm10916_vm5 = vcmask 1046528   ;;  %s19327_s25 = sld [smem:[#allocation3]]  ;;  %s13532_s30 = smul.u32 75, %s14903_s21 }
  0x6f   : > { %v14955_v14 = vpack.i.bf16 %v264_v13, %v263_v12  ;;  %v14962_v15 = vld [vmem:[%s14907_s26 + $0x58] sm:$0xff]  ;;  %v14965_v16 = vld [vmem:[%s14907_s26 + $0x60] sm:$0xff]  ;;  %741 = vmatprep.mubr.f32.mxu0 %v14704_v47  ;;  %v14997_v48 = vld [vmem:[%s14907_s26 + $0x68] sm:$0xff]  ;;  %854 = vmatprep.mubr.f32.mxu1 %v14704_v47  ;;  %s13533_s7 = smul.u32 1200, %s14755_s3  ;;  %s11724_s16 = scalar_lea.sflag [#allocation6], %s14903_s21 }
  0x70   : > { %v13642_v17 = vpack.i.bf16 %v14965_v16, %v14962_v15  ;;  %v254_v20 = vld [vmem:[%s14907_s26] sm:$0xff]  ;;  %v15005_v51 = vld [vmem:[%s14907_s26 + $0x70] sm:$0xff]  ;;  %v15008_v52 = vld [vmem:[%s14907_s26 + $0x78] sm:$0xff]  ;;  %s19491_s5 = scalar_lea.vmem [#allocation10], %s13532_s30  ;;  %p19902_p0 = scmp.ne.s32.totalorder %s19894_s11, 0 }
  0x71   : > { %v13687_v55 = vpack.i.bf16 %v15008_v52, %v15005_v51  ;;  %s11738_s8 = sshll.u32 %s19491_s5, 4  ;;  %s19834_s15 = scalar_lea.hbm %s19884_s4, %s13533_s7  ;;  %s19836_s8 = int_to_ptr.vmem [resolvable:$true] %s11738_s8 }
  0x72   : > { %343 = vrot.lane.b32.xlu1 %v14920_v2, %s14701_s22  ;;  %13613 = vrot.lane.b32.xlu0 %v13612_v5, %s14702_s24  ;;  %s14624_s29 = scalar_lea.vmem %s19836_s8, 1200  ;;  %s14705_s3 = smov [#allocation10]  }
  0x73   : > { %p14625_p11 = scmp.ne.s32.totalorder %s19836_s8, %s14624_s29  ;;  %s14628_s13 = sshll.u32 %s14705_s3, 4  ;;  %s14629_s13 = int_to_ptr.vmem [resolvable:$false] %s14628_s13 }
  0x74   : > { %s14630_s28 = scalar_lea.vmem %s14629_s13, 2400  ;;  %p14631_p7 = scmp.lt.s32.totalorder %s19836_s8, %s14629_s13 }
  0x75   : > { %p14626_p1 = pnand %p14625_p11, %p19902_p0  ;;  %p14632_p9 = scmp.lt.s32.totalorder %s14630_s28, %s14624_s29 }
  0x76   : > { %13623 = vrot.lane.b32.xlu1 %v14934_v8, %s14702_s24  ;;  %345 = vrot.lane.b32.xlu0 %v14923_v4, %s14701_s22 }
  0x77   : > { %p14627_p3 = pneg %p14626_p1  ;;  %p14633_p12 = por %p14632_p9, %p14631_p7 }
  0x79   : > { %p14634_p2 = pnand %p14633_p12, %p14627_p3 }
  0x7a   : > { %347 = vrot.lane.b32.xlu0 %v259_v6, %s14701_s22  ;;  %13628 = vrot.lane.b32.xlu1 %v13627_v11, %s14702_s24  ;;  %v15038_v11 = vld [vmem:[%s14907_s26 + $0x88] sm:$0xff] }
  0x7e   : > { %349 = vrot.lane.b32.xlu0 %v260_v7, %s14701_s22  ;;  %351 = vrot.lane.b32.xlu1 %v14937_v9, %s14701_s22 }
  0x82   : > { %13633 = vrot.lane.b32.xlu1 %v14955_v14, %s14702_s24  ;;  %353 = vrot.lane.b32.xlu0 %v14940_v10, %s14701_s22 }
  0x86   : > { %355 = vrot.lane.b32.xlu0 %v263_v12, %s14701_s22  ;;  %13638 = vrot.lane.b32.xlu1 %v13617_v3, %s14703_s12 }
  0x8a   : > { %13643 = vrot.lane.b32.xlu0 %v13642_v17, %s14702_s24  ;;  %357 = vrot.lane.b32.xlu1 %v264_v13, %s14701_s22 }
  0x8e   : > { %359 = vrot.lane.b32.xlu0 %v14962_v15, %s14701_s22 }
  0xe0   : > { %v13619_v18 = vpop.permute.xlu1 %13618  ;;  %v13609_v19 = vpop.permute.xlu0 %13608 }
  0xe1   : > { %v13621_v21 = vunpack.i.h.bf16 %v13619_v18  ;;  %v13610_v22 = vunpack.i.l.bf16 %v13609_v19  ;;  %v13611_v23 = vunpack.i.h.bf16 %v13609_v19  ;;  %v13620_v25 = vunpack.i.l.bf16 %v13619_v18 }
  0xe3   : > { %v13647_v24 = vpack.i.bf16 %v13610_v22, %v254_v20  ;;  %v323_v31 = vsel %vm322_vm1, %v13610_v22, %v13611_v23  ;;  %v374_v36 = vsel %vm373_vm0, %v13620_v25, %v13621_v21  ;;  %v13672_v42 = vpack.i.bf16 %v14923_v4, %v13621_v21 }
  0xe4   : > { %v344_v26 = vpop.permute.xlu1 %343  ;;  %v13614_v27 = vpop.permute.xlu0 %13613  ;;  %v13657_v39 = vpack.i.bf16 %v374_v36, %v14920_v2 }
  0xe5   : > { %v13615_v28 = vunpack.i.l.bf16 %v13614_v27  ;;  %13648 = vrot.lane.b32.xlu1 %v13647_v24, %s14703_s12  ;;  %v375_v29 = vsel %vm373_vm0, %v13621_v21, %v344_v26  ;;  %v13616_v34 = vunpack.i.h.bf16 %v13614_v27 }
  0xe6   : > { %v13662_v30 = vpack.i.bf16 %v13620_v25, %v375_v29  ;;  %v15069_v29 = vld [vmem:[%s14907_s26 + $0x90] sm:$0xff] }
  0xe7   : > { %v324_v32 = vsel %vm322_vm1, %v13611_v23, %v13615_v28  ;;  %v325_v41 = vsel %vm322_vm1, %v13615_v28, %v13616_v34 }
  0xe8   : > { %v13652_v33 = vpack.i.bf16 %v324_v32, %v323_v31  ;;  %v346_v35 = vpop.permute.xlu0 %345  ;;  %v13624_v37 = vpop.permute.xlu1 %13623  ;;  %v13667_v43 = vpack.i.bf16 %v13611_v23, %v325_v41 }
  0xe9   : > { %13663 = vrot.lane.b32.xlu1 %v13662_v30, %s14703_s12  ;;  %v376_v38 = vsel %vm373_vm0, %v344_v26, %v346_v35  ;;  %v13625_v40 = vunpack.i.l.bf16 %v13624_v37  ;;  %v13626_v53 = vunpack.i.h.bf16 %v13624_v37 }
  0xea   : > { %13653 = vrot.lane.b32.xlu0 %v13652_v33, %s14703_s12 }
  0xeb   : > { %v326_v44 = vsel %vm322_vm1, %v13616_v34, %v13625_v40  ;;  %v327_v58 = vsel %vm322_vm1, %v13625_v40, %v13626_v53 }
  0xec   : > { %v13677_v45 = vpack.i.bf16 %v13615_v28, %v326_v44  ;;  %v348_v46 = vpop.permute.xlu0 %347  ;;  %v13629_v50 = vpop.permute.xlu1 %13628 }
  0xed   : > { %479 = vrot.lane.b32.xlu1 %v376_v38, %s14703_s12  ;;  %v377_v49 = vsel %vm373_vm0, %v346_v35, %v348_v46  ;;  %v13630_v54 = vunpack.i.l.bf16 %v13629_v50  ;;  %v13631_v57 = vunpack.i.h.bf16 %v13629_v50 }
  0xee   : > { %13658 = vrot.lane.b32.xlu0 %v13657_v39, %s14703_s12 }
  0xef   : > { %v328_v59 = vsel %vm322_vm1, %v13626_v53, %v13630_v54  ;;  %v329_v62 = vsel %vm322_vm1, %v13630_v54, %v13631_v57 }
  0xf0   : > { %v352_v56 = vpop.permute.xlu1 %351  ;;  %v350_v60 = vpop.permute.xlu0 %349  ;;  %v13692_v61 = vpack.i.bf16 %v328_v59, %v327_v58  ;;  %v13697_v2 = vpack.i.bf16 %v329_v62, %v14937_v9  ;;  %v15035_v9 = vld [vmem:[%s14907_s26 + $0x80] sm:$0xff] }
  0xf1   : > { %13673 = vrot.lane.b32.xlu1 %v13672_v42, %s14703_s12  ;;  %v378_v1 = vsel %vm373_vm0, %v348_v46, %v350_v60  ;;  %v379_v3 = vsel %vm373_vm0, %v350_v60, %v352_v56  ;;  %v13702_v13 = vpack.i.bf16 %v15038_v11, %v15035_v9 }
  0xf2   : > { %13668 = vrot.lane.b32.xlu0 %v13667_v43, %s14703_s12 }
  0xf4   : > { %v13634_v63 = vpop.permute.xlu1 %13633  ;;  %v354_v0 = vpop.permute.xlu0 %353 }
  0xf5   : > { %361 = vrot.lane.b32.xlu1 %v14965_v16, %s14701_s22  ;;  %v13635_v4 = vunpack.i.l.bf16 %v13634_v63  ;;  %v380_v6 = vsel %vm373_vm0, %v352_v56, %v354_v0  ;;  %v13636_v17 = vunpack.i.h.bf16 %v13634_v63 }
  0xf6   : > { %13678 = vrot.lane.b32.xlu0 %v13677_v45, %s14703_s12 }
  0xf7   : > { %v330_v7 = vsel %vm322_vm1, %v13631_v57, %v13635_v4  ;;  %v331_v20 = vsel %vm322_vm1, %v13635_v4, %v13636_v17 }
  0xf8   : > { %v356_v5 = vpop.permute.xlu0 %355  ;;  %v13639_v19 = vpop.permute.xlu1 %13638 }
  0xf9   : > { %481 = vrot.lane.b32.xlu1 %v377_v49, %s14703_s12  ;;  %v381_v22 = vsel %vm373_vm0, %v354_v0, %v356_v5  ;;  %v13641_v32 = vunpack.i.h.bf16 %v13639_v19  ;;  %v13640_v33 = vunpack.i.l.bf16 %v13639_v19 }
  0xfa   : > { %314 = vrot.lane.b32.xlu0 %v14997_v48, %s14702_s24 }
  0xfb   : > { %v533_v41 = vsel %vm531_vm2, %v13640_v33, %v13641_v32 }
  0xfc   : > { %v15040_v12 = vpop.permute.xlu0 %13643  ;;  %v358_v25 = vpop.permute.xlu1 %357 }
  0xfd   : > { %363 = vrot.lane.b32.xlu1 %v14997_v48, %s14701_s22  ;;  %v13645_v18 = vunpack.i.l.bf16 %v15040_v12  ;;  %v382_v28 = vsel %vm373_vm0, %v356_v5, %v358_v25 }
  0xfe   : > { %527 = vrot.lane.b32.xlu0 %v344_v26, %s14703_s12 }
  0xff   : > { %v332_v21 = vsel %vm322_vm1, %v13636_v17, %v13645_v18 }
 0x100   : > { %v13717_v23 = vpack.i.bf16 %v332_v21, %v331_v20  ;;  %v360_v27 = vpop.permute.xlu0 %359 }
 0x101   : > { %13688 = vrot.lane.b32.xlu1 %v13687_v55, %s14702_s24  ;;  %v383_v30 = vsel %vm373_vm0, %v358_v25, %v360_v27 }
 0x102   : > { %13683 = vrot.lane.b32.xlu0 %v14934_v8, %s14703_s12  ;;  %v13707_v8 = vpack.i.bf16 %v330_v7, %v14940_v10  ;;  %v13646_v10 = vunpack.i.h.bf16 %v15040_v12  ;;  %v15120_v12 = vld [vmem:[#allocation7] sm:$0xff] }
 0x104   : > { %v333_v24 = vsel %vm322_vm1, %v13645_v18, %v13646_v10 }
 0x105   : > { %13693 = vrot.lane.b32.xlu1 %v13692_v61, %s14703_s12  ;;  %v13722_v26 = vpack.i.bf16 %v333_v24, %v14962_v15  ;;  %v13732_v15 = vpack.i.bf16 %v15005_v51, %v14997_v48 }
 0x106   : > { %483 = vrot.lane.b32.xlu0 %v378_v1, %s14703_s12 }
 0x109   : > { %13698 = vrot.lane.b32.xlu1 %v13697_v2, %s14703_s12 }
 0x10a   : > { %485 = vrot.lane.b32.xlu0 %v379_v3, %s14703_s12 }
 0x10d   : > { %487 = vrot.lane.b32.xlu1 %v380_v6, %s14703_s12 }
 0x10e   : > { %365 = vrot.lane.b32.xlu0 %v15005_v51, %s14701_s22 }
 0x111   : > { %13708 = vrot.lane.b32.xlu1 %v13707_v8, %s14703_s12 }
 0x112   : > { %367 = vrot.lane.b32.xlu0 %v15008_v52, %s14701_s22 }
 0x115   : > { %369 = vrot.lane.b32.xlu1 %v15035_v9, %s14701_s22 }
 0x116   : > { %13703 = vrot.lane.b32.xlu0 %v13702_v13, %s14702_s24 }
 0x119   : > { %371 = vrot.lane.b32.xlu1 %v15038_v11, %s14701_s22 }
 0x11a   : > { %489 = vrot.lane.b32.xlu0 %v381_v22, %s14703_s12 }
 0x11d   : > { %13718 = vrot.lane.b32.xlu1 %v13717_v23, %s14703_s12 }
 0x11e   : > { %13713 = vrot.lane.b32.xlu0 %v14955_v14, %s14703_s12  ;;  %v15078_v14 = vld [vmem:[%s14907_s26 + $0x98] sm:$0xff] }
 0x121   : > { %13723 = vrot.lane.b32.xlu1 %v13722_v26, %s14703_s12 }
 0x122   : > { %491 = vrot.lane.b32.xlu0 %v382_v28, %s14703_s12 }
 0x125   : > { %394 = vrot.lane.b32.xlu1 %v15069_v29, %s14701_s22 }
 0x126   : > { %493 = vrot.lane.b32.xlu0 %v383_v30, %s14703_s12 }
 0x129   : > { %397 = vrot.lane.b32.xlu1 %v15069_v29, %s14702_s24 }
 0x12d   : > { %401 = vrot.lane.b32.xlu1 %v15078_v14, %s14701_s22 }
 0x131   : > { %13733 = vrot.lane.b32.xlu1 %v13732_v15, %s14703_s12 }
 0x157   : > { %v13649_v31 = vpop.permute.xlu1 %13648 }
 0x158   : > { %v13650_v34 = vunpack.i.l.bf16 %v13649_v31  ;;  %v13651_v37 = vunpack.i.h.bf16 %v13649_v31 }
 0x15a   : > { %v532_v43 = vsel %vm531_vm2, %v13650_v34, %v13640_v33 }
 0x15b   : > { %v13664_v35 = vpop.permute.xlu1 %13663 }
 0x15c   : > { %v13654_v36 = vpop.permute.xlu0 %13653  ;;  %v13666_v49 = vunpack.i.h.bf16 %v13664_v35  ;;  %v13665_v50 = vunpack.i.l.bf16 %v13664_v35 }
 0x15d   : > { %v13656_v38 = vunpack.i.h.bf16 %v13654_v36  ;;  %v13655_v39 = vunpack.i.l.bf16 %v13654_v36 }
 0x15f   : > { %v480_v40 = vpop.permute.xlu1 %479  ;;  %v549_v42 = vsel %vm531_vm2, %v13655_v39, %v13656_v38  ;;  %v548_v44 = vsel %vm531_vm2, %v13651_v37, %v13655_v39 }
 0x160   : > { %v13659_v45 = vpop.permute.xlu0 %13658  ;;  %v12249_v46 = vpack.c.bf16 %v549_v42, %v533_v41  ;;  %v12251_v48 = vpack.c.bf16 %v548_v44, %v532_v43  ;;  %v15099_v4 = vsel %vm531_vm2, %v13665_v50, %v480_v40 }
 0x161   : > { %v13661_v51 = vunpack.i.h.bf16 %v13659_v45  ;;  %v13660_v53 = vunpack.i.l.bf16 %v13659_v45 }
 0x162   : > { %12250 = vmatprep.subr.bf16.mxu0 %v12249_v46 }
 0x163   : > { %v564_v54 = vsel %vm531_vm2, %v13666_v49, %v13661_v51  ;;  %v15090_v55 = vpop.permute.xlu1 %13673  ;;  %12252 = vmatpush1.bf16.msra.mxu0 %v12251_v48  ;;  %v534_v56 = vsel %vm531_vm2, %v13641_v32, %v13660_v53  ;;  %v565_v57 = vsel %vm531_vm2, %v13661_v51, %v13665_v50 }
 0x164   : > { %v12255_v58 = vpack.c.bf16 %v533_v41, %v564_v54  ;;  %v13675_v59 = vunpack.i.l.bf16 %v15090_v55  ;;  %v13669_v60 = vpop.permute.xlu0 %13668  ;;  %v12253_v61 = vpack.c.bf16 %v534_v56, %v565_v57  ;;  %v13676_v1 = vunpack.i.h.bf16 %v15090_v55 }
 0x165   : > { %v13671_v62 = vunpack.i.h.bf16 %v13669_v60  ;;  %v13670_v63 = vunpack.i.l.bf16 %v13669_v60 }
 0x166   : > { %12254 = vmatprep.subr.bf16.mxu0 %v12253_v61  ;;  %v584_v0 = vsel %vm531_vm2, %v13675_v59, %v13665_v50  ;;  %v535_v20 = vsel %vm531_vm2, %v13660_v53, %v13676_v1  ;;  %v15146_v53 = vld [vmem:[#allocation7 + $0x10] sm:$0xff] }
 0x167   : > { %v362_v2 = vpop.permute.xlu1 %361  ;;  %12256 = vmatpush1.bf16.msra.mxu0 %v12255_v58  ;;  %v550_v3 = vsel %vm531_vm2, %v13656_v38, %v13670_v63  ;;  %v581_v5 = vsel %vm531_vm2, %v13671_v62, %v13656_v38  ;;  %v15132_v38 = vld [vmem:[#allocation7 + $0x8] sm:$0xff]  ;;  %v12271_v51 = vpack.c.bf16 %v535_v20, %v15099_v4 }
 0x168   : > { %v13679_v6 = vpop.permute.xlu0 %13678  ;;  %v384_v7 = vsel %vm373_vm0, %v360_v27, %v362_v2  ;;  %v12257_v8 = vpack.c.bf16 %v15099_v4, %v550_v3  ;;  %v12259_v13 = vpack.c.bf16 %v584_v0, %v581_v5  ;;  %v12267_v27 = vpack.c.bf16 %v550_v3, %v534_v56 }
 0x169   : > { %v13681_v17 = vunpack.i.h.bf16 %v13679_v6  ;;  %v13680_v18 = vunpack.i.l.bf16 %v13679_v6  ;;  %495 = vrot.lane.b32.xlu0 %v384_v7, %s14703_s12 }
 0x16a   : > { %12258 = vmatprep.subr.bf16.mxu0 %v12257_v8 }
 0x16b   : > { %v482_v19 = vpop.permute.xlu1 %481  ;;  %12260 = vmatpush1.bf16.msra.mxu0 %v12259_v13  ;;  %v15107_v21 = vsel %vm531_vm2, %v13670_v63, %v13680_v18  ;;  %v587_v22 = vsel %vm531_vm2, %v13681_v17, %v13670_v63 }
 0x16c   : > { %v315_v23 = vpop.permute.xlu0 %314  ;;  %v12261_v24 = vpack.c.bf16 %v15107_v21, %v535_v20  ;;  %v12263_v25 = vpack.c.bf16 %v587_v22, %v534_v56  ;;  %v567_v15 = vsel %vm531_vm2, %v480_v40, %v482_v19 }
 0x16d   : > { %v334_v26 = vsel %vm322_vm1, %v13646_v10, %v315_v23  ;;  %v12275_v0 = vpack.c.bf16 %v567_v15, %v15107_v21 }
 0x16e   : > { %12262 = vmatprep.subr.bf16.mxu0 %v12261_v24  ;;  %12266 = vmatprep.subr.bf16.mxu1 %v12261_v24  ;;  %v13727_v28 = vpack.i.bf16 %v334_v26, %v14965_v16  ;;  %v15181_v24 = vld [vmem:[#allocation7 + $0x28] sm:$0xff] }
 0x16f   : > { %v15115_v30 = vpop.permute.xlu1 %363  ;;  %12264 = vmatpush1.bf16.msra.mxu0 %v12263_v25  ;;  %12268 = vmatpush1.bf16.msra.mxu1 %v12267_v27 }
 0x170   : > { %v528_v31 = vpop.permute.xlu0 %527  ;;  %13728 = vrot.lane.b32.xlu0 %v13727_v28, %s14703_s12  ;;  %693 = vmatprep.subr.mxu0 %v567_v15  ;;  %v385_v16 = vsel %vm373_vm0, %v362_v2, %v15115_v30 }
 0x171   : > { %v590_v32 = vsel %vm531_vm2, %v528_v31, %v480_v40 }
 0x173   : > { %v15122_v10 = vpop.permute.xlu1 %13688  ;;  %694 = vmatpush1.msra.mxu0 %v590_v32 }
 0x174   : > { %v13691_v33 = vunpack.i.h.bf16 %v15122_v10  ;;  %v13690_v34 = vunpack.i.l.bf16 %v15122_v10  ;;  %v13684_v35 = vpop.permute.xlu0 %13683  ;;  %497 = vrot.lane.b32.xlu0 %v385_v16, %s14703_s12  ;;  %11836 = vmatmul.mubr.msk.f32.vlgmr.msra.gmra.mrb[0].mxu0 %vm652_vm3, %v15120_v12  ;;  %v15215_v10 = vld [vmem:[#allocation7 + $0x38] sm:$0xff] }
 0x175   : > { %v13686_v36 = vunpack.i.h.bf16 %v13684_v35  ;;  %v13685_v37 = vunpack.i.l.bf16 %v13684_v35  ;;  %747 = vmatprep.mubr.f32.mxu0 %v14704_v47 }
 0x176   : > { %v335_v39 = vsel %vm322_vm1, %v315_v23, %v13690_v34  ;;  %v336_v40 = vsel %vm322_vm1, %v13690_v34, %v13691_v33  ;;  %v15199_v34 = vld [vmem:[#allocation7 + $0x30] sm:$0xff] }
 0x177   : > { %v13694_v41 = vpop.permute.xlu1 %13693  ;;  %v13737_v42 = vpack.i.bf16 %v336_v40, %v335_v39  ;;  %v536_v43 = vsel %vm531_vm2, %v13676_v1, %v13685_v37  ;;  %v537_v49 = vsel %vm531_vm2, %v13685_v37, %v13686_v36  ;;  %v15154_v1 = vld [vmem:[#allocation7 + $0x18] sm:$0xff] }
 0x178   : > { %v13696_v44 = vunpack.i.h.bf16 %v13694_v41  ;;  %v13695_v45 = vunpack.i.l.bf16 %v13694_v41  ;;  %v484_v46 = vpop.permute.xlu0 %483  ;;  %v12269_v48 = vpack.c.bf16 %v536_v43, %v567_v15  ;;  %11837 = vmatmul.mubr.msk.f32.gmra.mrb[2].mxu0 %vm652_vm3, %v15132_v38 }
 0x179   : > { %v568_v50 = vsel %vm531_vm2, %v482_v19, %v484_v46  ;;  %13738 = vrot.lane.b32.xlu0 %v13737_v42, %s14703_s12  ;;  %753 = vmatprep.mubr.f32.mxu0 %v14704_v47 }
 0x17a   : > { %12270 = vmatprep.subr.bf16.mxu1 %v12269_v48  ;;  %v552_v54 = vsel %vm531_vm2, %v13680_v18, %v13695_v45  ;;  %v553_v55 = vsel %vm531_vm2, %v13695_v45, %v13696_v44  ;;  %v12287_v5 = vpack.c.bf16 %v537_v49, %v568_v50 }
 0x17b   : > { %v13699_v56 = vpop.permute.xlu1 %13698  ;;  %12272 = vmatpush1.bf16.msra.mxu1 %v12271_v51  ;;  %v12273_v57 = vpack.c.bf16 %v568_v50, %v552_v54  ;;  %v12279_v58 = vpack.c.bf16 %v552_v54, %v536_v43  ;;  %v12277_v59 = vpack.c.bf16 %v553_v55, %v537_v49 }
 0x17c   : > { %v13701_v60 = vunpack.i.h.bf16 %v13699_v56  ;;  %v13700_v61 = vunpack.i.l.bf16 %v13699_v56  ;;  %v486_v62 = vpop.permute.xlu0 %485  ;;  %11838 = vmatmul.mubr.msk.f32.gmra.mrb[4].mxu0 %vm652_vm3, %v15146_v53 }
 0x17d   : > { %v569_v63 = vsel %vm531_vm2, %v484_v46, %v486_v62  ;;  %12274 = vmatprep.subr.bf16.mxu1 %v12273_v57  ;;  %12282 = vmatprep.subr.bf16.mxu0 %v12277_v59 }
 0x17e   : > { %12284 = vmatpush1.bf16.msra.mxu0 %v12279_v58  ;;  %v538_v2 = vsel %vm531_vm2, %v13686_v36, %v13700_v61  ;;  %759 = vmatprep.mubr.f32.mxu0 %v14704_v47  ;;  %v554_v8 = vsel %vm531_vm2, %v13696_v44, %v13701_v60  ;;  %v12291_v19 = vpack.c.bf16 %v569_v63, %v553_v55 }
 0x17f   : > { %v488_v3 = vpop.permute.xlu1 %487  ;;  %12276 = vmatpush1.bf16.msra.mxu1 %v12275_v0  ;;  %v12285_v4 = vpack.c.bf16 %v538_v2, %v569_v63  ;;  %435 = vrot.lane.b32.xlu0 %v15008_v52, %s14703_s12  ;;  %v15170_v52 = vld [vmem:[#allocation7 + $0x20] sm:$0xff] }
 0x180   : > { %v15161_v6 = vsel %vm531_vm2, %v486_v62, %v488_v3  ;;  %v366_v7 = vpop.permute.xlu0 %365  ;;  %12278 = vmatprep.subr.bf16.mxu1 %v12277_v59  ;;  %11839 = vmatmul.mubr.msk.f32.gmra.mrb[6].mxu0 %vm652_vm3, %v15154_v1 }
 0x181   : > { %12286 = vmatprep.subr.bf16.mxu0 %v12285_v4  ;;  %v386_v13 = vsel %vm373_vm0, %v15115_v30, %v366_v7  ;;  %v12289_v17 = vpack.c.bf16 %v15161_v6, %v554_v8  ;;  %765 = vmatprep.mubr.f32.mxu0 %v14704_v47  ;;  %v12295_v30 = vpack.c.bf16 %v554_v8, %v538_v2 }
 0x182   : > { %499 = vrot.lane.b32.xlu1 %v386_v13, %s14703_s12  ;;  %12288 = vmatpush1.bf16.msra.mxu0 %v12287_v5 }
 0x183   : > { %v15173_v18 = vpop.permute.xlu1 %13708  ;;  %12280 = vmatpush1.bf16.msra.mxu1 %v12279_v58  ;;  %12290 = vmatprep.subr.bf16.mxu0 %v12289_v17 }
 0x184   : > { %v13711_v20 = vunpack.i.h.bf16 %v15173_v18  ;;  %v13710_v21 = vunpack.i.l.bf16 %v15173_v18  ;;  %v368_v22 = vpop.permute.xlu0 %367  ;;  %806 = vmatprep.subr.mxu1 %v569_v63  ;;  %11840 = vmatmul.mubr.msk.f32.gmra.mrb[8].mxu0 %vm652_vm3, %v15170_v52 }
 0x185   : > { %v387_v23 = vsel %vm373_vm0, %v366_v7, %v368_v22  ;;  %771 = vmatprep.mubr.f32.mxu0 %v14704_v47 }
 0x186   : > { %501 = vrot.lane.b32.xlu1 %v387_v23, %s14703_s12  ;;  %12292 = vmatpush1.bf16.msra.mxu0 %v12291_v19  ;;  %v15185_v25 = vsel %vm531_vm2, %v13700_v61, %v13710_v21  ;;  %v15188_v26 = vsel %vm531_vm2, %v13701_v60, %v13711_v20 }
 0x187   : > { %v370_v27 = vpop.permute.xlu1 %369  ;;  %807 = vmatpush1.msra.mxu1 %v568_v50  ;;  %v12293_v28 = vpack.c.bf16 %v15188_v26, %v15185_v25  ;;  %v12303_v62 = vpack.c.bf16 %v15185_v25, %v15161_v6  ;;  %v13757_v25 = vpack.i.bf16 %v15069_v29, %v15038_v11 }
 0x188   : > { %v13704_v15 = vpop.permute.xlu0 %13703  ;;  %v388_v31 = vsel %vm373_vm0, %v368_v22, %v370_v27  ;;  %11844 = vmatmul.mubr.msk.f32.vlgmr.msra.gmra.mrb[0].mxu1 %vm652_vm3, %v15120_v12  ;;  %11841 = vmatmul.mubr.msk.f32.gmra.mrb[10].mxu0 %vm652_vm3, %v15181_v24 }
 0x189   : > { %v15197_v32 = vunpack.i.h.bf16 %v13704_v15  ;;  %v13705_v16 = vunpack.i.l.bf16 %v13704_v15  ;;  %12294 = vmatprep.subr.bf16.mxu0 %v12293_v28  ;;  %12298 = vmatprep.subr.bf16.mxu1 %v12293_v28  ;;  %v2369_v28 = vld [vmem:[%s14907_s26 + $0xa8] sm:$0xff] }
 0x18a   : > { %503 = vrot.lane.b32.xlu1 %v388_v31, %s14703_s12  ;;  %12296 = vmatpush1.bf16.msra.mxu0 %v12295_v30  ;;  %v15330_v31 = vld [vmem:[%s14907_s26 + $0xb8] sm:$0xff] }
 0x18b   : > { %12300 = vmatpush1.bf16.msra.mxu1 %v12295_v30  ;;  %v372_v35 = vpop.permute.xlu1 %371  ;;  %v337_v36 = vsel %vm322_vm1, %v13691_v33, %v13705_v16  ;;  %777 = vmatprep.mubr.f32.mxu0 %v14704_v47  ;;  %v392_v37 = vsel %vm322_vm1, %v13705_v16, %v15197_v32  ;;  %v13747_v33 = vpack.i.bf16 %v15197_v32, %v15038_v11  ;;  %v2370_v30 = vld [vmem:[%s14907_s26 + $0xb0] sm:$0xff] }
 0x18c   : > { %v490_v39 = vpop.permute.xlu0 %489  ;;  %469 = vrot.lane.b32.xlu0 %v337_v36, %s14703_s12  ;;  %v389_v40 = vsel %vm373_vm0, %v370_v27, %v372_v35  ;;  %11842 = vmatmul.mubr.msk.f32.gmra.mrb[12].mxu0 %vm652_vm3, %v15199_v34  ;;  %v13742_v41 = vpack.i.bf16 %v392_v37, %v15035_v9  ;;  %v15293_v27 = vld [vmem:[%s14907_s26 + $0xa0] sm:$0xff]  ;;  %v15326_v15 = vpack.i.bf16 %v2370_v30, %v2369_v28  ;;  %v15357_v36 = vld [vmem:[%s14907_s26 + $0xd0] sm:$0xff] }
 0x18d   : > { %v571_v42 = vsel %vm531_vm2, %v488_v3, %v490_v39  ;;  %783 = vmatprep.mubr.f32.mxu0 %v14704_v47  ;;  %860 = vmatprep.mubr.f32.mxu1 %v14704_v47 }
 0x18e   : > { %505 = vrot.lane.b32.xlu1 %v389_v40, %s14703_s12  ;;  %919 = vmatprep.subr.mxu0 %v571_v42  ;;  %v12307_v13 = vpack.c.bf16 %v571_v42, %v15188_v26 }
 0x18f   : > { %v13719_v43 = vpop.permute.xlu1 %13718  ;;  %920 = vmatpush1.msra.mxu0 %v15161_v6  ;;  %11845 = vmatmul.mubr.msk.f32.gmra.mrb[2].mxu1 %vm652_vm3, %v15132_v38 }
 0x190   : > { %v13721_v44 = vunpack.i.h.bf16 %v13719_v43  ;;  %v13720_v45 = vunpack.i.l.bf16 %v13719_v43  ;;  %v13714_v46 = vpop.permute.xlu0 %13713  ;;  %13743 = vrot.lane.b32.xlu0 %v13742_v41, %s14703_s12  ;;  %11843 = vmatmul.mubr.msk.f32.gmra.mrb[14].mxu0 %vm652_vm3, %v15215_v10 }
 0x191   : > { %v13716_v48 = vunpack.i.h.bf16 %v13714_v46  ;;  %v13715_v49 = vunpack.i.l.bf16 %v13714_v46  ;;  %967 = vmatprep.mubr.f32.mxu0 %v14704_v47  ;;  %866 = vmatprep.mubr.f32.mxu1 %v14704_v47 }
 0x192   : > { %13748 = vrot.lane.b32.xlu1 %v13747_v33, %s14703_s12  ;;  %v556_v50 = vsel %vm531_vm2, %v13711_v20, %v13720_v45  ;;  %v15232_v51 = vsel %vm531_vm2, %v13720_v45, %v13721_v44 }
 0x193   : > { %v15234_v54 = vpop.permute.xlu1 %13723  ;;  %v540_v55 = vsel %vm531_vm2, %v13710_v21, %v13715_v49  ;;  %v541_v56 = vsel %vm531_vm2, %v13715_v49, %v13716_v48  ;;  %11846 = vmatmul.mubr.msk.f32.gmra.mrb[4].mxu1 %vm652_vm3, %v15146_v53 }
 0x194   : > { %v13726_v57 = vunpack.i.h.bf16 %v15234_v54  ;;  %v13725_v58 = vunpack.i.l.bf16 %v15234_v54  ;;  %v492_v59 = vpop.permute.xlu0 %491  ;;  %471 = vrot.lane.b32.xlu0 %v13705_v16, %s14703_s12  ;;  %v12301_v60 = vpack.c.bf16 %v540_v55, %v571_v42  ;;  %v12311_v61 = vpack.c.bf16 %v556_v50, %v540_v55  ;;  %11852 = vmatmul.mubr.msk.f32.vlgmr.msra.gmra.mrb[16].mxu0 %vm652_vm3, %v15120_v12 }
 0x195   : > { %v572_v63 = vsel %vm531_vm2, %v490_v39, %v492_v59  ;;  %v12309_v0 = vpack.c.bf16 %v15232_v51, %v541_v56  ;;  %872 = vmatprep.mubr.f32.mxu1 %v14704_v47  ;;  %973 = vmatprep.mubr.f32.mxu0 %v14704_v47 }
 0x196   : > { %12302 = vmatprep.subr.bf16.mxu1 %v12301_v60  ;;  %v12305_v2 = vpack.c.bf16 %v572_v63, %v556_v50  ;;  %v542_v3 = vsel %vm531_vm2, %v13716_v48, %v13725_v58  ;;  %v15257_v4 = vsel %vm531_vm2, %v13721_v44, %v13726_v57  ;;  %v12319_v20 = vpack.c.bf16 %v541_v56, %v572_v63 }
 0x197   : > { %12314 = vmatprep.subr.bf16.mxu0 %v12309_v0  ;;  %v395_v5 = vpop.permute.xlu1 %394  ;;  %12304 = vmatpush1.bf16.msra.mxu1 %v12303_v62  ;;  %v15260_v6 = vpack.c.bf16 %v15257_v4, %v542_v3 }
 0x198   : > { %12316 = vmatpush1.bf16.msra.mxu0 %v12311_v61  ;;  %v15262_v7 = vpop.permute.xlu0 %493  ;;  %12306 = vmatprep.subr.bf16.mxu1 %v12305_v2  ;;  %v396_v8 = vsel %vm373_vm0, %v372_v35, %v395_v5  ;;  %v2373_v35 = vld [vmem:[%s14907_s26 + $0xc8] sm:$0xff] }
 0x199   : > { %v15268_v17 = vsel %vm531_vm2, %v492_v59, %v15262_v7  ;;  %517 = vrot.lane.b32.xlu0 %v396_v8, %s14703_s12  ;;  %11847 = vmatmul.mubr.msk.f32.gmra.mrb[6].mxu1 %vm652_vm3, %v15154_v1  ;;  %v15367_v37 = vpack.i.bf16 %v15357_v36, %v2373_v35 }
 0x19a   : > { %v12323_v18 = vpack.c.bf16 %v15268_v17, %v15232_v51  ;;  %v12317_v19 = vpack.c.bf16 %v542_v3, %v15268_v17  ;;  %878 = vmatprep.mubr.f32.mxu1 %v14704_v47  ;;  %11853 = vmatmul.mubr.msk.f32.gmra.mrb[18].mxu0 %vm652_vm3, %v15132_v38 }
 0x19b   : > { %v398_v21 = vpop.permute.xlu1 %397  ;;  %12308 = vmatpush1.bf16.msra.mxu1 %v12307_v13  ;;  %979 = vmatprep.mubr.f32.mxu0 %v14704_v47 }
 0x19c   : > { %v399_v22 = vsel %vm322_vm1, %v15197_v32, %v398_v21  ;;  %12310 = vmatprep.subr.bf16.mxu1 %v12309_v0  ;;  %12318 = vmatprep.subr.bf16.mxu0 %v12317_v19  ;;  %v15333_v32 = vld [vmem:[%s14907_s26 + $0xc0] sm:$0xff] }
 0x19d   : > { %525 = vrot.lane.b32.xlu0 %v398_v21, %s14703_s12  ;;  %12320 = vmatpush1.bf16.msra.mxu0 %v12319_v20  ;;  %v13752_v23 = vpack.i.bf16 %v399_v22, %v15069_v29  ;;  %v13762_v29 = vpack.i.bf16 %v15293_v27, %v15078_v14  ;;  %v13777_v16 = vpack.i.bf16 %v15333_v32, %v15330_v31 }
 0x19e   : > { %11848 = vmatmul.mubr.msk.f32.gmra.mrb[8].mxu1 %vm652_vm3, %v15170_v52  ;;  %11854 = vmatmul.mubr.msk.f32.gmra.mrb[20].mxu0 %vm652_vm3, %v15146_v53 }
 0x19f   : > { %13753 = vrot.lane.b32.xlu1 %v13752_v23, %s14703_s12  ;;  %v402_v26 = vpop.permute.xlu1 %401  ;;  %12312 = vmatpush1.bf16.msra.mxu1 %v12311_v61 }
 0x1a0   : > { %1032 = vmatprep.subr.mxu1 %v15268_v17  ;;  %884 = vmatprep.mubr.f32.mxu1 %v14704_v47  ;;  %v403_v11 = vsel %vm373_vm0, %v395_v5, %v402_v26 }
 0x1a1   : > { %13758 = vrot.lane.b32.xlu0 %v13757_v25, %s14702_s24  ;;  %985 = vmatprep.mubr.f32.mxu0 %v14704_v47 }
 0x1a2   : > { %11849 = vmatmul.mubr.msk.f32.gmra.mrb[10].mxu1 %vm652_vm3, %v15181_v24  ;;  %11855 = vmatmul.mubr.msk.f32.gmra.mrb[22].mxu0 %vm652_vm3, %v15154_v1 }
 0x1a3   : > { %529 = vrot.lane.b32.xlu1 %v403_v11, %s14703_s12  ;;  %1033 = vmatpush1.msra.mxu1 %v572_v63  ;;  %v13734_v42 = vpop.permute.xlu1 %13733 }
 0x1a4   : > { %890 = vmatprep.mubr.f32.mxu1 %v14704_v47  ;;  %991 = vmatprep.mubr.f32.mxu0 %v14704_v47  ;;  %v13735_v45 = vunpack.i.l.bf16 %v13734_v42  ;;  %v13736_v56 = vunpack.i.h.bf16 %v13734_v42 }
 0x1a5   : > { %13768 = vrot.lane.b32.xlu0 %v13757_v25, %s14701_s22 }
 0x1a6   : > { %11850 = vmatmul.mubr.msk.f32.gmra.mrb[12].mxu1 %vm652_vm3, %v15199_v34  ;;  %11856 = vmatmul.mubr.msk.f32.gmra.mrb[24].mxu0 %vm652_vm3, %v15170_v52  ;;  %v545_v61 = vsel %vm531_vm2, %v13735_v45, %v13736_v56 }
 0x1a7   : > { %13763 = vrot.lane.b32.xlu1 %v13762_v29, %s14702_s24  ;;  %896 = vmatprep.mubr.f32.mxu1 %v14704_v47 }
 0x1a8   : > { %997 = vmatprep.mubr.f32.mxu0 %v14704_v47 }
 0x1a9   : > { %2454 = vrot.lane.b32.xlu0 %v15293_v27, %s14701_s22 }
 0x1aa   : > { %11851 = vmatmul.mubr.msk.f32.gmra.mrb[14].mxu1 %vm652_vm3, %v15215_v10  ;;  %11857 = vmatmul.mubr.msk.f32.gmra.mrb[26].mxu0 %vm652_vm3, %v15181_v24 }
 0x1ab   : > { %2452 = vrot.lane.b32.xlu1 %v15078_v14, %s14701_s22  ;;  %1080 = vmatprep.mubr.f32.mxu1 %v14704_v47 }
 0x1ac   : > { %1003 = vmatprep.mubr.f32.mxu0 %v14704_v47 }
 0x1ad   : > { %2456 = vrot.lane.b32.xlu0 %v2369_v28, %s14701_s22 }
 0x1ae   : > { %11860 = vmatmul.mubr.msk.f32.vlgmr.msra.gmra.mrb[16].mxu1 %vm652_vm3, %v15120_v12  ;;  %11858 = vmatmul.mubr.msk.f32.gmra.mrb[28].mxu0 %vm652_vm3, %v15199_v34 }
 0x1af   : > { %13773 = vrot.lane.b32.xlu1 %v15326_v15, %s14702_s24  ;;  %1086 = vmatprep.mubr.f32.mxu1 %v14704_v47 }
 0x1b0   : > { %1009 = vmatprep.mubr.f32.mxu0 %v14704_v47 }
 0x1b1   : > { %2458 = vrot.lane.b32.xlu0 %v2370_v30, %s14701_s22 }
 0x1b2   : > { %11861 = vmatmul.mubr.msk.f32.gmra.mrb[18].mxu1 %vm652_vm3, %v15132_v38  ;;  %11859 = vmatmul.mubr.msk.f32.gmra.mrb[30].mxu0 %vm652_vm3, %v15215_v10 }
 0x1b3   : > { %13778 = vrot.lane.b32.xlu1 %v13777_v16, %s14702_s24  ;;  %1092 = vmatprep.mubr.f32.mxu1 %v14704_v47 }
 0x1b4   : > { %1193 = vmatprep.mubr.f32.mxu0 %v14704_v47 }
 0x1b5   : > { %2462 = vrot.lane.b32.xlu0 %v15333_v32, %s14701_s22 }
 0x1b6   : > { %11862 = vmatmul.mubr.msk.f32.gmra.mrb[20].mxu1 %vm652_vm3, %v15146_v53 }
 0x1b7   : > { %2460 = vrot.lane.b32.xlu1 %v15330_v31, %s14701_s22  ;;  %1098 = vmatprep.mubr.f32.mxu1 %v14704_v47 }
 0x1b9   : > { %2464 = vrot.lane.b32.xlu0 %v2373_v35, %s14701_s22 }
 0x1ba   : > { %11863 = vmatmul.mubr.msk.f32.gmra.mrb[22].mxu1 %vm652_vm3, %v15154_v1 }
 0x1bb   : > { %1104 = vmatprep.mubr.f32.mxu1 %v14704_v47  ;;  %13783 = vrot.lane.b32.xlu1 %v15367_v37, %s14702_s24 }
 0x1be   : > { %11864 = vmatmul.mubr.msk.f32.gmra.mrb[24].mxu1 %vm652_vm3, %v15170_v52 }
 0x1bf   : > { %1110 = vmatprep.mubr.f32.mxu1 %v14704_v47  ;;  %13788 = vrot.lane.b32.xlu1 %v13757_v25, %s14703_s12 }
 0x1c2   : > { %11865 = vmatmul.mubr.msk.f32.gmra.mrb[26].mxu1 %vm652_vm3, %v15181_v24 }
 0x1c3   : > { %1116 = vmatprep.mubr.f32.mxu1 %v14704_v47 }
 0x1c6   : > { %11866 = vmatmul.mubr.msk.f32.gmra.mrb[28].mxu1 %vm652_vm3, %v15199_v34 }
 0x1c7   : > { %1122 = vmatprep.mubr.f32.mxu1 %v14704_v47 }
 0x1ca   : > { %11867 = vmatmul.mubr.msk.f32.gmra.mrb[30].mxu1 %vm652_vm3, %v15215_v10 }
 0x1cb   : > { %1306 = vmatprep.mubr.f32.mxu1 %v14704_v47 }
 0x1db   : > { %v496_v39 = vpop.permute.xlu0 %495 }
 0x1dc   : > { %v574_v40 = vsel %vm531_vm2, %v15262_v7, %v496_v39 }
 0x1dd   : > { %v12321_v41 = vpack.c.bf16 %v574_v40, %v15257_v4 }
 0x1df   : > { %12322 = vmatprep.subr.bf16.mxu0 %v12321_v41 }
 0x1e0   : > { %12324 = vmatpush1.bf16.msra.mxu0 %v12323_v18 }
 0x1e2   : > { %v13729_v33 = vpop.permute.xlu0 %13728 }
 0x1e3   : > { %v13731_v43 = vunpack.i.h.bf16 %v13729_v33  ;;  %v13730_v44 = vunpack.i.l.bf16 %v13729_v33 }
 0x1e5   : > { %v543_v46 = vsel %vm531_vm2, %v13725_v58, %v13730_v44  ;;  %v559_v48 = vsel %vm531_vm2, %v13726_v57, %v13731_v43  ;;  %v544_v51 = vsel %vm531_vm2, %v13730_v44, %v13735_v45 }
 0x1e6   : > { %v498_v49 = vpop.permute.xlu0 %497  ;;  %v12325_v50 = vpack.c.bf16 %v559_v48, %v543_v46  ;;  %v12335_v58 = vpack.c.bf16 %v543_v46, %v574_v40 }
 0x1e7   : > { %v575_v55 = vsel %vm531_vm2, %v496_v39, %v498_v49 }
 0x1e8   : > { %12326 = vmatprep.subr.bf16.mxu0 %v12325_v50  ;;  %12330 = vmatprep.subr.bf16.mxu1 %v12325_v50  ;;  %v12333_v59 = vpack.c.bf16 %v544_v51, %v575_v55  ;;  %v12339_v7 = vpack.c.bf16 %v575_v55, %v559_v48 }
 0x1e9   : > { %12328 = vmatpush1.bf16.msra.mxu0 %v15260_v6  ;;  %12332 = vmatpush1.bf16.msra.mxu1 %v15260_v6 }
 0x1ea   : > { %1145 = vmatprep.subr.mxu0 %v575_v55  ;;  %12334 = vmatprep.subr.bf16.mxu1 %v12333_v59 }
 0x1eb   : > { %v13739_v54 = vpop.permute.xlu0 %13738 }
 0x1ec   : > { %v13741_v60 = vunpack.i.h.bf16 %v13739_v54  ;;  %v13740_v57 = vunpack.i.l.bf16 %v13739_v54 }
 0x1ed   : > { %1146 = vmatpush1.msra.mxu0 %v574_v40  ;;  %12336 = vmatpush1.bf16.msra.mxu1 %v12335_v58 }
 0x1ee   : > { %v560_v62 = vsel %vm531_vm2, %v13731_v43, %v13740_v57  ;;  %11868 = vmatmul.mubr.msk.f32.vlgmr.msra.gmra.mrb[32].mxu0 %vm652_vm3, %v15120_v12  ;;  %v561_v63 = vsel %vm531_vm2, %v13740_v57, %v13741_v60 }
 0x1ef   : > { %1199 = vmatprep.mubr.f32.mxu0 %v14704_v47  ;;  %v12341_v0 = vpack.c.bf16 %v561_v63, %v545_v61  ;;  %v12343_v2 = vpack.c.bf16 %v560_v62, %v544_v51 }
 0x1f1   : > { %12346 = vmatprep.subr.bf16.mxu0 %v12341_v0  ;;  %v436_v4 = vpop.permute.xlu0 %435 }
 0x1f2   : > { %11869 = vmatmul.mubr.msk.f32.gmra.mrb[34].mxu0 %vm652_vm3, %v15132_v38  ;;  %v546_v8 = vsel %vm531_vm2, %v13736_v56, %v436_v4 }
 0x1f3   : > { %12348 = vmatpush1.bf16.msra.mxu0 %v12343_v2  ;;  %1205 = vmatprep.mubr.f32.mxu0 %v14704_v47 }
 0x1f4   : > { %v500_v3 = vpop.permute.xlu1 %499 }
 0x1f5   : > { %v576_v5 = vsel %vm531_vm2, %v498_v49, %v500_v3 }
 0x1f6   : > { %11870 = vmatmul.mubr.msk.f32.gmra.mrb[36].mxu0 %vm652_vm3, %v15146_v53  ;;  %v12337_v6 = vpack.c.bf16 %v576_v5, %v560_v62  ;;  %v12351_v19 = vpack.c.bf16 %v545_v61, %v576_v5 }
 0x1f7   : > { %1211 = vmatprep.mubr.f32.mxu0 %v14704_v47 }
 0x1f8   : > { %v502_v13 = vpop.permute.xlu1 %501  ;;  %12338 = vmatprep.subr.bf16.mxu1 %v12337_v6 }
 0x1f9   : > { %v577_v17 = vsel %vm531_vm2, %v500_v3, %v502_v13  ;;  %12340 = vmatpush1.bf16.msra.mxu1 %v12339_v7 }
 0x1fa   : > { %11871 = vmatmul.mubr.msk.f32.gmra.mrb[38].mxu0 %vm652_vm3, %v15154_v1  ;;  %12342 = vmatprep.subr.bf16.mxu1 %v12341_v0  ;;  %v12349_v18 = vpack.c.bf16 %v546_v8, %v577_v17  ;;  %v12355_v11 = vpack.c.bf16 %v577_v17, %v561_v63 }
 0x1fb   : > { %1217 = vmatprep.mubr.f32.mxu0 %v14704_v47 }
 0x1fc   : > { %v504_v20 = vpop.permute.xlu1 %503  ;;  %12350 = vmatprep.subr.bf16.mxu0 %v12349_v18 }
 0x1fd   : > { %12344 = vmatpush1.bf16.msra.mxu1 %v12343_v2  ;;  %12352 = vmatpush1.bf16.msra.mxu0 %v12351_v19  ;;  %v578_v22 = vsel %vm531_vm2, %v502_v13, %v504_v20 }
 0x1fe   : > { %v470_v21 = vpop.permute.xlu0 %469  ;;  %11872 = vmatmul.mubr.msk.f32.gmra.mrb[40].mxu0 %vm652_vm3, %v15170_v52  ;;  %1258 = vmatprep.subr.mxu1 %v577_v17 }
 0x1ff   : > { %1223 = vmatprep.mubr.f32.mxu0 %v14704_v47  ;;  %v562_v23 = vsel %vm531_vm2, %v13741_v60, %v470_v21 }
 0x200   : > { %v506_v25 = vpop.permute.xlu1 %505  ;;  %v12353_v26 = vpack.c.bf16 %v578_v22, %v562_v23  ;;  %v12359_v33 = vpack.c.bf16 %v562_v23, %v546_v8 }
 0x201   : > { %1259 = vmatpush1.msra.mxu1 %v576_v5  ;;  %v579_v48 = vsel %vm531_vm2, %v504_v20, %v506_v25 }
 0x202   : > { %v13744_v29 = vpop.permute.xlu0 %13743  ;;  %11873 = vmatmul.mubr.msk.f32.gmra.mrb[42].mxu0 %vm652_vm3, %v15181_v24  ;;  %11876 = vmatmul.mubr.msk.f32.vlgmr.msra.gmra.mrb[32].mxu1 %vm652_vm3, %v15120_v12 }
 0x203   : > { %v13746_v28 = vunpack.i.h.bf16 %v13744_v29  ;;  %v13745_v30 = vunpack.i.l.bf16 %v13744_v29  ;;  %12354 = vmatprep.subr.bf16.mxu0 %v12353_v26  ;;  %1229 = vmatprep.mubr.f32.mxu0 %v14704_v47 }
 0x204   : > { %12356 = vmatpush1.bf16.msra.mxu0 %v12355_v11  ;;  %v13749_v16 = vpop.permute.xlu1 %13748  ;;  %1312 = vmatprep.mubr.f32.mxu1 %v14704_v47 }
 0x205   : > { %v13750_v35 = vunpack.i.l.bf16 %v13749_v16  ;;  %v547_v39 = vsel %vm531_vm2, %v436_v4, %v13745_v30  ;;  %v582_v40 = vsel %vm531_vm2, %v470_v21, %v13746_v28  ;;  %v13751_v44 = vunpack.i.h.bf16 %v13749_v16  ;;  %v15504_v16 = vld [vmem:[%s14907_s26 + $0xe0] sm:$0xff] }
 0x206   : > { %v472_v41 = vpop.permute.xlu0 %471  ;;  %11874 = vmatmul.mubr.msk.f32.gmra.mrb[44].mxu0 %vm652_vm3, %v15199_v34  ;;  %11877 = vmatmul.mubr.msk.f32.gmra.mrb[34].mxu1 %vm652_vm3, %v15132_v38  ;;  %v12357_v42 = vpack.c.bf16 %v582_v40, %v547_v39  ;;  %v12367_v59 = vpack.c.bf16 %v547_v39, %v578_v22  ;;  %v12371_v60 = vpack.c.bf16 %v579_v48, %v582_v40 }
 0x207   : > { %v563_v43 = vsel %vm531_vm2, %v470_v21, %v472_v41  ;;  %1235 = vmatprep.mubr.f32.mxu0 %v14704_v47  ;;  %1318 = vmatprep.mubr.f32.mxu1 %v14704_v47  ;;  %v580_v46 = vsel %vm531_vm2, %v13745_v30, %v13750_v35  ;;  %v583_v51 = vsel %vm531_vm2, %v13746_v28, %v13751_v44  ;;  %v15501_v30 = vld [vmem:[%s14907_s26 + $0xd8] sm:$0xff] }
 0x208   : > { %v12361_v45 = vpack.c.bf16 %v563_v43, %v547_v39  ;;  %12358 = vmatprep.subr.bf16.mxu0 %v12357_v42  ;;  %v12365_v50 = vpack.c.bf16 %v580_v46, %v579_v48  ;;  %v13812_v39 = vpack.i.bf16 %v15504_v16, %v15501_v30 }
 0x209   : > { %12360 = vmatpush1.bf16.msra.mxu0 %v12359_v33 }
 0x20a   : > { %11875 = vmatmul.mubr.msk.f32.gmra.mrb[46].mxu0 %vm652_vm3, %v15215_v10  ;;  %11878 = vmatmul.mubr.msk.f32.gmra.mrb[36].mxu1 %vm652_vm3, %v15146_v53 }
 0x20b   : > { %1371 = vmatprep.subr.mxu0 %v579_v48  ;;  %12362 = vmatprep.subr.bf16.mxu1 %v12361_v45  ;;  %v518_v49 = vpop.permute.xlu0 %517 }
 0x20c   : > { %v585_v55 = vsel %vm531_vm2, %v506_v25, %v518_v49  ;;  %12364 = vmatpush1.bf16.msra.mxu1 %v12359_v33  ;;  %1324 = vmatprep.mubr.f32.mxu1 %v14704_v47 }
 0x20d   : > { %12366 = vmatprep.subr.bf16.mxu1 %v12365_v50  ;;  %1372 = vmatpush1.msra.mxu0 %v578_v22  ;;  %v12369_v56 = vpack.c.bf16 %v585_v55, %v583_v51 }
 0x20e   : > { %1419 = vmatprep.mubr.f32.mxu0 %v14704_v47  ;;  %11879 = vmatmul.mubr.msk.f32.gmra.mrb[38].mxu1 %vm652_vm3, %v15154_v1 }
 0x20f   : > { %11884 = vmatmul.mubr.msk.f32.vlgmr.msra.gmra.mrb[48].mxu0 %vm652_vm3, %v15120_v12  ;;  %v526_v58 = vpop.permute.xlu0 %525  ;;  %1330 = vmatprep.mubr.f32.mxu1 %v14704_v47 }
 0x210   : > { %12368 = vmatpush1.bf16.msra.mxu1 %v12367_v59  ;;  %1425 = vmatprep.mubr.f32.mxu0 %v14704_v47  ;;  %v15575_v59 = vld [vmem:[%s14907_s26 + $0xf0] sm:$0xff] }
 0x211   : > { %12370 = vmatprep.subr.bf16.mxu1 %v12369_v56  ;;  %v13754_v54 = vpop.permute.xlu1 %13753 }
 0x212   : > { %v13756_v57 = vunpack.i.h.bf16 %v13754_v54  ;;  %v13755_v61 = vunpack.i.l.bf16 %v13754_v54  ;;  %11880 = vmatmul.mubr.msk.f32.gmra.mrb[40].mxu1 %vm652_vm3, %v15170_v52 }
 0x213   : > { %11885 = vmatmul.mubr.msk.f32.gmra.mrb[50].mxu0 %vm652_vm3, %v15132_v38  ;;  %1336 = vmatprep.mubr.f32.mxu1 %v14704_v47  ;;  %v13759_v62 = vpop.permute.xlu0 %13758 }
 0x214   : > { %v588_v63 = vsel %vm531_vm2, %v13746_v28, %v13756_v57  ;;  %12372 = vmatpush1.bf16.msra.mxu1 %v12371_v60  ;;  %1431 = vmatprep.mubr.f32.mxu0 %v14704_v47  ;;  %v13760_v0 = vunpack.i.l.bf16 %v13759_v62  ;;  %v586_v2 = vsel %vm531_vm2, %v13750_v35, %v13755_v61  ;;  %v589_v4 = vsel %vm531_vm2, %v13756_v57, %v526_v58  ;;  %v15580_v58 = vld [vmem:[%s14907_s26 + $0xf8] sm:$0xff] }
 0x215   : > { %v530_v3 = vpop.permute.xlu1 %529  ;;  %v12375_v5 = vpack.c.bf16 %v588_v63, %v580_v46  ;;  %v13761_v6 = vunpack.i.h.bf16 %v13759_v62  ;;  %v12373_v7 = vpack.c.bf16 %v589_v4, %v586_v2  ;;  %v15554_v46 = vld [vmem:[%s14907_s26 + $0xe8] sm:$0xff] }
 0x216   : > { %11881 = vmatmul.mubr.msk.f32.gmra.mrb[42].mxu1 %vm652_vm3, %v15181_v24  ;;  %v13797_v8 = vpack.i.bf16 %v13760_v0, %v15035_v9  ;;  %v591_v19 = vsel %vm531_vm2, %v518_v49, %v530_v3 }
 0x217   : > { %11886 = vmatmul.mubr.msk.f32.gmra.mrb[52].mxu0 %vm652_vm3, %v15146_v53  ;;  %1342 = vmatprep.mubr.f32.mxu1 %v14704_v47  ;;  %v13769_v13 = vpop.permute.xlu0 %13768  ;;  %v2432_v21 = vsel %vm322_vm1, %v13760_v0, %v13761_v6 }
 0x218   : > { %12374 = vmatprep.subr.bf16.mxu1 %v12373_v7  ;;  %1437 = vmatprep.mubr.f32.mxu0 %v14704_v47  ;;  %v13770_v17 = vunpack.i.l.bf16 %v13769_v13  ;;  %v13771_v9 = vunpack.i.h.bf16 %v13769_v13 }
 0x219   : > { %12376 = vmatpush1.bf16.msra.mxu1 %v12375_v5  ;;  %v13764_v18 = vpop.permute.xlu1 %13763  ;;  %13798 = vrot.lane.b32.xlu1 %v13797_v8, %s14703_s12  ;;  %v15605_v5 = vld [vmem:[%s14907_s26 + $0x100] sm:$0xff] }
 0x21a   : > { %v15476_v20 = vunpack.i.l.bf16 %v13764_v18  ;;  %1484 = vmatprep.subr.mxu1 %v591_v19  ;;  %11882 = vmatmul.mubr.msk.f32.gmra.mrb[44].mxu1 %vm652_vm3, %v15199_v34  ;;  %v2482_v23 = vsel %vm373_vm0, %v13770_v17, %v13771_v9  ;;  %v13766_v35 = vunpack.i.h.bf16 %v13764_v18  ;;  %v13822_v42 = vpack.i.bf16 %v15293_v27, %v13771_v9 }
 0x21b   : > { %11887 = vmatmul.mubr.msk.f32.gmra.mrb[54].mxu0 %vm652_vm3, %v15154_v1  ;;  %1348 = vmatprep.mubr.f32.mxu1 %v14704_v47  ;;  %v13802_v28 = vpack.i.bf16 %v2482_v23, %v15078_v14  ;;  %v2455_v14 = vpop.permute.xlu0 %2454 }
 0x21c   : > { %1443 = vmatprep.mubr.f32.mxu0 %v14704_v47  ;;  %v2433_v22 = vsel %vm322_vm1, %v13761_v6, %v15476_v20  ;;  %v2434_v40 = vsel %vm322_vm1, %v15476_v20, %v13766_v35 }
 0x21d   : > { %1485 = vmatpush1.msra.mxu1 %v585_v55  ;;  %v15488_v25 = vpop.permute.xlu1 %2452  ;;  %v13792_v26 = vpack.i.bf16 %v2433_v22, %v2432_v21 }
 0x21e   : > { %11883 = vmatmul.mubr.msk.f32.gmra.mrb[46].mxu1 %vm652_vm3, %v15215_v10  ;;  %v2483_v11 = vsel %vm373_vm0, %v13771_v9, %v15488_v25 }
 0x21f   : > { %11888 = vmatmul.mubr.msk.f32.gmra.mrb[56].mxu0 %vm652_vm3, %v15170_v52  ;;  %13793 = vrot.lane.b32.xlu0 %v13792_v26, %s14703_s12  ;;  %v13807_v29 = vpack.i.bf16 %v13770_v17, %v2483_v11 }
 0x220   : > { %1449 = vmatprep.mubr.f32.mxu0 %v14704_v47  ;;  %1532 = vmatprep.mubr.f32.mxu1 %v14704_v47 }
 0x221   : > { %13808 = vrot.lane.b32.xlu1 %v13807_v29, %s14703_s12  ;;  %v13774_v41 = vpop.permute.xlu1 %13773 }
 0x222   : > { %11892 = vmatmul.mubr.msk.f32.vlgmr.msra.gmra.mrb[48].mxu1 %vm652_vm3, %v15120_v12  ;;  %v2484_v12 = vsel %vm373_vm0, %v15488_v25, %v2455_v14  ;;  %v13776_v44 = vunpack.i.h.bf16 %v13774_v41 }
 0x223   : > { %11889 = vmatmul.mubr.msk.f32.gmra.mrb[58].mxu0 %vm652_vm3, %v15181_v24  ;;  %13803 = vrot.lane.b32.xlu0 %v13802_v28, %s14703_s12 }
 0x224   : > { %1455 = vmatprep.mubr.f32.mxu0 %v14704_v47  ;;  %1538 = vmatprep.mubr.f32.mxu1 %v14704_v47 }
 0x225   : > { %2466 = vrot.lane.b32.xlu1 %v15357_v36, %s14701_s22  ;;  %v13817_v36 = vpack.i.bf16 %v13761_v6, %v2434_v40  ;;  %v13779_v43 = vpop.permute.xlu1 %13778  ;;  %v15608_v6 = vld [vmem:[%s14907_s26 + $0x108] sm:$0xff] }
 0x226   : > { %11893 = vmatmul.mubr.msk.f32.gmra.mrb[50].mxu1 %vm652_vm3, %v15132_v38  ;;  %v13775_v38 = vunpack.i.l.bf16 %v13774_v41  ;;  %v13780_v45 = vunpack.i.l.bf16 %v13779_v43  ;;  %v13781_v49 = vunpack.i.h.bf16 %v13779_v43 }
 0x227   : > { %11890 = vmatmul.mubr.msk.f32.gmra.mrb[60].mxu0 %vm652_vm3, %v15199_v34  ;;  %13813 = vrot.lane.b32.xlu0 %v13812_v39, %s14702_s24 }
 0x228   : > { %1461 = vmatprep.mubr.f32.mxu0 %v14704_v47  ;;  %1544 = vmatprep.mubr.f32.mxu1 %v14704_v47  ;;  %v2435_v33 = vsel %vm322_vm1, %v13766_v35, %v13775_v38  ;;  %v2436_v48 = vsel %vm322_vm1, %v13775_v38, %v13776_v44  ;;  %v2438_v55 = vsel %vm322_vm1, %v13780_v45, %v13781_v49 }
 0x229   : > { %2587 = vrot.lane.b32.xlu1 %v2484_v12, %s14703_s12  ;;  %v13827_v27 = vpack.i.bf16 %v15476_v20, %v2435_v33  ;;  %v13842_v56 = vpack.i.bf16 %v2438_v55, %v15330_v31  ;;  %v13847_v31 = vpack.i.bf16 %v15580_v58, %v15575_v59 }
 0x22a   : > { %11894 = vmatmul.mubr.msk.f32.gmra.mrb[52].mxu1 %vm652_vm3, %v15146_v53  ;;  %v2457_v53 = vpop.permute.xlu0 %2456 }
 0x22b   : > { %11891 = vmatmul.mubr.msk.f32.gmra.mrb[62].mxu0 %vm652_vm3, %v15215_v10  ;;  %13818 = vrot.lane.b32.xlu0 %v13817_v36, %s14703_s12 }
 0x22c   : > { %1550 = vmatprep.mubr.f32.mxu1 %v14704_v47  ;;  %1780 = vmatprep.mubr.f32.mxu0 %v14704_v47 }
 0x22d   : > { %13823 = vrot.lane.b32.xlu1 %v13822_v42, %s14703_s12 }
 0x22e   : > { %11895 = vmatmul.mubr.msk.f32.gmra.mrb[54].mxu1 %vm652_vm3, %v15154_v1  ;;  %v2485_v1 = vsel %vm373_vm0, %v2455_v14, %v2457_v53  ;;  %v2459_v51 = vpop.permute.xlu0 %2458 }
 0x22f   : > { %2468 = vrot.lane.b32.xlu0 %v15501_v30, %s14701_s22  ;;  %1556 = vmatprep.mubr.f32.mxu1 %v14704_v47  ;;  %v2486_v54 = vsel %vm373_vm0, %v2457_v53, %v2459_v51 }
 0x231   : > { %2470 = vrot.lane.b32.xlu1 %v15504_v16, %s14701_s22 }
 0x232   : > { %11896 = vmatmul.mubr.msk.f32.gmra.mrb[56].mxu1 %vm652_vm3, %v15170_v52  ;;  %v2437_v52 = vsel %vm322_vm1, %v13776_v44, %v13780_v45 }
 0x233   : > { %13828 = vrot.lane.b32.xlu0 %v13827_v27, %s14703_s12  ;;  %1562 = vmatprep.mubr.f32.mxu1 %v14704_v47  ;;  %v13837_v50 = vpack.i.bf16 %v2437_v52, %v2436_v48 }
 0x235   : > { %2589 = vrot.lane.b32.xlu1 %v2485_v1, %s14703_s12 }
 0x236   : > { %11897 = vmatmul.mubr.msk.f32.gmra.mrb[58].mxu1 %vm652_vm3, %v15181_v24  ;;  %v2461_v24 = vpop.permute.xlu1 %2460 }
 0x237   : > { %2424 = vrot.lane.b32.xlu0 %v15554_v46, %s14702_s24  ;;  %1568 = vmatprep.mubr.f32.mxu1 %v14704_v47 }
 0x239   : > { %2472 = vrot.lane.b32.xlu1 %v15554_v46, %s14701_s22 }
 0x23a   : > { %11898 = vmatmul.mubr.msk.f32.gmra.mrb[60].mxu1 %vm652_vm3, %v15199_v34  ;;  %v15584_v34 = vpop.permute.xlu1 %13783 }
 0x23b   : > { %2635 = vrot.lane.b32.xlu0 %v15488_v25, %s14703_s12  ;;  %1574 = vmatprep.mubr.f32.mxu1 %v14704_v47  ;;  %v13785_v60 = vunpack.i.l.bf16 %v15584_v34 }
 0x23d   : > { %13838 = vrot.lane.b32.xlu1 %v13837_v50, %s14703_s12  ;;  %v2439_v57 = vsel %vm322_vm1, %v13781_v49, %v13785_v60 }
 0x23e   : > { %11899 = vmatmul.mubr.msk.f32.gmra.mrb[62].mxu1 %vm652_vm3, %v15215_v10  ;;  %v2463_v10 = vpop.permute.xlu0 %2462  ;;  %v13852_v0 = vpack.i.bf16 %v2439_v57, %v15333_v32  ;;  %v13857_v32 = vpack.i.bf16 %v15608_v6, %v15605_v5 }
 0x23f   : > { %13833 = vrot.lane.b32.xlu0 %v15326_v15, %s14703_s12  ;;  %1857 = vmatprep.mubr.f32.mxu1 %v14704_v47  ;;  %v2487_v15 = vsel %vm373_vm0, %v2459_v51, %v2461_v24  ;;  %v2488_v61 = vsel %vm373_vm0, %v2461_v24, %v2463_v10 }
 0x241   : > { %13843 = vrot.lane.b32.xlu1 %v13842_v56, %s14703_s12 }
 0x242   : > { %v15615_v9 = vpop.permute.xlu0 %2464 }
 0x243   : > { %2591 = vrot.lane.b32.xlu0 %v2486_v54, %s14703_s12  ;;  %v2489_v25 = vsel %vm373_vm0, %v2463_v10, %v15615_v9 }
 0x245   : > { %13848 = vrot.lane.b32.xlu1 %v13847_v31, %s14702_s24 }
 0x247   : > { %2593 = vrot.lane.b32.xlu0 %v2487_v15, %s14703_s12  ;;  %v743_v62 = vpop.f32.mrb[0].mxu0 }
 0x248   : > { %v745_v63 = vpop.f32.mrb[1].mxu0  ;;  %v1581_v2 = vmax.f32 %v743_v62, 0.0 }
 0x249   : > { %2595 = vrot.lane.b32.xlu1 %v2488_v61, %s14703_s12  ;;  %v1582_v3 = vmax.f32 %v745_v63, 0.0 }
 0x24b   : > { %2474 = vrot.lane.b32.xlu0 %v15575_v59, %s14701_s22  ;;  %v749_v4 = vpop.f32.mrb[2].mxu0 }
 0x24c   : > { %v1597_v7 = vmax.f32 %v749_v4, 0.0  ;;  %v751_v8 = vpop.f32.mrb[3].mxu0 }
 0x24d   : > { %13853 = vrot.lane.b32.xlu1 %v13852_v0, %s14703_s12  ;;  %v1598_v13 = vmax.f32 %v751_v8, 0.0 }
 0x24e   : > { %v12379_v17 = vpack.c.bf16 %v1597_v7, %v1581_v2 }
 0x24f   : > { %2476 = vrot.lane.b32.xlu0 %v15580_v58, %s14701_s22  ;;  %v755_v18 = vpop.f32.mrb[4].mxu0  ;;  %v12377_v19 = vpack.c.bf16 %v1598_v13, %v1582_v3  ;;  %v15627_v3 = vld [vmem:[#allocation9] sm:$0xff] }
 0x250   : > { %v757_v20 = vpop.f32.mrb[5].mxu0  ;;  %v1613_v21 = vmax.f32 %v755_v18, 0.0 }
 0x251   : > { %2478 = vrot.lane.b32.xlu1 %v15605_v5, %s14701_s22  ;;  %12378 = vmatprep.subr.bf16.mxu0 %v12377_v19  ;;  %v1614_v22 = vmax.f32 %v757_v20, 0.0 }
 0x252   : > { %12380 = vmatpush1.bf16.msra.mxu0 %v12379_v17 }
 0x253   : > { %13858 = vrot.lane.b32.xlu0 %v13857_v32, %s14702_s24  ;;  %v761_v23 = vpop.f32.mrb[6].mxu0 }
 0x254   : > { %v1629_v26 = vmax.f32 %v761_v23, 0.0  ;;  %v763_v11 = vpop.f32.mrb[7].mxu0  ;;  %v15632_v23 = vld [vmem:[#allocation9 + $0x8] sm:$0xff] }
 0x255   : > { %2480 = vrot.lane.b32.xlu1 %v15608_v6, %s14701_s22  ;;  %v1630_v29 = vmax.f32 %v763_v11, 0.0 }
 0x256   : > { %v12383_v28 = vpack.c.bf16 %v1629_v26, %v1613_v21 }
 0x257   : > { %2597 = vrot.lane.b32.xlu0 %v2489_v25, %s14703_s12  ;;  %v767_v35 = vpop.f32.mrb[8].mxu0  ;;  %v12381_v14 = vpack.c.bf16 %v1630_v29, %v1614_v22 }
 0x258   : > { %v769_v39 = vpop.f32.mrb[9].mxu0  ;;  %v1645_v12 = vmax.f32 %v767_v35, 0.0 }
 0x259   : > { %12382 = vmatprep.subr.bf16.mxu0 %v12381_v14  ;;  %v1646_v40 = vmax.f32 %v769_v39, 0.0 }
 0x25a   : > { %12384 = vmatpush1.bf16.msra.mxu0 %v12383_v28 }
 0x25b   : > { %13863 = vrot.lane.b32.xlu0 %v15367_v37, %s14703_s12  ;;  %v773_v41 = vpop.f32.mrb[10].mxu0  ;;  %v856_v36 = vpop.f32.mrb[0].mxu1 }
 0x25c   : > { %v1661_v38 = vmax.f32 %v773_v41, 0.0  ;;  %v775_v42 = vpop.f32.mrb[11].mxu0  ;;  %v858_v33 = vpop.f32.mrb[1].mxu1  ;;  %v1583_v45 = vmax.f32 %v856_v36, 0.0 }
 0x25d   : > { %v1662_v53 = vmax.f32 %v775_v42, 0.0  ;;  %v1584_v49 = vmax.f32 %v858_v33, 0.0 }
 0x25e   : > { %v12387_v43 = vpack.c.bf16 %v1661_v38, %v1645_v12 }
 0x25f   : > { %v779_v27 = vpop.f32.mrb[12].mxu0  ;;  %v12385_v44 = vpack.c.bf16 %v1662_v53, %v1646_v40 }
 0x260   : > { %v781_v1 = vpop.f32.mrb[13].mxu0  ;;  %v1677_v48 = vmax.f32 %v779_v27, 0.0 }
 0x261   : > { %12386 = vmatprep.subr.bf16.mxu0 %v12385_v44  ;;  %v1678_v50 = vmax.f32 %v781_v1, 0.0 }
 0x262   : > { %12388 = vmatpush1.bf16.msra.mxu0 %v12387_v43  ;;  %v862_v52 = vpop.f32.mrb[2].mxu1 }
 0x263   : > { %v785_v55 = vpop.f32.mrb[14].mxu0  ;;  %v1599_v37 = vmax.f32 %v862_v52, 0.0  ;;  %v864_v24 = vpop.f32.mrb[3].mxu1 }
 0x264   : > { %v1693_v51 = vmax.f32 %v785_v55, 0.0  ;;  %v787_v56 = vpop.f32.mrb[15].mxu0  ;;  %v1600_v54 = vmax.f32 %v864_v24, 0.0 }
 0x265   : > { %v1694_v31 = vmax.f32 %v787_v56, 0.0  ;;  %v12395_v10 = vpack.c.bf16 %v1599_v37, %v1583_v45 }
 0x266   : > { %v12391_v15 = vpack.c.bf16 %v1693_v51, %v1677_v48  ;;  %v868_v57 = vpop.f32.mrb[4].mxu1  ;;  %v12393_v61 = vpack.c.bf16 %v1600_v54, %v1584_v49 }
 0x267   : > { %v969_v62 = vpop.f32.mrb[16].mxu0  ;;  %v12389_v63 = vpack.c.bf16 %v1694_v31, %v1678_v50  ;;  %v870_v0 = vpop.f32.mrb[5].mxu1  ;;  %v1615_v4 = vmax.f32 %v868_v57, 0.0 }
 0x268   : > { %v971_v2 = vpop.f32.mrb[17].mxu0  ;;  %12394 = vmatprep.subr.bf16.mxu1 %v12393_v61  ;;  %v1585_v7 = vmax.f32 %v969_v62, 0.0  ;;  %v1616_v8 = vmax.f32 %v870_v0, 0.0 }
 0x269   : > { %12390 = vmatprep.subr.bf16.mxu0 %v12389_v63  ;;  %12396 = vmatpush1.bf16.msra.mxu1 %v12395_v10  ;;  %v1586_v17 = vmax.f32 %v971_v2, 0.0 }
 0x26a   : > { %12392 = vmatpush1.bf16.msra.mxu0 %v12391_v15 }
 0x26c   : > { %v874_v13 = vpop.f32.mrb[6].mxu1 }
 0x26d   : > { %v975_v32 = vpop.f32.mrb[18].mxu0  ;;  %11900 = vmatmul.mubr.msk.f32.vlgmr.msra.gmra.mrb[64].mxu0 %vm1709_vm4, %v15627_v3  ;;  %v1631_v18 = vmax.f32 %v874_v13, 0.0  ;;  %v876_v19 = vpop.f32.mrb[7].mxu1 }
 0x26e   : > { %v1601_v20 = vmax.f32 %v975_v32, 0.0  ;;  %v977_v21 = vpop.f32.mrb[19].mxu0  ;;  %v1632_v22 = vmax.f32 %v876_v19, 0.0  ;;  %1786 = vmatprep.mubr.f32.mxu0 %v14704_v47 }
 0x26f   : > { %v1602_v25 = vmax.f32 %v977_v21, 0.0  ;;  %v12399_v26 = vpack.c.bf16 %v1631_v18, %v1615_v4 }
 0x270   : > { %v12411_v11 = vpack.c.bf16 %v1601_v20, %v1585_v7  ;;  %v12397_v29 = vpack.c.bf16 %v1632_v22, %v1616_v8 }
 0x271   : > { %v981_v28 = vpop.f32.mrb[20].mxu0  ;;  %v12409_v35 = vpack.c.bf16 %v1602_v25, %v1586_v17  ;;  %v880_v14 = vpop.f32.mrb[8].mxu1  ;;  %11901 = vmatmul.mubr.msk.f32.gmra.mrb[66].mxu0 %vm1709_vm4, %v15632_v23 }
 0x272   : > { %v983_v39 = vpop.f32.mrb[21].mxu0  ;;  %v882_v12 = vpop.f32.mrb[9].mxu1  ;;  %12398 = vmatprep.subr.bf16.mxu1 %v12397_v29  ;;  %1934 = vmatprep.mubr.f32.mxu0 %v14704_v47  ;;  %v1617_v40 = vmax.f32 %v981_v28, 0.0  ;;  %v1647_v41 = vmax.f32 %v880_v14, 0.0 }
 0x273   : > { %12410 = vmatprep.subr.bf16.mxu0 %v12409_v35  ;;  %12400 = vmatpush1.bf16.msra.mxu1 %v12399_v26  ;;  %v1618_v36 = vmax.f32 %v983_v39, 0.0  ;;  %v1648_v42 = vmax.f32 %v882_v12, 0.0  ;;  %v15637_v12 = vpop.permute.xlu1 %13788 }
 0x274   : > { %12412 = vmatpush1.bf16.msra.mxu0 %v12411_v11 }
 0x275   : > { %v987_v38 = vpop.f32.mrb[22].mxu0  ;;  %v886_v33 = vpop.f32.mrb[10].mxu1 }
 0x276   : > { %v1633_v53 = vmax.f32 %v987_v38, 0.0  ;;  %v989_v43 = vpop.f32.mrb[23].mxu0  ;;  %v1663_v27 = vmax.f32 %v886_v33, 0.0  ;;  %v888_v44 = vpop.f32.mrb[11].mxu1 }
 0x277   : > { %v1634_v1 = vmax.f32 %v989_v43, 0.0  ;;  %v1664_v45 = vmax.f32 %v888_v44, 0.0 }
 0x278   : > { %v12415_v48 = vpack.c.bf16 %v1633_v53, %v1617_v40  ;;  %v12403_v49 = vpack.c.bf16 %v1663_v27, %v1647_v41 }
 0x279   : > { %v993_v52 = vpop.f32.mrb[24].mxu0  ;;  %v12413_v50 = vpack.c.bf16 %v1634_v1, %v1618_v36  ;;  %v892_v55 = vpop.f32.mrb[12].mxu1  ;;  %v12401_v37 = vpack.c.bf16 %v1664_v45, %v1648_v42 }
 0x27a   : > { %v995_v24 = vpop.f32.mrb[25].mxu0  ;;  %v894_v51 = vpop.f32.mrb[13].mxu1  ;;  %v1649_v56 = vmax.f32 %v993_v52, 0.0  ;;  %v1679_v54 = vmax.f32 %v892_v55, 0.0 }
 0x27b   : > { %12414 = vmatprep.subr.bf16.mxu0 %v12413_v50  ;;  %12402 = vmatprep.subr.bf16.mxu1 %v12401_v37  ;;  %v1650_v31 = vmax.f32 %v995_v24, 0.0  ;;  %v1680_v15 = vmax.f32 %v894_v51, 0.0 }
 0x27c   : > { %12416 = vmatpush1.bf16.msra.mxu0 %v12415_v48  ;;  %12404 = vmatpush1.bf16.msra.mxu1 %v12403_v49 }
 0x27d   : > { %v999_v10 = vpop.f32.mrb[26].mxu0  ;;  %v898_v57 = vpop.f32.mrb[14].mxu1 }
 0x27e   : > { %v1665_v61 = vmax.f32 %v999_v10, 0.0  ;;  %v1001_v62 = vpop.f32.mrb[27].mxu0  ;;  %v1695_v63 = vmax.f32 %v898_v57, 0.0  ;;  %v900_v0 = vpop.f32.mrb[15].mxu1 }
 0x27f   : > { %v1666_v2 = vmax.f32 %v1001_v62, 0.0  ;;  %v1696_v4 = vmax.f32 %v900_v0, 0.0  ;;  %v13786_v0 = vunpack.i.h.bf16 %v15584_v34 }
 0x280   : > { %v12419_v7 = vpack.c.bf16 %v1665_v61, %v1649_v56  ;;  %v12407_v8 = vpack.c.bf16 %v1695_v63, %v1679_v54 }
 0x281   : > { %v1005_v13 = vpop.f32.mrb[28].mxu0  ;;  %v12417_v17 = vpack.c.bf16 %v1666_v2, %v1650_v31  ;;  %v1082_v32 = vpop.f32.mrb[16].mxu1  ;;  %v12405_v18 = vpack.c.bf16 %v1696_v4, %v1680_v15 }
 0x282   : > { %v1007_v19 = vpop.f32.mrb[29].mxu0  ;;  %v1084_v20 = vpop.f32.mrb[17].mxu1  ;;  %v1681_v21 = vmax.f32 %v1005_v13, 0.0  ;;  %v1587_v22 = vmax.f32 %v1082_v32, 0.0 }
 0x283   : > { %12418 = vmatprep.subr.bf16.mxu0 %v12417_v17  ;;  %12406 = vmatprep.subr.bf16.mxu1 %v12405_v18  ;;  %v1682_v25 = vmax.f32 %v1007_v19, 0.0  ;;  %v1588_v11 = vmax.f32 %v1084_v20, 0.0  ;;  %v2440_v20 = vsel %vm322_vm1, %v13785_v60, %v13786_v0 }
 0x284   : > { %12420 = vmatpush1.bf16.msra.mxu0 %v12419_v7  ;;  %12408 = vmatpush1.bf16.msra.mxu1 %v12407_v8 }
 0x285   : > { %v1011_v26 = vpop.f32.mrb[30].mxu0  ;;  %v1088_v29 = vpop.f32.mrb[18].mxu1 }
 0x286   : > { %v1697_v28 = vmax.f32 %v1011_v26, 0.0  ;;  %v1013_v35 = vpop.f32.mrb[31].mxu0  ;;  %v1603_v14 = vmax.f32 %v1088_v29, 0.0  ;;  %v1090_v39 = vpop.f32.mrb[19].mxu1 }
 0x287   : > { %v1698_v40 = vmax.f32 %v1013_v35, 0.0  ;;  %v1604_v41 = vmax.f32 %v1090_v39, 0.0  ;;  %11902 = vmatmul.mubr.msk.f32.vlgmr.msra.gmra.mrb[64].mxu1 %vm1709_vm4, %v15627_v3 }
 0x288   : > { %v12423_v36 = vpack.c.bf16 %v1697_v28, %v1681_v21  ;;  %v12427_v38 = vpack.c.bf16 %v1603_v14, %v1587_v22  ;;  %1863 = vmatprep.mubr.f32.mxu1 %v14704_v47 }
 0x289   : > { %v12421_v42 = vpack.c.bf16 %v1698_v40, %v1682_v25  ;;  %v1094_v33 = vpop.f32.mrb[20].mxu1  ;;  %v12425_v53 = vpack.c.bf16 %v1604_v41, %v1588_v11 }
 0x28a   : > { %v1096_v43 = vpop.f32.mrb[21].mxu1  ;;  %v1619_v27 = vmax.f32 %v1094_v33, 0.0 }
 0x28b   : > { %12422 = vmatprep.subr.bf16.mxu0 %v12421_v42  ;;  %12426 = vmatprep.subr.bf16.mxu1 %v12425_v53  ;;  %v15642_v44 = vpop.permute.xlu1 %13798  ;;  %v1620_v1 = vmax.f32 %v1096_v43, 0.0  ;;  %v15680_v42 = vld [vmem:[%s14907_s26 + $0x110] sm:$0xff] }
 0x28c   : > { %12424 = vmatpush1.bf16.msra.mxu0 %v12423_v36  ;;  %12428 = vmatpush1.bf16.msra.mxu1 %v12427_v38 }
 0x28d   : > { %v1100_v45 = vpop.f32.mrb[22].mxu1  ;;  %11903 = vmatmul.mubr.msk.f32.gmra.mrb[66].mxu1 %vm1709_vm4, %v15632_v23 }
 0x28e   : > { %v1635_v48 = vmax.f32 %v1100_v45, 0.0  ;;  %v1102_v49 = vpop.f32.mrb[23].mxu1  ;;  %2011 = vmatprep.mubr.f32.mxu1 %v14704_v47 }
 0x28f   : > { %11904 = vmatmul.mubr.msk.f32.vlgmr.msra.gmra.mrb[68].mxu0 %vm1709_vm4, %v15627_v3  ;;  %v1636_v52 = vmax.f32 %v1102_v49, 0.0 }
 0x290   : > { %v12431_v50 = vpack.c.bf16 %v1635_v48, %v1619_v27  ;;  %1940 = vmatprep.mubr.f32.mxu0 %v14704_v47  ;;  %v2383_v48 = vld [vmem:[%s14907_s26 + $0x118] sm:$0xff] }
 0x291   : > { %v15650_v55 = vpop.permute.xlu0 %13793  ;;  %v1106_v37 = vpop.f32.mrb[24].mxu1  ;;  %v12429_v24 = vpack.c.bf16 %v1636_v52, %v1620_v1 }
 0x292   : > { %v1108_v51 = vpop.f32.mrb[25].mxu1  ;;  %v1651_v54 = vmax.f32 %v1106_v37, 0.0 }
 0x293   : > { %v15652_v56 = vpop.permute.xlu1 %13808  ;;  %12430 = vmatprep.subr.bf16.mxu1 %v12429_v24  ;;  %11905 = vmatmul.mubr.msk.f32.gmra.mrb[70].mxu0 %vm1709_vm4, %v15632_v23  ;;  %v1652_v10 = vmax.f32 %v1108_v51, 0.0 }
 0x294   : > { %12432 = vmatpush1.bf16.msra.mxu1 %v12431_v50  ;;  %2088 = vmatprep.mubr.f32.mxu0 %v14704_v47  ;;  %v13882_v50 = vpack.i.bf16 %v15575_v59, %v15554_v46 }
 0x295   : > { %v15657_v31 = vpop.permute.xlu0 %13803  ;;  %v1112_v15 = vpop.f32.mrb[26].mxu1 }
 0x296   : > { %v1667_v57 = vmax.f32 %v1112_v15, 0.0  ;;  %v1114_v61 = vpop.f32.mrb[27].mxu1 }
 0x297   : > { %v2467_v62 = vpop.permute.xlu1 %2466  ;;  %v1668_v63 = vmax.f32 %v1114_v61, 0.0 }
 0x298   : > { %v2490_v2 = vsel %vm373_vm0, %v15615_v9, %v2467_v62  ;;  %v12435_v4 = vpack.c.bf16 %v1667_v57, %v1651_v54 }
 0x299   : > { %v13814_v7 = vpop.permute.xlu0 %13813  ;;  %2599 = vrot.lane.b32.xlu0 %v2490_v2, %s14703_s12  ;;  %v1118_v8 = vpop.f32.mrb[28].mxu1  ;;  %v12433_v13 = vpack.c.bf16 %v1668_v63, %v1652_v10 }
 0x29a   : > { %v13816_v17 = vunpack.i.h.bf16 %v13814_v7  ;;  %v13815_v32 = vunpack.i.l.bf16 %v13814_v7  ;;  %v1120_v18 = vpop.f32.mrb[29].mxu1  ;;  %v1683_v22 = vmax.f32 %v1118_v8, 0.0 }
 0x29b   : > { %v15663_v19 = vpop.permute.xlu1 %2587  ;;  %12434 = vmatprep.subr.bf16.mxu1 %v12433_v13  ;;  %v1684_v26 = vmax.f32 %v1120_v18, 0.0 }
 0x29c   : > { %v2441_v21 = vsel %vm322_vm1, %v13786_v0, %v13815_v32  ;;  %12436 = vmatpush1.bf16.msra.mxu1 %v12435_v4  ;;  %v2442_v29 = vsel %vm322_vm1, %v13815_v32, %v13816_v17 }
 0x29d   : > { %v15669_v9 = vpop.permute.xlu0 %13818  ;;  %v13867_v25 = vpack.i.bf16 %v2441_v21, %v2440_v20  ;;  %v1124_v11 = vpop.f32.mrb[30].mxu1  ;;  %v13872_v40 = vpack.i.bf16 %v2442_v29, %v15501_v30 }
 0x29e   : > { %v1699_v28 = vmax.f32 %v1124_v11, 0.0  ;;  %v1126_v35 = vpop.f32.mrb[31].mxu1 }
 0x29f   : > { %13868 = vrot.lane.b32.xlu1 %v13867_v25, %s14703_s12  ;;  %v15673_v14 = vpop.permute.xlu1 %13823  ;;  %v1700_v34 = vmax.f32 %v1126_v35, 0.0 }
 0x2a0   : > { %v12439_v60 = vpack.c.bf16 %v1699_v28, %v1683_v22 }
 0x2a1   : > { %v2469_v39 = vpop.permute.xlu0 %2468  ;;  %v12437_v41 = vpack.c.bf16 %v1700_v34, %v1684_v26 }
 0x2a2   : > { %v2491_v36 = vsel %vm373_vm0, %v2467_v62, %v2469_v39 }
 0x2a3   : > { %13873 = vrot.lane.b32.xlu1 %v13872_v40, %s14703_s12  ;;  %2601 = vrot.lane.b32.xlu0 %v2491_v36, %s14703_s12  ;;  %v2471_v38 = vpop.permute.xlu1 %2470 }
 0x2a4   : > { %v2492_v33 = vsel %vm373_vm0, %v2469_v39, %v2471_v38  ;;  %12438 = vmatprep.subr.bf16.mxu1 %v12437_v41 }
 0x2a5   : > { %v15683_v53 = vpop.permute.xlu0 %13828  ;;  %12440 = vmatpush1.bf16.msra.mxu1 %v12439_v60 }
 0x2a7   : > { %2502 = vrot.lane.b32.xlu1 %v15680_v42, %s14701_s22  ;;  %2603 = vrot.lane.b32.xlu0 %v2492_v33, %s14703_s12  ;;  %v15688_v30 = vpop.permute.xlu1 %2589 }
 0x2a8   : > { %11906 = vmatmul.mubr.msk.f32.vlgmr.msra.gmra.mrb[68].mxu1 %vm1709_vm4, %v15627_v3 }
 0x2a9   : > { %v2425_v43 = vpop.permute.xlu0 %2424  ;;  %2017 = vmatprep.mubr.f32.mxu1 %v14704_v47 }
 0x2aa   : > { %v2443_v27 = vsel %vm322_vm1, %v13816_v17, %v2425_v43 }
 0x2ab   : > { %v13877_v1 = vpack.i.bf16 %v2443_v27, %v15504_v16  ;;  %2505 = vrot.lane.b32.xlu1 %v15680_v42, %s14702_s24  ;;  %v2473_v45 = vpop.permute.xlu1 %2472 }
 0x2ac   : > { %11907 = vmatmul.mubr.msk.f32.gmra.mrb[70].mxu1 %vm1709_vm4, %v15632_v23  ;;  %v2493_v52 = vsel %vm373_vm0, %v2471_v38, %v2473_v45 }
 0x2ad   : > { %v15700_v49 = vpop.permute.xlu0 %2635  ;;  %13878 = vrot.lane.b32.xlu0 %v13877_v1, %s14703_s12  ;;  %2165 = vmatprep.mubr.f32.mxu1 %v14704_v47 }
 0x2af   : > { %2509 = vrot.lane.b32.xlu1 %v2383_v48, %s14701_s22  ;;  %v15708_v16 = vpop.permute.xlu1 %13838 }
 0x2b1   : > { %v15710_v37 = vpop.permute.xlu0 %13833  ;;  %2605 = vrot.lane.b32.xlu0 %v2493_v52, %s14703_s12 }
 0x2b3   : > { %13883 = vrot.lane.b32.xlu1 %v13882_v50, %s14703_s12  ;;  %v15714_v24 = vpop.permute.xlu1 %13843 }
 0x2b5   : > { %v15716_v51 = vpop.permute.xlu0 %2591 }
 0x2b7   : > { %v13849_v54 = vpop.permute.xlu1 %13848 }
 0x2b8   : > { %v13851_v10 = vunpack.i.h.bf16 %v13849_v54  ;;  %v13850_v15 = vunpack.i.l.bf16 %v13849_v54 }
 0x2b9   : > { %v15718_v57 = vpop.permute.xlu0 %2593 }
 0x2ba   : > { %v2444_v46 = vsel %vm322_vm1, %v2425_v43, %v13850_v15  ;;  %v2445_v59 = vsel %vm322_vm1, %v13850_v15, %v13851_v10 }
 0x2bb   : > { %v13887_v61 = vpack.i.bf16 %v2445_v59, %v2444_v46  ;;  %v15722_v62 = vpop.permute.xlu1 %2595 }
 0x2bd   : > { %v2475_v63 = vpop.permute.xlu0 %2474  ;;  %13888 = vrot.lane.b32.xlu0 %v13887_v61, %s14703_s12 }
 0x2be   : > { %v2494_v0 = vsel %vm373_vm0, %v2473_v45, %v2475_v63 }
 0x2bf   : > { %2607 = vrot.lane.b32.xlu1 %v2494_v0, %s14703_s12  ;;  %v15727_v2 = vpop.permute.xlu1 %13853 }
 0x2c1   : > { %v1195_v4 = vpop.f32.mrb[32].mxu0  ;;  %v2477_v7 = vpop.permute.xlu0 %2476  ;;  %2543 = vrot.lane.b32.xlu0 %v15580_v58, %s14703_s12 }
 0x2c2   : > { %v1197_v8 = vpop.f32.mrb[33].mxu0  ;;  %v2495_v13 = vsel %vm373_vm0, %v2475_v63, %v2477_v7  ;;  %v1589_v32 = vmax.f32 %v1195_v4, 0.0 }
 0x2c3   : > { %2609 = vrot.lane.b32.xlu1 %v2495_v13, %s14703_s12  ;;  %v2479_v17 = vpop.permute.xlu1 %2478  ;;  %v1590_v20 = vmax.f32 %v1197_v8, 0.0 }
 0x2c4   : > { %v2496_v18 = vsel %vm373_vm0, %v2477_v7, %v2479_v17 }
 0x2c5   : > { %v1201_v21 = vpop.f32.mrb[34].mxu0  ;;  %v13859_v22 = vpop.permute.xlu0 %13858 }
 0x2c6   : > { %v1605_v25 = vmax.f32 %v1201_v21, 0.0  ;;  %v1203_v26 = vpop.f32.mrb[35].mxu0  ;;  %v15734_v11 = vunpack.i.h.bf16 %v13859_v22  ;;  %v13860_v29 = vunpack.i.l.bf16 %v13859_v22 }
 0x2c7   : > { %v1606_v28 = vmax.f32 %v1203_v26, 0.0  ;;  %2611 = vrot.lane.b32.xlu1 %v2496_v18, %s14703_s12  ;;  %v15737_v58 = vpop.permute.xlu1 %2480 }
 0x2c8   : > { %v12443_v35 = vpack.c.bf16 %v1605_v25, %v1589_v32  ;;  %v2500_v34 = vsel %vm322_vm1, %v13860_v29, %v15734_v11  ;;  %v2446_v60 = vsel %vm322_vm1, %v13851_v10, %v13860_v29  ;;  %v2497_v39 = vsel %vm373_vm0, %v2479_v17, %v15737_v58 }
 0x2c9   : > { %v1207_v40 = vpop.f32.mrb[36].mxu0  ;;  %v12441_v41 = vpack.c.bf16 %v1606_v28, %v1590_v20  ;;  %2577 = vrot.lane.b32.xlu0 %v2446_v60, %s14703_s12  ;;  %v13892_v36 = vpack.i.bf16 %v2500_v34, %v15605_v5  ;;  %v13897_v33 = vpack.i.bf16 %v15734_v11, %v15608_v6 }
 0x2ca   : > { %v1209_v38 = vpop.f32.mrb[37].mxu0  ;;  %v1621_v43 = vmax.f32 %v1207_v40, 0.0 }
 0x2cb   : > { %12442 = vmatprep.subr.bf16.mxu0 %v12441_v41  ;;  %2613 = vrot.lane.b32.xlu1 %v2497_v39, %s14703_s12  ;;  %v1622_v27 = vmax.f32 %v1209_v38, 0.0 }
 0x2cc   : > { %12444 = vmatpush1.bf16.msra.mxu0 %v12443_v35 }
 0x2cd   : > { %v1213_v1 = vpop.f32.mrb[38].mxu0  ;;  %13893 = vrot.lane.b32.xlu0 %v13892_v36, %s14703_s12 }
 0x2ce   : > { %v1637_v45 = vmax.f32 %v1213_v1, 0.0  ;;  %v1215_v48 = vpop.f32.mrb[39].mxu0 }
 0x2cf   : > { %v1638_v52 = vmax.f32 %v1215_v48, 0.0  ;;  %13898 = vrot.lane.b32.xlu1 %v13897_v33, %s14703_s12 }
 0x2d0   : > { %v12447_v50 = vpack.c.bf16 %v1637_v45, %v1621_v43 }
 0x2d1   : > { %v1219_v5 = vpop.f32.mrb[40].mxu0  ;;  %v12445_v54 = vpack.c.bf16 %v1638_v52, %v1622_v27  ;;  %2579 = vrot.lane.b32.xlu0 %v13860_v29, %s14703_s12 }
 0x2d2   : > { %v1221_v10 = vpop.f32.mrb[41].mxu0  ;;  %v1653_v15 = vmax.f32 %v1219_v5, 0.0 }
 0x2d3   : > { %12446 = vmatprep.subr.bf16.mxu0 %v12445_v54  ;;  %v1654_v6 = vmax.f32 %v1221_v10, 0.0 }
 0x2d4   : > { %12448 = vmatpush1.bf16.msra.mxu0 %v12447_v50 }
 0x2d5   : > { %v1225_v46 = vpop.f32.mrb[42].mxu0  ;;  %v1308_v59 = vpop.f32.mrb[32].mxu1 }
 0x2d6   : > { %v1669_v61 = vmax.f32 %v1225_v46, 0.0  ;;  %v1227_v63 = vpop.f32.mrb[43].mxu0  ;;  %v1310_v0 = vpop.f32.mrb[33].mxu1  ;;  %v1591_v8 = vmax.f32 %v1308_v59, 0.0 }
 0x2d7   : > { %v1670_v4 = vmax.f32 %v1227_v63, 0.0  ;;  %v1592_v32 = vmax.f32 %v1310_v0, 0.0 }
 0x2d8   : > { %v12451_v7 = vpack.c.bf16 %v1669_v61, %v1653_v15 }
 0x2d9   : > { %v1231_v13 = vpop.f32.mrb[44].mxu0  ;;  %v12449_v17 = vpack.c.bf16 %v1670_v4, %v1654_v6  ;;  %v1314_v18 = vpop.f32.mrb[34].mxu1 }
 0x2da   : > { %v1233_v20 = vpop.f32.mrb[45].mxu0  ;;  %v1607_v21 = vmax.f32 %v1314_v18, 0.0  ;;  %v1316_v22 = vpop.f32.mrb[35].mxu1  ;;  %v1685_v26 = vmax.f32 %v1231_v13, 0.0 }
 0x2db   : > { %12450 = vmatprep.subr.bf16.mxu0 %v12449_v17  ;;  %v1608_v25 = vmax.f32 %v1316_v22, 0.0  ;;  %v1686_v28 = vmax.f32 %v1233_v20, 0.0 }
 0x2dc   : > { %12452 = vmatpush1.bf16.msra.mxu0 %v12451_v7  ;;  %v12459_v29 = vpack.c.bf16 %v1607_v21, %v1591_v8 }
 0x2dd   : > { %v1237_v35 = vpop.f32.mrb[46].mxu0  ;;  %v1320_v34 = vpop.f32.mrb[36].mxu1  ;;  %v12457_v60 = vpack.c.bf16 %v1608_v25, %v1592_v32 }
 0x2de   : > { %v1701_v39 = vmax.f32 %v1237_v35, 0.0  ;;  %v1239_v40 = vpop.f32.mrb[47].mxu0  ;;  %v1322_v41 = vpop.f32.mrb[37].mxu1  ;;  %v1623_v33 = vmax.f32 %v1320_v34, 0.0 }
 0x2df   : > { %v1702_v36 = vmax.f32 %v1239_v40, 0.0  ;;  %12458 = vmatprep.subr.bf16.mxu1 %v12457_v60  ;;  %v1624_v27 = vmax.f32 %v1322_v41, 0.0 }
 0x2e0   : > { %v12455_v38 = vpack.c.bf16 %v1701_v39, %v1685_v26  ;;  %12460 = vmatpush1.bf16.msra.mxu1 %v12459_v29 }
 0x2e1   : > { %v12453_v43 = vpack.c.bf16 %v1702_v36, %v1686_v28  ;;  %v1326_v1 = vpop.f32.mrb[38].mxu1 }
 0x2e2   : > { %v1421_v45 = vpop.f32.mrb[48].mxu0  ;;  %v1639_v48 = vmax.f32 %v1326_v1, 0.0  ;;  %v1328_v52 = vpop.f32.mrb[39].mxu1 }
 0x2e3   : > { %v1423_v50 = vpop.f32.mrb[49].mxu0  ;;  %12454 = vmatprep.subr.bf16.mxu0 %v12453_v43  ;;  %v1640_v5 = vmax.f32 %v1328_v52, 0.0  ;;  %v1593_v10 = vmax.f32 %v1421_v45, 0.0 }
 0x2e4   : > { %12456 = vmatpush1.bf16.msra.mxu0 %v12455_v38  ;;  %v12463_v54 = vpack.c.bf16 %v1639_v48, %v1623_v33  ;;  %v1594_v46 = vmax.f32 %v1423_v50, 0.0 }
 0x2e5   : > { %v1332_v15 = vpop.f32.mrb[40].mxu1  ;;  %v12461_v6 = vpack.c.bf16 %v1640_v5, %v1624_v27 }
 0x2e6   : > { %v1427_v59 = vpop.f32.mrb[50].mxu0  ;;  %v1334_v61 = vpop.f32.mrb[41].mxu1  ;;  %v1655_v7 = vmax.f32 %v1332_v15, 0.0 }
 0x2e7   : > { %v1609_v63 = vmax.f32 %v1427_v59, 0.0  ;;  %v1429_v0 = vpop.f32.mrb[51].mxu0  ;;  %11908 = vmatmul.mubr.msk.f32.vlgmr.msra.gmra.mrb[72].mxu0 %vm1709_vm4, %v15627_v3  ;;  %12462 = vmatprep.subr.bf16.mxu1 %v12461_v6  ;;  %v1656_v13 = vmax.f32 %v1334_v61, 0.0 }
 0x2e8   : > { %v1610_v4 = vmax.f32 %v1429_v0, 0.0  ;;  %12464 = vmatpush1.bf16.msra.mxu1 %v12463_v54  ;;  %2094 = vmatprep.mubr.f32.mxu0 %v14704_v47 }
 0x2e9   : > { %v12475_v8 = vpack.c.bf16 %v1609_v63, %v1593_v10  ;;  %v1338_v17 = vpop.f32.mrb[42].mxu1 }
 0x2ea   : > { %v1433_v32 = vpop.f32.mrb[52].mxu0  ;;  %v12473_v18 = vpack.c.bf16 %v1610_v4, %v1594_v46  ;;  %v1671_v20 = vmax.f32 %v1338_v17, 0.0  ;;  %v1340_v21 = vpop.f32.mrb[43].mxu1 }
 0x2eb   : > { %v1435_v22 = vpop.f32.mrb[53].mxu0  ;;  %v1672_v25 = vmax.f32 %v1340_v21, 0.0  ;;  %11909 = vmatmul.mubr.msk.f32.gmra.mrb[74].mxu0 %vm1709_vm4, %v15632_v23  ;;  %v1625_v29 = vmax.f32 %v1433_v32, 0.0 }
 0x2ec   : > { %12474 = vmatprep.subr.bf16.mxu0 %v12473_v18  ;;  %v12467_v26 = vpack.c.bf16 %v1671_v20, %v1655_v7  ;;  %2242 = vmatprep.mubr.f32.mxu0 %v14704_v47  ;;  %v1626_v34 = vmax.f32 %v1435_v22, 0.0  ;;  %v13791_v22 = vunpack.i.h.bf16 %v15637_v12 }
 0x2ed   : > { %12476 = vmatpush1.bf16.msra.mxu0 %v12475_v8  ;;  %v1344_v28 = vpop.f32.mrb[44].mxu1  ;;  %v12465_v35 = vpack.c.bf16 %v1672_v25, %v1656_v13  ;;  %v13790_v25 = vunpack.i.l.bf16 %v15637_v12 }
 0x2ee   : > { %v1439_v60 = vpop.f32.mrb[54].mxu0  ;;  %v1346_v39 = vpop.f32.mrb[45].mxu1  ;;  %v1687_v38 = vmax.f32 %v1344_v28, 0.0  ;;  %v15763_v28 = vunpack.i.h.bf16 %v15650_v55 }
 0x2ef   : > { %v1641_v40 = vmax.f32 %v1439_v60, 0.0  ;;  %v1441_v41 = vpop.f32.mrb[55].mxu0  ;;  %12466 = vmatprep.subr.bf16.mxu1 %v12465_v35  ;;  %v1688_v43 = vmax.f32 %v1346_v39, 0.0  ;;  %v13795_v35 = vunpack.i.l.bf16 %v15650_v55  ;;  %v13810_v55 = vunpack.i.l.bf16 %v15652_v56 }
 0x2f0   : > { %v1642_v36 = vmax.f32 %v1441_v41, 0.0  ;;  %12468 = vmatpush1.bf16.msra.mxu1 %v12467_v26 }
 0x2f1   : > { %v12479_v33 = vpack.c.bf16 %v1641_v40, %v1625_v29  ;;  %v1350_v27 = vpop.f32.mrb[46].mxu1 }
 0x2f2   : > { %v1445_v1 = vpop.f32.mrb[56].mxu0  ;;  %v12477_v45 = vpack.c.bf16 %v1642_v36, %v1626_v34  ;;  %v1703_v48 = vmax.f32 %v1350_v27, 0.0  ;;  %v1352_v52 = vpop.f32.mrb[47].mxu1 }
 0x2f3   : > { %v1447_v50 = vpop.f32.mrb[57].mxu0  ;;  %v1704_v5 = vmax.f32 %v1352_v52, 0.0  ;;  %v1657_v10 = vmax.f32 %v1445_v1, 0.0  ;;  %v2640_v1 = vsel %vm531_vm2, %v13790_v25, %v13791_v22 }
 0x2f4   : > { %12478 = vmatprep.subr.bf16.mxu0 %v12477_v45  ;;  %v12471_v54 = vpack.c.bf16 %v1703_v48, %v1687_v38  ;;  %v1658_v46 = vmax.f32 %v1447_v50, 0.0  ;;  %v13801_v38 = vunpack.i.h.bf16 %v15642_v44  ;;  %v2656_v48 = vsel %vm531_vm2, %v13795_v35, %v15763_v28 }
 0x2f5   : > { %12480 = vmatpush1.bf16.msra.mxu0 %v12479_v33  ;;  %v1534_v15 = vpop.f32.mrb[48].mxu1  ;;  %v12469_v6 = vpack.c.bf16 %v1704_v5, %v1688_v43  ;;  %v13800_v33 = vunpack.i.l.bf16 %v15642_v44  ;;  %v13806_v44 = vunpack.i.h.bf16 %v15657_v31  ;;  %v13805_v50 = vunpack.i.l.bf16 %v15657_v31 }
 0x2f6   : > { %v1451_v59 = vpop.f32.mrb[58].mxu0  ;;  %v1536_v61 = vpop.f32.mrb[49].mxu1  ;;  %v1595_v7 = vmax.f32 %v1534_v15, 0.0 }
 0x2f7   : > { %v1673_v63 = vmax.f32 %v1451_v59, 0.0  ;;  %v1453_v0 = vpop.f32.mrb[59].mxu0  ;;  %12470 = vmatprep.subr.bf16.mxu1 %v12469_v6  ;;  %v1596_v13 = vmax.f32 %v1536_v61, 0.0  ;;  %v2639_v59 = vsel %vm531_vm2, %v13800_v33, %v13790_v25  ;;  %v15783_v31 = vsel %vm531_vm2, %v13791_v22, %v13805_v50 }
 0x2f8   : > { %v1674_v4 = vmax.f32 %v1453_v0, 0.0  ;;  %12472 = vmatpush1.bf16.msra.mxu1 %v12471_v54  ;;  %v13811_v0 = vunpack.i.h.bf16 %v15652_v56  ;;  %v13830_v22 = vunpack.i.l.bf16 %v15683_v53  ;;  %v13831_v33 = vunpack.i.h.bf16 %v15683_v53 }
 0x2f9   : > { %v12483_v8 = vpack.c.bf16 %v1673_v63, %v1657_v10  ;;  %v1540_v17 = vpop.f32.mrb[50].mxu1  ;;  %v2655_v63 = vsel %vm531_vm2, %v13801_v38, %v13795_v35 }
 0x2fa   : > { %v1457_v32 = vpop.f32.mrb[60].mxu0  ;;  %v12481_v18 = vpack.c.bf16 %v1674_v4, %v1658_v46  ;;  %v1611_v20 = vmax.f32 %v1540_v17, 0.0  ;;  %v1542_v21 = vpop.f32.mrb[51].mxu1  ;;  %v12505_v4 = vpack.c.bf16 %v2656_v48, %v2640_v1  ;;  %v2671_v56 = vsel %vm531_vm2, %v13811_v0, %v13806_v44 }
 0x2fb   : > { %v1459_v26 = vpop.f32.mrb[61].mxu0  ;;  %v1612_v29 = vmax.f32 %v1542_v21, 0.0  ;;  %11910 = vmatmul.mubr.msk.f32.vlgmr.msra.gmra.mrb[72].mxu1 %vm1709_vm4, %v15627_v3  ;;  %v1689_v60 = vmax.f32 %v1457_v32, 0.0  ;;  %v13825_v21 = vunpack.i.l.bf16 %v15673_v14 }
 0x2fc   : > { %12482 = vmatprep.subr.bf16.mxu0 %v12481_v18  ;;  %v12491_v34 = vpack.c.bf16 %v1611_v20, %v1595_v7  ;;  %2171 = vmatprep.mubr.f32.mxu1 %v14704_v47  ;;  %v1690_v41 = vmax.f32 %v1459_v26, 0.0  ;;  %v12507_v20 = vpack.c.bf16 %v2655_v63, %v2639_v59  ;;  %v13836_v59 = vunpack.i.h.bf16 %v15710_v37 }
 0x2fd   : > { %12484 = vmatpush1.bf16.msra.mxu0 %v12483_v8  ;;  %v1546_v39 = vpop.f32.mrb[52].mxu1  ;;  %v12489_v40 = vpack.c.bf16 %v1612_v29, %v1596_v13  ;;  %v13820_v8 = vunpack.i.l.bf16 %v15669_v9  ;;  %v2672_v13 = vsel %vm531_vm2, %v13806_v44, %v13810_v55  ;;  %v2691_v38 = vsel %vm531_vm2, %v13825_v21, %v13810_v55 }
 0x2fe   : > { %v1463_v12 = vpop.f32.mrb[62].mxu0  ;;  %v1548_v36 = vpop.f32.mrb[53].mxu1  ;;  %v1627_v52 = vmax.f32 %v1546_v39, 0.0  ;;  %v12509_v25 = vpack.c.bf16 %v15783_v31, %v2672_v13  ;;  %v15836_v13 = vsel %vm531_vm2, %v15663_v19, %v15688_v30 }
 0x2ff   : > { %v1705_v43 = vmax.f32 %v1463_v12, 0.0  ;;  %v1465_v27 = vpop.f32.mrb[63].mxu0  ;;  %12490 = vmatprep.subr.bf16.mxu1 %v12489_v40  ;;  %11911 = vmatmul.mubr.msk.f32.gmra.mrb[74].mxu1 %vm1709_vm4, %v15632_v23  ;;  %v1628_v54 = vmax.f32 %v1548_v36, 0.0  ;;  %v13826_v40 = vunpack.i.h.bf16 %v15673_v14  ;;  %v15801_v12 = vsel %vm531_vm2, %v13810_v55, %v15663_v19 }
 0x300   : > { %v1706_v45 = vmax.f32 %v1465_v27, 0.0  ;;  %12492 = vmatpush1.bf16.msra.mxu1 %v12491_v34  ;;  %2319 = vmatprep.mubr.f32.mxu1 %v14704_v47  ;;  %v15794_v34 = vsel %vm531_vm2, %v15763_v28, %v13820_v8  ;;  %v15812_v14 = vsel %vm531_vm2, %v13820_v8, %v13830_v22 }
 0x301   : > { %v12487_v5 = vpack.c.bf16 %v1705_v43, %v1689_v60  ;;  %v1552_v10 = vpop.f32.mrb[54].mxu1  ;;  %v13821_v60 = vunpack.i.h.bf16 %v15669_v9  ;;  %v12513_v27 = vpack.c.bf16 %v15801_v12, %v15794_v34 }
 0x302   : > { %v12485_v15 = vpack.c.bf16 %v1706_v45, %v1690_v41  ;;  %v1643_v6 = vmax.f32 %v1552_v10, 0.0  ;;  %v1554_v46 = vpop.f32.mrb[55].mxu1  ;;  %v12511_v41 = vpack.c.bf16 %v2640_v1, %v2671_v56  ;;  %v2697_v56 = vsel %vm531_vm2, %v15700_v49, %v15663_v19 }
 0x303   : > { %v1644_v61 = vmax.f32 %v1554_v46, 0.0  ;;  %v2688_v55 = vsel %vm531_vm2, %v13821_v60, %v15763_v28  ;;  %v13841_v28 = vunpack.i.h.bf16 %v15708_v16  ;;  %v15866_v60 = vld [vmem:[#allocation7] sm:$0xff]  ;;  %v15878_v49 = vsel %vm531_vm2, %v15718_v57, %v15722_v62 }
 0x304   : > { %12486 = vmatprep.subr.bf16.mxu0 %v12485_v15  ;;  %v12495_v7 = vpack.c.bf16 %v1643_v6, %v1627_v52  ;;  %v12515_v48 = vpack.c.bf16 %v2691_v38, %v2688_v55  ;;  %v15818_v52 = vsel %vm531_vm2, %v13805_v50, %v13826_v40  ;;  %v13835_v6 = vunpack.i.l.bf16 %v15710_v37  ;;  %v15896_v38 = vpop.permute.xlu0 %2597 }
 0x305   : > { %12488 = vmatpush1.bf16.msra.mxu0 %v12487_v5  ;;  %v1558_v17 = vpop.f32.mrb[56].mxu1  ;;  %v12493_v32 = vpack.c.bf16 %v1644_v61, %v1628_v54  ;;  %v12517_v5 = vpack.c.bf16 %v15812_v14, %v15818_v52  ;;  %v13845_v61 = vunpack.i.l.bf16 %v15714_v24 }
 0x306   : > { %12506 = vmatprep.subr.bf16.mxu0 %v12505_v4  ;;  %v1560_v18 = vpop.f32.mrb[57].mxu1  ;;  %v1659_v26 = vmax.f32 %v1558_v17, 0.0  ;;  %v13840_v4 = vunpack.i.l.bf16 %v15708_v16  ;;  %v15847_v16 = vsel %vm531_vm2, %v15716_v51, %v15718_v57 }
 0x307   : > { %12494 = vmatprep.subr.bf16.mxu1 %v12493_v32  ;;  %v1660_v29 = vmax.f32 %v1560_v18, 0.0  ;;  %v2643_v32 = vsel %vm531_vm2, %v13826_v40, %v13835_v6  ;;  %v13846_v18 = vunpack.i.h.bf16 %v15714_v24  ;;  %v15851_v21 = vsel %vm531_vm2, %v13836_v59, %v13845_v61 }
 0x308   : > { %11912 = vmatmul.mubr.msk.f32.vlgmr.msra.gmra.mrb[76].mxu0 %vm1709_vm4, %v15627_v3  ;;  %12496 = vmatpush1.bf16.msra.mxu1 %v12495_v7  ;;  %v15841_v37 = vsel %vm531_vm2, %v13840_v4, %v13841_v28  ;;  %v12541_v53 = vpack.c.bf16 %v15851_v21, %v15847_v16  ;;  %v12525_v57 = vpack.c.bf16 %v2643_v32, %v15836_v13 }
 0x309   : > { %12508 = vmatpush1.bf16.msra.mxu0 %v12507_v20  ;;  %v1564_v35 = vpop.f32.mrb[58].mxu1  ;;  %2248 = vmatprep.mubr.f32.mxu0 %v14704_v47  ;;  %v2644_v20 = vsel %vm531_vm2, %v13835_v6, %v13836_v59 }
 0x30a   : > { %12510 = vmatprep.subr.bf16.mxu0 %v12509_v25  ;;  %v1675_v39 = vmax.f32 %v1564_v35, 0.0  ;;  %v1566_v3 = vpop.f32.mrb[59].mxu1  ;;  %v2659_v25 = vsel %vm531_vm2, %v13830_v22, %v13840_v4  ;;  %v15860_v24 = vpack.c.bf16 %v15841_v37, %v2644_v20  ;;  %v12523_v35 = vpack.c.bf16 %v15794_v34, %v15783_v31  ;;  %v14482_v4 = vld [vmem:[#allocation9 + $0x8] sm:$0xff] }
 0x30b   : > { %v1676_v36 = vmax.f32 %v1566_v3, 0.0  ;;  %v13855_v22 = vunpack.i.l.bf16 %v15727_v2  ;;  %v15888_v34 = vsel %vm531_vm2, %v15688_v30, %v15716_v51  ;;  %v12527_v30 = vpack.c.bf16 %v15818_v52, %v15801_v12  ;;  %v15933_v52 = vld [vmem:[%s14907_s26 + $0x118] sm:$0xff] }
 0x30c   : > { %v12499_v43 = vpack.c.bf16 %v1675_v39, %v1659_v26  ;;  %11913 = vmatmul.mubr.msk.f32.gmra.mrb[78].mxu0 %vm1709_vm4, %v15632_v23  ;;  %v2694_v23 = vsel %vm531_vm2, %v13831_v33, %v13820_v8  ;;  %v14478_v39 = vld [vmem:[#allocation9] sm:$0xff]  ;;  %v12543_v3 = vpack.c.bf16 %v2644_v20, %v15888_v34  ;;  %v15902_v33 = vld [vmem:[#allocation7 + $0x8] sm:$0xff] }
 0x30d   : > { %12512 = vmatpush1.bf16.msra.mxu0 %v12511_v41  ;;  %v1570_v9 = vpop.f32.mrb[60].mxu1  ;;  %v12497_v1 = vpack.c.bf16 %v1676_v36, %v1660_v29  ;;  %2823 = vmatprep.mubr.f32.mxu0 %v14704_v47  ;;  %v12519_v0 = vpack.c.bf16 %v2694_v23, %v15783_v31  ;;  %v15862_v29 = vpack.c.bf16 %v2659_v25, %v2643_v32  ;;  %v13856_v31 = vunpack.i.h.bf16 %v15727_v2  ;;  %v4440_v41 = vld [vmem:[%s14907_s26 + $0x108] sm:$0xff]  ;;  %v4441_v36 = vld [vmem:[%s14907_s26 + $0x110] sm:$0xff]  ;;  %v15936_v23 = vld [vmem:[%s14907_s26 + $0x120] sm:$0xff] }
 0x30e   : > { %12514 = vmatprep.subr.bf16.mxu0 %v12513_v27  ;;  %v1572_v45 = vpop.f32.mrb[61].mxu1  ;;  %v1691_v44 = vmax.f32 %v1570_v9, 0.0  ;;  %v15912_v12 = vsel %vm531_vm2, %v13845_v61, %v13855_v22  ;;  %v15921_v9 = vpack.i.bf16 %v4441_v36, %v4440_v41  ;;  %v15962_v61 = vsel %vm531_vm2, %v15722_v62, %v15896_v38  ;;  %v15992_v32 = vld [vmem:[%s14907_s26 + $0x130] sm:$0xff]  ;;  %v16007_v20 = vld [vmem:[#allocation7 + $0x28] sm:$0xff] }
 0x30f   : > { %12498 = vmatprep.subr.bf16.mxu1 %v12497_v1  ;;  %v1692_v54 = vmax.f32 %v1572_v45, 0.0  ;;  %v12547_v1 = vpack.c.bf16 %v15847_v16, %v15841_v37  ;;  %v15926_v45 = vld [vmem:[#allocation7 + $0x10] sm:$0xff] }
 0x310   : > { %12500 = vmatpush1.bf16.msra.mxu1 %v12499_v43 }
 0x311   : > { %12516 = vmatpush1.bf16.msra.mxu0 %v12515_v48  ;;  %v15823_v10 = vpop.permute.xlu1 %13868  ;;  %v1576_v15 = vpop.f32.mrb[62].mxu1 }
 0x312   : > { %v1707_v46 = vmax.f32 %v1576_v15, 0.0  ;;  %12518 = vmatprep.subr.bf16.mxu0 %v12517_v5  ;;  %v1578_v50 = vpop.f32.mrb[63].mxu1  ;;  %v15943_v15 = vpop.permute.xlu0 %13863 }
 0x313   : > { %v1708_v63 = vmax.f32 %v1578_v50, 0.0  ;;  %v13866_v6 = vunpack.i.h.bf16 %v15943_v15  ;;  %v15953_v50 = vld [vmem:[#allocation7 + $0x18] sm:$0xff]  ;;  %v13865_v59 = vunpack.i.l.bf16 %v15943_v15 }
 0x314   : > { %v12503_v7 = vpack.c.bf16 %v1707_v46, %v1691_v44  ;;  %v13871_v44 = vunpack.i.h.bf16 %v15823_v10 }
 0x315   : > { %12520 = vmatpush1.bf16.msra.mxu0 %v12519_v0  ;;  %v15831_v8 = vpop.permute.xlu1 %13873  ;;  %v12501_v17 = vpack.c.bf16 %v1708_v63, %v1692_v54  ;;  %v12531_v54 = vpack.c.bf16 %v15836_v13, %v15812_v14  ;;  %v13912_v14 = vpack.i.bf16 %v15936_v23, %v15933_v52  ;;  %v15979_v62 = vsel %vm531_vm2, %v13865_v59, %v13866_v6 }
 0x316   : > { %2775 = vmatprep.subr.mxu0 %v15836_v13  ;;  %v15970_v0 = vpop.permute.xlu0 %2599  ;;  %v13875_v2 = vunpack.i.l.bf16 %v15831_v8 }
 0x317   : > { %12502 = vmatprep.subr.bf16.mxu1 %v12501_v17  ;;  %v4444_v17 = vld [vmem:[%s14907_s26 + $0x128] sm:$0xff] }
 0x318   : > { %12504 = vmatpush1.bf16.msra.mxu1 %v12503_v7  ;;  %v15982_v7 = vld [vmem:[#allocation7 + $0x20] sm:$0xff] }
 0x319   : > { %2776 = vmatpush1.msra.mxu0 %v2697_v56  ;;  %v2503_v26 = vpop.permute.xlu1 %2502  ;;  %12522 = vmatprep.subr.bf16.mxu1 %v12517_v5  ;;  %v13870_v5 = vunpack.i.l.bf16 %v15823_v10  ;;  %v16017_v56 = vld [vmem:[%s14907_s26 + $0x140] sm:$0xff] }
 0x31a   : > { %11916 = vmatmul.mubr.msk.f32.vlgmr.msra.gmra.mrb[80].mxu0 %vm652_vm3, %v15866_v60  ;;  %12538 = vmatprep.subr.bf16.mxu0 %v15860_v24  ;;  %v2504_v19 = vsel %vm373_vm0, %v15737_v58, %v2503_v26  ;;  %v2661_v58 = vsel %vm531_vm2, %v13841_v28, %v13846_v18  ;;  %v2602_v37 = vpop.permute.xlu0 %2601 }
 0x31b   : > { %12540 = vmatpush1.bf16.msra.mxu0 %v15862_v29  ;;  %2625 = vrot.lane.b32.xlu0 %v2504_v19, %s14703_s12  ;;  %v12545_v43 = vpack.c.bf16 %v15878_v49, %v2661_v58  ;;  %v12551_v46 = vpack.c.bf16 %v2661_v58, %v15851_v21  ;;  %v15968_v63 = vsel %vm531_vm2, %v13870_v5, %v13871_v44  ;;  %v16014_v21 = vld [vmem:[%s14907_s26 + $0x138] sm:$0xff] }
 0x31c   : > { %12542 = vmatprep.subr.bf16.mxu0 %v12541_v53  ;;  %11914 = vmatmul.mubr.msk.f32.vlgmr.msra.gmra.mrb[76].mxu1 %vm1709_vm4, %v14478_v39  ;;  %v12565_v13 = vpack.c.bf16 %v15968_v63, %v15979_v62  ;;  %v12559_v19 = vpack.c.bf16 %v15912_v12, %v15878_v49  ;;  %v16036_v53 = vld [vmem:[#allocation7 + $0x30] sm:$0xff]  ;;  %v16052_v58 = vld [vmem:[#allocation7 + $0x38] sm:$0xff] }
 0x31d   : > { %2829 = vmatprep.mubr.f32.mxu0 %v14704_v47  ;;  %12524 = vmatpush1.bf16.msra.mxu1 %v12523_v35  ;;  %v2506_v40 = vpop.permute.xlu1 %2505  ;;  %v2679_v35 = vsel %vm531_vm2, %v15896_v38, %v15970_v0 }
 0x31e   : > { %v2507_v51 = vsel %vm322_vm1, %v15734_v11, %v2506_v40  ;;  %11917 = vmatmul.mubr.msk.f32.gmra.mrb[82].mxu0 %vm652_vm3, %v15902_v33  ;;  %12526 = vmatprep.subr.bf16.mxu1 %v12525_v57  ;;  %v15917_v11 = vsel %vm531_vm2, %v13846_v18, %v13856_v31  ;;  %v2647_v18 = vsel %vm531_vm2, %v13855_v22, %v13865_v59 }
 0x31f   : > { %v13902_v27 = vpack.i.bf16 %v2507_v51, %v15680_v42  ;;  %12544 = vmatpush1.bf16.msra.mxu0 %v12543_v3  ;;  %2633 = vrot.lane.b32.xlu0 %v2506_v40, %s14703_s12  ;;  %v12529_v42 = vpack.c.bf16 %v15888_v34, %v2659_v25  ;;  %v12549_v48 = vpack.c.bf16 %v15917_v11, %v15912_v12  ;;  %v13876_v40 = vunpack.i.h.bf16 %v15831_v8 }
 0x320   : > { %12546 = vmatprep.subr.bf16.mxu0 %v12545_v43  ;;  %2835 = vmatprep.mubr.f32.mxu0 %v14704_v47  ;;  %v12557_v25 = vpack.c.bf16 %v2647_v18, %v15962_v61  ;;  %v12563_v22 = vpack.c.bf16 %v15962_v61, %v15917_v11  ;;  %v2680_v3 = vsel %vm531_vm2, %v15970_v0, %v2602_v37  ;;  %v4448_v11 = vld [vmem:[%s14907_s26 + $0x148] sm:$0xff] }
 0x321   : > { %12528 = vmatpush1.bf16.msra.mxu1 %v12527_v30  ;;  %13903 = vrot.lane.b32.xlu1 %v13902_v27, %s14703_s12  ;;  %v2510_v55 = vpop.permute.xlu1 %2509  ;;  %v12575_v43 = vpack.c.bf16 %v15979_v62, %v2679_v35  ;;  %v2665_v27 = vsel %vm531_vm2, %v13871_v44, %v13876_v40 }
 0x322   : > { %11918 = vmatmul.mubr.msk.f32.gmra.mrb[84].mxu0 %vm652_vm3, %v15926_v45  ;;  %12530 = vmatprep.subr.bf16.mxu1 %v12529_v42  ;;  %v2511_v28 = vsel %vm373_vm0, %v2503_v26, %v2510_v55  ;;  %v16025_v26 = vpop.permute.xlu0 %2603  ;;  %v16104_v42 = vld [vmem:[%s14907_s26 + $0x150] sm:$0xff]  ;;  %v12579_v55 = vpack.c.bf16 %v2680_v3, %v15968_v63 }
 0x323   : > { %12548 = vmatpush1.bf16.msra.mxu0 %v12547_v1  ;;  %2841 = vmatprep.mubr.f32.mxu0 %v14704_v47  ;;  %v16077_v38 = vsel %vm531_vm2, %v2602_v37, %v16025_v26  ;;  %v16116_v44 = vpack.i.bf16 %v16104_v42, %v4448_v11 }
 0x324   : > { %12550 = vmatprep.subr.bf16.mxu0 %v12549_v48  ;;  %13908 = vrot.lane.b32.xlu0 %v15921_v9, %s14702_s24  ;;  %v12577_v12 = vpack.c.bf16 %v16077_v38, %v2665_v27 }
 0x325   : > { %12532 = vmatpush1.bf16.msra.mxu1 %v12531_v54  ;;  %2637 = vrot.lane.b32.xlu1 %v2511_v28, %s14703_s12  ;;  %v16109_v10 = vpop.permute.xlu1 %13883 }
 0x326   : > { %11919 = vmatmul.mubr.msk.f32.gmra.mrb[86].mxu0 %vm652_vm3, %v15953_v50  ;;  %12534 = vmatprep.subr.bf16.mxu1 %v15860_v24  ;;  %v2663_v24 = vsel %vm531_vm2, %v13856_v31, %v13870_v5  ;;  %v13886_v5 = vunpack.i.h.bf16 %v16109_v10  ;;  %v13885_v15 = vunpack.i.l.bf16 %v16109_v10 }
 0x327   : > { %12552 = vmatpush1.bf16.msra.mxu0 %v12551_v46  ;;  %2325 = vmatprep.mubr.f32.mxu1 %v14704_v47  ;;  %v12561_v31 = vpack.c.bf16 %v2679_v35, %v2663_v24  ;;  %v12567_v41 = vpack.c.bf16 %v2663_v24, %v2647_v18 }
 0x328   : > { %3001 = vmatprep.subr.mxu0 %v15962_v61  ;;  %2847 = vmatprep.mubr.f32.mxu0 %v14704_v47 }
 0x329   : > { %12536 = vmatpush1.bf16.msra.mxu1 %v15862_v29  ;;  %13913 = vrot.lane.b32.xlu1 %v13912_v14, %s14702_s24  ;;  %v13927_v29 = vpack.i.bf16 %v16017_v56, %v16014_v21 }
 0x32a   : > { %11915 = vmatmul.mubr.msk.f32.gmra.mrb[78].mxu1 %vm1709_vm4, %v14482_v4  ;;  %11920 = vmatmul.mubr.msk.f32.gmra.mrb[88].mxu0 %vm652_vm3, %v15982_v7 }
 0x32b   : > { %2888 = vmatprep.subr.mxu1 %v15847_v16  ;;  %3002 = vmatpush1.msra.mxu0 %v15878_v49  ;;  %v16005_v16 = vpack.i.bf16 %v15992_v32, %v4444_v17  ;;  %v16047_v49 = vpop.permute.xlu0 %13878 }
 0x32c   : > { %13918 = vrot.lane.b32.xlu0 %v15921_v9, %s14701_s22  ;;  %12570 = vmatprep.subr.bf16.mxu0 %v12565_v13  ;;  %v13881_v39 = vunpack.i.h.bf16 %v16047_v49  ;;  %v13880_v57 = vunpack.i.l.bf16 %v16047_v49 }
 0x32d   : > { %2853 = vmatprep.mubr.f32.mxu0 %v14704_v47  ;;  %2889 = vmatpush1.msra.mxu1 %v15888_v34  ;;  %v2649_v34 = vsel %vm531_vm2, %v13866_v6, %v13875_v2 }
 0x32e   : > { %2936 = vmatprep.mubr.f32.mxu1 %v14704_v47  ;;  %4527 = vrot.lane.b32.xlu1 %v15933_v52, %s14701_s22  ;;  %v12573_v36 = vpack.c.bf16 %v2649_v34, %v2680_v3  ;;  %v16083_v8 = vsel %vm531_vm2, %v13875_v2, %v13880_v57  ;;  %v16088_v30 = vsel %vm531_vm2, %v13876_v40, %v13881_v39 }
 0x32f   : > { %11921 = vmatmul.mubr.msk.f32.gmra.mrb[90].mxu0 %vm652_vm3, %v16007_v20  ;;  %11924 = vmatmul.mubr.msk.f32.vlgmr.msra.gmra.mrb[80].mxu1 %vm652_vm3, %v15866_v60  ;;  %v16090_v51 = vpop.permute.xlu0 %2605  ;;  %v12581_v1 = vpack.c.bf16 %v16088_v30, %v16083_v8  ;;  %v12583_v6 = vpack.c.bf16 %v2665_v27, %v2649_v34  ;;  %v2651_v0 = vsel %vm531_vm2, %v13880_v57, %v13885_v15 }
 0x330   : > { %12554 = vmatprep.subr.bf16.mxu1 %v12549_v48  ;;  %2859 = vmatprep.mubr.f32.mxu0 %v14704_v47  ;;  %v2682_v59 = vsel %vm531_vm2, %v16025_v26, %v16090_v51 }
 0x331   : > { %12556 = vmatpush1.bf16.msra.mxu1 %v12551_v46  ;;  %2942 = vmatprep.mubr.f32.mxu1 %v14704_v47  ;;  %v16139_v46 = vsel %vm531_vm2, %v13885_v15, %v13886_v5  ;;  %v2608_v4 = vpop.permute.xlu1 %2607 }
 0x332   : > { %12558 = vmatprep.subr.bf16.mxu1 %v12557_v25  ;;  %13923 = vrot.lane.b32.xlu1 %v16005_v16, %s14702_s24  ;;  %v12591_v25 = vpack.c.bf16 %v16083_v8, %v16077_v38 }
 0x333   : > { %11922 = vmatmul.mubr.msk.f32.gmra.mrb[92].mxu0 %vm652_vm3, %v16036_v53  ;;  %11925 = vmatmul.mubr.msk.f32.gmra.mrb[82].mxu1 %vm652_vm3, %v15902_v33  ;;  %v16112_v48 = vpop.permute.xlu0 %13888 }
 0x334   : > { %2865 = vmatprep.mubr.f32.mxu0 %v14704_v47  ;;  %2948 = vmatprep.mubr.f32.mxu1 %v14704_v47  ;;  %v13891_v54 = vunpack.i.h.bf16 %v16112_v48  ;;  %v13890_v28 = vunpack.i.l.bf16 %v16112_v48 }
 0x335   : > { %12560 = vmatpush1.bf16.msra.mxu1 %v12559_v19  ;;  %4529 = vrot.lane.b32.xlu0 %v15936_v23, %s14701_s22  ;;  %v12595_v19 = vpack.c.bf16 %v2682_v59, %v16088_v30 }
 0x336   : > { %12562 = vmatprep.subr.bf16.mxu1 %v12561_v31  ;;  %13928 = vrot.lane.b32.xlu1 %v13927_v29, %s14702_s24  ;;  %v16144_v14 = vsel %vm531_vm2, %v13890_v28, %v13891_v54  ;;  %v2667_v37 = vsel %vm531_vm2, %v13881_v39, %v13890_v28 }
 0x337   : > { %11923 = vmatmul.mubr.msk.f32.gmra.mrb[94].mxu0 %vm652_vm3, %v16052_v58  ;;  %11926 = vmatmul.mubr.msk.f32.gmra.mrb[84].mxu1 %vm652_vm3, %v15926_v45  ;;  %v2544_v61 = vpop.permute.xlu0 %2543  ;;  %v12597_v63 = vpack.c.bf16 %v16144_v14, %v16139_v46  ;;  %v12599_v39 = vpack.c.bf16 %v2667_v37, %v2651_v0 }
 0x338   : > { %2954 = vmatprep.mubr.f32.mxu1 %v14704_v47  ;;  %3049 = vmatprep.mubr.f32.mxu0 %v14704_v47  ;;  %v2653_v2 = vsel %vm531_vm2, %v13886_v5, %v2544_v61 }
 0x339   : > { %12564 = vmatpush1.bf16.msra.mxu1 %v12563_v22  ;;  %4531 = vrot.lane.b32.xlu0 %v4444_v17, %s14701_s22  ;;  %v12589_v17 = vpack.c.bf16 %v2651_v0, %v2682_v59 }
 0x33a   : > { %12566 = vmatprep.subr.bf16.mxu1 %v12565_v13  ;;  %4535 = vrot.lane.b32.xlu1 %v16014_v21, %s14701_s22 }
 0x33b   : > { %11927 = vmatmul.mubr.msk.f32.gmra.mrb[86].mxu1 %vm652_vm3, %v15953_v50  ;;  %11932 = vmatmul.mubr.msk.f32.vlgmr.msra.gmra.mrb[96].mxu0 %vm652_vm3, %v15866_v60  ;;  %v16166_v62 = vpop.permute.xlu0 %2577 }
 0x33c   : > { %12572 = vmatpush1.bf16.msra.mxu0 %v12567_v41  ;;  %2960 = vmatprep.mubr.f32.mxu1 %v14704_v47 }
 0x33d   : > { %12568 = vmatpush1.bf16.msra.mxu1 %v12567_v41  ;;  %12574 = vmatprep.subr.bf16.mxu0 %v12573_v36  ;;  %v2669_v36 = vsel %vm531_vm2, %v13891_v54, %v16166_v62 }
 0x33e   : > { %3114 = vmatprep.subr.mxu1 %v2680_v3  ;;  %3055 = vmatprep.mubr.f32.mxu0 %v14704_v47  ;;  %v12615_v28 = vpack.c.bf16 %v2669_v36, %v2653_v2 }
 0x33f   : > { %11928 = vmatmul.mubr.msk.f32.gmra.mrb[88].mxu1 %vm652_vm3, %v15982_v7  ;;  %11933 = vmatmul.mubr.msk.f32.gmra.mrb[98].mxu0 %vm652_vm3, %v15902_v33  ;;  %v16183_v24 = vpop.permute.xlu0 %13893 }
 0x340   : > { %12576 = vmatpush1.bf16.msra.mxu0 %v12575_v43  ;;  %2966 = vmatprep.mubr.f32.mxu1 %v14704_v47  ;;  %v13895_v22 = vunpack.i.l.bf16 %v16183_v24  ;;  %v16214_v41 = vunpack.i.h.bf16 %v16183_v24 }
 0x341   : > { %3115 = vmatpush1.msra.mxu1 %v2679_v35  ;;  %12578 = vmatprep.subr.bf16.mxu0 %v12577_v12  ;;  %v2610_v35 = vpop.permute.xlu1 %2609 }
 0x342   : > { %12586 = vmatprep.subr.bf16.mxu1 %v12581_v1  ;;  %3061 = vmatprep.mubr.f32.mxu0 %v14704_v47  ;;  %v2684_v31 = vsel %vm531_vm2, %v2608_v4, %v2610_v35  ;;  %v16239_v12 = vsel %vm531_vm2, %v16166_v62, %v16214_v41 }
 0x343   : > { %11929 = vmatmul.mubr.msk.f32.gmra.mrb[90].mxu1 %vm652_vm3, %v16007_v20  ;;  %11934 = vmatmul.mubr.msk.f32.gmra.mrb[100].mxu0 %vm652_vm3, %v15926_v45  ;;  %v2580_v34 = vpop.permute.xlu0 %2579  ;;  %v12605_v57 = vpack.c.bf16 %v2653_v2, %v2684_v31  ;;  %v12611_v10 = vpack.c.bf16 %v2684_v31, %v16144_v14 }
 0x344   : > { %12580 = vmatpush1.bf16.msra.mxu0 %v12579_v55  ;;  %2972 = vmatprep.mubr.f32.mxu1 %v14704_v47  ;;  %v2670_v8 = vsel %vm531_vm2, %v16166_v62, %v2580_v34 }
 0x345   : > { %12582 = vmatprep.subr.bf16.mxu0 %v12581_v1  ;;  %3067 = vmatprep.mubr.f32.mxu0 %v14704_v47  ;;  %v16200_v49 = vpop.permute.xlu1 %2611 }
 0x346   : > { %4533 = vrot.lane.b32.xlu0 %v15992_v32, %s14701_s22  ;;  %13933 = vrot.lane.b32.xlu1 %v16116_v44, %s14702_s24  ;;  %v2683_v32 = vsel %vm531_vm2, %v16090_v51, %v2608_v4  ;;  %v16207_v3 = vsel %vm531_vm2, %v2610_v35, %v16200_v49 }
 0x347   : > { %11930 = vmatmul.mubr.msk.f32.gmra.mrb[92].mxu1 %vm652_vm3, %v16036_v53  ;;  %11935 = vmatmul.mubr.msk.f32.gmra.mrb[102].mxu0 %vm652_vm3, %v15953_v50  ;;  %v12593_v29 = vpack.c.bf16 %v2683_v32, %v2667_v37  ;;  %v12607_v51 = vpack.c.bf16 %v16139_v46, %v2683_v32  ;;  %v12609_v43 = vpack.c.bf16 %v16207_v3, %v2669_v36 }
 0x348   : > { %12584 = vmatpush1.bf16.msra.mxu0 %v12583_v6  ;;  %2978 = vmatprep.mubr.f32.mxu1 %v14704_v47 }
 0x349   : > { %3073 = vmatprep.mubr.f32.mxu0 %v14704_v47  ;;  %3227 = vmatprep.subr.mxu0 %v2682_v59 }
 0x34a   : > { %4537 = vrot.lane.b32.xlu0 %v16017_v56, %s14701_s22  ;;  %13938 = vrot.lane.b32.xlu1 %v15921_v9, %s14703_s12  ;;  %v1782_v9 = vpop.f32.mrb[64].mxu0 }
 0x34b   : > { %11931 = vmatmul.mubr.msk.f32.gmra.mrb[94].mxu1 %vm652_vm3, %v16052_v58  ;;  %11936 = vmatmul.mubr.msk.f32.gmra.mrb[104].mxu0 %vm652_vm3, %v15982_v7  ;;  %2332 = vst [vmem:[#allocation2] sm:$0xff] %v1782_v9  ;;  %v1784_v13 = vpop.f32.mrb[65].mxu0 }
 0x34c   : > { %3079 = vmatprep.mubr.f32.mxu0 %v14704_v47  ;;  %3162 = vmatprep.mubr.f32.mxu1 %v14704_v47  ;;  %2333 = vst [vmem:[#allocation2 + $0x8] sm:$0xff] %v1784_v13  ;;  %v1788_v18 = vpop.f32.mrb[66].mxu0 }
 0x34d   : > { %3228 = vmatpush1.msra.mxu0 %v16077_v38  ;;  %v1790_v26 = vpop.f32.mrb[67].mxu0  ;;  %v16223_v38 = vsel %vm531_vm2, %v2544_v61, %v13895_v22 }
 0x34e   : > { %12602 = vmatprep.subr.bf16.mxu0 %v12597_v63  ;;  %4539 = vrot.lane.b32.xlu0 %v4448_v11, %s14701_s22  ;;  %v12617_v27 = vpack.c.bf16 %v2670_v8, %v16223_v38  ;;  %v16241_v11 = vpop.permute.xlu1 %2613  ;;  %v12613_v48 = vpack.c.bf16 %v16239_v12, %v16223_v38  ;;  %v12623_v0 = vpack.c.bf16 %v16223_v38, %v16207_v3 }
 0x34f   : > { %11937 = vmatmul.mubr.msk.f32.gmra.mrb[106].mxu0 %vm652_vm3, %v16007_v20  ;;  %11940 = vmatmul.mubr.msk.f32.vlgmr.msra.gmra.mrb[96].mxu1 %vm652_vm3, %v15866_v60  ;;  %v16266_v59 = vsel %vm531_vm2, %v16200_v49, %v16241_v11 }
 0x350   : > { %12588 = vmatpush1.bf16.msra.mxu1 %v12583_v6  ;;  %3085 = vmatprep.mubr.f32.mxu0 %v14704_v47  ;;  %v12627_v24 = vpack.c.bf16 %v16266_v59, %v16239_v12 }
 0x351   : > { %12590 = vmatprep.subr.bf16.mxu1 %v12589_v17  ;;  %3168 = vmatprep.mubr.f32.mxu1 %v14704_v47 }
 0x352   : > { %v16252_v54 = vpop.permute.xlu1 %13898 }
 0x353   : > { %11938 = vmatmul.mubr.msk.f32.gmra.mrb[108].mxu0 %vm652_vm3, %v16036_v53  ;;  %11941 = vmatmul.mubr.msk.f32.gmra.mrb[98].mxu1 %vm652_vm3, %v15902_v33  ;;  %v13900_v6 = vunpack.i.l.bf16 %v16252_v54  ;;  %v13901_v17 = vunpack.i.h.bf16 %v16252_v54 }
 0x354   : > { %12592 = vmatpush1.bf16.msra.mxu1 %v12591_v25  ;;  %3091 = vmatprep.mubr.f32.mxu0 %v14704_v47 }
 0x355   : > { %12594 = vmatprep.subr.bf16.mxu1 %v12593_v29  ;;  %3174 = vmatprep.mubr.f32.mxu1 %v14704_v47  ;;  %v16274_v61 = vsel %vm531_vm2, %v13895_v22, %v13900_v6  ;;  %v2690_v18 = vsel %vm531_vm2, %v16214_v41, %v13901_v17 }
 0x357   : > { %11939 = vmatmul.mubr.msk.f32.gmra.mrb[110].mxu0 %vm652_vm3, %v16052_v58  ;;  %11942 = vmatmul.mubr.msk.f32.gmra.mrb[100].mxu1 %vm652_vm3, %v15926_v45 }
 0x358   : > { %12596 = vmatpush1.bf16.msra.mxu1 %v12595_v19  ;;  %3275 = vmatprep.mubr.f32.mxu0 %v14704_v47 }
 0x359   : > { %12598 = vmatprep.subr.bf16.mxu1 %v12597_v63  ;;  %3180 = vmatprep.mubr.f32.mxu1 %v14704_v47  ;;  %v12621_v63 = vpack.c.bf16 %v16274_v61, %v16266_v59 }
 0x35a   : > { %v1859_v40 = vpop.f32.mrb[64].mxu1 }
 0x35b   : > { %11948 = vmatmul.mubr.msk.f32.vlgmr.msra.gmra.mrb[112].mxu0 %vm652_vm3, %v15866_v60  ;;  %11943 = vmatmul.mubr.msk.f32.gmra.mrb[102].mxu1 %vm652_vm3, %v15953_v50  ;;  %2334 = vst [vmem:[#allocation2 + $0x10] sm:$0xff] %v1859_v40  ;;  %v1861_v30 = vpop.f32.mrb[65].mxu1 }
 0x35c   : > { %12600 = vmatpush1.bf16.msra.mxu1 %v12599_v39  ;;  %12604 = vmatpush1.bf16.msra.mxu0 %v12599_v39  ;;  %2335 = vst [vmem:[#allocation2 + $0x18] sm:$0xff] %v1861_v30 }
 0x35d   : > { %3281 = vmatprep.mubr.f32.mxu0 %v14704_v47  ;;  %3340 = vmatprep.subr.mxu1 %v2684_v31  ;;  %v4439_v31 = vld [vmem:[%s14907_s26 + $0x100] sm:$0xff] }
 0x35e   : > { %3186 = vmatprep.mubr.f32.mxu1 %v14704_v47  ;;  %12606 = vmatprep.subr.bf16.mxu0 %v12605_v57 }
 0x35f   : > { %11949 = vmatmul.mubr.msk.f32.gmra.mrb[114].mxu0 %vm652_vm3, %v15902_v33  ;;  %11944 = vmatmul.mubr.msk.f32.gmra.mrb[104].mxu1 %vm652_vm3, %v15982_v7 }
 0x360   : > { %3341 = vmatpush1.msra.mxu1 %v2683_v32  ;;  %3287 = vmatprep.mubr.f32.mxu0 %v14704_v47  ;;  %v1865_v1 = vpop.f32.mrb[66].mxu1 }
 0x361   : > { %12608 = vmatpush1.bf16.msra.mxu0 %v12607_v51  ;;  %3192 = vmatprep.mubr.f32.mxu1 %v14704_v47  ;;  %2350 = vst [vmem:[#allocation2 + $0x290] sm:$0xff] %v1865_v1  ;;  %v1867_v55 = vpop.f32.mrb[67].mxu1 }
 0x362   : > { %12610 = vmatprep.subr.bf16.mxu0 %v12609_v43  ;;  %12618 = vmatprep.subr.bf16.mxu1 %v12617_v27  ;;  %v1936_v5 = vpop.f32.mrb[68].mxu0  ;;  %2351 = vst [vmem:[#allocation2 + $0x298] sm:$0xff] %v1867_v55 }
 0x363   : > { %11950 = vmatmul.mubr.msk.f32.gmra.mrb[116].mxu0 %vm652_vm3, %v15926_v45  ;;  %11945 = vmatmul.mubr.msk.f32.gmra.mrb[106].mxu1 %vm652_vm3, %v16007_v20  ;;  %2336 = vst [vmem:[#allocation2 + $0x20] sm:$0xff] %v1936_v5  ;;  %v1938_v15 = vpop.f32.mrb[69].mxu0 }
 0x364   : > { %3293 = vmatprep.mubr.f32.mxu0 %v14704_v47  ;;  %3198 = vmatprep.mubr.f32.mxu1 %v14704_v47  ;;  %2337 = vst [vmem:[#allocation2 + $0x28] sm:$0xff] %v1938_v15  ;;  %v16374_v15 = vld [vmem:[%s14907_s26 + $0x158] sm:$0xff] }
 0x365   : > { %12612 = vmatpush1.bf16.msra.mxu0 %v12611_v10 }
 0x366   : > { %12614 = vmatprep.subr.bf16.mxu0 %v12613_v48  ;;  %v1942_v46 = vpop.f32.mrb[70].mxu0 }
 0x367   : > { %11951 = vmatmul.mubr.msk.f32.gmra.mrb[118].mxu0 %vm652_vm3, %v15953_v50  ;;  %11946 = vmatmul.mubr.msk.f32.gmra.mrb[108].mxu1 %vm652_vm3, %v16036_v53  ;;  %2352 = vst [vmem:[#allocation2 + $0x2a0] sm:$0xff] %v1942_v46  ;;  %v1944_v14 = vpop.f32.mrb[71].mxu0 }
 0x368   : > { %3299 = vmatprep.mubr.f32.mxu0 %v14704_v47  ;;  %3204 = vmatprep.mubr.f32.mxu1 %v14704_v47  ;;  %2353 = vst [vmem:[#allocation2 + $0x2a8] sm:$0xff] %v1944_v14 }
 0x369   : > { %12616 = vmatpush1.bf16.msra.mxu0 %v12615_v28 }
 0x36a   : > { %3453 = vmatprep.subr.mxu0 %v16266_v59 }
 0x36b   : > { %11952 = vmatmul.mubr.msk.f32.gmra.mrb[120].mxu0 %vm652_vm3, %v15982_v7  ;;  %11947 = vmatmul.mubr.msk.f32.gmra.mrb[110].mxu1 %vm652_vm3, %v16052_v58 }
 0x36c   : > { %3305 = vmatprep.mubr.f32.mxu0 %v14704_v47  ;;  %3388 = vmatprep.mubr.f32.mxu1 %v14704_v47 }
 0x36d   : > { %3454 = vmatpush1.msra.mxu0 %v16207_v3 }
 0x36f   : > { %11953 = vmatmul.mubr.msk.f32.gmra.mrb[122].mxu0 %vm652_vm3, %v16007_v20  ;;  %11956 = vmatmul.mubr.msk.f32.vlgmr.msra.gmra.mrb[112].mxu1 %vm652_vm3, %v15866_v60 }
 0x370   : > { %3311 = vmatprep.mubr.f32.mxu0 %v14704_v47  ;;  %12620 = vmatpush1.bf16.msra.mxu1 %v12615_v28  ;;  %v16377_v28 = vld [vmem:[%s14907_s26 + $0x160] sm:$0xff] }
 0x371   : > { %12622 = vmatprep.subr.bf16.mxu1 %v12621_v63  ;;  %3394 = vmatprep.mubr.f32.mxu1 %v14704_v47 }
 0x373   : > { %11954 = vmatmul.mubr.msk.f32.gmra.mrb[124].mxu0 %vm652_vm3, %v16036_v53  ;;  %11957 = vmatmul.mubr.msk.f32.gmra.mrb[114].mxu1 %vm652_vm3, %v15902_v33 }
 0x374   : > { %3317 = vmatprep.mubr.f32.mxu0 %v14704_v47  ;;  %12624 = vmatpush1.bf16.msra.mxu1 %v12623_v0 }
 0x375   : > { %3400 = vmatprep.mubr.f32.mxu1 %v14704_v47 }
 0x377   : > { %11955 = vmatmul.mubr.msk.f32.gmra.mrb[126].mxu0 %vm652_vm3, %v16052_v58  ;;  %11958 = vmatmul.mubr.msk.f32.gmra.mrb[116].mxu1 %vm652_vm3, %v15926_v45 }
 0x378   : > { %3501 = vmatprep.mubr.f32.mxu0 %v14704_v47  ;;  %3406 = vmatprep.mubr.f32.mxu1 %v14704_v47 }
 0x37b   : > { %11964 = vmatmul.mubr.msk.f32.vlgmr.msra.gmra.mrb[128].mxu0 %vm652_vm3, %v15866_v60  ;;  %11959 = vmatmul.mubr.msk.f32.gmra.mrb[118].mxu1 %vm652_vm3, %v15953_v50  ;;  %v2013_v62 = vpop.f32.mrb[68].mxu1 }
 0x37c   : > { %3507 = vmatprep.mubr.f32.mxu0 %v14704_v47  ;;  %3412 = vmatprep.mubr.f32.mxu1 %v14704_v47  ;;  %2338 = vst [vmem:[#allocation2 + $0x30] sm:$0xff] %v2013_v62  ;;  %v2015_v4 = vpop.f32.mrb[69].mxu1 }
 0x37d   : > { %2339 = vst [vmem:[#allocation2 + $0x38] sm:$0xff] %v2015_v4  ;;  %v16416_v4 = vld [vmem:[%s14907_s26 + $0x168] sm:$0xff] }
 0x37f   : > { %11965 = vmatmul.mubr.msk.f32.gmra.mrb[130].mxu0 %vm652_vm3, %v15902_v33  ;;  %11960 = vmatmul.mubr.msk.f32.gmra.mrb[120].mxu1 %vm652_vm3, %v15982_v7  ;;  %v2019_v9 = vpop.f32.mrb[70].mxu1 }
 0x380   : > { %3513 = vmatprep.mubr.f32.mxu0 %v14704_v47  ;;  %3418 = vmatprep.mubr.f32.mxu1 %v14704_v47  ;;  %2354 = vst [vmem:[#allocation2 + $0x2b0] sm:$0xff] %v2019_v9  ;;  %v2021_v13 = vpop.f32.mrb[71].mxu1 }
 0x381   : > { %2355 = vst [vmem:[#allocation2 + $0x2b8] sm:$0xff] %v2021_v13 }
 0x383   : > { %11966 = vmatmul.mubr.msk.f32.gmra.mrb[132].mxu0 %vm652_vm3, %v15926_v45  ;;  %11961 = vmatmul.mubr.msk.f32.gmra.mrb[122].mxu1 %vm652_vm3, %v16007_v20 }
 0x384   : > { %3519 = vmatprep.mubr.f32.mxu0 %v14704_v47  ;;  %3424 = vmatprep.mubr.f32.mxu1 %v14704_v47 }
 0x387   : > { %11967 = vmatmul.mubr.msk.f32.gmra.mrb[134].mxu0 %vm652_vm3, %v15953_v50  ;;  %11962 = vmatmul.mubr.msk.f32.gmra.mrb[124].mxu1 %vm652_vm3, %v16036_v53 }
 0x388   : > { %3525 = vmatprep.mubr.f32.mxu0 %v14704_v47  ;;  %3430 = vmatprep.mubr.f32.mxu1 %v14704_v47 }
 0x38b   : > { %11968 = vmatmul.mubr.msk.f32.gmra.mrb[136].mxu0 %vm652_vm3, %v15982_v7  ;;  %11963 = vmatmul.mubr.msk.f32.gmra.mrb[126].mxu1 %vm652_vm3, %v16052_v58 }
 0x38c   : > { %3531 = vmatprep.mubr.f32.mxu0 %v14704_v47  ;;  %3614 = vmatprep.mubr.f32.mxu1 %v14704_v47 }
 0x38d   : > { %v2626_v32 = vpop.permute.xlu0 %2625 }
 0x38e   : > { %v2692_v37 = vsel %vm531_vm2, %v16241_v11, %v2626_v32 }
 0x38f   : > { %11969 = vmatmul.mubr.msk.f32.gmra.mrb[138].mxu0 %vm652_vm3, %v16007_v20  ;;  %v12625_v25 = vpack.c.bf16 %v2692_v37, %v2690_v18 }
 0x390   : > { %3537 = vmatprep.mubr.f32.mxu0 %v14704_v47 }
 0x391   : > { %12626 = vmatprep.subr.bf16.mxu1 %v12625_v25  ;;  %v2634_v26 = vpop.permute.xlu0 %2633 }
 0x392   : > { %12628 = vmatpush1.bf16.msra.mxu1 %v12627_v24 }
 0x393   : > { %11970 = vmatmul.mubr.msk.f32.gmra.mrb[140].mxu0 %vm652_vm3, %v16036_v53  ;;  %v13904_v29 = vpop.permute.xlu1 %13903 }
 0x394   : > { %v13906_v35 = vunpack.i.h.bf16 %v13904_v29  ;;  %v13905_v19 = vunpack.i.l.bf16 %v13904_v29  ;;  %3543 = vmatprep.mubr.f32.mxu0 %v14704_v47  ;;  %v16437_v29 = vld [vmem:[%s14907_s26 + $0x170] sm:$0xff] }
 0x396   : > { %v2695_v2 = vsel %vm531_vm2, %v16214_v41, %v13906_v35  ;;  %v13909_v49 = vpop.permute.xlu0 %13908  ;;  %v2693_v22 = vsel %vm531_vm2, %v13900_v6, %v13905_v19  ;;  %v2696_v34 = vsel %vm531_vm2, %v13906_v35, %v2634_v26  ;;  %v13962_v6 = vpack.i.bf16 %v16377_v28, %v16374_v15  ;;  %v16442_v35 = vld [vmem:[%s14907_s26 + $0x178] sm:$0xff] }
 0x397   : > { %11971 = vmatmul.mubr.msk.f32.gmra.mrb[142].mxu0 %vm652_vm3, %v16052_v58  ;;  %v2638_v39 = vpop.permute.xlu1 %2637  ;;  %v13910_v57 = vunpack.i.l.bf16 %v13909_v49  ;;  %v12629_v3 = vpack.c.bf16 %v2696_v34, %v2693_v22  ;;  %v12631_v40 = vpack.c.bf16 %v2695_v2, %v16274_v61  ;;  %v13911_v36 = vunpack.i.h.bf16 %v13909_v49 }
 0x398   : > { %3855 = vmatprep.mubr.f32.mxu0 %v14704_v47  ;;  %v2698_v38 = vsel %vm531_vm2, %v2626_v32, %v2638_v39 }
 0x399   : > { %v13947_v41 = vpack.i.bf16 %v13910_v57, %v4439_v31  ;;  %12630 = vmatprep.subr.bf16.mxu1 %v12629_v3  ;;  %v4507_v30 = vsel %vm322_vm1, %v13910_v57, %v13911_v36  ;;  %v13997_v31 = vpack.i.bf16 %v16442_v35, %v16437_v29  ;;  %v16464_v57 = vld [vmem:[%s14907_s26 + $0x180] sm:$0xff]  ;;  %v16467_v3 = vld [vmem:[%s14907_s26 + $0x188] sm:$0xff] }
 0x39a   : > { %12632 = vmatpush1.bf16.msra.mxu1 %v12631_v40 }
 0x39b   : > { %v13914_v8 = vpop.permute.xlu1 %13913  ;;  %3566 = vmatprep.subr.mxu1 %v2698_v38  ;;  %13948 = vrot.lane.b32.xlu1 %v13947_v41, %s14703_s12  ;;  %v14007_v41 = vpack.i.bf16 %v16467_v3, %v16464_v57 }
 0x39c   : > { %v13915_v51 = vunpack.i.l.bf16 %v13914_v8 }
 0x39e   : > { %v4508_v43 = vsel %vm322_vm1, %v13911_v36, %v13915_v51  ;;  %v13919_v27 = vpop.permute.xlu0 %13918  ;;  %3567 = vmatpush1.msra.mxu1 %v2692_v37 }
 0x39f   : > { %v13921_v12 = vunpack.i.h.bf16 %v13919_v27  ;;  %v13920_v11 = vunpack.i.l.bf16 %v13919_v27  ;;  %11972 = vmatmul.mubr.msk.f32.vlgmr.msra.gmra.mrb[128].mxu1 %vm652_vm3, %v15866_v60  ;;  %v13942_v1 = vpack.i.bf16 %v4508_v43, %v4507_v30  ;;  %v13916_v60 = vunpack.i.h.bf16 %v13914_v8 }
 0x3a0   : > { %v16365_v10 = vpop.permute.xlu1 %4527  ;;  %3620 = vmatprep.mubr.f32.mxu1 %v14704_v47 }
 0x3a1   : > { %v4557_v55 = vsel %vm373_vm0, %v13920_v11, %v13921_v12  ;;  %v4558_v48 = vsel %vm373_vm0, %v13921_v12, %v16365_v10  ;;  %13943 = vrot.lane.b32.xlu0 %v13942_v1, %s14703_s12  ;;  %v4509_v46 = vsel %vm322_vm1, %v13915_v51, %v13916_v60 }
 0x3a2   : > { %v13957_v5 = vpack.i.bf16 %v13920_v11, %v4558_v48  ;;  %v13952_v54 = vpack.i.bf16 %v4557_v55, %v15933_v52  ;;  %v13967_v59 = vpack.i.bf16 %v13911_v36, %v4509_v46 }
 0x3a3   : > { %11973 = vmatmul.mubr.msk.f32.gmra.mrb[130].mxu1 %vm652_vm3, %v15902_v33 }
 0x3a4   : > { %13958 = vrot.lane.b32.xlu1 %v13957_v5, %s14703_s12  ;;  %3626 = vmatprep.mubr.f32.mxu1 %v14704_v47  ;;  %v13924_v33 = vpop.permute.xlu1 %13923 }
 0x3a5   : > { %13953 = vrot.lane.b32.xlu0 %v13952_v54, %s14703_s12  ;;  %v13925_v61 = vunpack.i.l.bf16 %v13924_v33 }
 0x3a7   : > { %11974 = vmatmul.mubr.msk.f32.gmra.mrb[132].mxu1 %vm652_vm3, %v15926_v45  ;;  %v4530_v52 = vpop.permute.xlu0 %4529  ;;  %v13972_v45 = vpack.i.bf16 %v15936_v23, %v13921_v12  ;;  %v13926_v23 = vunpack.i.h.bf16 %v13924_v33 }
 0x3a8   : > { %4541 = vrot.lane.b32.xlu1 %v16104_v42, %s14701_s22  ;;  %3632 = vmatprep.mubr.f32.mxu1 %v14704_v47  ;;  %v4559_v14 = vsel %vm373_vm0, %v16365_v10, %v4530_v52  ;;  %v4510_v42 = vsel %vm322_vm1, %v13916_v60, %v13925_v61  ;;  %v13929_v63 = vpop.permute.xlu1 %13928 }
 0x3a9   : > { %13963 = vrot.lane.b32.xlu0 %v13962_v6, %s14702_s24  ;;  %v13977_v0 = vpack.i.bf16 %v13915_v51, %v4510_v42  ;;  %v13930_v62 = vunpack.i.l.bf16 %v13929_v63  ;;  %v13931_v9 = vunpack.i.h.bf16 %v13929_v63 }
 0x3ab   : > { %11975 = vmatmul.mubr.msk.f32.gmra.mrb[134].mxu1 %vm652_vm3, %v15953_v50  ;;  %v4532_v50 = vpop.permute.xlu0 %4531  ;;  %v4512_v13 = vsel %vm322_vm1, %v13926_v23, %v13930_v62  ;;  %v4513_v37 = vsel %vm322_vm1, %v13930_v62, %v13931_v9 }
 0x3ac   : > { %4662 = vrot.lane.b32.xlu1 %v4559_v14, %s14703_s12  ;;  %3638 = vmatprep.mubr.f32.mxu1 %v14704_v47  ;;  %v4536_v18 = vpop.permute.xlu1 %4535  ;;  %v13992_v26 = vpack.i.bf16 %v4513_v37, %v16014_v21 }
 0x3ad   : > { %13968 = vrot.lane.b32.xlu0 %v13967_v59, %s14703_s12 }
 0x3af   : > { %11976 = vmatmul.mubr.msk.f32.gmra.mrb[136].mxu1 %vm652_vm3, %v15982_v7  ;;  %v4560_v7 = vsel %vm373_vm0, %v4530_v52, %v4532_v50 }
 0x3b0   : > { %13973 = vrot.lane.b32.xlu1 %v13972_v45, %s14703_s12  ;;  %3644 = vmatprep.mubr.f32.mxu1 %v14704_v47 }
 0x3b1   : > { %4543 = vrot.lane.b32.xlu0 %v16374_v15, %s14701_s22 }
 0x3b3   : > { %11977 = vmatmul.mubr.msk.f32.gmra.mrb[138].mxu1 %vm652_vm3, %v16007_v20  ;;  %v4511_v20 = vsel %vm322_vm1, %v13925_v61, %v13926_v23 }
 0x3b4   : > { %4545 = vrot.lane.b32.xlu1 %v16377_v28, %s14701_s22  ;;  %3650 = vmatprep.mubr.f32.mxu1 %v14704_v47 }
 0x3b5   : > { %13978 = vrot.lane.b32.xlu0 %v13977_v0, %s14703_s12 }
 0x3b7   : > { %11978 = vmatmul.mubr.msk.f32.gmra.mrb[140].mxu1 %vm652_vm3, %v16036_v53  ;;  %v13987_v53 = vpack.i.bf16 %v4512_v13, %v4511_v20 }
 0x3b8   : > { %4664 = vrot.lane.b32.xlu1 %v4560_v7, %s14703_s12  ;;  %3656 = vmatprep.mubr.f32.mxu1 %v14704_v47  ;;  %v4534_v24 = vpop.permute.xlu0 %4533  ;;  %v16445_v2 = vpop.permute.xlu1 %13933 }
 0x3b9   : > { %4499 = vrot.lane.b32.xlu0 %v16416_v4, %s14702_s24  ;;  %v4561_v19 = vsel %vm373_vm0, %v4532_v50, %v4534_v24  ;;  %v13935_v21 = vunpack.i.l.bf16 %v16445_v2  ;;  %v4562_v49 = vsel %vm373_vm0, %v4534_v24, %v4536_v18 }
 0x3ba   : > { %v2090_v17 = vpop.f32.mrb[72].mxu0 }
 0x3bb   : > { %11979 = vmatmul.mubr.msk.f32.gmra.mrb[142].mxu1 %vm652_vm3, %v16052_v58  ;;  %2340 = vst [vmem:[#allocation2 + $0x40] sm:$0xff] %v2090_v17  ;;  %v2092_v32 = vpop.f32.mrb[73].mxu0  ;;  %v4514_v22 = vsel %vm322_vm1, %v13931_v9, %v13935_v21 }
 0x3bc   : > { %4547 = vrot.lane.b32.xlu1 %v16416_v4, %s14701_s22  ;;  %2341 = vst [vmem:[#allocation2 + $0x48] sm:$0xff] %v2092_v32  ;;  %3932 = vmatprep.mubr.f32.mxu1 %v14704_v47  ;;  %v14002_v39 = vpack.i.bf16 %v4514_v22, %v16017_v56 }
 0x3bd   : > { %4710 = vrot.lane.b32.xlu0 %v16365_v10, %s14703_s12 }
 0x3be   : > { %v2096_v25 = vpop.f32.mrb[74].mxu0 }
 0x3bf   : > { %2356 = vst [vmem:[#allocation2 + $0x2c0] sm:$0xff] %v2096_v25  ;;  %v2098_v58 = vpop.f32.mrb[75].mxu0 }
 0x3c0   : > { %13988 = vrot.lane.b32.xlu1 %v13987_v53, %s14703_s12  ;;  %2357 = vst [vmem:[#allocation2 + $0x2c8] sm:$0xff] %v2098_v58 }
 0x3c1   : > { %13983 = vrot.lane.b32.xlu0 %v16005_v16, %s14703_s12  ;;  %v4538_v16 = vpop.permute.xlu0 %4537 }
 0x3c2   : > { %v4563_v34 = vsel %vm373_vm0, %v4536_v18, %v4538_v16 }
 0x3c4   : > { %13993 = vrot.lane.b32.xlu1 %v13992_v26, %s14703_s12 }
 0x3c5   : > { %4666 = vrot.lane.b32.xlu0 %v4561_v19, %s14703_s12  ;;  %v16474_v38 = vpop.permute.xlu0 %4539 }
 0x3c6   : > { %v4564_v30 = vsel %vm373_vm0, %v4538_v16, %v16474_v38 }
 0x3c8   : > { %13998 = vrot.lane.b32.xlu1 %v13997_v31, %s14702_s24 }
 0x3c9   : > { %4668 = vrot.lane.b32.xlu0 %v4562_v49, %s14703_s12 }
 0x3cc   : > { %4670 = vrot.lane.b32.xlu1 %v4563_v34, %s14703_s12 }
 0x3cd   : > { %4549 = vrot.lane.b32.xlu0 %v16437_v29, %s14701_s22 }
 0x3ce   : > { %v2167_v40 = vpop.f32.mrb[72].mxu1 }
 0x3cf   : > { %2342 = vst [vmem:[#allocation2 + $0x50] sm:$0xff] %v2167_v40  ;;  %v2169_v36 = vpop.f32.mrb[73].mxu1 }
 0x3d0   : > { %14003 = vrot.lane.b32.xlu1 %v14002_v39, %s14703_s12  ;;  %2343 = vst [vmem:[#allocation2 + $0x58] sm:$0xff] %v2169_v36 }
 0x3d1   : > { %4551 = vrot.lane.b32.xlu0 %v16442_v35, %s14701_s22 }
 0x3d2   : > { %v2173_v56 = vpop.f32.mrb[74].mxu1 }
 0x3d3   : > { %2358 = vst [vmem:[#allocation2 + $0x2d0] sm:$0xff] %v2173_v56  ;;  %v2175_v8 = vpop.f32.mrb[75].mxu1 }
 0x3d4   : > { %4553 = vrot.lane.b32.xlu1 %v16464_v57, %s14701_s22  ;;  %2359 = vst [vmem:[#allocation2 + $0x2d8] sm:$0xff] %v2175_v8 }
 0x3d5   : > { %14008 = vrot.lane.b32.xlu0 %v14007_v41, %s14702_s24  ;;  %v16486_v41 = vpop.permute.xlu1 %13938 }
 0x3d8   : > { %4555 = vrot.lane.b32.xlu1 %v16467_v3, %s14701_s22 }
 0x3d9   : > { %4672 = vrot.lane.b32.xlu0 %v4564_v30, %s14703_s12 }
 0x3db   : > { %v2244_v51 = vpop.f32.mrb[76].mxu0 }
 0x3dc   : > { %2344 = vst [vmem:[#allocation2 + $0x60] sm:$0xff] %v2244_v51  ;;  %v2246_v43 = vpop.f32.mrb[77].mxu0 }
 0x3dd   : > { %2345 = vst [vmem:[#allocation2 + $0x68] sm:$0xff] %v2246_v43  ;;  %14013 = vrot.lane.b32.xlu0 %v16116_v44, %s14703_s12 }
 0x3df   : > { %v2250_v27 = vpop.f32.mrb[78].mxu0 }
 0x3e0   : > { %2360 = vst [vmem:[#allocation2 + $0x2e0] sm:$0xff] %v2250_v27  ;;  %v2252_v12 = vpop.f32.mrb[79].mxu0 }
 0x3e1   : > { %2361 = vst [vmem:[#allocation2 + $0x2e8] sm:$0xff] %v2252_v12 }
 0x3ed   : > { %v2825_v11 = vpop.f32.mrb[80].mxu0 }
 0x3ee   : > { %v2827_v1 = vpop.f32.mrb[81].mxu0  ;;  %v3663_v55 = vmax.f32 %v2825_v11, 0.0 }
 0x3ef   : > { %v2321_v10 = vpop.f32.mrb[76].mxu1  ;;  %v3664_v5 = vmax.f32 %v2827_v1, 0.0 }
 0x3f0   : > { %2346 = vst [vmem:[#allocation2 + $0x70] sm:$0xff] %v2321_v10  ;;  %v2323_v48 = vpop.f32.mrb[77].mxu1 }
 0x3f1   : > { %v2831_v54 = vpop.f32.mrb[82].mxu0  ;;  %2347 = vst [vmem:[#allocation2 + $0x78] sm:$0xff] %v2323_v48 }
 0x3f2   : > { %v3679_v60 = vmax.f32 %v2831_v54, 0.0  ;;  %v2833_v6 = vpop.f32.mrb[83].mxu0 }
 0x3f3   : > { %v3680_v52 = vmax.f32 %v2833_v6, 0.0 }
 0x3f4   : > { %v12635_v46 = vpack.c.bf16 %v3679_v60, %v3663_v55 }
 0x3f5   : > { %v2837_v33 = vpop.f32.mrb[84].mxu0  ;;  %v12633_v14 = vpack.c.bf16 %v3680_v52, %v3664_v5 }
 0x3f6   : > { %v2839_v44 = vpop.f32.mrb[85].mxu0  ;;  %v3695_v59 = vmax.f32 %v2837_v33, 0.0 }
 0x3f7   : > { %12634 = vmatprep.subr.bf16.mxu0 %v12633_v14  ;;  %v3696_v61 = vmax.f32 %v2839_v44, 0.0 }
 0x3f8   : > { %12636 = vmatpush1.bf16.msra.mxu0 %v12635_v46 }
 0x3f9   : > { %v2843_v45 = vpop.f32.mrb[86].mxu0 }
 0x3fa   : > { %v3711_v42 = vmax.f32 %v2843_v45, 0.0  ;;  %v2845_v50 = vpop.f32.mrb[87].mxu0 }
 0x3fb   : > { %v3712_v63 = vmax.f32 %v2845_v50, 0.0 }
 0x3fc   : > { %v12639_v0 = vpack.c.bf16 %v3711_v42, %v3695_v59 }
 0x3fd   : > { %v2849_v23 = vpop.f32.mrb[88].mxu0  ;;  %v12637_v7 = vpack.c.bf16 %v3712_v63, %v3696_v61  ;;  %v2327_v62 = vpop.f32.mrb[78].mxu1 }
 0x3fe   : > { %v2851_v20 = vpop.f32.mrb[89].mxu0  ;;  %2362 = vst [vmem:[#allocation2 + $0x2f0] sm:$0xff] %v2327_v62  ;;  %v2329_v9 = vpop.f32.mrb[79].mxu1  ;;  %v3727_v13 = vmax.f32 %v2849_v23, 0.0 }
 0x3ff   : > { %12638 = vmatprep.subr.bf16.mxu0 %v12637_v7  ;;  %2363 = vst [vmem:[#allocation2 + $0x2f8] sm:$0xff] %v2329_v9  ;;  %v3728_v17 = vmax.f32 %v2851_v20, 0.0  ;;  %v16492_v7 = vld [vmem:[#allocation9] sm:$0xff] }
 0x400   : > { %12640 = vmatpush1.bf16.msra.mxu0 %v12639_v0 }
 0x402   : > { %v2855_v32 = vpop.f32.mrb[90].mxu0  ;;  %v2938_v53 = vpop.f32.mrb[80].mxu1 }
 0x403   : > { %v3743_v37 = vmax.f32 %v2855_v32, 0.0  ;;  %v2857_v18 = vpop.f32.mrb[91].mxu0  ;;  %v2940_v25 = vpop.f32.mrb[81].mxu1  ;;  %v3665_v26 = vmax.f32 %v2938_v53, 0.0 }
 0x404   : > { %v3744_v24 = vmax.f32 %v2857_v18, 0.0  ;;  %v3666_v49 = vmax.f32 %v2940_v25, 0.0  ;;  %v16501_v25 = vld [vmem:[#allocation9 + $0x8] sm:$0xff] }
 0x405   : > { %v12643_v58 = vpack.c.bf16 %v3743_v37, %v3727_v13 }
 0x406   : > { %v2861_v19 = vpop.f32.mrb[92].mxu0  ;;  %v12641_v31 = vpack.c.bf16 %v3744_v24, %v3728_v17  ;;  %v2944_v16 = vpop.f32.mrb[82].mxu1 }
 0x407   : > { %v2863_v22 = vpop.f32.mrb[93].mxu0  ;;  %v3681_v34 = vmax.f32 %v2944_v16, 0.0  ;;  %v2946_v39 = vpop.f32.mrb[83].mxu1  ;;  %v3759_v36 = vmax.f32 %v2861_v19, 0.0 }
 0x408   : > { %12642 = vmatprep.subr.bf16.mxu0 %v12641_v31  ;;  %v3682_v40 = vmax.f32 %v2946_v39, 0.0  ;;  %v3760_v8 = vmax.f32 %v2863_v22, 0.0 }
 0x409   : > { %12644 = vmatpush1.bf16.msra.mxu0 %v12643_v58  ;;  %v12651_v56 = vpack.c.bf16 %v3681_v34, %v3665_v26 }
 0x40a   : > { %v2867_v30 = vpop.f32.mrb[94].mxu0  ;;  %v2950_v51 = vpop.f32.mrb[84].mxu1  ;;  %v12649_v43 = vpack.c.bf16 %v3682_v40, %v3666_v49  ;;  %v13936_v49 = vunpack.i.h.bf16 %v16445_v2 }
 0x40b   : > { %v3775_v27 = vmax.f32 %v2867_v30, 0.0  ;;  %v2869_v12 = vpop.f32.mrb[95].mxu0  ;;  %v2952_v11 = vpop.f32.mrb[85].mxu1  ;;  %v3697_v55 = vmax.f32 %v2950_v51, 0.0 }
 0x40c   : > { %v3776_v1 = vmax.f32 %v2869_v12, 0.0  ;;  %12650 = vmatprep.subr.bf16.mxu1 %v12649_v43  ;;  %v3698_v54 = vmax.f32 %v2952_v11, 0.0 }
 0x40d   : > { %v12647_v10 = vpack.c.bf16 %v3775_v27, %v3759_v36  ;;  %12652 = vmatpush1.bf16.msra.mxu1 %v12651_v56  ;;  %v16488_v33 = vpop.permute.xlu1 %13948 }
 0x40e   : > { %v12645_v48 = vpack.c.bf16 %v3776_v1, %v3760_v8  ;;  %v3051_v5 = vpop.f32.mrb[96].mxu0  ;;  %v2956_v60 = vpop.f32.mrb[86].mxu1 }
 0x40f   : > { %v3053_v6 = vpop.f32.mrb[97].mxu0  ;;  %v3713_v52 = vmax.f32 %v2956_v60, 0.0  ;;  %v2958_v46 = vpop.f32.mrb[87].mxu1  ;;  %v3667_v44 = vmax.f32 %v3051_v5, 0.0 }
 0x410   : > { %12646 = vmatprep.subr.bf16.mxu0 %v12645_v48  ;;  %v3714_v14 = vmax.f32 %v2958_v46, 0.0  ;;  %v3668_v61 = vmax.f32 %v3053_v6, 0.0 }
 0x411   : > { %12648 = vmatpush1.bf16.msra.mxu0 %v12647_v10  ;;  %v12655_v59 = vpack.c.bf16 %v3713_v52, %v3697_v55  ;;  %v4515_v55 = vsel %vm322_vm1, %v13935_v21, %v13936_v49 }
 0x412   : > { %v3057_v45 = vpop.f32.mrb[98].mxu0  ;;  %v2962_v42 = vpop.f32.mrb[88].mxu1  ;;  %v12653_v50 = vpack.c.bf16 %v3714_v14, %v3698_v54 }
 0x413   : > { %v16490_v63 = vpop.permute.xlu0 %13943  ;;  %v3683_v0 = vmax.f32 %v3057_v45, 0.0  ;;  %v3059_v23 = vpop.f32.mrb[99].mxu0  ;;  %v3729_v18 = vmax.f32 %v2962_v42, 0.0 }
 0x414   : > { %11980 = vmatmul.mubr.msk.f32.vlgmr.msra.gmra.mrb[144].mxu0 %vm1709_vm4, %v16492_v7  ;;  %v3684_v62 = vmax.f32 %v3059_v23, 0.0  ;;  %12654 = vmatprep.subr.bf16.mxu1 %v12653_v50  ;;  %v2964_v20 = vpop.f32.mrb[89].mxu1 }
 0x415   : > { %3861 = vmatprep.mubr.f32.mxu0 %v14704_v47  ;;  %v12667_v9 = vpack.c.bf16 %v3683_v0, %v3667_v44  ;;  %12656 = vmatpush1.bf16.msra.mxu1 %v12655_v59  ;;  %v3730_v24 = vmax.f32 %v2964_v20, 0.0 }
 0x416   : > { %v16497_v13 = vpop.permute.xlu1 %13958  ;;  %v3063_v17 = vpop.f32.mrb[100].mxu0  ;;  %v12665_v32 = vpack.c.bf16 %v3684_v62, %v3668_v61 }
 0x417   : > { %v16499_v53 = vpop.permute.xlu0 %13953  ;;  %v3065_v37 = vpop.f32.mrb[101].mxu0  ;;  %v3699_v26 = vmax.f32 %v3063_v17, 0.0 }
 0x418   : > { %11981 = vmatmul.mubr.msk.f32.gmra.mrb[146].mxu0 %vm1709_vm4, %v16501_v25  ;;  %12666 = vmatprep.subr.bf16.mxu0 %v12665_v32  ;;  %v2968_v58 = vpop.f32.mrb[90].mxu1  ;;  %v3700_v22 = vmax.f32 %v3065_v37, 0.0 }
 0x419   : > { %12668 = vmatpush1.bf16.msra.mxu0 %v12667_v9  ;;  %4009 = vmatprep.mubr.f32.mxu0 %v14704_v47  ;;  %v3745_v19 = vmax.f32 %v2968_v58, 0.0  ;;  %v2970_v31 = vpop.f32.mrb[91].mxu1 }
 0x41a   : > { %v4542_v16 = vpop.permute.xlu1 %4541  ;;  %v3069_v34 = vpop.f32.mrb[102].mxu0  ;;  %v3746_v39 = vmax.f32 %v2970_v31, 0.0  ;;  %v16533_v31 = vld [vmem:[%s14907_s26 + $0x190] sm:$0xff] }
 0x41b   : > { %v16507_v40 = vpop.permute.xlu0 %13963  ;;  %v4565_v36 = vsel %vm373_vm0, %v16474_v38, %v4542_v16  ;;  %v3715_v56 = vmax.f32 %v3069_v34, 0.0  ;;  %v3071_v8 = vpop.f32.mrb[103].mxu0  ;;  %v12659_v30 = vpack.c.bf16 %v3745_v19, %v3729_v18 }
 0x41c   : > { %v13966_v51 = vunpack.i.h.bf16 %v16507_v40  ;;  %v13965_v43 = vunpack.i.l.bf16 %v16507_v40  ;;  %4674 = vrot.lane.b32.xlu0 %v4565_v36, %s14703_s12  ;;  %v3716_v27 = vmax.f32 %v3071_v8, 0.0  ;;  %v2974_v12 = vpop.f32.mrb[92].mxu1  ;;  %v12657_v11 = vpack.c.bf16 %v3746_v39, %v3730_v24 }
 0x41d   : > { %v12671_v1 = vpack.c.bf16 %v3715_v56, %v3699_v26  ;;  %v2976_v10 = vpop.f32.mrb[93].mxu1  ;;  %v3761_v46 = vmax.f32 %v2974_v12, 0.0 }
 0x41e   : > { %v4516_v38 = vsel %vm322_vm1, %v13936_v49, %v13965_v43  ;;  %v16518_v48 = vpop.permute.xlu1 %4662  ;;  %v3075_v5 = vpop.f32.mrb[104].mxu0  ;;  %v12669_v54 = vpack.c.bf16 %v3716_v27, %v3700_v22  ;;  %12658 = vmatprep.subr.bf16.mxu1 %v12657_v11  ;;  %v4517_v14 = vsel %vm322_vm1, %v13965_v43, %v13966_v51  ;;  %v3762_v2 = vmax.f32 %v2976_v10, 0.0 }
 0x41f   : > { %v16520_v60 = vpop.permute.xlu0 %13968  ;;  %v14017_v6 = vpack.i.bf16 %v4516_v38, %v4515_v55  ;;  %v3077_v52 = vpop.f32.mrb[105].mxu0  ;;  %12660 = vmatpush1.bf16.msra.mxu1 %v12659_v30  ;;  %v3731_v44 = vmax.f32 %v3075_v5, 0.0  ;;  %v14022_v62 = vpack.i.bf16 %v4517_v14, %v16374_v15 }
 0x420   : > { %12670 = vmatprep.subr.bf16.mxu0 %v12669_v54  ;;  %v2980_v21 = vpop.f32.mrb[94].mxu1  ;;  %v3732_v42 = vmax.f32 %v3077_v52, 0.0 }
 0x421   : > { %14018 = vrot.lane.b32.xlu1 %v14017_v6, %s14703_s12  ;;  %12672 = vmatpush1.bf16.msra.mxu0 %v12671_v1  ;;  %v3777_v59 = vmax.f32 %v2980_v21, 0.0  ;;  %v2982_v61 = vpop.f32.mrb[95].mxu1 }
 0x422   : > { %v16526_v45 = vpop.permute.xlu1 %13973  ;;  %v3081_v50 = vpop.f32.mrb[106].mxu0  ;;  %v3778_v0 = vmax.f32 %v2982_v61, 0.0 }
 0x423   : > { %v4544_v23 = vpop.permute.xlu0 %4543  ;;  %v3747_v20 = vmax.f32 %v3081_v50, 0.0  ;;  %v3083_v9 = vpop.f32.mrb[107].mxu0  ;;  %v12663_v17 = vpack.c.bf16 %v3777_v59, %v3761_v46  ;;  %v4458_v59 = vld [vmem:[%s14907_s26 + $0x198] sm:$0xff] }
 0x424   : > { %v4566_v32 = vsel %vm373_vm0, %v4542_v16, %v4544_v23  ;;  %v3748_v37 = vmax.f32 %v3083_v9, 0.0  ;;  %v3164_v18 = vpop.f32.mrb[96].mxu1  ;;  %v12661_v24 = vpack.c.bf16 %v3778_v0, %v3762_v2 }
 0x425   : > { %14023 = vrot.lane.b32.xlu1 %v14022_v62, %s14703_s12  ;;  %4676 = vrot.lane.b32.xlu0 %v4566_v32, %s14703_s12  ;;  %v12675_v58 = vpack.c.bf16 %v3747_v20, %v3731_v44  ;;  %v3166_v26 = vpop.f32.mrb[97].mxu1  ;;  %v3669_v39 = vmax.f32 %v3164_v18, 0.0  ;;  %v14032_v62 = vpack.i.bf16 %v16437_v29, %v16416_v4 }
 0x426   : > { %v4546_v19 = vpop.permute.xlu1 %4545  ;;  %v3087_v49 = vpop.f32.mrb[108].mxu0  ;;  %v12673_v22 = vpack.c.bf16 %v3748_v37, %v3732_v42  ;;  %12662 = vmatprep.subr.bf16.mxu1 %v12661_v24  ;;  %v3670_v36 = vmax.f32 %v3166_v26, 0.0 }
 0x427   : > { %v16535_v15 = vpop.permute.xlu0 %13978  ;;  %v4567_v34 = vsel %vm373_vm0, %v4544_v23, %v4546_v19  ;;  %v3089_v16 = vpop.f32.mrb[109].mxu0  ;;  %12664 = vmatpush1.bf16.msra.mxu1 %v12663_v17  ;;  %v3763_v8 = vmax.f32 %v3087_v49, 0.0 }
 0x428   : > { %12674 = vmatprep.subr.bf16.mxu0 %v12673_v22  ;;  %v3170_v56 = vpop.f32.mrb[98].mxu1  ;;  %v3764_v12 = vmax.f32 %v3089_v16, 0.0 }
 0x429   : > { %4577 = vrot.lane.b32.xlu1 %v16533_v31, %s14701_s22  ;;  %4678 = vrot.lane.b32.xlu0 %v4567_v34, %s14703_s12  ;;  %v3685_v30 = vmax.f32 %v3170_v56, 0.0  ;;  %v3172_v43 = vpop.f32.mrb[99].mxu1 }
 0x42a   : > { %v16541_v27 = vpop.permute.xlu1 %4664  ;;  %v3093_v11 = vpop.f32.mrb[110].mxu0  ;;  %12676 = vmatpush1.bf16.msra.mxu0 %v12675_v58  ;;  %v3686_v1 = vmax.f32 %v3172_v43, 0.0  ;;  %11982 = vmatmul.mubr.msk.f32.vlgmr.msra.gmra.mrb[144].mxu1 %vm1709_vm4, %v16492_v7 }
 0x42b   : > { %v16545_v10 = vpop.permute.xlu0 %4499  ;;  %v3779_v55 = vmax.f32 %v3093_v11, 0.0  ;;  %v3095_v38 = vpop.f32.mrb[111].mxu0  ;;  %v12683_v5 = vpack.c.bf16 %v3685_v30, %v3669_v39  ;;  %3938 = vmatprep.mubr.f32.mxu1 %v14704_v47 }
 0x42c   : > { %v4518_v54 = vsel %vm322_vm1, %v13966_v51, %v16545_v10  ;;  %v3780_v6 = vmax.f32 %v3095_v38, 0.0  ;;  %v3176_v52 = vpop.f32.mrb[100].mxu1  ;;  %v12681_v46 = vpack.c.bf16 %v3686_v1, %v3670_v36 }
 0x42d   : > { %v14027_v14 = vpack.i.bf16 %v4518_v54, %v16377_v28  ;;  %4580 = vrot.lane.b32.xlu1 %v16533_v31, %s14702_s24  ;;  %v12679_v2 = vpack.c.bf16 %v3779_v55, %v3763_v8  ;;  %v3178_v21 = vpop.f32.mrb[101].mxu1  ;;  %v3701_v28 = vmax.f32 %v3176_v52, 0.0 }
 0x42e   : > { %v16555_v44 = vpop.permute.xlu1 %4547  ;;  %v3277_v61 = vpop.f32.mrb[112].mxu0  ;;  %v12677_v42 = vpack.c.bf16 %v3780_v6, %v3764_v12  ;;  %12682 = vmatprep.subr.bf16.mxu1 %v12681_v46  ;;  %11983 = vmatmul.mubr.msk.f32.gmra.mrb[146].mxu1 %vm1709_vm4, %v16501_v25  ;;  %v3702_v0 = vmax.f32 %v3178_v21, 0.0 }
 0x42f   : > { %v16560_v40 = vpop.permute.xlu0 %4710  ;;  %14028 = vrot.lane.b32.xlu0 %v14027_v14, %s14703_s12  ;;  %v3279_v51 = vpop.f32.mrb[113].mxu0  ;;  %12684 = vmatpush1.bf16.msra.mxu1 %v12683_v5  ;;  %v4568_v50 = vsel %vm373_vm0, %v4546_v19, %v16555_v44  ;;  %v3671_v20 = vmax.f32 %v3277_v61, 0.0 }
 0x430   : > { %12678 = vmatprep.subr.bf16.mxu0 %v12677_v42  ;;  %v3182_v23 = vpop.f32.mrb[102].mxu1  ;;  %4086 = vmatprep.mubr.f32.mxu1 %v14704_v47  ;;  %v3672_v37 = vmax.f32 %v3279_v51, 0.0 }
 0x431   : > { %4584 = vrot.lane.b32.xlu1 %v4458_v59, %s14701_s22  ;;  %12680 = vmatpush1.bf16.msra.mxu0 %v12679_v2  ;;  %v3717_v9 = vmax.f32 %v3182_v23, 0.0  ;;  %v3184_v17 = vpop.f32.mrb[103].mxu1 }
 0x432   : > { %v16569_v32 = vpop.permute.xlu1 %13988  ;;  %v3283_v18 = vpop.f32.mrb[114].mxu0  ;;  %v3718_v24 = vmax.f32 %v3184_v17, 0.0 }
 0x433   : > { %v16571_v58 = vpop.permute.xlu0 %13983  ;;  %4680 = vrot.lane.b32.xlu0 %v4568_v50, %s14703_s12  ;;  %v3687_v26 = vmax.f32 %v3283_v18, 0.0  ;;  %v3285_v19 = vpop.f32.mrb[115].mxu0  ;;  %v12687_v49 = vpack.c.bf16 %v3717_v9, %v3701_v28 }
 0x434   : > { %v3688_v22 = vmax.f32 %v3285_v19, 0.0  ;;  %11984 = vmatmul.mubr.msk.f32.vlgmr.msra.gmra.mrb[148].mxu0 %vm1709_vm4, %v16492_v7  ;;  %v3188_v4 = vpop.f32.mrb[104].mxu1  ;;  %v12685_v29 = vpack.c.bf16 %v3718_v24, %v3702_v0 }
 0x435   : > { %14033 = vrot.lane.b32.xlu1 %v14032_v62, %s14703_s12  ;;  %v12699_v34 = vpack.c.bf16 %v3687_v26, %v3671_v20  ;;  %4015 = vmatprep.mubr.f32.mxu0 %v14704_v47  ;;  %v3190_v16 = vpop.f32.mrb[105].mxu1  ;;  %v3733_v43 = vmax.f32 %v3188_v4, 0.0 }
 0x436   : > { %v16578_v39 = vpop.permute.xlu1 %13993  ;;  %v3289_v36 = vpop.f32.mrb[116].mxu0  ;;  %v12697_v56 = vpack.c.bf16 %v3688_v22, %v3672_v37  ;;  %12686 = vmatprep.subr.bf16.mxu1 %v12685_v29  ;;  %v3734_v12 = vmax.f32 %v3190_v16, 0.0 }
 0x437   : > { %v16580_v8 = vpop.permute.xlu0 %4666  ;;  %v3291_v30 = vpop.f32.mrb[117].mxu0  ;;  %12688 = vmatpush1.bf16.msra.mxu1 %v12687_v49  ;;  %v3703_v1 = vmax.f32 %v3289_v36, 0.0 }
 0x438   : > { %12698 = vmatprep.subr.bf16.mxu0 %v12697_v56  ;;  %11985 = vmatmul.mubr.msk.f32.gmra.mrb[150].mxu0 %vm1709_vm4, %v16501_v25  ;;  %v3194_v11 = vpop.f32.mrb[106].mxu1  ;;  %v3704_v54 = vmax.f32 %v3291_v30, 0.0 }
 0x439   : > { %12700 = vmatpush1.bf16.msra.mxu0 %v12699_v34  ;;  %4163 = vmatprep.mubr.f32.mxu0 %v14704_v47  ;;  %v3749_v55 = vmax.f32 %v3194_v11, 0.0  ;;  %v3196_v38 = vpop.f32.mrb[107].mxu1 }
 0x43a   : > { %v16585_v5 = vpop.permute.xlu1 %13998  ;;  %v3295_v6 = vpop.f32.mrb[118].mxu0  ;;  %v3750_v52 = vmax.f32 %v3196_v38, 0.0 }
 0x43b   : > { %v14001_v46 = vunpack.i.h.bf16 %v16585_v5  ;;  %v14000_v14 = vunpack.i.l.bf16 %v16585_v5  ;;  %v16589_v2 = vpop.permute.xlu0 %4668  ;;  %v3719_v21 = vmax.f32 %v3295_v6, 0.0  ;;  %v3297_v59 = vpop.f32.mrb[119].mxu0  ;;  %v12691_v61 = vpack.c.bf16 %v3749_v55, %v3733_v43 }
 0x43c   : > { %v3720_v42 = vmax.f32 %v3297_v59, 0.0  ;;  %v3200_v51 = vpop.f32.mrb[108].mxu1  ;;  %v12689_v28 = vpack.c.bf16 %v3750_v52, %v3734_v12 }
 0x43d   : > { %v4519_v50 = vsel %vm322_vm1, %v16545_v10, %v14000_v14  ;;  %v4520_v0 = vsel %vm322_vm1, %v14000_v14, %v14001_v46  ;;  %v12703_v23 = vpack.c.bf16 %v3719_v21, %v3703_v1  ;;  %v3202_v62 = vpop.f32.mrb[109].mxu1  ;;  %v3765_v26 = vmax.f32 %v3200_v51, 0.0 }
 0x43e   : > { %v14037_v20 = vpack.i.bf16 %v4520_v0, %v4519_v50  ;;  %v3301_v9 = vpop.f32.mrb[120].mxu0  ;;  %v12701_v17 = vpack.c.bf16 %v3720_v42, %v3704_v54  ;;  %v16596_v37 = vpop.permute.xlu1 %4670  ;;  %12690 = vmatprep.subr.bf16.mxu1 %v12689_v28  ;;  %v3766_v19 = vmax.f32 %v3202_v62, 0.0 }
 0x43f   : > { %v4550_v18 = vpop.permute.xlu0 %4549  ;;  %v3303_v24 = vpop.f32.mrb[121].mxu0  ;;  %12692 = vmatpush1.bf16.msra.mxu1 %v12691_v61  ;;  %v3735_v22 = vmax.f32 %v3301_v9, 0.0 }
 0x440   : > { %14038 = vrot.lane.b32.xlu0 %v14037_v20, %s14703_s12  ;;  %v4569_v10 = vsel %vm373_vm0, %v16555_v44, %v4550_v18  ;;  %12702 = vmatprep.subr.bf16.mxu0 %v12701_v17  ;;  %v3206_v49 = vpop.f32.mrb[110].mxu1  ;;  %v3736_v34 = vmax.f32 %v3303_v24, 0.0 }
 0x441   : > { %4682 = vrot.lane.b32.xlu1 %v4569_v10, %s14703_s12  ;;  %12704 = vmatpush1.bf16.msra.mxu0 %v12703_v23  ;;  %v3781_v4 = vmax.f32 %v3206_v49, 0.0  ;;  %v3208_v29 = vpop.f32.mrb[111].mxu1 }
 0x442   : > { %v3307_v16 = vpop.f32.mrb[122].mxu0  ;;  %v16602_v36 = vpop.permute.xlu1 %14003  ;;  %v3782_v56 = vmax.f32 %v3208_v29, 0.0 }
 0x443   : > { %v3751_v30 = vmax.f32 %v3307_v16, 0.0  ;;  %v3309_v43 = vpop.f32.mrb[123].mxu0  ;;  %v4552_v12 = vpop.permute.xlu0 %4551  ;;  %v12695_v11 = vpack.c.bf16 %v3781_v4, %v3765_v26 }
 0x444   : > { %v3752_v1 = vmax.f32 %v3309_v43, 0.0  ;;  %4618 = vrot.lane.b32.xlu0 %v16442_v35, %s14703_s12  ;;  %v4570_v44 = vsel %vm373_vm0, %v4550_v18, %v4552_v12  ;;  %v3390_v55 = vpop.f32.mrb[112].mxu1  ;;  %v12693_v38 = vpack.c.bf16 %v3782_v56, %v3766_v19 }
 0x445   : > { %v12707_v54 = vpack.c.bf16 %v3751_v30, %v3735_v22  ;;  %4684 = vrot.lane.b32.xlu1 %v4570_v44, %s14703_s12  ;;  %v3392_v6 = vpop.f32.mrb[113].mxu1  ;;  %v3673_v51 = vmax.f32 %v3390_v55, 0.0 }
 0x446   : > { %v3313_v52 = vpop.f32.mrb[124].mxu0  ;;  %v12705_v14 = vpack.c.bf16 %v3752_v1, %v3736_v34  ;;  %v4554_v21 = vpop.permute.xlu1 %4553  ;;  %12694 = vmatprep.subr.bf16.mxu1 %v12693_v38  ;;  %v3674_v50 = vmax.f32 %v3392_v6, 0.0 }
 0x447   : > { %v3315_v59 = vpop.f32.mrb[125].mxu0  ;;  %v14009_v61 = vpop.permute.xlu0 %14008  ;;  %v4571_v42 = vsel %vm373_vm0, %v4552_v12, %v4554_v21  ;;  %12696 = vmatpush1.bf16.msra.mxu1 %v12695_v11  ;;  %v3767_v23 = vmax.f32 %v3313_v52, 0.0 }
 0x448   : > { %12706 = vmatprep.subr.bf16.mxu0 %v12705_v14  ;;  %v16609_v35 = vunpack.i.h.bf16 %v14009_v61  ;;  %v14010_v28 = vunpack.i.l.bf16 %v14009_v61  ;;  %v3396_v0 = vpop.f32.mrb[114].mxu1  ;;  %v3768_v9 = vmax.f32 %v3315_v59, 0.0 }
 0x449   : > { %12708 = vmatpush1.bf16.msra.mxu0 %v12707_v54  ;;  %4686 = vrot.lane.b32.xlu1 %v4571_v42, %s14703_s12  ;;  %v3689_v62 = vmax.f32 %v3396_v0, 0.0  ;;  %v3398_v20 = vpop.f32.mrb[115].mxu1 }
 0x44a   : > { %v3319_v17 = vpop.f32.mrb[126].mxu0  ;;  %v4575_v18 = vsel %vm322_vm1, %v14010_v28, %v16609_v35  ;;  %v4521_v24 = vsel %vm322_vm1, %v14001_v46, %v14010_v28  ;;  %v16617_v26 = vpop.permute.xlu1 %4555  ;;  %v3690_v10 = vmax.f32 %v3398_v20, 0.0  ;;  %11986 = vmatmul.mubr.msk.f32.vlgmr.msra.gmra.mrb[148].mxu1 %vm1709_vm4, %v16492_v7  ;;  %v14047_v43 = vpack.i.bf16 %v16609_v35, %v16467_v3 }
 0x44b   : > { %v3783_v19 = vmax.f32 %v3319_v17, 0.0  ;;  %v3321_v49 = vpop.f32.mrb[127].mxu0  ;;  %4652 = vrot.lane.b32.xlu0 %v4521_v24, %s14703_s12  ;;  %v14042_v22 = vpack.i.bf16 %v4575_v18, %v16464_v57  ;;  %v4572_v4 = vsel %vm373_vm0, %v4554_v21, %v16617_v26  ;;  %v12715_v29 = vpack.c.bf16 %v3689_v62, %v3673_v51  ;;  %4092 = vmatprep.mubr.f32.mxu1 %v14704_v47  ;;  %v3402_v46 = vpop.f32.mrb[116].mxu1 }
 0x44c   : > { %v3784_v5 = vmax.f32 %v3321_v49, 0.0  ;;  %v12713_v34 = vpack.c.bf16 %v3690_v10, %v3674_v50  ;;  %v3705_v56 = vmax.f32 %v3402_v46, 0.0  ;;  %v3404_v30 = vpop.f32.mrb[117].mxu1 }
 0x44d   : > { %v12711_v16 = vpack.c.bf16 %v3783_v19, %v3767_v23  ;;  %4688 = vrot.lane.b32.xlu1 %v4572_v4, %s14703_s12  ;;  %v3706_v44 = vmax.f32 %v3404_v30, 0.0 }
 0x44e   : > { %v3503_v12 = vpop.f32.mrb[128].mxu0  ;;  %v12709_v11 = vpack.c.bf16 %v3784_v5, %v3768_v9  ;;  %v3408_v57 = vpop.f32.mrb[118].mxu1  ;;  %12714 = vmatprep.subr.bf16.mxu1 %v12713_v34  ;;  %11987 = vmatmul.mubr.msk.f32.gmra.mrb[150].mxu1 %vm1709_vm4, %v16501_v25 }
 0x44f   : > { %v3505_v1 = vpop.f32.mrb[129].mxu0  ;;  %14043 = vrot.lane.b32.xlu0 %v14042_v22, %s14703_s12  ;;  %v3721_v55 = vmax.f32 %v3408_v57, 0.0  ;;  %12716 = vmatpush1.bf16.msra.mxu1 %v12715_v29  ;;  %v3410_v38 = vpop.f32.mrb[119].mxu1  ;;  %v3675_v54 = vmax.f32 %v3503_v12, 0.0 }
 0x450   : > { %12710 = vmatprep.subr.bf16.mxu0 %v12709_v11  ;;  %4240 = vmatprep.mubr.f32.mxu1 %v14704_v47  ;;  %v3722_v6 = vmax.f32 %v3410_v38, 0.0  ;;  %v3676_v52 = vmax.f32 %v3505_v1, 0.0 }
 0x451   : > { %12712 = vmatpush1.bf16.msra.mxu0 %v12711_v16  ;;  %v12719_v3 = vpack.c.bf16 %v3721_v55, %v3705_v56  ;;  %14048 = vrot.lane.b32.xlu1 %v14047_v43, %s14703_s12 }
 0x452   : > { %v3509_v14 = vpop.f32.mrb[130].mxu0  ;;  %v3414_v21 = vpop.f32.mrb[120].mxu1  ;;  %v12717_v51 = vpack.c.bf16 %v3722_v6, %v3706_v44 }
 0x453   : > { %v3691_v59 = vmax.f32 %v3509_v14, 0.0  ;;  %v3511_v61 = vpop.f32.mrb[131].mxu0  ;;  %v3416_v42 = vpop.f32.mrb[121].mxu1  ;;  %4654 = vrot.lane.b32.xlu0 %v14010_v28, %s14703_s12  ;;  %v3737_v23 = vmax.f32 %v3414_v21, 0.0 }
 0x454   : > { %v3692_v50 = vmax.f32 %v3511_v61, 0.0  ;;  %11988 = vmatmul.mubr.msk.f32.vlgmr.msra.gmra.mrb[152].mxu0 %vm1709_vm4, %v16492_v7  ;;  %12718 = vmatprep.subr.bf16.mxu1 %v12717_v51  ;;  %v3738_v9 = vmax.f32 %v3416_v42, 0.0 }
 0x455   : > { %v12731_v0 = vpack.c.bf16 %v3691_v59, %v3675_v54  ;;  %4169 = vmatprep.mubr.f32.mxu0 %v14704_v47  ;;  %12720 = vmatpush1.bf16.msra.mxu1 %v12719_v3 }
 0x456   : > { %v3515_v62 = vpop.f32.mrb[132].mxu0  ;;  %v12729_v20 = vpack.c.bf16 %v3692_v50, %v3676_v52  ;;  %v3420_v17 = vpop.f32.mrb[122].mxu1 }
 0x457   : > { %v3517_v18 = vpop.f32.mrb[133].mxu0  ;;  %v3753_v24 = vmax.f32 %v3420_v17, 0.0  ;;  %v3422_v10 = vpop.f32.mrb[123].mxu1  ;;  %v3707_v19 = vmax.f32 %v3515_v62, 0.0  ;;  %v13940_v62 = vunpack.i.l.bf16 %v16486_v41  ;;  %v13945_v17 = vunpack.i.l.bf16 %v16490_v63 }
 0x458   : > { %12730 = vmatprep.subr.bf16.mxu0 %v12729_v20  ;;  %11989 = vmatmul.mubr.msk.f32.gmra.mrb[154].mxu0 %vm1709_vm4, %v16501_v25  ;;  %v3754_v28 = vmax.f32 %v3422_v10, 0.0  ;;  %v3708_v22 = vmax.f32 %v3517_v18, 0.0 }
 0x459   : > { %12732 = vmatpush1.bf16.msra.mxu0 %v12731_v0  ;;  %4317 = vmatprep.mubr.f32.mxu0 %v14704_v47  ;;  %v12723_v49 = vpack.c.bf16 %v3753_v24, %v3737_v23  ;;  %v13941_v23 = vunpack.i.h.bf16 %v16486_v41 }
 0x45a   : > { %v3521_v4 = vpop.f32.mrb[134].mxu0  ;;  %v3426_v29 = vpop.f32.mrb[124].mxu1  ;;  %v12721_v5 = vpack.c.bf16 %v3754_v28, %v3738_v9  ;;  %v16644_v9 = vunpack.i.h.bf16 %v16490_v63 }
 0x45b   : > { %v3723_v46 = vmax.f32 %v3521_v4, 0.0  ;;  %v3523_v34 = vpop.f32.mrb[135].mxu0  ;;  %v3428_v16 = vpop.f32.mrb[125].mxu1  ;;  %v3769_v43 = vmax.f32 %v3426_v29, 0.0  ;;  %v4715_v41 = vsel %vm531_vm2, %v13940_v62, %v13941_v23  ;;  %v13960_v29 = vunpack.i.l.bf16 %v16497_v13 }
 0x45c   : > { %v3724_v56 = vmax.f32 %v3523_v34, 0.0  ;;  %12722 = vmatprep.subr.bf16.mxu1 %v12721_v5  ;;  %v3770_v57 = vmax.f32 %v3428_v16, 0.0  ;;  %v4731_v63 = vsel %vm531_vm2, %v13945_v17, %v16644_v9  ;;  %v13956_v5 = vunpack.i.h.bf16 %v16499_v53 }
 0x45d   : > { %v12735_v30 = vpack.c.bf16 %v3723_v46, %v3707_v19  ;;  %12724 = vmatpush1.bf16.msra.mxu1 %v12723_v49  ;;  %v13951_v49 = vunpack.i.h.bf16 %v16488_v33  ;;  %v13955_v46 = vunpack.i.l.bf16 %v16499_v53 }
 0x45e   : > { %v3527_v12 = vpop.f32.mrb[136].mxu0  ;;  %v12733_v11 = vpack.c.bf16 %v3724_v56, %v3708_v22  ;;  %v3432_v1 = vpop.f32.mrb[126].mxu1  ;;  %v13950_v22 = vunpack.i.l.bf16 %v16488_v33  ;;  %v13961_v56 = vunpack.i.h.bf16 %v16497_v13  ;;  %v4747_v53 = vsel %vm531_vm2, %v13956_v5, %v13960_v29 }
 0x45f   : > { %v3529_v44 = vpop.f32.mrb[137].mxu0  ;;  %v3785_v55 = vmax.f32 %v3432_v1, 0.0  ;;  %v3434_v38 = vpop.f32.mrb[127].mxu1  ;;  %v3739_v3 = vmax.f32 %v3527_v12, 0.0  ;;  %v13970_v12 = vunpack.i.l.bf16 %v16520_v60 }
 0x460   : > { %12734 = vmatprep.subr.bf16.mxu0 %v12733_v11  ;;  %v3786_v54 = vmax.f32 %v3434_v38, 0.0  ;;  %v3740_v52 = vmax.f32 %v3529_v44, 0.0  ;;  %v4714_v33 = vsel %vm531_vm2, %v13950_v22, %v13940_v62  ;;  %v16666_v11 = vsel %vm531_vm2, %v13941_v23, %v13955_v46 }
 0x461   : > { %12736 = vmatpush1.bf16.msra.mxu0 %v12735_v30  ;;  %v12727_v6 = vpack.c.bf16 %v3785_v55, %v3769_v43  ;;  %v4730_v30 = vsel %vm531_vm2, %v13951_v49, %v13945_v17  ;;  %v12761_v43 = vpack.c.bf16 %v4731_v63, %v4715_v41  ;;  %v4746_v1 = vsel %vm531_vm2, %v13961_v56, %v13956_v5 }
 0x462   : > { %v3533_v14 = vpop.f32.mrb[138].mxu0  ;;  %v12725_v21 = vpack.c.bf16 %v3786_v54, %v3770_v57  ;;  %v12763_v44 = vpack.c.bf16 %v4730_v30, %v4714_v33  ;;  %v13975_v55 = vunpack.i.l.bf16 %v16526_v45  ;;  %v12765_v38 = vpack.c.bf16 %v16666_v11, %v4747_v53 }
 0x463   : > { %v3755_v59 = vmax.f32 %v3533_v14, 0.0  ;;  %v3535_v61 = vpop.f32.mrb[139].mxu0  ;;  %v13980_v54 = vunpack.i.l.bf16 %v16535_v15  ;;  %v12767_v14 = vpack.c.bf16 %v4715_v41, %v4746_v1  ;;  %v13991_v63 = vunpack.i.h.bf16 %v16569_v32 }
 0x464   : > { %v3756_v42 = vmax.f32 %v3535_v61, 0.0  ;;  %12726 = vmatprep.subr.bf16.mxu1 %v12725_v21  ;;  %v13981_v61 = vunpack.i.h.bf16 %v16535_v15  ;;  %v13995_v5 = vunpack.i.l.bf16 %v16578_v39  ;;  %v16718_v33 = vsel %vm531_vm2, %v16518_v48, %v16541_v27 }
 0x465   : > { %v12739_v51 = vpack.c.bf16 %v3755_v59, %v3739_v3  ;;  %12728 = vmatpush1.bf16.msra.mxu1 %v12727_v6  ;;  %v16677_v3 = vsel %vm531_vm2, %v16644_v9, %v13970_v12 }
 0x466   : > { %v3539_v50 = vpop.f32.mrb[140].mxu0  ;;  %v12737_v0 = vpack.c.bf16 %v3756_v42, %v3740_v52  ;;  %v13971_v52 = vunpack.i.h.bf16 %v16520_v60  ;;  %v16685_v42 = vsel %vm531_vm2, %v13960_v29, %v16518_v48 }
 0x467   : > { %v3541_v20 = vpop.f32.mrb[141].mxu0  ;;  %v3771_v18 = vmax.f32 %v3539_v50, 0.0  ;;  %v12769_v23 = vpack.c.bf16 %v16685_v42, %v16677_v3 }
 0x468   : > { %12738 = vmatprep.subr.bf16.mxu0 %v12737_v0  ;;  %11990 = vmatmul.mubr.msk.f32.vlgmr.msra.gmra.mrb[152].mxu1 %vm1709_vm4, %v16492_v7  ;;  %v3772_v24 = vmax.f32 %v3541_v20, 0.0  ;;  %v4766_v0 = vsel %vm531_vm2, %v13975_v55, %v13960_v29  ;;  %v4763_v20 = vsel %vm531_vm2, %v13971_v52, %v16644_v9  ;;  %v13985_v9 = vunpack.i.l.bf16 %v16571_v58 }
 0x469   : > { %12740 = vmatpush1.bf16.msra.mxu0 %v12739_v51  ;;  %4246 = vmatprep.mubr.f32.mxu1 %v14704_v47  ;;  %v13986_v29 = vunpack.i.h.bf16 %v16571_v58 }
 0x46a   : > { %v3545_v10 = vpop.f32.mrb[142].mxu0 }
 0x46b   : > { %v3787_v28 = vmax.f32 %v3545_v10, 0.0  ;;  %v3547_v19 = vpop.f32.mrb[143].mxu0  ;;  %v12771_v10 = vpack.c.bf16 %v4766_v0, %v4763_v20 }
 0x46c   : > { %v3788_v4 = vmax.f32 %v3547_v19, 0.0  ;;  %11991 = vmatmul.mubr.msk.f32.gmra.mrb[154].mxu1 %vm1709_vm4, %v16501_v25 }
 0x46d   : > { %v12743_v34 = vpack.c.bf16 %v3787_v28, %v3771_v18  ;;  %4394 = vmatprep.mubr.f32.mxu1 %v14704_v47 }
 0x46e   : > { %v12741_v16 = vpack.c.bf16 %v3788_v4, %v3772_v24  ;;  %v4769_v24 = vsel %vm531_vm2, %v13981_v61, %v13970_v12 }
 0x46f   : > { %v12775_v49 = vpack.c.bf16 %v4769_v24, %v16666_v11 }
 0x470   : > { %12742 = vmatprep.subr.bf16.mxu0 %v12741_v16  ;;  %v13990_v16 = vunpack.i.l.bf16 %v16569_v32  ;;  %v16728_v32 = vsel %vm531_vm2, %v16580_v8, %v16589_v2 }
 0x471   : > { %12744 = vmatpush1.bf16.msra.mxu0 %v12743_v34 }
 0x472   : > { %12762 = vmatprep.subr.bf16.mxu0 %v12761_v43  ;;  %v3616_v57 = vpop.f32.mrb[128].mxu1  ;;  %v4735_v1 = vsel %vm531_vm2, %v13990_v16, %v13991_v63  ;;  %v16739_v55 = vsel %vm531_vm2, %v13980_v54, %v13990_v16 }
 0x473   : > { %v3618_v13 = vpop.f32.mrb[129].mxu1  ;;  %v3677_v6 = vmax.f32 %v3616_v57, 0.0  ;;  %v4719_v57 = vsel %vm531_vm2, %v13985_v9, %v13986_v29 }
 0x474   : > { %11992 = vmatmul.mubr.msk.f32.vlgmr.msra.gmra.mrb[156].mxu0 %vm1709_vm4, %v16492_v7  ;;  %v3678_v21 = vmax.f32 %v3618_v13, 0.0  ;;  %v13976_v7 = vunpack.i.h.bf16 %v16526_v45  ;;  %v16695_v45 = vsel %vm531_vm2, %v13970_v12, %v13980_v54  ;;  %v13996_v12 = vunpack.i.h.bf16 %v16578_v39 }
 0x475   : > { %12764 = vmatpush1.bf16.msra.mxu0 %v12763_v44  ;;  %4323 = vmatprep.mubr.f32.mxu0 %v14704_v47  ;;  %v4720_v44 = vsel %vm531_vm2, %v13986_v29, %v13995_v5  ;;  %v4772_v39 = vsel %vm531_vm2, %v16560_v40, %v16518_v48 }
 0x476   : > { %12766 = vmatprep.subr.bf16.mxu0 %v12765_v38  ;;  %v3622_v59 = vpop.f32.mrb[130].mxu1  ;;  %v16721_v43 = vsel %vm531_vm2, %v13976_v7, %v13985_v9  ;;  %v16741_v38 = vpack.c.bf16 %v4735_v1, %v4719_v57  ;;  %v12797_v48 = vpack.c.bf16 %v4720_v44, %v16728_v32  ;;  %v4736_v54 = vsel %vm531_vm2, %v13991_v63, %v13996_v12 }
 0x477   : > { %v3693_v51 = vmax.f32 %v3622_v59, 0.0  ;;  %v3624_v50 = vpop.f32.mrb[131].mxu1  ;;  %v14006_v59 = vunpack.i.h.bf16 %v16602_v36 }
 0x478   : > { %11993 = vmatmul.mubr.msk.f32.gmra.mrb[158].mxu0 %vm1709_vm4, %v16501_v25  ;;  %v3694_v60 = vmax.f32 %v3624_v50, 0.0  ;;  %v16702_v25 = vsel %vm531_vm2, %v13955_v46, %v13976_v7  ;;  %v14005_v7 = vunpack.i.l.bf16 %v16602_v36  ;;  %v16766_v50 = vsel %vm531_vm2, %v16541_v27, %v16580_v8  ;;  %v16919_v36 = vld [vmem:[%s14907_s26 + $0x1a0] sm:$0xff] }
 0x479   : > { %12768 = vmatpush1.bf16.msra.mxu0 %v12767_v14  ;;  %v12747_v62 = vpack.c.bf16 %v3693_v51, %v3677_v6  ;;  %4898 = vmatprep.mubr.f32.mxu0 %v14704_v47  ;;  %v16706_v19 = vpack.c.bf16 %v16695_v45, %v16702_v25  ;;  %v16745_v6 = vpack.c.bf16 %v16739_v55, %v16721_v43  ;;  %v16747_v14 = vld [vmem:[#allocation7] sm:$0xff] }
 0x47a   : > { %12770 = vmatprep.subr.bf16.mxu0 %v12769_v23  ;;  %v3628_v17 = vpop.f32.mrb[132].mxu1  ;;  %v12745_v18 = vpack.c.bf16 %v3694_v60, %v3678_v21  ;;  %v16757_v21 = vsel %vm531_vm2, %v16589_v2, %v16596_v37  ;;  %v12799_v2 = vpack.c.bf16 %v4719_v57, %v16766_v50  ;;  %v16769_v60 = vld [vmem:[#allocation7 + $0x8] sm:$0xff]  ;;  %v16780_v8 = vsel %vm531_vm2, %v13995_v5, %v14005_v7 }
 0x47b   : > { %v3630_v28 = vpop.f32.mrb[133].mxu1  ;;  %v3709_v41 = vmax.f32 %v3628_v17, 0.0  ;;  %v16785_v24 = vsel %vm531_vm2, %v13996_v12, %v14006_v59 }
 0x47c   : > { %12746 = vmatprep.subr.bf16.mxu1 %v12745_v18  ;;  %v3710_v22 = vmax.f32 %v3630_v28, 0.0  ;;  %v16774_v18 = vpop.permute.xlu0 %4672 }
 0x47d   : > { %12772 = vmatpush1.bf16.msra.mxu0 %v12771_v10  ;;  %12748 = vmatpush1.bf16.msra.mxu1 %v12747_v62  ;;  %v12801_v62 = vpack.c.bf16 %v16757_v21, %v4736_v54  ;;  %v12803_v10 = vpack.c.bf16 %v16728_v32, %v4735_v1  ;;  %v16811_v12 = vsel %vm531_vm2, %v16596_v37, %v16774_v18 }
 0x47e   : > { %12774 = vmatprep.subr.bf16.mxu0 %v16706_v19  ;;  %v3634_v4 = vpop.f32.mrb[134].mxu1 }
 0x47f   : > { %v3725_v46 = vmax.f32 %v3634_v4, 0.0  ;;  %v3636_v34 = vpop.f32.mrb[135].mxu1 }
 0x480   : > { %v3726_v56 = vmax.f32 %v3636_v34, 0.0  ;;  %v16798_v5 = vpop.permute.xlu0 %14013 }
 0x481   : > { %12776 = vmatpush1.bf16.msra.mxu0 %v12775_v49  ;;  %v12751_v30 = vpack.c.bf16 %v3725_v46, %v3709_v41  ;;  %v16788_v41 = vld [vmem:[#allocation7 + $0x10] sm:$0xff]  ;;  %v16800_v46 = vpack.c.bf16 %v4736_v54, %v4720_v44  ;;  %v14016_v16 = vunpack.i.h.bf16 %v16798_v5  ;;  %v12783_v54 = vpack.c.bf16 %v16702_v25, %v16685_v42  ;;  %v6515_v42 = vld [vmem:[%s14907_s26 + $0x188] sm:$0xff] }
 0x482   : > { %4850 = vmatprep.subr.mxu0 %v16718_v33  ;;  %v3640_v58 = vpop.f32.mrb[136].mxu1  ;;  %v12749_v53 = vpack.c.bf16 %v3726_v56, %v3710_v22  ;;  %v16794_v22 = vpack.c.bf16 %v16785_v24, %v16780_v8  ;;  %v16803_v56 = vld [vmem:[#allocation7 + $0x18] sm:$0xff]  ;;  %v6516_v25 = vld [vmem:[%s14907_s26 + $0x190] sm:$0xff] }
 0x483   : > { %v3642_v13 = vpop.f32.mrb[137].mxu1  ;;  %v3741_v52 = vmax.f32 %v3640_v58, 0.0 }
 0x484   : > { %12750 = vmatprep.subr.bf16.mxu1 %v12749_v53  ;;  %v3742_v15 = vmax.f32 %v3642_v13, 0.0  ;;  %v14015_v53 = vunpack.i.l.bf16 %v16798_v5  ;;  %v16822_v13 = vld [vmem:[#allocation7 + $0x20] sm:$0xff] }
 0x485   : > { %4851 = vmatpush1.msra.mxu0 %v4772_v39  ;;  %12752 = vmatpush1.bf16.msra.mxu1 %v12751_v30 }
 0x486   : > { %11996 = vmatmul.mubr.msk.f32.vlgmr.msra.gmra.mrb[160].mxu0 %vm652_vm3, %v16747_v14  ;;  %12794 = vmatprep.subr.bf16.mxu0 %v16741_v38  ;;  %v3646_v40 = vpop.f32.mrb[138].mxu1  ;;  %v16830_v37 = vsel %vm531_vm2, %v14015_v53, %v14016_v16 }
 0x487   : > { %12796 = vmatpush1.bf16.msra.mxu0 %v16745_v6  ;;  %4904 = vmatprep.mubr.f32.mxu0 %v14704_v47  ;;  %v3757_v61 = vmax.f32 %v3646_v40, 0.0  ;;  %v3648_v51 = vpop.f32.mrb[139].mxu1  ;;  %v12781_v40 = vpack.c.bf16 %v16721_v43, %v16718_v33 }
 0x488   : > { %12798 = vmatprep.subr.bf16.mxu0 %v12797_v48  ;;  %v3758_v0 = vmax.f32 %v3648_v51, 0.0  ;;  %v12785_v51 = vpack.c.bf16 %v16766_v50, %v16739_v55 }
 0x489   : > { %v12755_v23 = vpack.c.bf16 %v3757_v61, %v3741_v52  ;;  %v12779_v52 = vpack.c.bf16 %v16677_v3, %v16666_v11  ;;  %v16851_v3 = vld [vmem:[#allocation7 + $0x28] sm:$0xff] }
 0x48a   : > { %11997 = vmatmul.mubr.msk.f32.gmra.mrb[162].mxu0 %vm652_vm3, %v16769_v60  ;;  %v3652_v20 = vpop.f32.mrb[140].mxu1  ;;  %v12753_v17 = vpack.c.bf16 %v3758_v0, %v3742_v15  ;;  %v14494_v15 = vld [vmem:[#allocation9] sm:$0xff]  ;;  %v14496_v0 = vld [vmem:[#allocation9 + $0x8] sm:$0xff] }
 0x48b   : > { %12800 = vmatpush1.bf16.msra.mxu0 %v12799_v2  ;;  %4910 = vmatprep.mubr.f32.mxu0 %v14704_v47  ;;  %v3654_v27 = vpop.f32.mrb[141].mxu1  ;;  %v3773_v28 = vmax.f32 %v3652_v20, 0.0  ;;  %v16865_v2 = vld [vmem:[#allocation7 + $0x30] sm:$0xff] }
 0x48c   : > { %12802 = vmatprep.subr.bf16.mxu0 %v12801_v62  ;;  %12754 = vmatprep.subr.bf16.mxu1 %v12753_v17  ;;  %v3774_v9 = vmax.f32 %v3654_v27, 0.0  ;;  %v16882_v27 = vpack.i.bf16 %v6516_v25, %v6515_v42  ;;  %v17050_v42 = vld [vmem:[%s14907_s26 + $0x1c0] sm:$0xff] }
 0x48d   : > { %12756 = vmatpush1.bf16.msra.mxu1 %v12755_v23 }
 0x48e   : > { %11998 = vmatmul.mubr.msk.f32.gmra.mrb[164].mxu0 %vm652_vm3, %v16788_v41  ;;  %v3658_v49 = vpop.f32.mrb[142].mxu1  ;;  %v16820_v44 = vpop.permute.xlu0 %4674 }
 0x48f   : > { %12804 = vmatpush1.bf16.msra.mxu0 %v12803_v10  ;;  %v3789_v4 = vmax.f32 %v3658_v49, 0.0  ;;  %v3660_v63 = vpop.f32.mrb[143].mxu1  ;;  %4916 = vmatprep.mubr.f32.mxu0 %v14704_v47  ;;  %v16916_v49 = vld [vmem:[%s14907_s26 + $0x198] sm:$0xff] }
 0x490   : > { %12806 = vmatprep.subr.bf16.mxu0 %v16794_v22  ;;  %v3790_v29 = vmax.f32 %v3660_v63, 0.0 }
 0x491   : > { %v12759_v34 = vpack.c.bf16 %v3789_v4, %v3773_v28 }
 0x492   : > { %11999 = vmatmul.mubr.msk.f32.gmra.mrb[166].mxu0 %vm652_vm3, %v16803_v56  ;;  %v12757_v30 = vpack.c.bf16 %v3790_v29, %v3774_v9 }
 0x493   : > { %12808 = vmatpush1.bf16.msra.mxu0 %v16800_v46  ;;  %v16813_v58 = vpop.permute.xlu1 %14018  ;;  %4922 = vmatprep.mubr.f32.mxu0 %v14704_v47 }
 0x494   : > { %5076 = vmatprep.subr.mxu0 %v16811_v12  ;;  %v14021_v57 = vunpack.i.h.bf16 %v16813_v58  ;;  %v14020_v1 = vunpack.i.l.bf16 %v16813_v58  ;;  %12758 = vmatprep.subr.bf16.mxu1 %v12757_v30 }
 0x495   : > { %12760 = vmatpush1.bf16.msra.mxu1 %v12759_v34 }
 0x496   : > { %12000 = vmatmul.mubr.msk.f32.gmra.mrb[168].mxu0 %vm652_vm3, %v16822_v13  ;;  %12778 = vmatprep.subr.bf16.mxu1 %v16706_v19  ;;  %v16835_v39 = vsel %vm531_vm2, %v14020_v1, %v14021_v57 }
 0x497   : > { %5077 = vmatpush1.msra.mxu0 %v16757_v21  ;;  %v16840_v48 = vpop.permute.xlu1 %14023  ;;  %4928 = vmatprep.mubr.f32.mxu0 %v14704_v47  ;;  %v16845_v19 = vpack.c.bf16 %v16835_v39, %v16830_v37  ;;  %v4677_v11 = vpop.permute.xlu0 %4676 }
 0x498   : > { %11994 = vmatmul.mubr.msk.f32.vlgmr.msra.gmra.mrb[156].mxu1 %vm1709_vm4, %v14494_v15  ;;  %v14025_v23 = vunpack.i.l.bf16 %v16840_v48  ;;  %v16906_v28 = vsel %vm531_vm2, %v16820_v44, %v4677_v11 }
 0x499   : > { %12780 = vmatpush1.bf16.msra.mxu1 %v12779_v52  ;;  %12826 = vmatprep.subr.bf16.mxu0 %v16845_v19 }
 0x49a   : > { %12001 = vmatmul.mubr.msk.f32.gmra.mrb[170].mxu0 %vm652_vm3, %v16851_v3  ;;  %12782 = vmatprep.subr.bf16.mxu1 %v12781_v40  ;;  %v12819_v40 = vpack.c.bf16 %v16811_v12, %v16785_v24 }
 0x49b   : > { %v4578_v61 = vpop.permute.xlu1 %4577  ;;  %4934 = vmatprep.mubr.f32.mxu0 %v14704_v47  ;;  %4400 = vmatprep.mubr.f32.mxu1 %v14704_v47  ;;  %v16876_v62 = vpop.permute.xlu0 %4678 }
 0x49c   : > { %v4579_v43 = vsel %vm373_vm0, %v16617_v26, %v4578_v61  ;;  %11995 = vmatmul.mubr.msk.f32.gmra.mrb[158].mxu1 %vm1709_vm4, %v14496_v0  ;;  %v12787_v26 = vpack.c.bf16 %v16718_v33, %v16695_v45  ;;  %v16887_v45 = vsel %vm531_vm2, %v14006_v59, %v14020_v1  ;;  %v16889_v33 = vld [vmem:[#allocation7 + $0x38] sm:$0xff]  ;;  %v4722_v59 = vsel %vm531_vm2, %v14005_v7, %v14015_v53  ;;  %v6519_v1 = vld [vmem:[%s14907_s26 + $0x1a8] sm:$0xff] }
 0x49d   : > { %4700 = vrot.lane.b32.xlu0 %v4579_v43, %s14703_s12  ;;  %12784 = vmatpush1.bf16.msra.mxu1 %v12783_v54  ;;  %v16910_v9 = vpack.c.bf16 %v16887_v45, %v4722_v59  ;;  %v16924_v7 = vsel %vm531_vm2, %v16774_v18, %v16820_v44  ;;  %v14062_v18 = vpack.i.bf16 %v16919_v36, %v16916_v49  ;;  %v16980_v44 = vld [vmem:[%s14907_s26 + $0x1b0] sm:$0xff]  ;;  %v17047_v0 = vld [vmem:[%s14907_s26 + $0x1b8] sm:$0xff] }
 0x49e   : > { %12002 = vmatmul.mubr.msk.f32.gmra.mrb[172].mxu0 %vm652_vm3, %v16865_v2  ;;  %12786 = vmatprep.subr.bf16.mxu1 %v12785_v51  ;;  %v12813_v58 = vpack.c.bf16 %v4722_v59, %v16811_v12  ;;  %v12835_v53 = vpack.c.bf16 %v16906_v28, %v16835_v39  ;;  %v12817_v52 = vpack.c.bf16 %v16924_v7, %v16887_v45 }
 0x49f   : > { %v4581_v55 = vpop.permute.xlu1 %4580  ;;  %4940 = vmatprep.mubr.f32.mxu0 %v14704_v47  ;;  %5011 = vmatprep.mubr.f32.mxu1 %v14704_v47 }
 0x4a0   : > { %v4582_v20 = vsel %vm322_vm1, %v16609_v35, %v4581_v55  ;;  %v4724_v35 = vsel %vm531_vm2, %v14016_v16, %v14025_v23 }
 0x4a1   : > { %v14052_v17 = vpack.i.bf16 %v4582_v20, %v16533_v31  ;;  %4708 = vrot.lane.b32.xlu0 %v4581_v55, %s14703_s12  ;;  %12788 = vmatpush1.bf16.msra.mxu1 %v12787_v26  ;;  %v16902_v10 = vpop.permute.xlu0 %14028  ;;  %v12829_v63 = vpack.c.bf16 %v4724_v35, %v16906_v28  ;;  %v14077_v26 = vpack.i.bf16 %v17050_v42, %v17047_v0  ;;  %v6523_v20 = vld [vmem:[%s14907_s26 + $0x1c8] sm:$0xff] }
 0x4a2   : > { %12003 = vmatmul.mubr.msk.f32.gmra.mrb[174].mxu0 %vm652_vm3, %v16889_v33  ;;  %12790 = vmatprep.subr.bf16.mxu1 %v16741_v38  ;;  %v14026_v38 = vunpack.i.h.bf16 %v16840_v48  ;;  %v14031_v29 = vunpack.i.h.bf16 %v16902_v10  ;;  %v14030_v5 = vunpack.i.l.bf16 %v16902_v10  ;;  %v16997_v48 = vpack.i.bf16 %v16980_v44, %v6519_v1 }
 0x4a3   : > { %14053 = vrot.lane.b32.xlu1 %v14052_v17, %s14703_s12  ;;  %v4585_v31 = vpop.permute.xlu1 %4584  ;;  %5124 = vmatprep.mubr.f32.mxu0 %v14704_v47  ;;  %v17079_v17 = vld [vmem:[%s14907_s26 + $0x1d0] sm:$0xff] }
 0x4a4   : > { %v4586_v4 = vsel %vm373_vm0, %v4578_v61, %v4585_v31  ;;  %v4740_v34 = vsel %vm531_vm2, %v14021_v57, %v14026_v38  ;;  %v16964_v30 = vsel %vm531_vm2, %v14026_v38, %v14031_v29  ;;  %v17097_v38 = vpack.i.bf16 %v17079_v17, %v6523_v20 }
 0x4a5   : > { %12792 = vmatpush1.bf16.msra.mxu1 %v16745_v6  ;;  %14058 = vrot.lane.b32.xlu0 %v16882_v27, %s14702_s24  ;;  %v16933_v6 = vsel %vm531_vm2, %v4677_v11, %v16876_v62  ;;  %v16989_v39 = vpack.c.bf16 %v4740_v34, %v4724_v35 }
 0x4a6   : > { %12012 = vmatmul.mubr.msk.f32.vlgmr.msra.gmra.mrb[176].mxu0 %vm652_vm3, %v16747_v14  ;;  %4963 = vmatprep.subr.mxu1 %v16728_v32  ;;  %v12831_v32 = vpack.c.bf16 %v16830_v37, %v16924_v7  ;;  %v12833_v16 = vpack.c.bf16 %v16933_v6, %v4740_v34  ;;  %v12815_v37 = vpack.c.bf16 %v16780_v8, %v16757_v21 }
 0x4a7   : > { %12828 = vmatpush1.bf16.msra.mxu0 %v16910_v9  ;;  %4712 = vrot.lane.b32.xlu1 %v4586_v4, %s14703_s12 }
 0x4a8   : > { %12830 = vmatprep.subr.bf16.mxu0 %v12829_v63  ;;  %5130 = vmatprep.mubr.f32.mxu0 %v14704_v47 }
 0x4a9   : > { %4964 = vmatpush1.msra.mxu1 %v16766_v50  ;;  %14068 = vrot.lane.b32.xlu0 %v16882_v27, %s14701_s22  ;;  %v16959_v50 = vsel %vm531_vm2, %v14025_v23, %v14030_v5 }
 0x4aa   : > { %12013 = vmatmul.mubr.msk.f32.gmra.mrb[178].mxu0 %vm652_vm3, %v16769_v60  ;;  %12004 = vmatmul.mubr.msk.f32.vlgmr.msra.gmra.mrb[160].mxu1 %vm652_vm3, %v16747_v14  ;;  %v12837_v57 = vpack.c.bf16 %v16964_v30, %v16959_v50 }
 0x4ab   : > { %12832 = vmatpush1.bf16.msra.mxu0 %v12831_v32  ;;  %12810 = vmatprep.subr.bf16.mxu1 %v16794_v22  ;;  %v16972_v22 = vpop.permute.xlu0 %4680 }
 0x4ac   : > { %12834 = vmatprep.subr.bf16.mxu0 %v12833_v16  ;;  %14063 = vrot.lane.b32.xlu1 %v14062_v18, %s14702_s24  ;;  %v17034_v51 = vsel %vm531_vm2, %v16876_v62, %v16972_v22 }
 0x4ad   : > { %5136 = vmatprep.mubr.f32.mxu0 %v14704_v47  ;;  %12812 = vmatpush1.bf16.msra.mxu1 %v16800_v46  ;;  %v16987_v46 = vpop.permute.xlu1 %14033 }
 0x4ae   : > { %12014 = vmatmul.mubr.msk.f32.gmra.mrb[180].mxu0 %vm652_vm3, %v16788_v41  ;;  %12814 = vmatprep.subr.bf16.mxu1 %v12813_v58  ;;  %v14036_v21 = vunpack.i.h.bf16 %v16987_v46  ;;  %v14035_v11 = vunpack.i.l.bf16 %v16987_v46 }
 0x4af   : > { %12836 = vmatpush1.bf16.msra.mxu0 %v12835_v53  ;;  %5017 = vmatprep.mubr.f32.mxu1 %v14704_v47 }
 0x4b0   : > { %12838 = vmatprep.subr.bf16.mxu0 %v12837_v57  ;;  %12005 = vmatmul.mubr.msk.f32.gmra.mrb[162].mxu1 %vm652_vm3, %v16769_v60  ;;  %v17019_v24 = vsel %vm531_vm2, %v14035_v11, %v14036_v21  ;;  %v4726_v59 = vsel %vm531_vm2, %v14030_v5, %v14035_v11 }
 0x4b1   : > { %6602 = vrot.lane.b32.xlu1 %v16916_v49, %s14701_s22  ;;  %5142 = vmatprep.mubr.f32.mxu0 %v14704_v47  ;;  %v12845_v58 = vpack.c.bf16 %v4726_v59, %v17034_v51 }
 0x4b2   : > { %12816 = vmatpush1.bf16.msra.mxu1 %v12815_v37  ;;  %12015 = vmatmul.mubr.msk.f32.gmra.mrb[182].mxu0 %vm652_vm3, %v16803_v56  ;;  %v17002_v8 = vpop.permute.xlu0 %14038 }
 0x4b3   : > { %12818 = vmatprep.subr.bf16.mxu1 %v12817_v52  ;;  %12840 = vmatpush1.bf16.msra.mxu0 %v16989_v39  ;;  %v14041_v15 = vunpack.i.h.bf16 %v17002_v8  ;;  %v14040_v54 = vunpack.i.l.bf16 %v17002_v8  ;;  %v4683_v43 = vpop.permute.xlu1 %4682 }
 0x4b4   : > { %5023 = vmatprep.mubr.f32.mxu1 %v14704_v47  ;;  %5148 = vmatprep.mubr.f32.mxu0 %v14704_v47  ;;  %v17110_v4 = vsel %vm531_vm2, %v16972_v22, %v4683_v43 }
 0x4b5   : > { %12006 = vmatmul.mubr.msk.f32.gmra.mrb[164].mxu1 %vm652_vm3, %v16788_v41  ;;  %14073 = vrot.lane.b32.xlu1 %v16997_v48, %s14702_s24  ;;  %v17022_v12 = vsel %vm531_vm2, %v14040_v54, %v14041_v15  ;;  %v4742_v45 = vsel %vm531_vm2, %v14031_v29, %v14040_v54  ;;  %v12863_v5 = vpack.c.bf16 %v17019_v24, %v17110_v4 }
 0x4b6   : > { %12820 = vmatpush1.bf16.msra.mxu1 %v12819_v40  ;;  %12016 = vmatmul.mubr.msk.f32.gmra.mrb[184].mxu0 %vm652_vm3, %v16822_v13  ;;  %v17026_v61 = vpop.permute.xlu0 %4618 }
 0x4b7   : > { %12822 = vmatprep.subr.bf16.mxu1 %v16845_v19  ;;  %5029 = vmatprep.mubr.f32.mxu1 %v14704_v47  ;;  %v17041_v19 = vpack.c.bf16 %v17022_v12, %v17019_v24  ;;  %v4685_v25 = vpop.permute.xlu1 %4684  ;;  %v4728_v55 = vsel %vm531_vm2, %v14036_v21, %v17026_v61 }
 0x4b8   : > { %5154 = vmatprep.mubr.f32.mxu0 %v14704_v47  ;;  %6604 = vrot.lane.b32.xlu0 %v16919_v36, %s14701_s22  ;;  %v17075_v62 = vsel %vm531_vm2, %v4683_v43, %v4685_v25 }
 0x4b9   : > { %12007 = vmatmul.mubr.msk.f32.gmra.mrb[166].mxu1 %vm652_vm3, %v16803_v56  ;;  %5302 = vmatprep.subr.mxu0 %v17034_v51  ;;  %v12867_v16 = vpack.c.bf16 %v17075_v62, %v17022_v12 }
 0x4ba   : > { %12824 = vmatpush1.bf16.msra.mxu1 %v16910_v9  ;;  %12017 = vmatmul.mubr.msk.f32.gmra.mrb[186].mxu0 %vm652_vm3, %v16851_v3  ;;  %v12855_v9 = vpack.c.bf16 %v4742_v45, %v4726_v59 }
 0x4bb   : > { %5189 = vmatprep.subr.mxu1 %v16906_v28  ;;  %5035 = vmatprep.mubr.f32.mxu1 %v14704_v47  ;;  %v4687_v31 = vpop.permute.xlu1 %4686  ;;  %v12861_v28 = vpack.c.bf16 %v4728_v55, %v17075_v62 }
 0x4bc   : > { %5160 = vmatprep.mubr.f32.mxu0 %v14704_v47  ;;  %5303 = vmatpush1.msra.mxu0 %v16933_v6 }
 0x4bd   : > { %12008 = vmatmul.mubr.msk.f32.gmra.mrb[168].mxu1 %vm652_vm3, %v16822_v13  ;;  %12858 = vmatprep.subr.bf16.mxu0 %v17041_v19  ;;  %v17061_v23 = vpop.permute.xlu0 %4652 }
 0x4be   : > { %5190 = vmatpush1.msra.mxu1 %v16924_v7  ;;  %12018 = vmatmul.mubr.msk.f32.gmra.mrb[188].mxu0 %vm652_vm3, %v16865_v2  ;;  %v17102_v7 = vsel %vm531_vm2, %v4685_v25, %v4687_v31  ;;  %v4744_v10 = vsel %vm531_vm2, %v14041_v15, %v17061_v23 }
 0x4bf   : > { %12842 = vmatprep.subr.bf16.mxu1 %v12837_v57  ;;  %5041 = vmatprep.mubr.f32.mxu1 %v14704_v47  ;;  %v12865_v18 = vpack.c.bf16 %v17102_v7, %v4744_v10  ;;  %v17158_v22 = vpop.permute.xlu1 %4688  ;;  %v12847_v57 = vpack.c.bf16 %v16959_v50, %v16933_v6  ;;  %v12851_v6 = vpack.c.bf16 %v17034_v51, %v16964_v30 }
 0x4c0   : > { %5166 = vmatprep.mubr.f32.mxu0 %v14704_v47  ;;  %6606 = vrot.lane.b32.xlu0 %v6519_v1, %s14701_s22  ;;  %v12871_v1 = vpack.c.bf16 %v4744_v10, %v4728_v55 }
 0x4c1   : > { %12009 = vmatmul.mubr.msk.f32.gmra.mrb[170].mxu1 %vm652_vm3, %v16851_v3  ;;  %14078 = vrot.lane.b32.xlu1 %v14077_v26, %s14702_s24  ;;  %v17088_v35 = vpop.permute.xlu0 %14043 }
 0x4c2   : > { %12019 = vmatmul.mubr.msk.f32.gmra.mrb[190].mxu0 %vm652_vm3, %v16889_v33  ;;  %5047 = vmatprep.mubr.f32.mxu1 %v14704_v47  ;;  %v17116_v63 = vunpack.i.h.bf16 %v17088_v35  ;;  %v14045_v29 = vunpack.i.l.bf16 %v17088_v35 }
 0x4c3   : > { %5350 = vmatprep.mubr.f32.mxu0 %v14704_v47  ;;  %v17204_v46 = vpop.permute.xlu1 %14048 }
 0x4c4   : > { %6608 = vrot.lane.b32.xlu0 %v16980_v44, %s14701_s22  ;;  %v17136_v32 = vsel %vm531_vm2, %v17026_v61, %v14045_v29  ;;  %v17141_v34 = vsel %vm531_vm2, %v17061_v23, %v17116_v63  ;;  %v12849_v44 = vpack.c.bf16 %v17110_v4, %v4742_v45  ;;  %v14051_v26 = vunpack.i.h.bf16 %v17204_v46 }
 0x4c5   : > { %12010 = vmatmul.mubr.msk.f32.gmra.mrb[172].mxu1 %vm652_vm3, %v16865_v2  ;;  %6610 = vrot.lane.b32.xlu1 %v17047_v0, %s14701_s22  ;;  %v12869_v53 = vpack.c.bf16 %v17141_v34, %v17136_v32  ;;  %v4655_v50 = vpop.permute.xlu0 %4654  ;;  %v12879_v54 = vpack.c.bf16 %v17136_v32, %v17102_v7 }
 0x4c6   : > { %12028 = vmatmul.mubr.msk.f32.vlgmr.msra.gmra.mrb[192].mxu0 %vm652_vm3, %v16747_v14  ;;  %5053 = vmatprep.mubr.f32.mxu1 %v14704_v47  ;;  %v4745_v30 = vsel %vm531_vm2, %v17061_v23, %v4655_v50 }
 0x4c7   : > { %12860 = vmatpush1.bf16.msra.mxu0 %v12855_v9  ;;  %5356 = vmatprep.mubr.f32.mxu0 %v14704_v47  ;;  %v12873_v37 = vpack.c.bf16 %v4745_v30, %v17136_v32 }
 0x4c8   : > { %12862 = vmatprep.subr.bf16.mxu0 %v12861_v28  ;;  %6612 = vrot.lane.b32.xlu0 %v17050_v42, %s14701_s22 }
 0x4c9   : > { %12011 = vmatmul.mubr.msk.f32.gmra.mrb[174].mxu1 %vm652_vm3, %v16889_v33  ;;  %14083 = vrot.lane.b32.xlu1 %v17097_v38, %s14702_s24 }
 0x4ca   : > { %12029 = vmatmul.mubr.msk.f32.gmra.mrb[194].mxu0 %vm652_vm3, %v16769_v60  ;;  %5237 = vmatprep.mubr.f32.mxu1 %v14704_v47 }
 0x4cb   : > { %5362 = vmatprep.mubr.f32.mxu0 %v14704_v47  ;;  %12864 = vmatpush1.bf16.msra.mxu0 %v12863_v5 }
 0x4cc   : > { %12866 = vmatprep.subr.bf16.mxu0 %v12865_v18  ;;  %6614 = vrot.lane.b32.xlu0 %v6523_v20, %s14701_s22  ;;  %v4765_v20 = vsel %vm531_vm2, %v17116_v63, %v14051_v26 }
 0x4cd   : > { %12020 = vmatmul.mubr.msk.f32.vlgmr.msra.gmra.mrb[176].mxu1 %vm652_vm3, %v16747_v14  ;;  %14088 = vrot.lane.b32.xlu1 %v16882_v27, %s14703_s12  ;;  %v17170_v27 = vsel %vm531_vm2, %v4687_v31, %v17158_v22 }
 0x4ce   : > { %12844 = vmatpush1.bf16.msra.mxu1 %v16989_v39  ;;  %12030 = vmatmul.mubr.msk.f32.gmra.mrb[196].mxu0 %vm652_vm3, %v16788_v41  ;;  %v14050_v39 = vunpack.i.l.bf16 %v17204_v46  ;;  %v12883_v31 = vpack.c.bf16 %v17170_v27, %v17141_v34 }
 0x4cf   : > { %12846 = vmatprep.subr.bf16.mxu1 %v12845_v58  ;;  %5368 = vmatprep.mubr.f32.mxu0 %v14704_v47 }
 0x4d0   : > { %5243 = vmatprep.mubr.f32.mxu1 %v14704_v47  ;;  %12868 = vmatpush1.bf16.msra.mxu0 %v12867_v16  ;;  %v17222_v8 = vsel %vm531_vm2, %v14045_v29, %v14050_v39 }
 0x4d1   : > { %12021 = vmatmul.mubr.msk.f32.gmra.mrb[178].mxu1 %vm652_vm3, %v16769_v60  ;;  %12870 = vmatprep.subr.bf16.mxu0 %v12869_v53  ;;  %v12877_v40 = vpack.c.bf16 %v17222_v8, %v17170_v27 }
 0x4d2   : > { %12848 = vmatpush1.bf16.msra.mxu1 %v12847_v57  ;;  %12031 = vmatmul.mubr.msk.f32.gmra.mrb[198].mxu0 %vm652_vm3, %v16803_v56 }
 0x4d3   : > { %12850 = vmatprep.subr.bf16.mxu1 %v12849_v44  ;;  %5374 = vmatprep.mubr.f32.mxu0 %v14704_v47 }
 0x4d4   : > { %5249 = vmatprep.mubr.f32.mxu1 %v14704_v47  ;;  %12872 = vmatpush1.bf16.msra.mxu0 %v12871_v1 }
 0x4d5   : > { %12022 = vmatmul.mubr.msk.f32.gmra.mrb[180].mxu1 %vm652_vm3, %v16788_v41  ;;  %5528 = vmatprep.subr.mxu0 %v17170_v27 }
 0x4d6   : > { %12852 = vmatpush1.bf16.msra.mxu1 %v12851_v6  ;;  %12032 = vmatmul.mubr.msk.f32.gmra.mrb[200].mxu0 %vm652_vm3, %v16822_v13 }
 0x4d7   : > { %12854 = vmatprep.subr.bf16.mxu1 %v17041_v19  ;;  %5380 = vmatprep.mubr.f32.mxu0 %v14704_v47 }
 0x4d8   : > { %5255 = vmatprep.mubr.f32.mxu1 %v14704_v47  ;;  %5529 = vmatpush1.msra.mxu0 %v17102_v7  ;;  %v6514_v7 = vld [vmem:[%s14907_s26 + $0x180] sm:$0xff] }
 0x4d9   : > { %12023 = vmatmul.mubr.msk.f32.gmra.mrb[182].mxu1 %vm652_vm3, %v16803_v56 }
 0x4da   : > { %12856 = vmatpush1.bf16.msra.mxu1 %v12855_v9  ;;  %12033 = vmatmul.mubr.msk.f32.gmra.mrb[202].mxu0 %vm652_vm3, %v16851_v3 }
 0x4db   : > { %5386 = vmatprep.mubr.f32.mxu0 %v14704_v47  ;;  %5415 = vmatprep.subr.mxu1 %v17075_v62 }
 0x4dc   : > { %5261 = vmatprep.mubr.f32.mxu1 %v14704_v47 }
 0x4dd   : > { %12024 = vmatmul.mubr.msk.f32.gmra.mrb[184].mxu1 %vm652_vm3, %v16822_v13 }
 0x4de   : > { %12034 = vmatmul.mubr.msk.f32.gmra.mrb[204].mxu0 %vm652_vm3, %v16865_v2  ;;  %5416 = vmatpush1.msra.mxu1 %v17110_v4 }
 0x4df   : > { %5392 = vmatprep.mubr.f32.mxu0 %v14704_v47  ;;  %5267 = vmatprep.mubr.f32.mxu1 %v14704_v47 }
 0x4e0   : > { %12874 = vmatprep.subr.bf16.mxu1 %v12873_v37 }
 0x4e1   : > { %12025 = vmatmul.mubr.msk.f32.gmra.mrb[186].mxu1 %vm652_vm3, %v16851_v3 }
 0x4e2   : > { %12035 = vmatmul.mubr.msk.f32.gmra.mrb[206].mxu0 %vm652_vm3, %v16889_v33  ;;  %5273 = vmatprep.mubr.f32.mxu1 %v14704_v47 }
 0x4e3   : > { %5576 = vmatprep.mubr.f32.mxu0 %v14704_v47 }
 0x4e5   : > { %12026 = vmatmul.mubr.msk.f32.gmra.mrb[188].mxu1 %vm652_vm3, %v16865_v2 }
 0x4e6   : > { %12044 = vmatmul.mubr.msk.f32.vlgmr.msra.gmra.mrb[208].mxu0 %vm652_vm3, %v16747_v14  ;;  %5279 = vmatprep.mubr.f32.mxu1 %v14704_v47 }
 0x4e7   : > { %v3857_v52 = vpop.f32.mrb[144].mxu0  ;;  %5582 = vmatprep.mubr.f32.mxu0 %v14704_v47 }
 0x4e8   : > { %4407 = vst [vmem:[#allocation2 + $0x80] sm:$0xff] %v3857_v52  ;;  %v3859_v21 = vpop.f32.mrb[145].mxu0 }
 0x4e9   : > { %4408 = vst [vmem:[#allocation2 + $0x88] sm:$0xff] %v3859_v21  ;;  %12027 = vmatmul.mubr.msk.f32.gmra.mrb[190].mxu1 %vm652_vm3, %v16889_v33 }
 0x4ea   : > { %12045 = vmatmul.mubr.msk.f32.gmra.mrb[210].mxu0 %vm652_vm3, %v16769_v60  ;;  %5463 = vmatprep.mubr.f32.mxu1 %v14704_v47 }
 0x4eb   : > { %v3863_v15 = vpop.f32.mrb[146].mxu0  ;;  %5588 = vmatprep.mubr.f32.mxu0 %v14704_v47 }
 0x4ec   : > { %4423 = vst [vmem:[#allocation2 + $0x300] sm:$0xff] %v3863_v15  ;;  %v3865_v11 = vpop.f32.mrb[147].mxu0 }
 0x4ed   : > { %4424 = vst [vmem:[#allocation2 + $0x308] sm:$0xff] %v3865_v11  ;;  %12036 = vmatmul.mubr.msk.f32.vlgmr.msra.gmra.mrb[192].mxu1 %vm652_vm3, %v16747_v14 }
 0x4ee   : > { %12046 = vmatmul.mubr.msk.f32.gmra.mrb[212].mxu0 %vm652_vm3, %v16788_v41  ;;  %12876 = vmatpush1.bf16.msra.mxu1 %v12871_v1 }
 0x4ef   : > { %5594 = vmatprep.mubr.f32.mxu0 %v14704_v47  ;;  %12878 = vmatprep.subr.bf16.mxu1 %v12877_v40 }
 0x4f0   : > { %5469 = vmatprep.mubr.f32.mxu1 %v14704_v47 }
 0x4f1   : > { %12037 = vmatmul.mubr.msk.f32.gmra.mrb[194].mxu1 %vm652_vm3, %v16769_v60 }
 0x4f2   : > { %12047 = vmatmul.mubr.msk.f32.gmra.mrb[214].mxu0 %vm652_vm3, %v16803_v56  ;;  %12880 = vmatpush1.bf16.msra.mxu1 %v12879_v54  ;;  %v17306_v54 = vld [vmem:[%s14907_s26 + $0x1d8] sm:$0xff] }
 0x4f3   : > { %5600 = vmatprep.mubr.f32.mxu0 %v14704_v47  ;;  %5475 = vmatprep.mubr.f32.mxu1 %v14704_v47 }
 0x4f5   : > { %12038 = vmatmul.mubr.msk.f32.gmra.mrb[196].mxu1 %vm652_vm3, %v16788_v41 }
 0x4f6   : > { %12048 = vmatmul.mubr.msk.f32.gmra.mrb[216].mxu0 %vm652_vm3, %v16822_v13  ;;  %5481 = vmatprep.mubr.f32.mxu1 %v14704_v47 }
 0x4f7   : > { %5606 = vmatprep.mubr.f32.mxu0 %v14704_v47 }
 0x4f9   : > { %12039 = vmatmul.mubr.msk.f32.gmra.mrb[198].mxu1 %vm652_vm3, %v16803_v56 }
 0x4fa   : > { %12049 = vmatmul.mubr.msk.f32.gmra.mrb[218].mxu0 %vm652_vm3, %v16851_v3  ;;  %5487 = vmatprep.mubr.f32.mxu1 %v14704_v47 }
 0x4fb   : > { %5612 = vmatprep.mubr.f32.mxu0 %v14704_v47 }
 0x4fd   : > { %12040 = vmatmul.mubr.msk.f32.gmra.mrb[200].mxu1 %vm652_vm3, %v16822_v13  ;;  %v3934_v24 = vpop.f32.mrb[144].mxu1 }
 0x4fe   : > { %12050 = vmatmul.mubr.msk.f32.gmra.mrb[220].mxu0 %vm652_vm3, %v16865_v2  ;;  %5493 = vmatprep.mubr.f32.mxu1 %v14704_v47  ;;  %4409 = vst [vmem:[#allocation2 + $0x90] sm:$0xff] %v3934_v24  ;;  %v3936_v12 = vpop.f32.mrb[145].mxu1  ;;  %v17309_v24 = vld [vmem:[%s14907_s26 + $0x1e0] sm:$0xff] }
 0x4ff   : > { %5618 = vmatprep.mubr.f32.mxu0 %v14704_v47  ;;  %4410 = vst [vmem:[#allocation2 + $0x98] sm:$0xff] %v3936_v12 }
 0x501   : > { %12041 = vmatmul.mubr.msk.f32.gmra.mrb[202].mxu1 %vm652_vm3, %v16851_v3  ;;  %v3940_v61 = vpop.f32.mrb[146].mxu1 }
 0x502   : > { %12051 = vmatmul.mubr.msk.f32.gmra.mrb[222].mxu0 %vm652_vm3, %v16889_v33  ;;  %5499 = vmatprep.mubr.f32.mxu1 %v14704_v47  ;;  %4425 = vst [vmem:[#allocation2 + $0x310] sm:$0xff] %v3940_v61  ;;  %v3942_v43 = vpop.f32.mrb[147].mxu1  ;;  %v14112_v61 = vpack.i.bf16 %v17309_v24, %v17306_v54 }
 0x503   : > { %4426 = vst [vmem:[#allocation2 + $0x318] sm:$0xff] %v3942_v43  ;;  %5930 = vmatprep.mubr.f32.mxu0 %v14704_v47 }
 0x505   : > { %12042 = vmatmul.mubr.msk.f32.gmra.mrb[204].mxu1 %vm652_vm3, %v16865_v2 }
 0x506   : > { %5505 = vmatprep.mubr.f32.mxu1 %v14704_v47 }
 0x507   : > { %v4011_v51 = vpop.f32.mrb[148].mxu0 }
 0x508   : > { %4411 = vst [vmem:[#allocation2 + $0xa0] sm:$0xff] %v4011_v51  ;;  %v4013_v19 = vpop.f32.mrb[149].mxu0 }
 0x509   : > { %12043 = vmatmul.mubr.msk.f32.gmra.mrb[206].mxu1 %vm652_vm3, %v16889_v33  ;;  %4412 = vst [vmem:[#allocation2 + $0xa8] sm:$0xff] %v4013_v19 }
 0x50a   : > { %5689 = vmatprep.mubr.f32.mxu1 %v14704_v47 }
 0x50b   : > { %v4017_v25 = vpop.f32.mrb[150].mxu0 }
 0x50c   : > { %4427 = vst [vmem:[#allocation2 + $0x320] sm:$0xff] %v4017_v25  ;;  %v4019_v23 = vpop.f32.mrb[151].mxu0 }
 0x50d   : > { %4428 = vst [vmem:[#allocation2 + $0x328] sm:$0xff] %v4019_v23 }
 0x50f   : > { %v4701_v55 = vpop.permute.xlu0 %4700 }
 0x510   : > { %v4767_v62 = vsel %vm531_vm2, %v17158_v22, %v4701_v55 }
 0x511   : > { %v12881_v45 = vpack.c.bf16 %v4767_v62, %v4765_v20 }
 0x513   : > { %v4709_v35 = vpop.permute.xlu0 %4708  ;;  %12882 = vmatprep.subr.bf16.mxu1 %v12881_v45 }
 0x514   : > { %12884 = vmatpush1.bf16.msra.mxu1 %v12883_v31  ;;  %v17348_v31 = vld [vmem:[%s14907_s26 + $0x1e8] sm:$0xff] }
 0x515   : > { %v14054_v59 = vpop.permute.xlu1 %14053 }
 0x516   : > { %v14056_v28 = vunpack.i.h.bf16 %v14054_v59  ;;  %v14055_v9 = vunpack.i.l.bf16 %v14054_v59 }
 0x517   : > { %v14059_v10 = vpop.permute.xlu0 %14058 }
 0x518   : > { %v4770_v4 = vsel %vm531_vm2, %v17116_v63, %v14056_v28  ;;  %v14060_v29 = vunpack.i.l.bf16 %v14059_v10  ;;  %v4768_v5 = vsel %vm531_vm2, %v14050_v39, %v14055_v9  ;;  %v4771_v32 = vsel %vm531_vm2, %v14056_v28, %v4709_v35 }
 0x519   : > { %v4713_v18 = vpop.permute.xlu1 %4712  ;;  %v12887_v34 = vpack.c.bf16 %v4770_v4, %v17222_v8  ;;  %v12885_v58 = vpack.c.bf16 %v4771_v32, %v4768_v5  ;;  %v14061_v53 = vunpack.i.h.bf16 %v14059_v10  ;;  %v17374_v32 = vld [vmem:[%s14907_s26 + $0x1f8] sm:$0xff] }
 0x51a   : > { %v14097_v16 = vpack.i.bf16 %v14060_v29, %v6514_v7  ;;  %v4773_v63 = vsel %vm531_vm2, %v4701_v55, %v4713_v18  ;;  %v17369_v18 = vld [vmem:[%s14907_s26 + $0x1f0] sm:$0xff] }
 0x51b   : > { %v14069_v22 = vpop.permute.xlu0 %14068  ;;  %12886 = vmatprep.subr.bf16.mxu1 %v12885_v58  ;;  %v6582_v6 = vsel %vm322_vm1, %v14060_v29, %v14061_v53  ;;  %v14147_v58 = vpack.i.bf16 %v17374_v32, %v17369_v18 }
 0x51c   : > { %14098 = vrot.lane.b32.xlu1 %v14097_v16, %s14703_s12  ;;  %12888 = vmatpush1.bf16.msra.mxu1 %v12887_v34  ;;  %v14070_v57 = vunpack.i.l.bf16 %v14069_v22  ;;  %v14071_v30 = vunpack.i.h.bf16 %v14069_v22 }
 0x51d   : > { %v4088_v1 = vpop.f32.mrb[148].mxu1  ;;  %5641 = vmatprep.subr.mxu1 %v4773_v63 }
 0x51e   : > { %v14064_v44 = vpop.permute.xlu1 %14063  ;;  %4413 = vst [vmem:[#allocation2 + $0xb0] sm:$0xff] %v4088_v1  ;;  %v4090_v27 = vpop.f32.mrb[149].mxu1  ;;  %v6632_v46 = vsel %vm373_vm0, %v14070_v57, %v14071_v30 }
 0x51f   : > { %v14065_v50 = vunpack.i.l.bf16 %v14064_v44  ;;  %4414 = vst [vmem:[#allocation2 + $0xb8] sm:$0xff] %v4090_v27  ;;  %v14102_v40 = vpack.i.bf16 %v6632_v46, %v16916_v49 }
 0x520   : > { %5642 = vmatpush1.msra.mxu1 %v4767_v62 }
 0x521   : > { %v6583_v37 = vsel %vm322_vm1, %v14061_v53, %v14065_v50  ;;  %v4094_v39 = vpop.f32.mrb[150].mxu1  ;;  %12052 = vmatmul.mubr.msk.f32.vlgmr.msra.gmra.mrb[208].mxu1 %vm652_vm3, %v16747_v14  ;;  %v14066_v14 = vunpack.i.h.bf16 %v14064_v44 }
 0x522   : > { %v14092_v52 = vpack.i.bf16 %v6583_v37, %v6582_v6  ;;  %4429 = vst [vmem:[#allocation2 + $0x330] sm:$0xff] %v4094_v39  ;;  %v4096_v21 = vpop.f32.mrb[151].mxu1  ;;  %5695 = vmatprep.mubr.f32.mxu1 %v14704_v47 }
 0x523   : > { %v17298_v8 = vpop.permute.xlu1 %6602  ;;  %4430 = vst [vmem:[#allocation2 + $0x338] sm:$0xff] %v4096_v21 }
 0x524   : > { %v6633_v15 = vsel %vm373_vm0, %v14071_v30, %v17298_v8  ;;  %14093 = vrot.lane.b32.xlu0 %v14092_v52, %s14703_s12 }
 0x525   : > { %v14107_v11 = vpack.i.bf16 %v14070_v57, %v6633_v15  ;;  %12053 = vmatmul.mubr.msk.f32.gmra.mrb[210].mxu1 %vm652_vm3, %v16769_v60  ;;  %v6584_v60 = vsel %vm322_vm1, %v14065_v50, %v14066_v14 }
 0x526   : > { %5701 = vmatprep.mubr.f32.mxu1 %v14704_v47 }
 0x527   : > { %14108 = vrot.lane.b32.xlu1 %v14107_v11, %s14703_s12  ;;  %v4165_v12 = vpop.f32.mrb[152].mxu0  ;;  %v14074_v19 = vpop.permute.xlu1 %14073 }
 0x528   : > { %14103 = vrot.lane.b32.xlu0 %v14102_v40, %s14703_s12  ;;  %4415 = vst [vmem:[#allocation2 + $0xc0] sm:$0xff] %v4165_v12  ;;  %v4167_v49 = vpop.f32.mrb[153].mxu0  ;;  %v14075_v23 = vunpack.i.l.bf16 %v14074_v19 }
 0x529   : > { %4416 = vst [vmem:[#allocation2 + $0xc8] sm:$0xff] %v4167_v49  ;;  %12054 = vmatmul.mubr.msk.f32.gmra.mrb[212].mxu1 %vm652_vm3, %v16788_v41  ;;  %v14117_v41 = vpack.i.bf16 %v14061_v53, %v6584_v60 }
 0x52a   : > { %v6605_v43 = vpop.permute.xlu0 %6604  ;;  %5707 = vmatprep.mubr.f32.mxu1 %v14704_v47  ;;  %v6585_v55 = vsel %vm322_vm1, %v14066_v14, %v14075_v23 }
 0x52b   : > { %6616 = vrot.lane.b32.xlu1 %v17079_v17, %s14701_s22  ;;  %v4171_v51 = vpop.f32.mrb[154].mxu0  ;;  %v6634_v25 = vsel %vm373_vm0, %v17298_v8, %v6605_v43  ;;  %v14122_v17 = vpack.i.bf16 %v16919_v36, %v14071_v30  ;;  %v14127_v20 = vpack.i.bf16 %v14065_v50, %v6585_v55  ;;  %v17396_v50 = vld [vmem:[%s14907_s26 + $0x200] sm:$0xff]  ;;  %v17399_v30 = vld [vmem:[%s14907_s26 + $0x208] sm:$0xff] }
 0x52c   : > { %14113 = vrot.lane.b32.xlu0 %v14112_v61, %s14702_s24  ;;  %4431 = vst [vmem:[#allocation2 + $0x340] sm:$0xff] %v4171_v51  ;;  %v4173_v26 = vpop.f32.mrb[155].mxu0  ;;  %v14157_v37 = vpack.i.bf16 %v17399_v30, %v17396_v50 }
 0x52d   : > { %4432 = vst [vmem:[#allocation2 + $0x348] sm:$0xff] %v4173_v26  ;;  %12055 = vmatmul.mubr.msk.f32.gmra.mrb[214].mxu1 %vm652_vm3, %v16803_v56 }
 0x52e   : > { %5713 = vmatprep.mubr.f32.mxu1 %v14704_v47 }
 0x52f   : > { %6737 = vrot.lane.b32.xlu1 %v6634_v25, %s14703_s12 }
 0x530   : > { %14118 = vrot.lane.b32.xlu0 %v14117_v41, %s14703_s12 }
 0x531   : > { %12056 = vmatmul.mubr.msk.f32.gmra.mrb[216].mxu1 %vm652_vm3, %v16822_v13  ;;  %v14076_v13 = vunpack.i.h.bf16 %v14074_v19 }
 0x532   : > { %5719 = vmatprep.mubr.f32.mxu1 %v14704_v47  ;;  %v6607_v56 = vpop.permute.xlu0 %6606 }
 0x533   : > { %14123 = vrot.lane.b32.xlu1 %v14122_v17, %s14703_s12  ;;  %v14079_v62 = vpop.permute.xlu1 %14078  ;;  %v6635_v36 = vsel %vm373_vm0, %v6605_v43, %v6607_v56  ;;  %v6586_v35 = vsel %vm322_vm1, %v14075_v23, %v14076_v13 }
 0x534   : > { %6618 = vrot.lane.b32.xlu0 %v17306_v54, %s14701_s22  ;;  %v14080_v45 = vunpack.i.l.bf16 %v14079_v62  ;;  %v14081_v59 = vunpack.i.h.bf16 %v14079_v62 }
 0x535   : > { %12057 = vmatmul.mubr.msk.f32.gmra.mrb[218].mxu1 %vm652_vm3, %v16851_v3 }
 0x536   : > { %5725 = vmatprep.mubr.f32.mxu1 %v14704_v47  ;;  %v6587_v28 = vsel %vm322_vm1, %v14076_v13, %v14080_v45  ;;  %v6588_v10 = vsel %vm322_vm1, %v14080_v45, %v14081_v59  ;;  %v6609_v5 = vpop.permute.xlu0 %6608 }
 0x537   : > { %6620 = vrot.lane.b32.xlu1 %v17309_v24, %s14701_s22  ;;  %v6611_v29 = vpop.permute.xlu1 %6610  ;;  %v6636_v34 = vsel %vm373_vm0, %v6607_v56, %v6609_v5 }
 0x538   : > { %14128 = vrot.lane.b32.xlu0 %v14127_v20, %s14703_s12 }
 0x539   : > { %12058 = vmatmul.mubr.msk.f32.gmra.mrb[220].mxu1 %vm652_vm3, %v16865_v2  ;;  %v14137_v2 = vpack.i.bf16 %v6587_v28, %v6586_v35 }
 0x53a   : > { %5731 = vmatprep.mubr.f32.mxu1 %v14704_v47  ;;  %v6613_v63 = vpop.permute.xlu0 %6612 }
 0x53b   : > { %6739 = vrot.lane.b32.xlu1 %v6635_v36, %s14703_s12  ;;  %v4242_v3 = vpop.f32.mrb[152].mxu1  ;;  %v17377_v16 = vpop.permute.xlu1 %14083  ;;  %v6638_v44 = vsel %vm373_vm0, %v6611_v29, %v6613_v63 }
 0x53c   : > { %6574 = vrot.lane.b32.xlu0 %v17348_v31, %s14702_s24  ;;  %4417 = vst [vmem:[#allocation2 + $0xd0] sm:$0xff] %v4242_v3  ;;  %v4244_v9 = vpop.f32.mrb[153].mxu1 }
 0x53d   : > { %4418 = vst [vmem:[#allocation2 + $0xd8] sm:$0xff] %v4244_v9  ;;  %12059 = vmatmul.mubr.msk.f32.gmra.mrb[222].mxu1 %vm652_vm3, %v16889_v33  ;;  %v14142_v33 = vpack.i.bf16 %v6588_v10, %v17047_v0  ;;  %v14085_v0 = vunpack.i.l.bf16 %v17377_v16 }
 0x53e   : > { %6007 = vmatprep.mubr.f32.mxu1 %v14704_v47  ;;  %v17406_v46 = vpop.permute.xlu0 %6614 }
 0x53f   : > { %6622 = vrot.lane.b32.xlu1 %v17348_v31, %s14701_s22  ;;  %v4248_v7 = vpop.f32.mrb[154].mxu1  ;;  %v6589_v1 = vsel %vm322_vm1, %v14081_v59, %v14085_v0  ;;  %v6639_v39 = vsel %vm373_vm0, %v6613_v63, %v17406_v46 }
 0x540   : > { %6785 = vrot.lane.b32.xlu0 %v17298_v8, %s14703_s12  ;;  %4433 = vst [vmem:[#allocation2 + $0x350] sm:$0xff] %v4248_v7  ;;  %v4250_v4 = vpop.f32.mrb[155].mxu1  ;;  %v14152_v6 = vpack.i.bf16 %v6589_v1, %v17050_v42 }
 0x541   : > { %4434 = vst [vmem:[#allocation2 + $0x358] sm:$0xff] %v4250_v4 }
 0x543   : > { %14138 = vrot.lane.b32.xlu1 %v14137_v2, %s14703_s12 }
 0x544   : > { %14133 = vrot.lane.b32.xlu0 %v16997_v48, %s14703_s12  ;;  %v6637_v48 = vsel %vm373_vm0, %v6609_v5, %v6611_v29 }
 0x547   : > { %14143 = vrot.lane.b32.xlu1 %v14142_v33, %s14703_s12  ;;  %v4319_v53 = vpop.f32.mrb[156].mxu0 }
 0x548   : > { %6741 = vrot.lane.b32.xlu0 %v6636_v34, %s14703_s12  ;;  %4419 = vst [vmem:[#allocation2 + $0xe0] sm:$0xff] %v4319_v53  ;;  %v4321_v22 = vpop.f32.mrb[157].mxu0 }
 0x549   : > { %4420 = vst [vmem:[#allocation2 + $0xe8] sm:$0xff] %v4321_v22 }
 0x54b   : > { %14148 = vrot.lane.b32.xlu1 %v14147_v58, %s14702_s24  ;;  %v4325_v57 = vpop.f32.mrb[158].mxu0 }
 0x54c   : > { %6743 = vrot.lane.b32.xlu0 %v6637_v48, %s14703_s12  ;;  %4435 = vst [vmem:[#allocation2 + $0x360] sm:$0xff] %v4325_v57  ;;  %v4327_v27 = vpop.f32.mrb[159].mxu0 }
 0x54d   : > { %4436 = vst [vmem:[#allocation2 + $0x368] sm:$0xff] %v4327_v27 }
 0x54f   : > { %6745 = vrot.lane.b32.xlu1 %v6638_v44, %s14703_s12 }
 0x550   : > { %6624 = vrot.lane.b32.xlu0 %v17369_v18, %s14701_s22 }
 0x553   : > { %14153 = vrot.lane.b32.xlu1 %v14152_v6, %s14703_s12 }
 0x554   : > { %6626 = vrot.lane.b32.xlu0 %v17374_v32, %s14701_s22 }
 0x557   : > { %6628 = vrot.lane.b32.xlu1 %v17396_v50, %s14701_s22 }
 0x558   : > { %14158 = vrot.lane.b32.xlu0 %v14157_v37, %s14702_s24 }
 0x559   : > { %v4900_v42 = vpop.f32.mrb[160].mxu0 }
 0x55a   : > { %v4902_v52 = vpop.f32.mrb[161].mxu0  ;;  %v5738_v21 = vmax.f32 %v4900_v42, 0.0 }
 0x55b   : > { %6630 = vrot.lane.b32.xlu1 %v17399_v30, %s14701_s22  ;;  %v5739_v8 = vmax.f32 %v4902_v52, 0.0 }
 0x55c   : > { %6747 = vrot.lane.b32.xlu0 %v6639_v39, %s14703_s12  ;;  %v17418_v39 = vld [vmem:[#allocation9] sm:$0xff] }
 0x55d   : > { %v4906_v15 = vpop.f32.mrb[162].mxu0 }
 0x55e   : > { %v5754_v40 = vmax.f32 %v4906_v15, 0.0  ;;  %v4908_v11 = vpop.f32.mrb[163].mxu0 }
 0x55f   : > { %v5755_v14 = vmax.f32 %v4908_v11, 0.0 }
 0x560   : > { %v12891_v12 = vpack.c.bf16 %v5754_v40, %v5738_v21  ;;  %14163 = vrot.lane.b32.xlu0 %v17097_v38, %s14703_s12 }
 0x561   : > { %v12889_v61 = vpack.c.bf16 %v5755_v14, %v5739_v8  ;;  %v4912_v49 = vpop.f32.mrb[164].mxu0  ;;  %v17423_v14 = vld [vmem:[#allocation9 + $0x8] sm:$0xff] }
 0x562   : > { %v4914_v43 = vpop.f32.mrb[165].mxu0  ;;  %v5770_v60 = vmax.f32 %v4912_v49, 0.0 }
 0x563   : > { %12890 = vmatprep.subr.bf16.mxu0 %v12889_v61  ;;  %v5771_v51 = vmax.f32 %v4914_v43, 0.0 }
 0x564   : > { %12892 = vmatpush1.bf16.msra.mxu0 %v12891_v12 }
 0x565   : > { %v4918_v19 = vpop.f32.mrb[166].mxu0 }
 0x566   : > { %v5786_v25 = vmax.f32 %v4918_v19, 0.0  ;;  %v4920_v26 = vpop.f32.mrb[167].mxu0 }
 0x567   : > { %v5787_v41 = vmax.f32 %v4920_v26, 0.0 }
 0x568   : > { %v12895_v23 = vpack.c.bf16 %v5786_v25, %v5770_v60 }
 0x569   : > { %v12893_v17 = vpack.c.bf16 %v5787_v41, %v5771_v51  ;;  %v4924_v55 = vpop.f32.mrb[168].mxu0 }
 0x56a   : > { %v4926_v56 = vpop.f32.mrb[169].mxu0  ;;  %v5802_v20 = vmax.f32 %v4924_v55, 0.0 }
 0x56b   : > { %12894 = vmatprep.subr.bf16.mxu0 %v12893_v17  ;;  %v4396_v62 = vpop.f32.mrb[156].mxu1  ;;  %v5803_v13 = vmax.f32 %v4926_v56, 0.0 }
 0x56c   : > { %12896 = vmatpush1.bf16.msra.mxu0 %v12895_v23  ;;  %4421 = vst [vmem:[#allocation2 + $0xf0] sm:$0xff] %v4396_v62  ;;  %v4398_v38 = vpop.f32.mrb[157].mxu1 }
 0x56d   : > { %v4930_v36 = vpop.f32.mrb[170].mxu0  ;;  %4422 = vst [vmem:[#allocation2 + $0xf8] sm:$0xff] %v4398_v38 }
 0x56e   : > { %v5818_v45 = vmax.f32 %v4930_v36, 0.0  ;;  %v4932_v3 = vpop.f32.mrb[171].mxu0 }
 0x56f   : > { %v5819_v35 = vmax.f32 %v4932_v3, 0.0  ;;  %v4402_v59 = vpop.f32.mrb[158].mxu1  ;;  %v17428_v3 = vpop.permute.xlu1 %14088 }
 0x570   : > { %v12899_v28 = vpack.c.bf16 %v5818_v45, %v5802_v20  ;;  %4437 = vst [vmem:[#allocation2 + $0x370] sm:$0xff] %v4402_v59  ;;  %v4404_v9 = vpop.f32.mrb[159].mxu1 }
 0x571   : > { %v12897_v2 = vpack.c.bf16 %v5819_v35, %v5803_v13  ;;  %v4936_v7 = vpop.f32.mrb[172].mxu0  ;;  %4438 = vst [vmem:[#allocation2 + $0x378] sm:$0xff] %v4404_v9 }
 0x572   : > { %v4938_v10 = vpop.f32.mrb[173].mxu0  ;;  %v5834_v4 = vmax.f32 %v4936_v7, 0.0 }
 0x573   : > { %12898 = vmatprep.subr.bf16.mxu0 %v12897_v2  ;;  %v5835_v29 = vmax.f32 %v4938_v10, 0.0 }
 0x574   : > { %12900 = vmatpush1.bf16.msra.mxu0 %v12899_v28 }
 0x575   : > { %v4942_v5 = vpop.f32.mrb[174].mxu0 }
 0x576   : > { %v5850_v33 = vmax.f32 %v4942_v5, 0.0  ;;  %v4944_v34 = vpop.f32.mrb[175].mxu0 }
 0x577   : > { %v5851_v58 = vmax.f32 %v4944_v34, 0.0 }
 0x578   : > { %v12903_v53 = vpack.c.bf16 %v5850_v33, %v5834_v4 }
 0x579   : > { %v12901_v22 = vpack.c.bf16 %v5851_v58, %v5835_v29  ;;  %v5126_v48 = vpop.f32.mrb[176].mxu0 }
 0x57a   : > { %v5128_v63 = vpop.f32.mrb[177].mxu0  ;;  %v5742_v57 = vmax.f32 %v5126_v48, 0.0 }
 0x57b   : > { %12902 = vmatprep.subr.bf16.mxu0 %v12901_v22  ;;  %v5743_v1 = vmax.f32 %v5128_v63, 0.0 }
 0x57c   : > { %12904 = vmatpush1.bf16.msra.mxu0 %v12903_v53 }
 0x57d   : > { %v5132_v44 = vpop.f32.mrb[178].mxu0  ;;  %v5013_v27 = vpop.f32.mrb[160].mxu1 }
 0x57e   : > { %v5758_v6 = vmax.f32 %v5132_v44, 0.0  ;;  %v5134_v37 = vpop.f32.mrb[179].mxu0  ;;  %v5015_v42 = vpop.f32.mrb[161].mxu1  ;;  %v5740_v11 = vmax.f32 %v5013_v27, 0.0 }
 0x57f   : > { %12060 = vmatmul.mubr.msk.f32.vlgmr.msra.gmra.mrb[224].mxu0 %vm1709_vm4, %v17418_v39  ;;  %v5759_v52 = vmax.f32 %v5134_v37, 0.0  ;;  %v5741_v12 = vmax.f32 %v5015_v42, 0.0 }
 0x580   : > { %5936 = vmatprep.mubr.f32.mxu0 %v14704_v47  ;;  %v12923_v21 = vpack.c.bf16 %v5758_v6, %v5742_v57 }
 0x581   : > { %v12921_v8 = vpack.c.bf16 %v5759_v52, %v5743_v1  ;;  %v5138_v15 = vpop.f32.mrb[180].mxu0 }
 0x582   : > { %v5140_v40 = vpop.f32.mrb[181].mxu0  ;;  %v5774_v49 = vmax.f32 %v5138_v15, 0.0 }
 0x583   : > { %12061 = vmatmul.mubr.msk.f32.gmra.mrb[226].mxu0 %vm1709_vm4, %v17423_v14  ;;  %12922 = vmatprep.subr.bf16.mxu0 %v12921_v8  ;;  %v5019_v61 = vpop.f32.mrb[162].mxu1  ;;  %v5775_v51 = vmax.f32 %v5140_v40, 0.0 }
 0x584   : > { %12924 = vmatpush1.bf16.msra.mxu0 %v12923_v21  ;;  %v5756_v43 = vmax.f32 %v5019_v61, 0.0  ;;  %v5021_v60 = vpop.f32.mrb[163].mxu1  ;;  %6084 = vmatprep.mubr.f32.mxu0 %v14704_v47 }
 0x585   : > { %v5144_v19 = vpop.f32.mrb[182].mxu0  ;;  %v5757_v25 = vmax.f32 %v5021_v60, 0.0 }
 0x586   : > { %v5790_v26 = vmax.f32 %v5144_v19, 0.0  ;;  %v5146_v41 = vpop.f32.mrb[183].mxu0  ;;  %v12907_v23 = vpack.c.bf16 %v5756_v43, %v5740_v11 }
 0x587   : > { %v5791_v17 = vmax.f32 %v5146_v41, 0.0  ;;  %v12905_v55 = vpack.c.bf16 %v5757_v25, %v5741_v12 }
 0x588   : > { %v12927_v56 = vpack.c.bf16 %v5790_v26, %v5774_v49  ;;  %v5025_v62 = vpop.f32.mrb[164].mxu1 }
 0x589   : > { %v12925_v20 = vpack.c.bf16 %v5791_v17, %v5775_v51  ;;  %v5150_v38 = vpop.f32.mrb[184].mxu0  ;;  %12906 = vmatprep.subr.bf16.mxu1 %v12905_v55  ;;  %v5027_v13 = vpop.f32.mrb[165].mxu1  ;;  %v5772_v45 = vmax.f32 %v5025_v62, 0.0 }
 0x58a   : > { %v5152_v36 = vpop.f32.mrb[185].mxu0  ;;  %12908 = vmatpush1.bf16.msra.mxu1 %v12907_v23  ;;  %v5806_v35 = vmax.f32 %v5150_v38, 0.0  ;;  %v5773_v59 = vmax.f32 %v5027_v13, 0.0  ;;  %v14086_v38 = vunpack.i.h.bf16 %v17377_v16 }
 0x58b   : > { %12926 = vmatprep.subr.bf16.mxu0 %v12925_v20  ;;  %v5807_v9 = vmax.f32 %v5152_v36, 0.0 }
 0x58c   : > { %12928 = vmatpush1.bf16.msra.mxu0 %v12927_v56  ;;  %v5031_v28 = vpop.f32.mrb[166].mxu1 }
 0x58d   : > { %v5156_v2 = vpop.f32.mrb[186].mxu0  ;;  %v5788_v7 = vmax.f32 %v5031_v28, 0.0  ;;  %v5033_v10 = vpop.f32.mrb[167].mxu1 }
 0x58e   : > { %v5822_v4 = vmax.f32 %v5156_v2, 0.0  ;;  %v5158_v29 = vpop.f32.mrb[187].mxu0  ;;  %v5789_v5 = vmax.f32 %v5033_v10, 0.0  ;;  %v17430_v44 = vpop.permute.xlu1 %14098 }
 0x58f   : > { %v5823_v33 = vmax.f32 %v5158_v29, 0.0  ;;  %v12911_v34 = vpack.c.bf16 %v5788_v7, %v5772_v45 }
 0x590   : > { %v12931_v58 = vpack.c.bf16 %v5822_v4, %v5806_v35  ;;  %v12909_v53 = vpack.c.bf16 %v5789_v5, %v5773_v59  ;;  %v5037_v22 = vpop.f32.mrb[168].mxu1 }
 0x591   : > { %v12929_v48 = vpack.c.bf16 %v5823_v33, %v5807_v9  ;;  %v5162_v63 = vpop.f32.mrb[188].mxu0  ;;  %v5039_v57 = vpop.f32.mrb[169].mxu1  ;;  %v5804_v27 = vmax.f32 %v5037_v22, 0.0 }
 0x592   : > { %v5164_v1 = vpop.f32.mrb[189].mxu0  ;;  %12910 = vmatprep.subr.bf16.mxu1 %v12909_v53  ;;  %v5838_v6 = vmax.f32 %v5162_v63, 0.0  ;;  %v5805_v37 = vmax.f32 %v5039_v57, 0.0  ;;  %v6590_v53 = vsel %vm322_vm1, %v14085_v0, %v14086_v38 }
 0x593   : > { %12930 = vmatprep.subr.bf16.mxu0 %v12929_v48  ;;  %12912 = vmatpush1.bf16.msra.mxu1 %v12911_v34  ;;  %v5839_v52 = vmax.f32 %v5164_v1, 0.0 }
 0x594   : > { %12932 = vmatpush1.bf16.msra.mxu0 %v12931_v58  ;;  %v5043_v42 = vpop.f32.mrb[170].mxu1 }
 0x595   : > { %v5168_v21 = vpop.f32.mrb[190].mxu0  ;;  %v5820_v8 = vmax.f32 %v5043_v42, 0.0  ;;  %v5045_v15 = vpop.f32.mrb[171].mxu1 }
 0x596   : > { %v17432_v40 = vpop.permute.xlu0 %14093  ;;  %v5854_v11 = vmax.f32 %v5168_v21, 0.0  ;;  %v5170_v12 = vpop.f32.mrb[191].mxu0  ;;  %v5821_v61 = vmax.f32 %v5045_v15, 0.0 }
 0x597   : > { %v5855_v49 = vmax.f32 %v5170_v12, 0.0  ;;  %v12915_v43 = vpack.c.bf16 %v5820_v8, %v5804_v27 }
 0x598   : > { %v12935_v60 = vpack.c.bf16 %v5854_v11, %v5838_v6  ;;  %v12913_v51 = vpack.c.bf16 %v5821_v61, %v5805_v37  ;;  %v5049_v19 = vpop.f32.mrb[172].mxu1 }
 0x599   : > { %v17434_v25 = vpop.permute.xlu1 %14108  ;;  %v12933_v26 = vpack.c.bf16 %v5855_v49, %v5839_v52  ;;  %v5352_v41 = vpop.f32.mrb[192].mxu0  ;;  %v5836_v55 = vmax.f32 %v5049_v19, 0.0 }
 0x59a   : > { %v17436_v23 = vpop.permute.xlu0 %14103  ;;  %v5354_v17 = vpop.f32.mrb[193].mxu0  ;;  %12914 = vmatprep.subr.bf16.mxu1 %v12913_v51  ;;  %v5746_v62 = vmax.f32 %v5352_v41, 0.0 }
 0x59b   : > { %12934 = vmatprep.subr.bf16.mxu0 %v12933_v26  ;;  %v5051_v56 = vpop.f32.mrb[173].mxu1  ;;  %12916 = vmatpush1.bf16.msra.mxu1 %v12915_v43  ;;  %v5747_v36 = vmax.f32 %v5354_v17, 0.0 }
 0x59c   : > { %12936 = vmatpush1.bf16.msra.mxu0 %v12935_v60  ;;  %v5055_v20 = vpop.f32.mrb[174].mxu1  ;;  %v5837_v7 = vmax.f32 %v5051_v56, 0.0 }
 0x59d   : > { %v6617_v13 = vpop.permute.xlu1 %6616  ;;  %v5358_v45 = vpop.f32.mrb[194].mxu0  ;;  %v5852_v35 = vmax.f32 %v5055_v20, 0.0 }
 0x59e   : > { %v17439_v59 = vpop.permute.xlu0 %14113  ;;  %v6640_v28 = vsel %vm373_vm0, %v17406_v46, %v6617_v13  ;;  %v5762_v9 = vmax.f32 %v5358_v45, 0.0  ;;  %v5360_v2 = vpop.f32.mrb[195].mxu0 }
 0x59f   : > { %v14116_v10 = vunpack.i.h.bf16 %v17439_v59  ;;  %v14115_v4 = vunpack.i.l.bf16 %v17439_v59  ;;  %6749 = vrot.lane.b32.xlu0 %v6640_v28, %s14703_s12  ;;  %v5763_v29 = vmax.f32 %v5360_v2, 0.0  ;;  %12064 = vmatmul.mubr.msk.f32.vlgmr.msra.gmra.mrb[228].mxu0 %vm1709_vm4, %v17418_v39  ;;  %v12919_v5 = vpack.c.bf16 %v5852_v35, %v5836_v55  ;;  %v5057_v33 = vpop.f32.mrb[175].mxu1  ;;  %v6533_v59 = vld [vmem:[%s14907_s26 + $0x218] sm:$0xff] }
 0x5a0   : > { %v12955_v34 = vpack.c.bf16 %v5762_v9, %v5746_v62  ;;  %v5853_v58 = vmax.f32 %v5057_v33, 0.0  ;;  %6090 = vmatprep.mubr.f32.mxu0 %v14704_v47  ;;  %v5239_v46 = vpop.f32.mrb[176].mxu1 }
 0x5a1   : > { %v6591_v22 = vsel %vm322_vm1, %v14086_v38, %v14115_v4  ;;  %v17453_v48 = vpop.permute.xlu1 %6737  ;;  %v12953_v63 = vpack.c.bf16 %v5763_v29, %v5747_v36  ;;  %v5364_v57 = vpop.f32.mrb[196].mxu0  ;;  %v6592_v42 = vsel %vm322_vm1, %v14115_v4, %v14116_v10  ;;  %v5744_v16 = vmax.f32 %v5239_v46, 0.0  ;;  %v17471_v38 = vld [vmem:[%s14907_s26 + $0x210] sm:$0xff] }
 0x5a2   : > { %v17455_v1 = vpop.permute.xlu0 %14118  ;;  %v14167_v27 = vpack.i.bf16 %v6591_v22, %v6590_v53  ;;  %v5366_v6 = vpop.f32.mrb[197].mxu0  ;;  %v12917_v37 = vpack.c.bf16 %v5853_v58, %v5837_v7  ;;  %v5778_v52 = vmax.f32 %v5364_v57, 0.0  ;;  %v14172_v49 = vpack.i.bf16 %v6592_v42, %v17306_v54 }
 0x5a3   : > { %12954 = vmatprep.subr.bf16.mxu0 %v12953_v63  ;;  %12065 = vmatmul.mubr.msk.f32.gmra.mrb[230].mxu0 %vm1709_vm4, %v17423_v14  ;;  %v5241_v0 = vpop.f32.mrb[177].mxu1  ;;  %v5779_v15 = vmax.f32 %v5366_v6, 0.0 }
 0x5a4   : > { %14168 = vrot.lane.b32.xlu1 %v14167_v27, %s14703_s12  ;;  %12956 = vmatpush1.bf16.msra.mxu0 %v12955_v34  ;;  %v5245_v21 = vpop.f32.mrb[178].mxu1  ;;  %v5745_v51 = vmax.f32 %v5241_v0, 0.0 }
 0x5a5   : > { %v17463_v8 = vpop.permute.xlu1 %14123  ;;  %v5370_v11 = vpop.f32.mrb[198].mxu0  ;;  %12918 = vmatprep.subr.bf16.mxu1 %v12917_v37  ;;  %6238 = vmatprep.mubr.f32.mxu0 %v14704_v47  ;;  %v5760_v12 = vmax.f32 %v5245_v21, 0.0 }
 0x5a6   : > { %v6619_v61 = vpop.permute.xlu0 %6618  ;;  %v5794_v43 = vmax.f32 %v5370_v11, 0.0  ;;  %v5372_v60 = vpop.f32.mrb[199].mxu0  ;;  %12920 = vmatpush1.bf16.msra.mxu1 %v12919_v5 }
 0x5a7   : > { %v6641_v19 = vsel %vm373_vm0, %v6617_v13, %v6619_v61  ;;  %v5795_v26 = vmax.f32 %v5372_v60, 0.0  ;;  %v12939_v41 = vpack.c.bf16 %v5760_v12, %v5744_v16  ;;  %v5247_v17 = vpop.f32.mrb[179].mxu1 }
 0x5a8   : > { %14173 = vrot.lane.b32.xlu1 %v14172_v49, %s14703_s12  ;;  %6751 = vrot.lane.b32.xlu0 %v6641_v19, %s14703_s12  ;;  %v12959_v55 = vpack.c.bf16 %v5794_v43, %v5778_v52  ;;  %v5761_v56 = vmax.f32 %v5247_v17, 0.0  ;;  %v5251_v62 = vpop.f32.mrb[180].mxu1  ;;  %v14182_v43 = vpack.i.bf16 %v17369_v18, %v17348_v31 }
 0x5a9   : > { %v6621_v20 = vpop.permute.xlu1 %6620  ;;  %v12957_v54 = vpack.c.bf16 %v5795_v26, %v5779_v15  ;;  %v5376_v36 = vpop.f32.mrb[200].mxu0  ;;  %12062 = vmatmul.mubr.msk.f32.vlgmr.msra.gmra.mrb[224].mxu1 %vm1709_vm4, %v17418_v39  ;;  %v5776_v9 = vmax.f32 %v5251_v62, 0.0 }
 0x5aa   : > { %v17475_v45 = vpop.permute.xlu0 %14128  ;;  %v6642_v13 = vsel %vm373_vm0, %v6619_v61, %v6621_v20  ;;  %v5378_v35 = vpop.f32.mrb[201].mxu0  ;;  %v12937_v28 = vpack.c.bf16 %v5761_v56, %v5745_v51  ;;  %6013 = vmatprep.mubr.f32.mxu1 %v14704_v47  ;;  %v5810_v7 = vmax.f32 %v5376_v36, 0.0 }
 0x5ab   : > { %12958 = vmatprep.subr.bf16.mxu0 %v12957_v54  ;;  %v5253_v2 = vpop.f32.mrb[181].mxu1  ;;  %v5811_v5 = vmax.f32 %v5378_v35, 0.0 }
 0x5ac   : > { %6652 = vrot.lane.b32.xlu1 %v17471_v38, %s14701_s22  ;;  %6753 = vrot.lane.b32.xlu0 %v6642_v13, %s14703_s12  ;;  %v5257_v4 = vpop.f32.mrb[182].mxu1  ;;  %v5777_v22 = vmax.f32 %v5253_v2, 0.0 }
 0x5ad   : > { %v17482_v29 = vpop.permute.xlu1 %6739  ;;  %v5382_v33 = vpop.f32.mrb[202].mxu0  ;;  %12960 = vmatpush1.bf16.msra.mxu0 %v12959_v55  ;;  %12938 = vmatprep.subr.bf16.mxu1 %v12937_v28  ;;  %v5792_v34 = vmax.f32 %v5257_v4, 0.0 }
 0x5ae   : > { %v17484_v58 = vpop.permute.xlu0 %6574  ;;  %v5826_v46 = vmax.f32 %v5382_v33, 0.0  ;;  %v5384_v53 = vpop.f32.mrb[203].mxu0  ;;  %12940 = vmatpush1.bf16.msra.mxu1 %v12939_v41 }
 0x5af   : > { %v6593_v63 = vsel %vm322_vm1, %v14116_v10, %v17484_v58  ;;  %v5827_v57 = vmax.f32 %v5384_v53, 0.0  ;;  %v12943_v27 = vpack.c.bf16 %v5792_v34, %v5776_v9  ;;  %v5259_v6 = vpop.f32.mrb[183].mxu1  ;;  %12063 = vmatmul.mubr.msk.f32.gmra.mrb[226].mxu1 %vm1709_vm4, %v17423_v14 }
 0x5b0   : > { %v14177_v37 = vpack.i.bf16 %v6593_v63, %v17309_v24  ;;  %6655 = vrot.lane.b32.xlu1 %v17471_v38, %s14702_s24  ;;  %v12963_v42 = vpack.c.bf16 %v5826_v46, %v5810_v7  ;;  %v5793_v16 = vmax.f32 %v5259_v6, 0.0  ;;  %v5263_v0 = vpop.f32.mrb[184].mxu1  ;;  %6161 = vmatprep.mubr.f32.mxu1 %v14704_v47 }
 0x5b1   : > { %v17496_v52 = vpop.permute.xlu1 %6622  ;;  %v12961_v10 = vpack.c.bf16 %v5827_v57, %v5811_v5  ;;  %v5388_v21 = vpop.f32.mrb[204].mxu0  ;;  %v5808_v61 = vmax.f32 %v5263_v0, 0.0 }
 0x5b2   : > { %v17499_v15 = vpop.permute.xlu0 %6785  ;;  %14178 = vrot.lane.b32.xlu0 %v14177_v37, %s14703_s12  ;;  %v5390_v11 = vpop.f32.mrb[205].mxu0  ;;  %v12941_v12 = vpack.c.bf16 %v5793_v16, %v5777_v22  ;;  %v6643_v24 = vsel %vm373_vm0, %v6621_v20, %v17496_v52  ;;  %v5842_v60 = vmax.f32 %v5388_v21, 0.0 }
 0x5b3   : > { %12962 = vmatprep.subr.bf16.mxu0 %v12961_v10  ;;  %v5265_v49 = vpop.f32.mrb[185].mxu1  ;;  %v5843_v26 = vmax.f32 %v5390_v11, 0.0 }
 0x5b4   : > { %6659 = vrot.lane.b32.xlu1 %v6533_v59, %s14701_s22  ;;  %12964 = vmatpush1.bf16.msra.mxu0 %v12963_v42  ;;  %v5269_v51 = vpop.f32.mrb[186].mxu1  ;;  %v5809_v20 = vmax.f32 %v5265_v49, 0.0 }
 0x5b5   : > { %v17507_v19 = vpop.permute.xlu1 %14138  ;;  %v5394_v41 = vpop.f32.mrb[206].mxu0  ;;  %12942 = vmatprep.subr.bf16.mxu1 %v12941_v12  ;;  %v5824_v17 = vmax.f32 %v5269_v51, 0.0 }
 0x5b6   : > { %v17509_v55 = vpop.permute.xlu0 %14133  ;;  %6755 = vrot.lane.b32.xlu0 %v6643_v24, %s14703_s12  ;;  %v5858_v56 = vmax.f32 %v5394_v41, 0.0  ;;  %v5396_v62 = vpop.f32.mrb[207].mxu0  ;;  %12944 = vmatpush1.bf16.msra.mxu1 %v12943_v27 }
 0x5b7   : > { %v5859_v31 = vmax.f32 %v5396_v62, 0.0  ;;  %v12947_v18 = vpack.c.bf16 %v5824_v17, %v5808_v61  ;;  %v5271_v54 = vpop.f32.mrb[187].mxu1 }
 0x5b8   : > { %14183 = vrot.lane.b32.xlu1 %v14182_v43, %s14703_s12  ;;  %v12967_v36 = vpack.c.bf16 %v5858_v56, %v5842_v60  ;;  %v5825_v13 = vmax.f32 %v5271_v54, 0.0  ;;  %v5275_v35 = vpop.f32.mrb[188].mxu1 }
 0x5b9   : > { %v17513_v28 = vpop.permute.xlu1 %14143  ;;  %v12965_v9 = vpack.c.bf16 %v5859_v31, %v5843_v26  ;;  %v5578_v2 = vpop.f32.mrb[208].mxu0  ;;  %v5840_v33 = vmax.f32 %v5275_v35, 0.0 }
 0x5ba   : > { %v17515_v7 = vpop.permute.xlu0 %6741  ;;  %v5580_v4 = vpop.f32.mrb[209].mxu0  ;;  %v12945_v5 = vpack.c.bf16 %v5825_v13, %v5809_v20  ;;  %v5750_v46 = vmax.f32 %v5578_v2, 0.0 }
 0x5bb   : > { %12966 = vmatprep.subr.bf16.mxu0 %v12965_v9  ;;  %v5277_v34 = vpop.f32.mrb[189].mxu1  ;;  %v5751_v63 = vmax.f32 %v5580_v4, 0.0 }
 0x5bc   : > { %12968 = vmatpush1.bf16.msra.mxu0 %v12967_v36  ;;  %12946 = vmatprep.subr.bf16.mxu1 %v12945_v5  ;;  %v5281_v53 = vpop.f32.mrb[190].mxu1  ;;  %v5841_v59 = vmax.f32 %v5277_v34, 0.0 }
 0x5bd   : > { %v17517_v22 = vpop.permute.xlu1 %14148  ;;  %v5584_v57 = vpop.f32.mrb[210].mxu0  ;;  %v5856_v27 = vmax.f32 %v5281_v53, 0.0  ;;  %12948 = vmatpush1.bf16.msra.mxu1 %v12947_v18 }
 0x5be   : > { %v14151_v6 = vunpack.i.h.bf16 %v17517_v22  ;;  %v14150_v37 = vunpack.i.l.bf16 %v17517_v22  ;;  %v17521_v42 = vpop.permute.xlu0 %6743  ;;  %v5766_v16 = vmax.f32 %v5584_v57, 0.0  ;;  %v5586_v0 = vpop.f32.mrb[211].mxu0 }
 0x5bf   : > { %v5767_v10 = vmax.f32 %v5586_v0, 0.0  ;;  %12068 = vmatmul.mubr.msk.f32.vlgmr.msra.gmra.mrb[232].mxu0 %vm1709_vm4, %v17418_v39  ;;  %v12951_v21 = vpack.c.bf16 %v5856_v27, %v5840_v33  ;;  %v5283_v11 = vpop.f32.mrb[191].mxu1 }
 0x5c0   : > { %v6594_v12 = vsel %vm322_vm1, %v17484_v58, %v14150_v37  ;;  %v6595_v24 = vsel %vm322_vm1, %v14150_v37, %v14151_v6  ;;  %v12987_v61 = vpack.c.bf16 %v5766_v16, %v5750_v46  ;;  %6244 = vmatprep.mubr.f32.mxu0 %v14704_v47  ;;  %v5857_v49 = vmax.f32 %v5283_v11, 0.0  ;;  %v5465_v43 = vpop.f32.mrb[192].mxu1 }
 0x5c1   : > { %v14187_v60 = vpack.i.bf16 %v6595_v24, %v6594_v12  ;;  %v17531_v51 = vpop.permute.xlu1 %6745  ;;  %v12985_v26 = vpack.c.bf16 %v5767_v10, %v5751_v63  ;;  %v5590_v41 = vpop.f32.mrb[212].mxu0  ;;  %v5748_v20 = vmax.f32 %v5465_v43, 0.0 }
 0x5c2   : > { %v6625_v17 = vpop.permute.xlu0 %6624  ;;  %v5592_v56 = vpop.f32.mrb[213].mxu0  ;;  %v12949_v62 = vpack.c.bf16 %v5857_v49, %v5841_v59  ;;  %v5782_v18 = vmax.f32 %v5590_v41, 0.0 }
 0x5c3   : > { %14188 = vrot.lane.b32.xlu0 %v14187_v60, %s14703_s12  ;;  %v6644_v58 = vsel %vm373_vm0, %v17496_v52, %v6625_v17  ;;  %12986 = vmatprep.subr.bf16.mxu0 %v12985_v26  ;;  %v5467_v31 = vpop.f32.mrb[193].mxu1  ;;  %v5783_v13 = vmax.f32 %v5592_v56, 0.0 }
 0x5c4   : > { %6757 = vrot.lane.b32.xlu1 %v6644_v58, %s14703_s12  ;;  %12988 = vmatpush1.bf16.msra.mxu0 %v12987_v61  ;;  %v5471_v54 = vpop.f32.mrb[194].mxu1  ;;  %v5749_v5 = vmax.f32 %v5467_v31, 0.0 }
 0x5c5   : > { %v17537_v36 = vpop.permute.xlu1 %14153  ;;  %v5596_v35 = vpop.f32.mrb[214].mxu0  ;;  %12069 = vmatmul.mubr.msk.f32.gmra.mrb[234].mxu0 %vm1709_vm4, %v17423_v14  ;;  %12950 = vmatprep.subr.bf16.mxu1 %v12949_v62  ;;  %v5764_v9 = vmax.f32 %v5471_v54, 0.0 }
 0x5c6   : > { %v6627_v2 = vpop.permute.xlu0 %6626  ;;  %v5798_v4 = vmax.f32 %v5596_v35, 0.0  ;;  %v5598_v52 = vpop.f32.mrb[215].mxu0  ;;  %6392 = vmatprep.mubr.f32.mxu0 %v14704_v47  ;;  %12952 = vmatpush1.bf16.msra.mxu1 %v12951_v21 }
 0x5c7   : > { %6693 = vrot.lane.b32.xlu0 %v17374_v32, %s14703_s12  ;;  %v6645_v33 = vsel %vm373_vm0, %v6625_v17, %v6627_v2  ;;  %v5799_v34 = vmax.f32 %v5598_v52, 0.0  ;;  %v12971_v46 = vpack.c.bf16 %v5764_v9, %v5748_v20  ;;  %v5473_v53 = vpop.f32.mrb[195].mxu1  ;;  %v14090_v52 = vunpack.i.l.bf16 %v17428_v3 }
 0x5c8   : > { %6759 = vrot.lane.b32.xlu1 %v6645_v33, %s14703_s12  ;;  %v12991_v63 = vpack.c.bf16 %v5798_v4, %v5782_v18  ;;  %v5765_v57 = vmax.f32 %v5473_v53, 0.0  ;;  %v5477_v27 = vpop.f32.mrb[196].mxu1 }
 0x5c9   : > { %v12989_v37 = vpack.c.bf16 %v5799_v34, %v5783_v13  ;;  %v6629_v16 = vpop.permute.xlu1 %6628  ;;  %v5602_v0 = vpop.f32.mrb[216].mxu0  ;;  %12066 = vmatmul.mubr.msk.f32.vlgmr.msra.gmra.mrb[228].mxu1 %vm1709_vm4, %v17418_v39  ;;  %v5780_v24 = vmax.f32 %v5477_v27, 0.0 }
 0x5ca   : > { %v14159_v59 = vpop.permute.xlu0 %14158  ;;  %v5604_v10 = vpop.f32.mrb[217].mxu0  ;;  %v6646_v32 = vsel %vm373_vm0, %v6627_v2, %v6629_v16  ;;  %v12969_v21 = vpack.c.bf16 %v5765_v57, %v5749_v5  ;;  %6167 = vmatprep.mubr.f32.mxu1 %v14704_v47  ;;  %v5814_v49 = vmax.f32 %v5602_v0, 0.0  ;;  %v14095_v57 = vunpack.i.l.bf16 %v17432_v40 }
 0x5cb   : > { %v17550_v11 = vunpack.i.h.bf16 %v14159_v59  ;;  %v14160_v12 = vunpack.i.l.bf16 %v14159_v59  ;;  %12990 = vmatprep.subr.bf16.mxu0 %v12989_v37  ;;  %v5479_v61 = vpop.f32.mrb[197].mxu1  ;;  %v5815_v41 = vmax.f32 %v5604_v10, 0.0 }
 0x5cc   : > { %6761 = vrot.lane.b32.xlu1 %v6646_v32, %s14703_s12  ;;  %12992 = vmatpush1.bf16.msra.mxu0 %v12991_v63  ;;  %v5483_v43 = vpop.f32.mrb[198].mxu1  ;;  %v5781_v18 = vmax.f32 %v5479_v61, 0.0  ;;  %v17574_v63 = vunpack.i.h.bf16 %v17432_v40 }
 0x5cd   : > { %v6650_v60 = vsel %vm322_vm1, %v14160_v12, %v17550_v11  ;;  %v6596_v26 = vsel %vm322_vm1, %v14151_v6, %v14160_v12  ;;  %v5608_v17 = vpop.f32.mrb[218].mxu0  ;;  %v17558_v56 = vpop.permute.xlu1 %6630  ;;  %12970 = vmatprep.subr.bf16.mxu1 %v12969_v21  ;;  %v5796_v62 = vmax.f32 %v5483_v43, 0.0  ;;  %12067 = vmatmul.mubr.msk.f32.gmra.mrb[230].mxu1 %vm1709_vm4, %v17423_v14  ;;  %v14197_v4 = vpack.i.bf16 %v17550_v11, %v17399_v30 }
 0x5ce   : > { %6727 = vrot.lane.b32.xlu0 %v6596_v26, %s14703_s12  ;;  %v5830_v58 = vmax.f32 %v5608_v17, 0.0  ;;  %v5610_v20 = vpop.f32.mrb[219].mxu0  ;;  %v14192_v31 = vpack.i.bf16 %v6650_v60, %v17396_v50  ;;  %v6647_v22 = vsel %vm373_vm0, %v6629_v16, %v17558_v56  ;;  %12972 = vmatpush1.bf16.msra.mxu1 %v12971_v46  ;;  %v5485_v13 = vpop.f32.mrb[199].mxu1  ;;  %v14091_v50 = vunpack.i.h.bf16 %v17428_v3 }
 0x5cf   : > { %v5831_v6 = vmax.f32 %v5610_v20, 0.0  ;;  %v12975_v54 = vpack.c.bf16 %v5796_v62, %v5780_v24  ;;  %6315 = vmatprep.mubr.f32.mxu1 %v14704_v47  ;;  %v5797_v9 = vmax.f32 %v5485_v13, 0.0  ;;  %v14101_v21 = vunpack.i.h.bf16 %v17430_v44 }
 0x5d0   : > { %v12995_v35 = vpack.c.bf16 %v5830_v58, %v5814_v49  ;;  %6763 = vrot.lane.b32.xlu1 %v6647_v22, %s14703_s12  ;;  %v5489_v2 = vpop.f32.mrb[200].mxu1  ;;  %v6790_v59 = vsel %vm531_vm2, %v14090_v52, %v14091_v50  ;;  %v14100_v24 = vunpack.i.l.bf16 %v17430_v44  ;;  %v14110_v43 = vunpack.i.l.bf16 %v17434_v25 }
 0x5d1   : > { %v12993_v5 = vpack.c.bf16 %v5831_v6, %v5815_v41  ;;  %v5614_v33 = vpop.f32.mrb[220].mxu0  ;;  %v5491_v34 = vpop.f32.mrb[201].mxu1  ;;  %v12973_v53 = vpack.c.bf16 %v5797_v9, %v5781_v18  ;;  %v5812_v27 = vmax.f32 %v5489_v2, 0.0  ;;  %v6806_v26 = vsel %vm531_vm2, %v14095_v57, %v17574_v63 }
 0x5d2   : > { %14193 = vrot.lane.b32.xlu0 %v14192_v31, %s14703_s12  ;;  %v5616_v46 = vpop.f32.mrb[221].mxu0  ;;  %v5846_v37 = vmax.f32 %v5614_v33, 0.0  ;;  %v5813_v30 = vmax.f32 %v5491_v34, 0.0  ;;  %v14106_v17 = vunpack.i.h.bf16 %v17436_v23  ;;  %v14105_v62 = vunpack.i.l.bf16 %v17436_v23 }
 0x5d3   : > { %12994 = vmatprep.subr.bf16.mxu0 %v12993_v5  ;;  %v5847_v16 = vmax.f32 %v5616_v46, 0.0  ;;  %12974 = vmatprep.subr.bf16.mxu1 %v12973_v53  ;;  %v6805_v18 = vsel %vm531_vm2, %v14101_v21, %v14095_v57  ;;  %v14111_v6 = vunpack.i.h.bf16 %v17434_v25  ;;  %v14125_v25 = vunpack.i.l.bf16 %v17463_v8 }
 0x5d4   : > { %12996 = vmatpush1.bf16.msra.mxu0 %v12995_v35  ;;  %14198 = vrot.lane.b32.xlu1 %v14197_v4, %s14703_s12  ;;  %v5495_v3 = vpop.f32.mrb[202].mxu1  ;;  %v14120_v35 = vunpack.i.l.bf16 %v17455_v1  ;;  %v17592_v23 = vsel %vm531_vm2, %v14091_v50, %v14105_v62  ;;  %v6822_v9 = vsel %vm531_vm2, %v14106_v17, %v14110_v43  ;;  %v14130_v57 = vunpack.i.l.bf16 %v17475_v45 }
 0x5d5   : > { %v5620_v0 = vpop.f32.mrb[222].mxu0  ;;  %v5828_v10 = vmax.f32 %v5495_v3, 0.0  ;;  %v5497_v32 = vpop.f32.mrb[203].mxu1  ;;  %12976 = vmatpush1.bf16.msra.mxu1 %v12975_v54  ;;  %v13017_v54 = vpack.c.bf16 %v6806_v26, %v6790_v59  ;;  %v6821_v46 = vsel %vm531_vm2, %v14111_v6, %v14106_v17  ;;  %v13021_v53 = vpack.c.bf16 %v17592_v23, %v6822_v9 }
 0x5d6   : > { %v5862_v40 = vmax.f32 %v5620_v0, 0.0  ;;  %v5622_v61 = vpop.f32.mrb[223].mxu0  ;;  %6729 = vrot.lane.b32.xlu0 %v14160_v12, %s14703_s12  ;;  %v5829_v49 = vmax.f32 %v5497_v32, 0.0  ;;  %v6789_v12 = vsel %vm531_vm2, %v14100_v24, %v14090_v52  ;;  %v14126_v3 = vunpack.i.h.bf16 %v17463_v8 }
 0x5d7   : > { %v5863_v60 = vmax.f32 %v5622_v61, 0.0  ;;  %v12979_v41 = vpack.c.bf16 %v5828_v10, %v5812_v27  ;;  %v13019_v33 = vpack.c.bf16 %v6805_v18, %v6789_v12  ;;  %v17603_v27 = vsel %vm531_vm2, %v17574_v63, %v14120_v35  ;;  %v17677_v12 = vld [vmem:[#allocation7] sm:$0xff] }
 0x5d8   : > { %v12999_v58 = vpack.c.bf16 %v5862_v40, %v5846_v37  ;;  %v12977_v20 = vpack.c.bf16 %v5829_v49, %v5813_v30  ;;  %v5501_v44 = vpop.f32.mrb[204].mxu1  ;;  %v14121_v30 = vunpack.i.h.bf16 %v17455_v1  ;;  %v17610_v0 = vsel %vm531_vm2, %v14110_v43, %v17453_v48 }
 0x5d9   : > { %v12997_v31 = vpack.c.bf16 %v5863_v60, %v5847_v16  ;;  %v5503_v22 = vpop.f32.mrb[205].mxu1  ;;  %v5844_v13 = vmax.f32 %v5501_v44, 0.0  ;;  %v13023_v16 = vpack.c.bf16 %v6790_v59, %v6821_v46  ;;  %v6841_v10 = vsel %vm531_vm2, %v14125_v25, %v14110_v43 }
 0x5da   : > { %12978 = vmatprep.subr.bf16.mxu1 %v12977_v20  ;;  %v5845_v2 = vmax.f32 %v5503_v22, 0.0  ;;  %v14131_v32 = vunpack.i.h.bf16 %v17475_v45  ;;  %v13025_v21 = vpack.c.bf16 %v17610_v0, %v17603_v27  ;;  %v17619_v1 = vsel %vm531_vm2, %v14120_v35, %v14130_v57 }
 0x5db   : > { %12998 = vmatprep.subr.bf16.mxu0 %v12997_v31  ;;  %12980 = vmatpush1.bf16.msra.mxu1 %v12979_v41  ;;  %v6838_v8 = vsel %vm531_vm2, %v14121_v30, %v17574_v63  ;;  %v17625_v45 = vsel %vm531_vm2, %v14105_v62, %v14126_v3  ;;  %v14141_v61 = vunpack.i.h.bf16 %v17507_v19  ;;  %v14135_v63 = vunpack.i.l.bf16 %v17509_v55  ;;  %v17728_v30 = vld [vmem:[#allocation7 + $0x18] sm:$0xff] }
 0x5dc   : > { %13000 = vmatpush1.bf16.msra.mxu0 %v12999_v58  ;;  %v5507_v4 = vpop.f32.mrb[206].mxu1  ;;  %v13027_v59 = vpack.c.bf16 %v6841_v10, %v6838_v8  ;;  %v6844_v24 = vsel %vm531_vm2, %v14131_v32, %v14120_v35  ;;  %v17632_v40 = vpack.c.bf16 %v17619_v1, %v17625_v45  ;;  %v14140_v49 = vunpack.i.l.bf16 %v17507_v19  ;;  %v17707_v35 = vld [vmem:[#allocation7 + $0x8] sm:$0xff]  ;;  %v17740_v8 = vld [vmem:[#allocation7 + $0x20] sm:$0xff] }
 0x5dd   : > { %13018 = vmatprep.subr.bf16.mxu0 %v13017_v54  ;;  %v5860_v52 = vmax.f32 %v5507_v4, 0.0  ;;  %v5509_v5 = vpop.f32.mrb[207].mxu1  ;;  %v14136_v43 = vunpack.i.h.bf16 %v17509_v55  ;;  %v17645_v60 = vsel %vm531_vm2, %v14126_v3, %v14135_v63  ;;  %v14145_v26 = vunpack.i.l.bf16 %v17513_v28 }
 0x5de   : > { %v5861_v34 = vmax.f32 %v5509_v5, 0.0  ;;  %v17651_v41 = vsel %vm531_vm2, %v17453_v48, %v17482_v29  ;;  %v6810_v19 = vsel %vm531_vm2, %v14140_v49, %v14141_v61  ;;  %v17656_v55 = vsel %vm531_vm2, %v14130_v57, %v14140_v49  ;;  %v17718_v5 = vld [vmem:[#allocation7 + $0x10] sm:$0xff] }
 0x5df   : > { %12072 = vmatmul.mubr.msk.f32.vlgmr.msra.gmra.mrb[236].mxu0 %vm1709_vm4, %v17418_v39  ;;  %v12983_v50 = vpack.c.bf16 %v5860_v52, %v5844_v13  ;;  %v6794_v17 = vsel %vm531_vm2, %v14135_v63, %v14136_v43  ;;  %v6847_v62 = vsel %vm531_vm2, %v17499_v15, %v17453_v48  ;;  %v17667_v20 = vpack.c.bf16 %v17656_v55, %v17645_v60 }
 0x5e0   : > { %13020 = vmatpush1.bf16.msra.mxu0 %v13019_v33  ;;  %6398 = vmatprep.mubr.f32.mxu0 %v14704_v47  ;;  %v12981_v37 = vpack.c.bf16 %v5861_v34, %v5845_v2  ;;  %v17663_v58 = vpack.c.bf16 %v6810_v19, %v6794_v17  ;;  %v17672_v44 = vsel %vm531_vm2, %v17515_v7, %v17521_v42  ;;  %v14156_v31 = vunpack.i.h.bf16 %v17537_v36 }
 0x5e1   : > { %13022 = vmatprep.subr.bf16.mxu0 %v13021_v53  ;;  %v6795_v22 = vsel %vm531_vm2, %v14136_v43, %v14145_v26  ;;  %v17686_v15 = vsel %vm531_vm2, %v17521_v42, %v17531_v51  ;;  %v17694_v6 = vsel %vm531_vm2, %v17482_v29, %v17515_v7  ;;  %v13059_v4 = vpack.c.bf16 %v17672_v44, %v6810_v19  ;;  %v17746_v43 = vld [vmem:[#allocation7 + $0x28] sm:$0xff] }
 0x5e2   : > { %12982 = vmatprep.subr.bf16.mxu1 %v12981_v37  ;;  %v13053_v48 = vpack.c.bf16 %v6795_v22, %v17672_v44  ;;  %v13055_v54 = vpack.c.bf16 %v6794_v17, %v17694_v6  ;;  %v17726_v37 = vpop.permute.xlu0 %6747  ;;  %v17751_v17 = vld [vmem:[#allocation7 + $0x30] sm:$0xff] }
 0x5e3   : > { %12073 = vmatmul.mubr.msk.f32.gmra.mrb[238].mxu0 %vm1709_vm4, %v17423_v14  ;;  %12984 = vmatpush1.bf16.msra.mxu1 %v12983_v50  ;;  %v17736_v10 = vsel %vm531_vm2, %v17531_v51, %v17726_v37 }
 0x5e4   : > { %13024 = vmatpush1.bf16.msra.mxu0 %v13023_v16  ;;  %6973 = vmatprep.mubr.f32.mxu0 %v14704_v47 }
 0x5e5   : > { %13026 = vmatprep.subr.bf16.mxu0 %v13025_v21 }
 0x5e6   : > { %12070 = vmatmul.mubr.msk.f32.vlgmr.msra.gmra.mrb[232].mxu1 %vm1709_vm4, %v17418_v39  ;;  %v13031_v39 = vpack.c.bf16 %v6844_v24, %v17592_v23 }
 0x5e7   : > { %6321 = vmatprep.mubr.f32.mxu1 %v14704_v47 }
 0x5e8   : > { %13028 = vmatpush1.bf16.msra.mxu0 %v13027_v59 }
 0x5e9   : > { %13030 = vmatprep.subr.bf16.mxu0 %v17632_v40 }
 0x5ea   : > { %12071 = vmatmul.mubr.msk.f32.gmra.mrb[234].mxu1 %vm1709_vm4, %v17423_v14  ;;  %v14146_v14 = vunpack.i.h.bf16 %v17513_v28  ;;  %v14155_v28 = vunpack.i.l.bf16 %v17537_v36 }
 0x5eb   : > { %6469 = vmatprep.mubr.f32.mxu1 %v14704_v47 }
 0x5ec   : > { %13032 = vmatpush1.bf16.msra.mxu0 %v13031_v39  ;;  %v6811_v18 = vsel %vm531_vm2, %v14141_v61, %v14146_v14  ;;  %v17700_v13 = vsel %vm531_vm2, %v14145_v26, %v14155_v28  ;;  %v17705_v42 = vsel %vm531_vm2, %v14146_v14, %v14156_v31 }
 0x5ed   : > { %6925 = vmatprep.subr.mxu0 %v17651_v41  ;;  %v13057_v29 = vpack.c.bf16 %v17686_v15, %v6811_v18  ;;  %v17715_v2 = vpack.c.bf16 %v17705_v42, %v17700_v13  ;;  %v17724_v50 = vpack.c.bf16 %v6811_v18, %v6795_v22 }
 0x5f0   : > { %6926 = vmatpush1.msra.mxu0 %v6847_v62 }
 0x5f1   : > { %12076 = vmatmul.mubr.msk.f32.vlgmr.msra.gmra.mrb[240].mxu0 %vm652_vm3, %v17677_v12  ;;  %13050 = vmatprep.subr.bf16.mxu0 %v17663_v58 }
 0x5f2   : > { %13052 = vmatpush1.bf16.msra.mxu0 %v17667_v20  ;;  %6979 = vmatprep.mubr.f32.mxu0 %v14704_v47 }
 0x5f3   : > { %13054 = vmatprep.subr.bf16.mxu0 %v13053_v48 }
 0x5f4   : > { %v5691_v7 = vpop.f32.mrb[208].mxu1 }
 0x5f5   : > { %12077 = vmatmul.mubr.msk.f32.gmra.mrb[242].mxu0 %vm652_vm3, %v17707_v35  ;;  %v5693_v9 = vpop.f32.mrb[209].mxu1  ;;  %v5752_v52 = vmax.f32 %v5691_v7, 0.0  ;;  %v17756_v7 = vld [vmem:[#allocation7 + $0x38] sm:$0xff] }
 0x5f6   : > { %13056 = vmatpush1.bf16.msra.mxu0 %v13055_v54  ;;  %6985 = vmatprep.mubr.f32.mxu0 %v14704_v47  ;;  %v5753_v33 = vmax.f32 %v5693_v9, 0.0 }
 0x5f7   : > { %13058 = vmatprep.subr.bf16.mxu0 %v13057_v29 }
 0x5f8   : > { %v5697_v34 = vpop.f32.mrb[210].mxu1 }
 0x5f9   : > { %12078 = vmatmul.mubr.msk.f32.gmra.mrb[244].mxu0 %vm652_vm3, %v17718_v5  ;;  %v5768_v25 = vmax.f32 %v5697_v34, 0.0  ;;  %v5699_v46 = vpop.f32.mrb[211].mxu1  ;;  %v14164_v34 = vpop.permute.xlu0 %14163 }
 0x5fa   : > { %13060 = vmatpush1.bf16.msra.mxu0 %v13059_v4  ;;  %6991 = vmatprep.mubr.f32.mxu0 %v14704_v47  ;;  %v5769_v53 = vmax.f32 %v5699_v46, 0.0 }
 0x5fb   : > { %13062 = vmatprep.subr.bf16.mxu0 %v17715_v2  ;;  %v13003_v57 = vpack.c.bf16 %v5768_v25, %v5752_v52 }
 0x5fc   : > { %v13001_v3 = vpack.c.bf16 %v5769_v53, %v5753_v33  ;;  %v5703_v16 = vpop.f32.mrb[212].mxu1 }
 0x5fd   : > { %12079 = vmatmul.mubr.msk.f32.gmra.mrb[246].mxu0 %vm652_vm3, %v17728_v30  ;;  %v5705_v32 = vpop.f32.mrb[213].mxu1  ;;  %v5784_v21 = vmax.f32 %v5703_v16, 0.0  ;;  %v14165_v16 = vunpack.i.l.bf16 %v14164_v34 }
 0x5fe   : > { %13064 = vmatpush1.bf16.msra.mxu0 %v17724_v50  ;;  %6997 = vmatprep.mubr.f32.mxu0 %v14704_v47  ;;  %v5785_v59 = vmax.f32 %v5705_v32, 0.0 }
 0x5ff   : > { %7151 = vmatprep.subr.mxu0 %v17736_v10  ;;  %13002 = vmatprep.subr.bf16.mxu1 %v13001_v3 }
 0x600   : > { %13004 = vmatpush1.bf16.msra.mxu1 %v13003_v57  ;;  %v5709_v24 = vpop.f32.mrb[214].mxu1 }
 0x601   : > { %12080 = vmatmul.mubr.msk.f32.gmra.mrb[248].mxu0 %vm652_vm3, %v17740_v8  ;;  %v5800_v51 = vmax.f32 %v5709_v24, 0.0  ;;  %v5711_v61 = vpop.f32.mrb[215].mxu1 }
 0x602   : > { %7152 = vmatpush1.msra.mxu0 %v17686_v15  ;;  %7003 = vmatprep.mubr.f32.mxu0 %v14704_v47  ;;  %v5801_v63 = vmax.f32 %v5711_v61, 0.0 }
 0x603   : > { %v13007_v49 = vpack.c.bf16 %v5800_v51, %v5784_v21  ;;  %v14166_v21 = vunpack.i.h.bf16 %v14164_v34 }
 0x604   : > { %v13005_v39 = vpack.c.bf16 %v5801_v63, %v5785_v59  ;;  %v5715_v26 = vpop.f32.mrb[216].mxu1 }
 0x605   : > { %12081 = vmatmul.mubr.msk.f32.gmra.mrb[250].mxu0 %vm652_vm3, %v17746_v43  ;;  %v5717_v19 = vpop.f32.mrb[217].mxu1  ;;  %v5816_v14 = vmax.f32 %v5715_v26, 0.0  ;;  %v6798_v26 = vsel %vm531_vm2, %v14165_v16, %v14166_v21 }
 0x606   : > { %7009 = vmatprep.mubr.f32.mxu0 %v14704_v47  ;;  %13006 = vmatprep.subr.bf16.mxu1 %v13005_v39  ;;  %v5817_v62 = vmax.f32 %v5717_v19, 0.0 }
 0x607   : > { %13008 = vmatpush1.bf16.msra.mxu1 %v13007_v49  ;;  %v17770_v49 = vsel %vm531_vm2, %v14155_v28, %v14165_v16 }
 0x608   : > { %v5721_v22 = vpop.f32.mrb[218].mxu1 }
 0x609   : > { %12082 = vmatmul.mubr.msk.f32.gmra.mrb[252].mxu0 %vm652_vm3, %v17751_v17  ;;  %v5832_v48 = vmax.f32 %v5721_v22, 0.0  ;;  %v5723_v18 = vpop.f32.mrb[219].mxu1 }
 0x60a   : > { %7015 = vmatprep.mubr.f32.mxu0 %v14704_v47  ;;  %v5833_v54 = vmax.f32 %v5723_v18, 0.0  ;;  %v13037_v18 = vpack.c.bf16 %v17645_v60, %v17651_v41 }
 0x60b   : > { %v13011_v29 = vpack.c.bf16 %v5832_v48, %v5816_v14  ;;  %v13035_v14 = vpack.c.bf16 %v17603_v27, %v17592_v23 }
 0x60c   : > { %v13009_v9 = vpack.c.bf16 %v5833_v54, %v5817_v62  ;;  %v5727_v4 = vpop.f32.mrb[220].mxu1 }
 0x60d   : > { %12083 = vmatmul.mubr.msk.f32.gmra.mrb[254].mxu0 %vm652_vm3, %v17756_v7  ;;  %v5729_v52 = vpop.f32.mrb[221].mxu1  ;;  %v5848_v33 = vmax.f32 %v5727_v4, 0.0 }
 0x60e   : > { %7199 = vmatprep.mubr.f32.mxu0 %v14704_v47  ;;  %13010 = vmatprep.subr.bf16.mxu1 %v13009_v9  ;;  %v5849_v25 = vmax.f32 %v5729_v52, 0.0 }
 0x60f   : > { %13012 = vmatpush1.bf16.msra.mxu1 %v13011_v29  ;;  %v13039_v29 = vpack.c.bf16 %v17625_v45, %v17610_v0 }
 0x610   : > { %v5733_v46 = vpop.f32.mrb[222].mxu1 }
 0x611   : > { %12092 = vmatmul.mubr.msk.f32.vlgmr.msra.gmra.mrb[0].mxu0 %vm652_vm3, %v17677_v12  ;;  %v5864_v53 = vmax.f32 %v5733_v46, 0.0  ;;  %v5735_v57 = vpop.f32.mrb[223].mxu1  ;;  %v6750_v24 = vpop.permute.xlu0 %6749  ;;  %v13043_v46 = vpack.c.bf16 %v17651_v41, %v17619_v1  ;;  %v17848_v41 = vld [vmem:[#allocation9 + $0x8] sm:$0xff] }
 0x612   : > { %7205 = vmatprep.mubr.f32.mxu0 %v14704_v47  ;;  %v5865_v3 = vmax.f32 %v5735_v57, 0.0  ;;  %v17797_v23 = vsel %vm531_vm2, %v17726_v37, %v6750_v24 }
 0x613   : > { %v13015_v32 = vpack.c.bf16 %v5864_v53, %v5848_v33  ;;  %v13087_v45 = vpack.c.bf16 %v6798_v26, %v17797_v23  ;;  %v13041_v33 = vpack.c.bf16 %v17694_v6, %v17656_v55 }
 0x614   : > { %v13013_v59 = vpack.c.bf16 %v5865_v3, %v5849_v25  ;;  %v8590_v25 = vld [vmem:[%s14907_s26 + $0x208] sm:$0xff] }
 0x615   : > { %12093 = vmatmul.mubr.msk.f32.gmra.mrb[2].mxu0 %vm652_vm3, %v17707_v35 }
 0x616   : > { %v14169_v51 = vpop.permute.xlu1 %14168  ;;  %7211 = vmatprep.mubr.f32.mxu0 %v14704_v47  ;;  %13014 = vmatprep.subr.bf16.mxu1 %v13013_v59 }
 0x617   : > { %v14171_v61 = vunpack.i.h.bf16 %v14169_v51  ;;  %v14170_v63 = vunpack.i.l.bf16 %v14169_v51  ;;  %13016 = vmatpush1.bf16.msra.mxu1 %v13015_v32  ;;  %v17873_v51 = vld [vmem:[%s14907_s26 + $0x220] sm:$0xff] }
 0x618   : > { %13034 = vmatprep.subr.bf16.mxu1 %v17632_v40  ;;  %v14509_v40 = vld [vmem:[#allocation9] sm:$0xff] }
 0x619   : > { %v17775_v39 = vsel %vm531_vm2, %v14156_v31, %v14170_v63  ;;  %12094 = vmatmul.mubr.msk.f32.gmra.mrb[4].mxu0 %vm652_vm3, %v17718_v5  ;;  %v6814_v19 = vsel %vm531_vm2, %v14170_v63, %v14171_v61 }
 0x61a   : > { %v6752_v28 = vpop.permute.xlu0 %6751  ;;  %v14174_v62 = vpop.permute.xlu1 %14173  ;;  %7217 = vmatprep.mubr.f32.mxu0 %v14704_v47  ;;  %v17785_v36 = vpack.c.bf16 %v6814_v19, %v6798_v26  ;;  %v17789_v31 = vpack.c.bf16 %v17775_v39, %v17770_v49  ;;  %12074 = vmatmul.mubr.msk.f32.vlgmr.msra.gmra.mrb[236].mxu1 %vm1709_vm4, %v14509_v40 }
 0x61b   : > { %v14176_v22 = vunpack.i.h.bf16 %v14174_v62  ;;  %v14175_v48 = vunpack.i.l.bf16 %v14174_v62  ;;  %13036 = vmatpush1.bf16.msra.mxu1 %v13035_v14  ;;  %v17800_v27 = vsel %vm531_vm2, %v6750_v24, %v6752_v28  ;;  %6475 = vmatprep.mubr.f32.mxu1 %v14704_v47  ;;  %v17870_v24 = vld [vmem:[%s14907_s26 + $0x218] sm:$0xff]  ;;  %v17911_v14 = vld [vmem:[%s14907_s26 + $0x230] sm:$0xff]  ;;  %v13073_v62 = vpack.c.bf16 %v17797_v23, %v17775_v39 }
 0x61c   : > { %13082 = vmatprep.subr.bf16.mxu0 %v17785_v36  ;;  %13038 = vmatprep.subr.bf16.mxu1 %v13037_v18  ;;  %v13091_v55 = vpack.c.bf16 %v17800_v27, %v6814_v19  ;;  %v17908_v19 = vld [vmem:[%s14907_s26 + $0x228] sm:$0xff] }
 0x61d   : > { %12095 = vmatmul.mubr.msk.f32.gmra.mrb[6].mxu0 %vm652_vm3, %v17728_v30  ;;  %v6799_v54 = vsel %vm531_vm2, %v14166_v21, %v14175_v48  ;;  %v6815_v0 = vsel %vm531_vm2, %v14171_v61, %v14176_v22 }
 0x61e   : > { %13084 = vmatpush1.bf16.msra.mxu0 %v17789_v31  ;;  %v17808_v60 = vpop.permute.xlu0 %6753  ;;  %v6653_v37 = vpop.permute.xlu1 %6652  ;;  %7223 = vmatprep.mubr.f32.mxu0 %v14704_v47  ;;  %v13085_v9 = vpack.c.bf16 %v6799_v54, %v17800_v27  ;;  %v17875_v61 = vpack.c.bf16 %v6815_v0, %v6799_v54 }
 0x61f   : > { %v17814_v4 = vsel %vm531_vm2, %v6752_v28, %v17808_v60  ;;  %v6654_v52 = vsel %vm373_vm0, %v17558_v56, %v6653_v37  ;;  %13040 = vmatpush1.bf16.msra.mxu1 %v13039_v29  ;;  %v8591_v56 = vld [vmem:[%s14907_s26 + $0x210] sm:$0xff]  ;;  %v17923_v28 = vpack.i.bf16 %v17911_v14, %v17908_v19 }
 0x620   : > { %6775 = vrot.lane.b32.xlu0 %v6654_v52, %s14703_s12  ;;  %v13089_v34 = vpack.c.bf16 %v17814_v4, %v6815_v0  ;;  %13086 = vmatprep.subr.bf16.mxu0 %v13085_v9  ;;  %v17839_v32 = vpack.i.bf16 %v8591_v56, %v8590_v25 }
 0x621   : > { %12096 = vmatmul.mubr.msk.f32.gmra.mrb[8].mxu0 %vm652_vm3, %v17740_v8  ;;  %13042 = vmatprep.subr.bf16.mxu1 %v13041_v33 }
 0x622   : > { %13088 = vmatpush1.bf16.msra.mxu0 %v13087_v45  ;;  %v6656_v53 = vpop.permute.xlu1 %6655  ;;  %7229 = vmatprep.mubr.f32.mxu0 %v14704_v47 }
 0x623   : > { %v6657_v57 = vsel %vm322_vm1, %v17550_v11, %v6656_v53  ;;  %13090 = vmatprep.subr.bf16.mxu0 %v13089_v34  ;;  %13044 = vmatpush1.bf16.msra.mxu1 %v13043_v46  ;;  %v17996_v34 = vld [vmem:[%s14907_s26 + $0x240] sm:$0xff] }
 0x624   : > { %v14202_v3 = vpack.i.bf16 %v6657_v57, %v17471_v38  ;;  %v17836_v16 = vpop.permute.xlu0 %14178  ;;  %6783 = vrot.lane.b32.xlu0 %v6656_v53, %s14703_s12  ;;  %13046 = vmatprep.subr.bf16.mxu1 %v17663_v58 }
 0x625   : > { %v14181_v1 = vunpack.i.h.bf16 %v17836_v16  ;;  %v14180_v11 = vunpack.i.l.bf16 %v17836_v16  ;;  %12097 = vmatmul.mubr.msk.f32.gmra.mrb[10].mxu0 %vm652_vm3, %v17746_v43  ;;  %12075 = vmatmul.mubr.msk.f32.gmra.mrb[238].mxu1 %vm1709_vm4, %v17848_v41 }
 0x626   : > { %13092 = vmatpush1.bf16.msra.mxu0 %v13091_v55  ;;  %14203 = vrot.lane.b32.xlu1 %v14202_v3, %s14703_s12  ;;  %v6660_v38 = vpop.permute.xlu1 %6659 }
 0x627   : > { %7235 = vmatprep.mubr.f32.mxu0 %v14704_v47  ;;  %v17855_v21 = vsel %vm531_vm2, %v14175_v48, %v14180_v11  ;;  %v17860_v58 = vsel %vm531_vm2, %v14176_v22, %v14181_v1  ;;  %13048 = vmatpush1.bf16.msra.mxu1 %v17667_v20  ;;  %v6661_v63 = vsel %vm373_vm0, %v6653_v37, %v6660_v38 }
 0x628   : > { %14208 = vrot.lane.b32.xlu0 %v17839_v32, %s14702_s24  ;;  %v17867_v59 = vpack.c.bf16 %v17860_v58, %v17855_v21  ;;  %7038 = vmatprep.subr.mxu1 %v17672_v44  ;;  %v14212_v20 = vpack.i.bf16 %v17873_v51, %v17870_v24  ;;  %v17887_v26 = vpop.permute.xlu0 %6755  ;;  %v13069_v44 = vpack.c.bf16 %v17770_v49, %v17736_v10 }
 0x629   : > { %12098 = vmatmul.mubr.msk.f32.gmra.mrb[12].mxu0 %vm652_vm3, %v17751_v17  ;;  %7086 = vmatprep.mubr.f32.mxu1 %v14704_v47 }
 0x62a   : > { %6787 = vrot.lane.b32.xlu1 %v6661_v63, %s14703_s12  ;;  %13094 = vmatprep.subr.bf16.mxu0 %v17867_v59 }
 0x62b   : > { %7241 = vmatprep.mubr.f32.mxu0 %v14704_v47  ;;  %13096 = vmatpush1.bf16.msra.mxu0 %v17875_v61 }
 0x62c   : > { %14218 = vrot.lane.b32.xlu0 %v17839_v32, %s14701_s22  ;;  %7039 = vmatpush1.msra.mxu1 %v17694_v6  ;;  %v17905_v6 = vsel %vm531_vm2, %v17808_v60, %v17887_v26 }
 0x62d   : > { %12099 = vmatmul.mubr.msk.f32.gmra.mrb[14].mxu0 %vm652_vm3, %v17756_v7  ;;  %12084 = vmatmul.mubr.msk.f32.vlgmr.msra.gmra.mrb[240].mxu1 %vm652_vm3, %v17677_v12 }
 0x62e   : > { %13066 = vmatprep.subr.bf16.mxu1 %v17715_v2  ;;  %14213 = vrot.lane.b32.xlu1 %v14212_v20, %s14702_s24  ;;  %v14184_v2 = vpop.permute.xlu1 %14183 }
 0x62f   : > { %13068 = vmatpush1.bf16.msra.mxu1 %v17724_v50  ;;  %7377 = vmatprep.subr.mxu0 %v17905_v6  ;;  %v13071_v50 = vpack.c.bf16 %v17700_v13, %v17686_v15  ;;  %v14186_v49 = vunpack.i.h.bf16 %v14184_v2  ;;  %v14185_v22 = vunpack.i.l.bf16 %v14184_v2  ;;  %v13075_v13 = vpack.c.bf16 %v17736_v10, %v17705_v42  ;;  %v18065_v2 = vld [vmem:[%s14907_s26 + $0x250] sm:$0xff] }
 0x630   : > { %13070 = vmatprep.subr.bf16.mxu1 %v13069_v44  ;;  %7378 = vmatpush1.msra.mxu0 %v17814_v4  ;;  %v18062_v44 = vld [vmem:[%s14907_s26 + $0x248] sm:$0xff] }
 0x631   : > { %7425 = vmatprep.mubr.f32.mxu0 %v14704_v47  ;;  %7092 = vmatprep.mubr.f32.mxu1 %v14704_v47  ;;  %v6802_v39 = vsel %vm531_vm2, %v14185_v22, %v14186_v49  ;;  %v17945_v42 = vsel %vm531_vm2, %v14180_v11, %v14185_v22 }
 0x632   : > { %12108 = vmatmul.mubr.msk.f32.vlgmr.msra.gmra.mrb[16].mxu0 %vm652_vm3, %v17677_v12  ;;  %12085 = vmatmul.mubr.msk.f32.gmra.mrb[242].mxu1 %vm652_vm3, %v17707_v35 }
 0x633   : > { %7431 = vmatprep.mubr.f32.mxu0 %v14704_v47  ;;  %13072 = vmatpush1.bf16.msra.mxu1 %v13071_v50  ;;  %v18076_v50 = vpack.i.bf16 %v18065_v2, %v18062_v44 }
 0x634   : > { %7098 = vmatprep.mubr.f32.mxu1 %v14704_v47  ;;  %13074 = vmatprep.subr.bf16.mxu1 %v13073_v62 }
 0x635   : > { %v14189_v15 = vpop.permute.xlu0 %14188  ;;  %14223 = vrot.lane.b32.xlu1 %v14212_v20, %s14701_s22  ;;  %14228 = vrot.lane.b32.xlu0 %v17923_v28, %s14702_s24 }
 0x636   : > { %v14191_v48 = vunpack.i.h.bf16 %v14189_v15  ;;  %v14190_v40 = vunpack.i.l.bf16 %v14189_v15  ;;  %12109 = vmatmul.mubr.msk.f32.gmra.mrb[18].mxu0 %vm652_vm3, %v17707_v35  ;;  %v6758_v18 = vpop.permute.xlu1 %6757  ;;  %12086 = vmatmul.mubr.msk.f32.gmra.mrb[244].mxu1 %vm652_vm3, %v17718_v5 }
 0x637   : > { %7437 = vmatprep.mubr.f32.mxu0 %v14704_v47  ;;  %13076 = vmatpush1.bf16.msra.mxu1 %v13075_v13  ;;  %v17984_v33 = vsel %vm531_vm2, %v17887_v26, %v6758_v18 }
 0x638   : > { %v17950_v10 = vsel %vm531_vm2, %v14181_v1, %v14190_v40  ;;  %7104 = vmatprep.mubr.f32.mxu1 %v14704_v47  ;;  %v6818_v54 = vsel %vm531_vm2, %v14190_v40, %v14191_v48  ;;  %13078 = vmatprep.subr.bf16.mxu1 %v17785_v36  ;;  %v13119_v25 = vpack.c.bf16 %v6802_v39, %v17984_v33 }
 0x639   : > { %v17955_v29 = vpack.c.bf16 %v6818_v54, %v6802_v39  ;;  %v17959_v60 = vpack.c.bf16 %v17950_v10, %v17945_v42  ;;  %v6694_v37 = vpop.permute.xlu0 %6693  ;;  %8766 = vrot.lane.b32.xlu1 %v17870_v24, %s14701_s22  ;;  %8768 = vrot.lane.b32.xlu0 %v17873_v51, %s14701_s22  ;;  %v13105_v22 = vpack.c.bf16 %v17984_v33, %v17950_v10 }
 0x63a   : > { %12110 = vmatmul.mubr.msk.f32.gmra.mrb[20].mxu0 %vm652_vm3, %v17718_v5  ;;  %v6803_v9 = vsel %vm531_vm2, %v14186_v49, %v6694_v37  ;;  %v6760_v52 = vpop.permute.xlu1 %6759  ;;  %12087 = vmatmul.mubr.msk.f32.gmra.mrb[246].mxu1 %vm652_vm3, %v17728_v30  ;;  %v13101_v49 = vpack.c.bf16 %v17945_v42, %v17905_v6 }
 0x63b   : > { %13114 = vmatprep.subr.bf16.mxu0 %v17955_v29  ;;  %v17972_v36 = vsel %vm531_vm2, %v6758_v18, %v6760_v52  ;;  %13080 = vmatpush1.bf16.msra.mxu1 %v17789_v31 }
 0x63c   : > { %7443 = vmatprep.mubr.f32.mxu0 %v14704_v47  ;;  %7264 = vmatprep.subr.mxu1 %v17800_v27  ;;  %v13117_v0 = vpack.c.bf16 %v6803_v9, %v17972_v36  ;;  %v17993_v27 = vld [vmem:[%s14907_s26 + $0x238] sm:$0xff]  ;;  %v13123_v57 = vpack.c.bf16 %v17972_v36, %v6818_v54 }
 0x63d   : > { %13116 = vmatpush1.bf16.msra.mxu0 %v17959_v60  ;;  %7110 = vmatprep.mubr.f32.mxu1 %v14704_v47 }
 0x63e   : > { %12111 = vmatmul.mubr.msk.f32.gmra.mrb[22].mxu0 %vm652_vm3, %v17728_v30  ;;  %v6762_v45 = vpop.permute.xlu1 %6761  ;;  %12088 = vmatmul.mubr.msk.f32.gmra.mrb[248].mxu1 %vm652_vm3, %v17740_v8 }
 0x63f   : > { %7449 = vmatprep.mubr.f32.mxu0 %v14704_v47  ;;  %v17990_v31 = vsel %vm531_vm2, %v6760_v52, %v6762_v45  ;;  %7265 = vmatpush1.msra.mxu1 %v17797_v23  ;;  %v14237_v23 = vpack.i.bf16 %v17996_v34, %v17993_v27 }
 0x640   : > { %v18000_v56 = vpop.permute.xlu0 %6727  ;;  %7116 = vmatprep.mubr.f32.mxu1 %v14704_v47  ;;  %13098 = vmatprep.subr.bf16.mxu1 %v17867_v59 }
 0x641   : > { %13118 = vmatprep.subr.bf16.mxu0 %v13117_v0  ;;  %v6819_v46 = vsel %vm531_vm2, %v14191_v48, %v18000_v56  ;;  %8770 = vrot.lane.b32.xlu1 %v17908_v19, %s14701_s22 }
 0x642   : > { %12112 = vmatmul.mubr.msk.f32.gmra.mrb[24].mxu0 %vm652_vm3, %v17740_v8  ;;  %v13121_v53 = vpack.c.bf16 %v17990_v31, %v6819_v46  ;;  %12089 = vmatmul.mubr.msk.f32.gmra.mrb[250].mxu1 %vm652_vm3, %v17746_v43  ;;  %v18020_v3 = vpop.permute.xlu1 %6763  ;;  %v18048_v63 = vpack.c.bf16 %v6819_v46, %v6803_v9 }
 0x643   : > { %7455 = vmatprep.mubr.f32.mxu0 %v14704_v47  ;;  %13120 = vmatpush1.bf16.msra.mxu0 %v13119_v25  ;;  %v18046_v59 = vsel %vm531_vm2, %v6762_v45, %v18020_v3 }
 0x644   : > { %v18017_v55 = vpop.permute.xlu0 %14193  ;;  %7122 = vmatprep.mubr.f32.mxu1 %v14704_v47  ;;  %13122 = vmatprep.subr.bf16.mxu0 %v13121_v53 }
 0x645   : > { %v18023_v16 = vunpack.i.h.bf16 %v18017_v55  ;;  %v14195_v1 = vunpack.i.l.bf16 %v18017_v55  ;;  %14233 = vrot.lane.b32.xlu0 %v17923_v28, %s14701_s22  ;;  %14238 = vrot.lane.b32.xlu1 %v14237_v23, %s14702_s24  ;;  %v13103_v28 = vpack.c.bf16 %v17855_v21, %v17814_v4  ;;  %v13107_v4 = vpack.c.bf16 %v17905_v6, %v17860_v58 }
 0x646   : > { %12113 = vmatmul.mubr.msk.f32.gmra.mrb[26].mxu0 %vm652_vm3, %v17746_v43  ;;  %12090 = vmatmul.mubr.msk.f32.gmra.mrb[252].mxu1 %vm652_vm3, %v17751_v17 }
 0x647   : > { %7461 = vmatprep.mubr.f32.mxu0 %v14704_v47  ;;  %v18037_v11 = vsel %vm531_vm2, %v6694_v37, %v14195_v1  ;;  %v18042_v38 = vsel %vm531_vm2, %v18000_v56, %v18023_v16  ;;  %13124 = vmatpush1.bf16.msra.mxu0 %v13123_v57 }
 0x648   : > { %7128 = vmatprep.mubr.f32.mxu1 %v14704_v47  ;;  %v13125_v20 = vpack.c.bf16 %v18042_v38, %v18037_v11  ;;  %v13139_v26 = vpack.c.bf16 %v18046_v59, %v18042_v38  ;;  %v6730_v13 = vpop.permute.xlu0 %6729  ;;  %v13135_v39 = vpack.c.bf16 %v18037_v11, %v17990_v31 }
 0x649   : > { %14243 = vrot.lane.b32.xlu0 %v14237_v23, %s14701_s22  ;;  %8772 = vrot.lane.b32.xlu1 %v17911_v14, %s14701_s22  ;;  %v6820_v58 = vsel %vm531_vm2, %v18000_v56, %v6730_v13 }
 0x64a   : > { %12114 = vmatmul.mubr.msk.f32.gmra.mrb[28].mxu0 %vm652_vm3, %v17751_v17  ;;  %13126 = vmatprep.subr.bf16.mxu0 %v13125_v20  ;;  %v13129_v6 = vpack.c.bf16 %v6820_v58, %v18037_v11 }
 0x64b   : > { %12091 = vmatmul.mubr.msk.f32.gmra.mrb[254].mxu1 %vm652_vm3, %v17756_v7  ;;  %7467 = vmatprep.mubr.f32.mxu0 %v14704_v47 }
 0x64c   : > { %13128 = vmatpush1.bf16.msra.mxu0 %v18048_v63  ;;  %7312 = vmatprep.mubr.f32.mxu1 %v14704_v47 }
 0x64d   : > { %7603 = vmatprep.subr.mxu0 %v18046_v59  ;;  %8774 = vrot.lane.b32.xlu0 %v17993_v27, %s14701_s22 }
 0x64e   : > { %12115 = vmatmul.mubr.msk.f32.gmra.mrb[30].mxu0 %vm652_vm3, %v17756_v7  ;;  %14248 = vrot.lane.b32.xlu1 %v18076_v50, %s14702_s24 }
 0x64f   : > { %12100 = vmatmul.mubr.msk.f32.vlgmr.msra.gmra.mrb[0].mxu1 %vm652_vm3, %v17677_v12  ;;  %7651 = vmatprep.mubr.f32.mxu0 %v14704_v47 }
 0x650   : > { %13100 = vmatpush1.bf16.msra.mxu1 %v17875_v61  ;;  %7604 = vmatpush1.msra.mxu0 %v17990_v31 }
 0x651   : > { %13102 = vmatprep.subr.bf16.mxu1 %v13101_v49  ;;  %7318 = vmatprep.mubr.f32.mxu1 %v14704_v47 }
 0x652   : > { %12124 = vmatmul.mubr.msk.f32.vlgmr.msra.gmra.mrb[32].mxu0 %vm652_vm3, %v17677_v12  ;;  %v5932_v62 = vpop.f32.mrb[224].mxu0  ;;  %8776 = vrot.lane.b32.xlu0 %v17996_v34, %s14701_s22 }
 0x653   : > { %6482 = vst [vmem:[#allocation2 + $0x100] sm:$0xff] %v5932_v62  ;;  %12101 = vmatmul.mubr.msk.f32.gmra.mrb[2].mxu1 %vm652_vm3, %v17707_v35  ;;  %v5934_v61 = vpop.f32.mrb[225].mxu0  ;;  %7657 = vmatprep.mubr.f32.mxu0 %v14704_v47 }
 0x654   : > { %13104 = vmatpush1.bf16.msra.mxu1 %v13103_v28  ;;  %6483 = vst [vmem:[#allocation2 + $0x108] sm:$0xff] %v5934_v61  ;;  %7324 = vmatprep.mubr.f32.mxu1 %v14704_v47 }
 0x655   : > { %13106 = vmatprep.subr.bf16.mxu1 %v13105_v22  ;;  %8778 = vrot.lane.b32.xlu1 %v18062_v44, %s14701_s22 }
 0x656   : > { %12125 = vmatmul.mubr.msk.f32.gmra.mrb[34].mxu0 %vm652_vm3, %v17707_v35  ;;  %v5938_v21 = vpop.f32.mrb[226].mxu0  ;;  %14253 = vrot.lane.b32.xlu0 %v17839_v32, %s14703_s12  ;;  %v18138_v32 = vpop.permute.xlu1 %14198 }
 0x657   : > { %6498 = vst [vmem:[#allocation2 + $0x380] sm:$0xff] %v5938_v21  ;;  %12102 = vmatmul.mubr.msk.f32.gmra.mrb[4].mxu1 %vm652_vm3, %v17718_v5  ;;  %v5940_v15 = vpop.f32.mrb[227].mxu0  ;;  %7663 = vmatprep.mubr.f32.mxu0 %v14704_v47  ;;  %v14200_v48 = vunpack.i.l.bf16 %v18138_v32 }
 0x658   : > { %13108 = vmatpush1.bf16.msra.mxu1 %v13107_v4  ;;  %6499 = vst [vmem:[#allocation2 + $0x388] sm:$0xff] %v5940_v15  ;;  %7330 = vmatprep.mubr.f32.mxu1 %v14704_v47 }
 0x659   : > { %13110 = vmatprep.subr.bf16.mxu1 %v17955_v29  ;;  %v18155_v40 = vsel %vm531_vm2, %v14195_v1, %v14200_v48 }
 0x65a   : > { %12126 = vmatmul.mubr.msk.f32.gmra.mrb[36].mxu0 %vm652_vm3, %v17718_v5  ;;  %v13133_v18 = vpack.c.bf16 %v18155_v40, %v18046_v59 }
 0x65b   : > { %12103 = vmatmul.mubr.msk.f32.gmra.mrb[6].mxu1 %vm652_vm3, %v17728_v30  ;;  %7669 = vmatprep.mubr.f32.mxu0 %v14704_v47 }
 0x65c   : > { %13112 = vmatpush1.bf16.msra.mxu1 %v17959_v60  ;;  %7336 = vmatprep.mubr.f32.mxu1 %v14704_v47 }
 0x65d   : > { %7490 = vmatprep.subr.mxu1 %v17972_v36  ;;  %v14201_v36 = vunpack.i.h.bf16 %v18138_v32 }
 0x65e   : > { %12127 = vmatmul.mubr.msk.f32.gmra.mrb[38].mxu0 %vm652_vm3, %v17728_v30 }
 0x65f   : > { %12104 = vmatmul.mubr.msk.f32.gmra.mrb[8].mxu1 %vm652_vm3, %v17740_v8  ;;  %7675 = vmatprep.mubr.f32.mxu0 %v14704_v47  ;;  %v6840_v31 = vsel %vm531_vm2, %v18023_v16, %v14201_v36 }
 0x660   : > { %7491 = vmatpush1.msra.mxu1 %v17984_v33  ;;  %7342 = vmatprep.mubr.f32.mxu1 %v14704_v47 }
 0x661   : > { %13130 = vmatprep.subr.bf16.mxu1 %v13129_v6 }
 0x662   : > { %12128 = vmatmul.mubr.msk.f32.gmra.mrb[40].mxu0 %vm652_vm3, %v17740_v8 }
 0x663   : > { %12105 = vmatmul.mubr.msk.f32.gmra.mrb[10].mxu1 %vm652_vm3, %v17746_v43  ;;  %7681 = vmatprep.mubr.f32.mxu0 %v14704_v47 }
 0x664   : > { %7348 = vmatprep.mubr.f32.mxu1 %v14704_v47 }
 0x666   : > { %12129 = vmatmul.mubr.msk.f32.gmra.mrb[42].mxu0 %vm652_vm3, %v17746_v43 }
 0x667   : > { %12106 = vmatmul.mubr.msk.f32.gmra.mrb[12].mxu1 %vm652_vm3, %v17751_v17  ;;  %7687 = vmatprep.mubr.f32.mxu0 %v14704_v47 }
 0x668   : > { %7354 = vmatprep.mubr.f32.mxu1 %v14704_v47 }
 0x66a   : > { %12130 = vmatmul.mubr.msk.f32.gmra.mrb[44].mxu0 %vm652_vm3, %v17751_v17 }
 0x66b   : > { %12107 = vmatmul.mubr.msk.f32.gmra.mrb[14].mxu1 %vm652_vm3, %v17756_v7  ;;  %7693 = vmatprep.mubr.f32.mxu0 %v14704_v47 }
 0x66c   : > { %7538 = vmatprep.mubr.f32.mxu1 %v14704_v47 }
 0x66e   : > { %12131 = vmatmul.mubr.msk.f32.gmra.mrb[46].mxu0 %vm652_vm3, %v17756_v7 }
 0x66f   : > { %12116 = vmatmul.mubr.msk.f32.vlgmr.msra.gmra.mrb[16].mxu1 %vm652_vm3, %v17677_v12  ;;  %8005 = vmatprep.mubr.f32.mxu0 %v14704_v47 }
 0x670   : > { %13132 = vmatpush1.bf16.msra.mxu1 %v18048_v63  ;;  %7544 = vmatprep.mubr.f32.mxu1 %v14704_v47 }
 0x671   : > { %13134 = vmatprep.subr.bf16.mxu1 %v13133_v18 }
 0x672   : > { %v6086_v42 = vpop.f32.mrb[228].mxu0 }
 0x673   : > { %12117 = vmatmul.mubr.msk.f32.gmra.mrb[18].mxu1 %vm652_vm3, %v17707_v35  ;;  %6486 = vst [vmem:[#allocation2 + $0x120] sm:$0xff] %v6086_v42  ;;  %v6088_v10 = vpop.f32.mrb[229].mxu0 }
 0x674   : > { %13136 = vmatpush1.bf16.msra.mxu1 %v13135_v39  ;;  %7550 = vmatprep.mubr.f32.mxu1 %v14704_v47  ;;  %6487 = vst [vmem:[#allocation2 + $0x128] sm:$0xff] %v6088_v10 }
 0x676   : > { %v6092_v54 = vpop.f32.mrb[230].mxu0 }
 0x677   : > { %12118 = vmatmul.mubr.msk.f32.gmra.mrb[20].mxu1 %vm652_vm3, %v17718_v5  ;;  %6502 = vst [vmem:[#allocation2 + $0x3a0] sm:$0xff] %v6092_v54  ;;  %v6094_v29 = vpop.f32.mrb[231].mxu0 }
 0x678   : > { %7556 = vmatprep.mubr.f32.mxu1 %v14704_v47  ;;  %6503 = vst [vmem:[#allocation2 + $0x3a8] sm:$0xff] %v6094_v29 }
 0x67b   : > { %12119 = vmatmul.mubr.msk.f32.gmra.mrb[22].mxu1 %vm652_vm3, %v17728_v30 }
 0x67c   : > { %7562 = vmatprep.mubr.f32.mxu1 %v14704_v47  ;;  %v6009_v60 = vpop.f32.mrb[224].mxu1 }
 0x67d   : > { %6484 = vst [vmem:[#allocation2 + $0x110] sm:$0xff] %v6009_v60  ;;  %v6011_v37 = vpop.f32.mrb[225].mxu1 }
 0x67e   : > { %6485 = vst [vmem:[#allocation2 + $0x118] sm:$0xff] %v6011_v37 }
 0x67f   : > { %12120 = vmatmul.mubr.msk.f32.gmra.mrb[24].mxu1 %vm652_vm3, %v17740_v8 }
 0x680   : > { %7568 = vmatprep.mubr.f32.mxu1 %v14704_v47 }
 0x682   : > { %v6015_v9 = vpop.f32.mrb[226].mxu1 }
 0x683   : > { %12121 = vmatmul.mubr.msk.f32.gmra.mrb[26].mxu1 %vm652_vm3, %v17746_v43  ;;  %6500 = vst [vmem:[#allocation2 + $0x390] sm:$0xff] %v6015_v9  ;;  %v6017_v52 = vpop.f32.mrb[227].mxu1 }
 0x684   : > { %7574 = vmatprep.mubr.f32.mxu1 %v14704_v47  ;;  %6501 = vst [vmem:[#allocation2 + $0x398] sm:$0xff] %v6017_v52 }
 0x687   : > { %12122 = vmatmul.mubr.msk.f32.gmra.mrb[28].mxu1 %vm652_vm3, %v17751_v17 }
 0x688   : > { %7580 = vmatprep.mubr.f32.mxu1 %v14704_v47 }
 0x68b   : > { %12123 = vmatmul.mubr.msk.f32.gmra.mrb[30].mxu1 %vm652_vm3, %v17756_v7 }
 0x68c   : > { %7764 = vmatprep.mubr.f32.mxu1 %v14704_v47 }
 0x692   : > { %v6776_v0 = vpop.permute.xlu0 %6775  ;;  %v6240_v45 = vpop.f32.mrb[232].mxu0 }
 0x693   : > { %v6842_v33 = vsel %vm531_vm2, %v18020_v3, %v6776_v0  ;;  %6490 = vst [vmem:[#allocation2 + $0x140] sm:$0xff] %v6240_v45  ;;  %v6242_v25 = vpop.f32.mrb[233].mxu0  ;;  %v8589_v3 = vld [vmem:[%s14907_s26 + $0x200] sm:$0xff] }
 0x694   : > { %v13137_v56 = vpack.c.bf16 %v6842_v33, %v6840_v31  ;;  %6491 = vst [vmem:[#allocation2 + $0x148] sm:$0xff] %v6242_v25 }
 0x696   : > { %v6784_v46 = vpop.permute.xlu0 %6783  ;;  %13138 = vmatprep.subr.bf16.mxu1 %v13137_v56 }
 0x697   : > { %13140 = vmatpush1.bf16.msra.mxu1 %v13139_v26 }
 0x698   : > { %v14204_v53 = vpop.permute.xlu1 %14203  ;;  %v6246_v23 = vpop.f32.mrb[234].mxu0 }
 0x699   : > { %v14206_v57 = vunpack.i.h.bf16 %v14204_v53  ;;  %v14205_v55 = vunpack.i.l.bf16 %v14204_v53  ;;  %6506 = vst [vmem:[#allocation2 + $0x3c0] sm:$0xff] %v6246_v23  ;;  %v6248_v1 = vpop.f32.mrb[235].mxu0  ;;  %v18270_v53 = vld [vmem:[%s14907_s26 + $0x270] sm:$0xff] }
 0x69a   : > { %v14209_v11 = vpop.permute.xlu0 %14208  ;;  %6507 = vst [vmem:[#allocation2 + $0x3c8] sm:$0xff] %v6248_v1 }
 0x69b   : > { %v6845_v63 = vsel %vm531_vm2, %v18023_v16, %v14206_v57  ;;  %v14210_v20 = vunpack.i.l.bf16 %v14209_v11  ;;  %v6843_v49 = vsel %vm531_vm2, %v14200_v48, %v14205_v55  ;;  %v6846_v38 = vsel %vm531_vm2, %v14206_v57, %v6784_v46  ;;  %v18218_v48 = vld [vmem:[%s14907_s26 + $0x258] sm:$0xff]  ;;  %v18267_v46 = vld [vmem:[%s14907_s26 + $0x268] sm:$0xff] }
 0x69c   : > { %v6788_v28 = vpop.permute.xlu1 %6787  ;;  %v13143_v59 = vpack.c.bf16 %v6845_v63, %v18155_v40  ;;  %v6163_v26 = vpop.f32.mrb[228].mxu1  ;;  %v13141_v61 = vpack.c.bf16 %v6846_v38, %v6843_v49  ;;  %v18209_v4 = vunpack.i.h.bf16 %v14209_v11  ;;  %v18221_v40 = vld [vmem:[%s14907_s26 + $0x260] sm:$0xff] }
 0x69d   : > { %v14262_v62 = vpack.i.bf16 %v14210_v20, %v8589_v3  ;;  %6488 = vst [vmem:[#allocation2 + $0x130] sm:$0xff] %v6163_v26  ;;  %v6165_v22 = vpop.f32.mrb[229].mxu1  ;;  %v6848_v13 = vsel %vm531_vm2, %v6776_v0, %v6788_v28  ;;  %v14282_v29 = vpack.i.bf16 %v18221_v40, %v18218_v48 }
 0x69e   : > { %v14219_v16 = vpop.permute.xlu0 %14218  ;;  %6489 = vst [vmem:[#allocation2 + $0x138] sm:$0xff] %v6165_v22  ;;  %13142 = vmatprep.subr.bf16.mxu1 %v13141_v61  ;;  %v8673_v39 = vsel %vm322_vm1, %v14210_v20, %v18209_v4 }
 0x69f   : > { %v18211_v21 = vunpack.i.h.bf16 %v14219_v16  ;;  %v14220_v15 = vunpack.i.l.bf16 %v14219_v16  ;;  %14263 = vrot.lane.b32.xlu0 %v14262_v62, %s14703_s12  ;;  %13144 = vmatpush1.bf16.msra.mxu1 %v13143_v59 }
 0x6a0   : > { %v6169_v58 = vpop.f32.mrb[230].mxu1  ;;  %v14214_v32 = vpop.permute.xlu1 %14213  ;;  %7716 = vmatprep.subr.mxu1 %v6848_v13 }
 0x6a1   : > { %v8723_v6 = vsel %vm373_vm0, %v14220_v15, %v18211_v21  ;;  %6504 = vst [vmem:[#allocation2 + $0x3b0] sm:$0xff] %v6169_v58  ;;  %v6171_v18 = vpop.f32.mrb[231].mxu1  ;;  %v18225_v42 = vunpack.i.l.bf16 %v14214_v32  ;;  %v14216_v37 = vunpack.i.h.bf16 %v14214_v32  ;;  %v14297_v23 = vpack.i.bf16 %v18211_v21, %v18209_v4 }
 0x6a2   : > { %v14272_v10 = vpack.i.bf16 %v8723_v6, %v17870_v24  ;;  %6505 = vst [vmem:[#allocation2 + $0x3b8] sm:$0xff] %v6171_v18 }
 0x6a3   : > { %v8674_v54 = vsel %vm322_vm1, %v18209_v4, %v18225_v42  ;;  %7717 = vmatpush1.msra.mxu1 %v6842_v33  ;;  %v14307_v3 = vpack.i.bf16 %v17908_v19, %v18225_v42 }
 0x6a4   : > { %14273 = vrot.lane.b32.xlu0 %v14272_v10, %s14703_s12  ;;  %12132 = vmatmul.mubr.msk.f32.vlgmr.msra.gmra.mrb[32].mxu1 %vm652_vm3, %v17677_v12  ;;  %v14257_v60 = vpack.i.bf16 %v8674_v54, %v8673_v39 }
 0x6a5   : > { %7770 = vmatprep.mubr.f32.mxu1 %v14704_v47 }
 0x6a6   : > { %14258 = vrot.lane.b32.xlu1 %v14257_v60, %s14703_s12 }
 0x6a7   : > { %v14224_v24 = vpop.permute.xlu1 %14223  ;;  %v18239_v36 = vpop.permute.xlu0 %14228 }
 0x6a8   : > { %v14226_v9 = vunpack.i.h.bf16 %v14224_v24  ;;  %v14225_v52 = vunpack.i.l.bf16 %v14224_v24  ;;  %14283 = vrot.lane.b32.xlu0 %v14282_v29, %s14702_s24  ;;  %12133 = vmatmul.mubr.msk.f32.gmra.mrb[34].mxu1 %vm652_vm3, %v17707_v35  ;;  %v14230_v0 = vunpack.i.l.bf16 %v18239_v36  ;;  %v8675_v35 = vsel %vm322_vm1, %v18225_v42, %v14216_v37 }
 0x6a9   : > { %7776 = vmatprep.mubr.f32.mxu1 %v14704_v47 }
 0x6aa   : > { %v8724_v12 = vsel %vm373_vm0, %v18211_v21, %v14225_v52  ;;  %v8676_v45 = vsel %vm322_vm1, %v14216_v37, %v14230_v0  ;;  %14268 = vrot.lane.b32.xlu1 %v18076_v50, %s14701_s22  ;;  %v8725_v31 = vsel %vm373_vm0, %v14225_v52, %v14226_v9 }
 0x6ab   : > { %v14277_v33 = vpack.i.bf16 %v14220_v15, %v8724_v12  ;;  %v14302_v25 = vpack.i.bf16 %v8676_v45, %v17873_v51  ;;  %v14287_v56 = vpack.i.bf16 %v8725_v31, %v8675_v35  ;;  %v18262_v50 = vpop.permute.xlu1 %8766  ;;  %v8769_v51 = vpop.permute.xlu0 %8768  ;;  %v14231_v15 = vunpack.i.h.bf16 %v18239_v36 }
 0x6ac   : > { %14293 = vrot.lane.b32.xlu0 %v14282_v29, %s14701_s22  ;;  %12134 = vmatmul.mubr.msk.f32.gmra.mrb[36].mxu1 %vm652_vm3, %v17718_v5 }
 0x6ad   : > { %7782 = vmatprep.mubr.f32.mxu1 %v14704_v47  ;;  %v8677_v39 = vsel %vm322_vm1, %v14230_v0, %v14231_v15 }
 0x6ae   : > { %14278 = vrot.lane.b32.xlu1 %v14277_v33, %s14703_s12 }
 0x6b0   : > { %14303 = vrot.lane.b32.xlu0 %v14302_v25, %s14703_s12  ;;  %12135 = vmatmul.mubr.msk.f32.gmra.mrb[38].mxu1 %vm652_vm3, %v17728_v30  ;;  %v18280_v30 = vpack.i.bf16 %v18270_v53, %v18267_v46  ;;  %v18347_v25 = vld [vmem:[%s14907_s26 + $0x278] sm:$0xff] }
 0x6b1   : > { %7788 = vmatprep.mubr.f32.mxu1 %v14704_v47 }
 0x6b2   : > { %v6394_v5 = vpop.f32.mrb[236].mxu0  ;;  %14288 = vrot.lane.b32.xlu1 %v14287_v56, %s14703_s12  ;;  %v8605_v56 = vld [vmem:[%s14907_s26 + $0x280] sm:$0xff] }
 0x6b3   : > { %6494 = vst [vmem:[#allocation2 + $0x160] sm:$0xff] %v6394_v5  ;;  %v6396_v57 = vpop.f32.mrb[237].mxu0  ;;  %v18285_v55 = vpop.permute.xlu1 %8770 }
 0x6b4   : > { %8780 = vrot.lane.b32.xlu0 %v18065_v2, %s14701_s22  ;;  %6495 = vst [vmem:[#allocation2 + $0x168] sm:$0xff] %v6396_v57  ;;  %12136 = vmatmul.mubr.msk.f32.gmra.mrb[40].mxu1 %vm652_vm3, %v17740_v8  ;;  %v8801_v8 = vsel %vm373_vm0, %v8769_v51, %v18285_v55 }
 0x6b5   : > { %7794 = vmatprep.mubr.f32.mxu1 %v14704_v47 }
 0x6b6   : > { %v6400_v1 = vpop.f32.mrb[238].mxu0  ;;  %14298 = vrot.lane.b32.xlu1 %v14297_v23, %s14703_s12 }
 0x6b7   : > { %v14234_v11 = vpop.permute.xlu0 %14233  ;;  %6510 = vst [vmem:[#allocation2 + $0x3e0] sm:$0xff] %v6400_v1  ;;  %v6402_v63 = vpop.f32.mrb[239].mxu0  ;;  %v14342_v1 = vpack.i.bf16 %v8605_v56, %v18347_v25 }
 0x6b8   : > { %14313 = vrot.lane.b32.xlu0 %v18280_v30, %s14702_s24  ;;  %6511 = vst [vmem:[#allocation2 + $0x3e8] sm:$0xff] %v6402_v63  ;;  %12137 = vmatmul.mubr.msk.f32.gmra.mrb[42].mxu1 %vm652_vm3, %v17746_v43  ;;  %v14235_v20 = vunpack.i.l.bf16 %v14234_v11  ;;  %v14236_v19 = vunpack.i.h.bf16 %v14234_v11  ;;  %v18302_v38 = vpop.permute.xlu1 %14238 }
 0x6b9   : > { %v6317_v49 = vpop.f32.mrb[232].mxu1  ;;  %7800 = vmatprep.mubr.f32.mxu1 %v14704_v47  ;;  %v14241_v4 = vunpack.i.h.bf16 %v18302_v38  ;;  %v14240_v16 = vunpack.i.l.bf16 %v18302_v38 }
 0x6ba   : > { %6492 = vst [vmem:[#allocation2 + $0x150] sm:$0xff] %v6317_v49  ;;  %v6319_v28 = vpop.f32.mrb[233].mxu1  ;;  %14308 = vrot.lane.b32.xlu1 %v14307_v3, %s14703_s12  ;;  %v8726_v43 = vsel %vm373_vm0, %v14226_v9, %v14235_v20  ;;  %v8727_v22 = vsel %vm373_vm0, %v14235_v20, %v14236_v19 }
 0x6bb   : > { %6493 = vst [vmem:[#allocation2 + $0x158] sm:$0xff] %v6319_v28  ;;  %v18305_v26 = vpop.permute.xlu0 %14243  ;;  %v14317_v61 = vpack.i.bf16 %v17911_v14, %v8726_v43  ;;  %v14327_v14 = vpack.i.bf16 %v17993_v27, %v8727_v22  ;;  %v8679_v58 = vsel %vm322_vm1, %v14240_v16, %v14241_v4  ;;  %v8678_v42 = vsel %vm322_vm1, %v14231_v15, %v14240_v16 }
 0x6bc   : > { %8943 = vrot.lane.b32.xlu0 %v8801_v8, %s14703_s12  ;;  %12138 = vmatmul.mubr.msk.f32.gmra.mrb[44].mxu1 %vm652_vm3, %v17751_v17  ;;  %v8800_v17 = vsel %vm373_vm0, %v18262_v50, %v8769_v51  ;;  %v14245_v21 = vunpack.i.l.bf16 %v18305_v26  ;;  %v8773_v10 = vpop.permute.xlu1 %8772  ;;  %v14322_v52 = vpack.i.bf16 %v8678_v42, %v8677_v39  ;;  %v8606_v39 = vld [vmem:[%s14907_s26 + $0x288] sm:$0xff] }
 0x6bd   : > { %v6323_v59 = vpop.f32.mrb[234].mxu1  ;;  %7806 = vmatprep.mubr.f32.mxu1 %v14704_v47 }
 0x6be   : > { %6508 = vst [vmem:[#allocation2 + $0x3d0] sm:$0xff] %v6323_v59  ;;  %v6325_v62 = vpop.f32.mrb[235].mxu1  ;;  %8782 = vrot.lane.b32.xlu1 %v18218_v48, %s14701_s22  ;;  %v8728_v6 = vsel %vm373_vm0, %v14236_v19, %v14245_v21 }
 0x6bf   : > { %6509 = vst [vmem:[#allocation2 + $0x3d8] sm:$0xff] %v6325_v62  ;;  %v14337_v27 = vpack.i.bf16 %v8679_v58, %v8728_v6  ;;  %v8775_v8 = vpop.permute.xlu0 %8774 }
 0x6c0   : > { %8784 = vrot.lane.b32.xlu0 %v18221_v40, %s14701_s22  ;;  %12139 = vmatmul.mubr.msk.f32.gmra.mrb[46].mxu1 %vm652_vm3, %v17756_v7  ;;  %v14246_v7 = vunpack.i.h.bf16 %v18305_v26  ;;  %v18342_v35 = vpop.permute.xlu1 %14248  ;;  %v8803_v22 = vsel %vm373_vm0, %v8773_v10, %v8775_v8 }
 0x6c1   : > { %8082 = vmatprep.mubr.f32.mxu1 %v14704_v47  ;;  %v14250_v51 = vunpack.i.l.bf16 %v18342_v35 }
 0x6c2   : > { %8941 = vrot.lane.b32.xlu1 %v8800_v17, %s14703_s12  ;;  %v8729_v60 = vsel %vm373_vm0, %v14245_v21, %v14246_v7 }
 0x6c3   : > { %v14347_v0 = vpack.i.bf16 %v17996_v34, %v8729_v60  ;;  %v8802_v34 = vsel %vm373_vm0, %v18285_v55, %v8773_v10  ;;  %v8680_v20 = vsel %vm322_vm1, %v14241_v4, %v14250_v51 }
 0x6c4   : > { %14318 = vrot.lane.b32.xlu0 %v14317_v61, %s14703_s12  ;;  %v6975_v13 = vpop.f32.mrb[240].mxu0  ;;  %v8777_v59 = vpop.permute.xlu0 %8776 }
 0x6c5   : > { %v6977_v32 = vpop.f32.mrb[241].mxu0  ;;  %v7813_v18 = vmax.f32 %v6975_v13, 0.0  ;;  %v8804_v16 = vsel %vm373_vm0, %v8775_v8, %v8777_v59 }
 0x6c6   : > { %8939 = vrot.lane.b32.xlu1 %v18262_v50, %s14703_s12  ;;  %v7814_v54 = vmax.f32 %v6977_v32, 0.0 }
 0x6c8   : > { %14328 = vrot.lane.b32.xlu0 %v14327_v14, %s14703_s12  ;;  %v6981_v29 = vpop.f32.mrb[242].mxu0 }
 0x6c9   : > { %v7829_v37 = vmax.f32 %v6981_v29, 0.0  ;;  %v6983_v24 = vpop.f32.mrb[243].mxu0  ;;  %v14251_v29 = vunpack.i.h.bf16 %v18342_v35 }
 0x6ca   : > { %v7830_v9 = vmax.f32 %v6983_v24, 0.0  ;;  %8786 = vrot.lane.b32.xlu1 %v18267_v46, %s14701_s22 }
 0x6cb   : > { %v13147_v36 = vpack.c.bf16 %v7829_v37, %v7813_v18 }
 0x6cc   : > { %14338 = vrot.lane.b32.xlu0 %v14337_v27, %s14703_s12  ;;  %v13145_v12 = vpack.c.bf16 %v7830_v9, %v7814_v54  ;;  %v6987_v45 = vpop.f32.mrb[244].mxu0  ;;  %v18373_v27 = vpop.permute.xlu1 %8778 }
 0x6cd   : > { %v6989_v33 = vpop.f32.mrb[245].mxu0  ;;  %v7845_v31 = vmax.f32 %v6987_v45, 0.0  ;;  %v8805_v60 = vsel %vm373_vm0, %v8777_v59, %v18373_v27  ;;  %v8681_v45 = vsel %vm322_vm1, %v14250_v51, %v14251_v29 }
 0x6ce   : > { %13146 = vmatprep.subr.bf16.mxu0 %v13145_v12  ;;  %14323 = vrot.lane.b32.xlu1 %v14322_v52, %s14703_s12  ;;  %v7846_v50 = vmax.f32 %v6989_v33, 0.0 }
 0x6cf   : > { %13148 = vmatpush1.bf16.msra.mxu0 %v13147_v36  ;;  %v18379_v36 = vld [vmem:[#allocation9] sm:$0xff] }
 0x6d0   : > { %14348 = vrot.lane.b32.xlu0 %v14347_v0, %s14703_s12  ;;  %v6993_v46 = vpop.f32.mrb[246].mxu0 }
 0x6d1   : > { %v7861_v5 = vmax.f32 %v6993_v46, 0.0  ;;  %v6995_v23 = vpop.f32.mrb[247].mxu0 }
 0x6d2   : > { %v7862_v57 = vmax.f32 %v6995_v23, 0.0  ;;  %14333 = vrot.lane.b32.xlu1 %v18280_v30, %s14701_s22 }
 0x6d3   : > { %v13151_v3 = vpack.c.bf16 %v7861_v5, %v7845_v31 }
 0x6d4   : > { %8945 = vrot.lane.b32.xlu0 %v8802_v34, %s14703_s12  ;;  %v13149_v11 = vpack.c.bf16 %v7862_v57, %v7846_v50  ;;  %v6999_v63 = vpop.f32.mrb[248].mxu0  ;;  %v14362_v34 = vpack.i.bf16 %v8681_v45, %v18065_v2 }
 0x6d5   : > { %v7001_v49 = vpop.f32.mrb[249].mxu0  ;;  %v7877_v55 = vmax.f32 %v6999_v63, 0.0 }
 0x6d6   : > { %13150 = vmatprep.subr.bf16.mxu0 %v13149_v11  ;;  %14343 = vrot.lane.b32.xlu1 %v14342_v1, %s14702_s24  ;;  %v7878_v30 = vmax.f32 %v7001_v49, 0.0 }
 0x6d7   : > { %13152 = vmatpush1.bf16.msra.mxu0 %v13151_v3 }
 0x6d8   : > { %8867 = vrot.lane.b32.xlu0 %v8680_v20, %s14703_s12  ;;  %v7005_v28 = vpop.f32.mrb[250].mxu0 }
 0x6d9   : > { %v7893_v19 = vmax.f32 %v7005_v28, 0.0  ;;  %v7007_v43 = vpop.f32.mrb[251].mxu0 }
 0x6da   : > { %v7894_v38 = vmax.f32 %v7007_v43, 0.0  ;;  %14353 = vrot.lane.b32.xlu1 %v14342_v1, %s14701_s22 }
 0x6db   : > { %v13155_v62 = vpack.c.bf16 %v7893_v19, %v7877_v55 }
 0x6dc   : > { %v13153_v17 = vpack.c.bf16 %v7894_v38, %v7878_v30  ;;  %v7011_v61 = vpop.f32.mrb[252].mxu0  ;;  %8790 = vrot.lane.b32.xlu0 %v18347_v25, %s14701_s22 }
 0x6dd   : > { %v7013_v4 = vpop.f32.mrb[253].mxu0  ;;  %v7909_v21 = vmax.f32 %v7011_v61, 0.0 }
 0x6de   : > { %13154 = vmatprep.subr.bf16.mxu0 %v13153_v17  ;;  %8947 = vrot.lane.b32.xlu1 %v8803_v22, %s14703_s12  ;;  %v7910_v15 = vmax.f32 %v7013_v4, 0.0 }
 0x6df   : > { %13156 = vmatpush1.bf16.msra.mxu0 %v13155_v62 }
 0x6e0   : > { %v7017_v14 = vpop.f32.mrb[254].mxu0  ;;  %8949 = vrot.lane.b32.xlu0 %v8804_v16, %s14703_s12 }
 0x6e1   : > { %v7925_v13 = vmax.f32 %v7017_v14, 0.0  ;;  %v7019_v58 = vpop.f32.mrb[255].mxu0 }
 0x6e2   : > { %v7926_v6 = vmax.f32 %v7019_v58, 0.0  ;;  %8788 = vrot.lane.b32.xlu1 %v18270_v53, %s14701_s22 }
 0x6e3   : > { %v13159_v32 = vpack.c.bf16 %v7925_v13, %v7909_v21 }
 0x6e4   : > { %v13157_v18 = vpack.c.bf16 %v7926_v6, %v7910_v15  ;;  %8792 = vrot.lane.b32.xlu0 %v8605_v56, %s14701_s22  ;;  %v7201_v42 = vpop.f32.mrb[0].mxu0 }
 0x6e5   : > { %v7203_v10 = vpop.f32.mrb[1].mxu0  ;;  %v7817_v54 = vmax.f32 %v7201_v42, 0.0 }
 0x6e6   : > { %13158 = vmatprep.subr.bf16.mxu0 %v13157_v18  ;;  %8739 = vrot.lane.b32.xlu1 %v8606_v39, %s14702_s24  ;;  %v7818_v37 = vmax.f32 %v7203_v10, 0.0 }
 0x6e7   : > { %13160 = vmatpush1.bf16.msra.mxu0 %v13159_v32 }
 0x6e8   : > { %v7207_v24 = vpop.f32.mrb[2].mxu0 }
 0x6e9   : > { %v7833_v9 = vmax.f32 %v7207_v24, 0.0  ;;  %v7209_v52 = vpop.f32.mrb[3].mxu0 }
 0x6ea   : > { %12140 = vmatmul.mubr.msk.f32.vlgmr.msra.gmra.mrb[48].mxu0 %vm1709_vm4, %v18379_v36  ;;  %v7834_v0 = vmax.f32 %v7209_v52, 0.0  ;;  %8951 = vrot.lane.b32.xlu1 %v8805_v60, %s14703_s12 }
 0x6eb   : > { %8011 = vmatprep.mubr.f32.mxu0 %v14704_v47  ;;  %v13179_v12 = vpack.c.bf16 %v7833_v9, %v7817_v54 }
 0x6ec   : > { %v13177_v33 = vpack.c.bf16 %v7834_v0, %v7818_v37  ;;  %v7213_v31 = vpop.f32.mrb[4].mxu0 }
 0x6ed   : > { %v7215_v56 = vpop.f32.mrb[5].mxu0  ;;  %v6471_v50 = vpop.f32.mrb[236].mxu1  ;;  %v7849_v5 = vmax.f32 %v7213_v31, 0.0 }
 0x6ee   : > { %12141 = vmatmul.mubr.msk.f32.gmra.mrb[50].mxu0 %vm1709_vm4, %v17848_v41  ;;  %13178 = vmatprep.subr.bf16.mxu0 %v13177_v33  ;;  %6496 = vst [vmem:[#allocation2 + $0x170] sm:$0xff] %v6471_v50  ;;  %v6473_v46 = vpop.f32.mrb[237].mxu1  ;;  %v7850_v23 = vmax.f32 %v7215_v56, 0.0  ;;  %v18398_v56 = vpop.permute.xlu0 %14253 }
 0x6ef   : > { %8794 = vrot.lane.b32.xlu1 %v8606_v39, %s14701_s22  ;;  %13180 = vmatpush1.bf16.msra.mxu0 %v13179_v12  ;;  %6497 = vst [vmem:[#allocation2 + $0x178] sm:$0xff] %v6473_v46 }
 0x6f0   : > { %v7219_v57 = vpop.f32.mrb[6].mxu0  ;;  %8159 = vmatprep.mubr.f32.mxu0 %v14704_v47 }
 0x6f1   : > { %v7865_v51 = vmax.f32 %v7219_v57, 0.0  ;;  %v7221_v1 = vpop.f32.mrb[7].mxu0 }
 0x6f2   : > { %v7866_v3 = vmax.f32 %v7221_v1, 0.0 }
 0x6f3   : > { %14363 = vrot.lane.b32.xlu1 %v14362_v34, %s14703_s12  ;;  %v13183_v41 = vpack.c.bf16 %v7865_v51, %v7849_v5 }
 0x6f4   : > { %v13181_v11 = vpack.c.bf16 %v7866_v3, %v7850_v23  ;;  %v7225_v63 = vpop.f32.mrb[8].mxu0 }
 0x6f5   : > { %v7227_v8 = vpop.f32.mrb[9].mxu0  ;;  %v7881_v20 = vmax.f32 %v7225_v63, 0.0 }
 0x6f6   : > { %13182 = vmatprep.subr.bf16.mxu0 %v13181_v11  ;;  %v7882_v2 = vmax.f32 %v7227_v8, 0.0 }
 0x6f7   : > { %13184 = vmatpush1.bf16.msra.mxu0 %v13183_v41  ;;  %v18401_v41 = vld [vmem:[#allocation9 + $0x8] sm:$0xff] }
 0x6f8   : > { %v7231_v49 = vpop.f32.mrb[10].mxu0  ;;  %v6477_v28 = vpop.f32.mrb[238].mxu1 }
 0x6f9   : > { %v7897_v55 = vmax.f32 %v7231_v49, 0.0  ;;  %v7233_v30 = vpop.f32.mrb[11].mxu0  ;;  %6512 = vst [vmem:[#allocation2 + $0x3f0] sm:$0xff] %v6477_v28  ;;  %v6479_v43 = vpop.f32.mrb[239].mxu1 }
 0x6fa   : > { %v7898_v19 = vmax.f32 %v7233_v30, 0.0  ;;  %6513 = vst [vmem:[#allocation2 + $0x3f8] sm:$0xff] %v6479_v43 }
 0x6fb   : > { %v13187_v38 = vpack.c.bf16 %v7897_v55, %v7881_v20 }
 0x6fc   : > { %v13185_v59 = vpack.c.bf16 %v7898_v19, %v7882_v2  ;;  %v7237_v62 = vpop.f32.mrb[12].mxu0 }
 0x6fd   : > { %v7239_v17 = vpop.f32.mrb[13].mxu0  ;;  %v7913_v61 = vmax.f32 %v7237_v62, 0.0 }
 0x6fe   : > { %13186 = vmatprep.subr.bf16.mxu0 %v13185_v59  ;;  %v7914_v22 = vmax.f32 %v7239_v17, 0.0 }
 0x6ff   : > { %13188 = vmatpush1.bf16.msra.mxu0 %v13187_v38 }
 0x700   : > { %v7243_v4 = vpop.f32.mrb[14].mxu0  ;;  %v7088_v16 = vpop.f32.mrb[240].mxu1 }
 0x701   : > { %v7929_v21 = vmax.f32 %v7243_v4, 0.0  ;;  %v7245_v15 = vpop.f32.mrb[15].mxu0  ;;  %v7090_v14 = vpop.f32.mrb[241].mxu1  ;;  %v7815_v32 = vmax.f32 %v7088_v16, 0.0 }
 0x702   : > { %v7930_v13 = vmax.f32 %v7245_v15, 0.0  ;;  %v7816_v39 = vmax.f32 %v7090_v14, 0.0 }
 0x703   : > { %v13191_v58 = vpack.c.bf16 %v7929_v21, %v7913_v61 }
 0x704   : > { %v13189_v6 = vpack.c.bf16 %v7930_v13, %v7914_v22 }
 0x705   : > { %v7427_v18 = vpop.f32.mrb[16].mxu0  ;;  %v7094_v42 = vpop.f32.mrb[242].mxu1 }
 0x706   : > { %v7429_v10 = vpop.f32.mrb[17].mxu0  ;;  %13190 = vmatprep.subr.bf16.mxu0 %v13189_v6  ;;  %v7831_v54 = vmax.f32 %v7094_v42, 0.0  ;;  %v7096_v60 = vpop.f32.mrb[243].mxu1  ;;  %v7821_v24 = vmax.f32 %v7427_v18, 0.0 }
 0x707   : > { %13192 = vmatpush1.bf16.msra.mxu0 %v13191_v58  ;;  %v7832_v37 = vmax.f32 %v7096_v60, 0.0  ;;  %v7822_v52 = vmax.f32 %v7429_v10, 0.0 }
 0x708   : > { %v13163_v9 = vpack.c.bf16 %v7831_v54, %v7815_v32 }
 0x709   : > { %v7433_v0 = vpop.f32.mrb[18].mxu0  ;;  %v13161_v12 = vpack.c.bf16 %v7832_v37, %v7816_v39  ;;  %v7100_v45 = vpop.f32.mrb[244].mxu1 }
 0x70a   : > { %v7837_v33 = vmax.f32 %v7433_v0, 0.0  ;;  %v7435_v31 = vpop.f32.mrb[19].mxu0  ;;  %12144 = vmatmul.mubr.msk.f32.vlgmr.msra.gmra.mrb[52].mxu0 %vm1709_vm4, %v18379_v36  ;;  %v7102_v50 = vpop.f32.mrb[245].mxu1  ;;  %v7847_v5 = vmax.f32 %v7100_v45, 0.0 }
 0x70b   : > { %v7838_v46 = vmax.f32 %v7435_v31, 0.0  ;;  %8165 = vmatprep.mubr.f32.mxu0 %v14704_v47  ;;  %13162 = vmatprep.subr.bf16.mxu1 %v13161_v12  ;;  %v7848_v51 = vmax.f32 %v7102_v50, 0.0 }
 0x70c   : > { %v13211_v34 = vpack.c.bf16 %v7837_v33, %v7821_v24  ;;  %13164 = vmatpush1.bf16.msra.mxu1 %v13163_v9 }
 0x70d   : > { %v13209_v23 = vpack.c.bf16 %v7838_v46, %v7822_v52  ;;  %v7439_v57 = vpop.f32.mrb[20].mxu0  ;;  %v7106_v1 = vpop.f32.mrb[246].mxu1 }
 0x70e   : > { %v7441_v3 = vpop.f32.mrb[21].mxu0  ;;  %12145 = vmatmul.mubr.msk.f32.gmra.mrb[54].mxu0 %vm1709_vm4, %v18401_v41  ;;  %v7863_v11 = vmax.f32 %v7106_v1, 0.0  ;;  %v7108_v63 = vpop.f32.mrb[247].mxu1  ;;  %v7853_v20 = vmax.f32 %v7439_v57, 0.0 }
 0x70f   : > { %13210 = vmatprep.subr.bf16.mxu0 %v13209_v23  ;;  %8313 = vmatprep.mubr.f32.mxu0 %v14704_v47  ;;  %v7864_v8 = vmax.f32 %v7108_v63, 0.0  ;;  %v7854_v55 = vmax.f32 %v7441_v3, 0.0  ;;  %v14256_v23 = vunpack.i.h.bf16 %v18398_v56 }
 0x710   : > { %13212 = vmatpush1.bf16.msra.mxu0 %v13211_v34  ;;  %v13167_v49 = vpack.c.bf16 %v7863_v11, %v7847_v5 }
 0x711   : > { %v18406_v2 = vpop.permute.xlu0 %14263  ;;  %v7445_v30 = vpop.f32.mrb[22].mxu0  ;;  %v13165_v28 = vpack.c.bf16 %v7864_v8, %v7848_v51 }
 0x712   : > { %v7869_v19 = vmax.f32 %v7445_v30, 0.0  ;;  %v7447_v43 = vpop.f32.mrb[23].mxu0  ;;  %v7112_v38 = vpop.f32.mrb[248].mxu1 }
 0x713   : > { %v7870_v59 = vmax.f32 %v7447_v43, 0.0  ;;  %v7114_v62 = vpop.f32.mrb[249].mxu1  ;;  %13166 = vmatprep.subr.bf16.mxu1 %v13165_v28  ;;  %v7879_v16 = vmax.f32 %v7112_v38, 0.0 }
 0x714   : > { %v13215_v17 = vpack.c.bf16 %v7869_v19, %v7853_v20  ;;  %13168 = vmatpush1.bf16.msra.mxu1 %v13167_v49  ;;  %v7880_v15 = vmax.f32 %v7114_v62, 0.0 }
 0x715   : > { %v13213_v61 = vpack.c.bf16 %v7870_v59, %v7854_v55  ;;  %v7451_v22 = vpop.f32.mrb[24].mxu0  ;;  %v7118_v14 = vpop.f32.mrb[250].mxu1 }
 0x716   : > { %v18408_v4 = vpop.permute.xlu0 %14273  ;;  %v7453_v21 = vpop.f32.mrb[25].mxu0  ;;  %v7885_v13 = vmax.f32 %v7451_v22, 0.0  ;;  %v7895_v58 = vmax.f32 %v7118_v14, 0.0 }
 0x717   : > { %13214 = vmatprep.subr.bf16.mxu0 %v13213_v61  ;;  %v7120_v6 = vpop.f32.mrb[251].mxu1  ;;  %v7886_v18 = vmax.f32 %v7453_v21, 0.0  ;;  %v14275_v59 = vunpack.i.l.bf16 %v18408_v4 }
 0x718   : > { %13216 = vmatpush1.bf16.msra.mxu0 %v13215_v17  ;;  %v18410_v32 = vpop.permute.xlu1 %14258  ;;  %v7896_v42 = vmax.f32 %v7120_v6, 0.0  ;;  %v13171_v54 = vpack.c.bf16 %v7895_v58, %v7879_v16 }
 0x719   : > { %v7457_v39 = vpop.f32.mrb[26].mxu0  ;;  %v7124_v52 = vpop.f32.mrb[252].mxu1  ;;  %v18434_v22 = vunpack.i.h.bf16 %v18410_v32 }
 0x71a   : > { %v18412_v10 = vpop.permute.xlu0 %14283  ;;  %v7901_v60 = vmax.f32 %v7457_v39, 0.0  ;;  %v7459_v37 = vpop.f32.mrb[27].mxu0  ;;  %v13169_v24 = vpack.c.bf16 %v7896_v42, %v7880_v15  ;;  %v7911_v8 = vmax.f32 %v7124_v52, 0.0  ;;  %v18459_v52 = vsel %vm531_vm2, %v14256_v23, %v14275_v59 }
 0x71b   : > { %v7902_v9 = vmax.f32 %v7459_v37, 0.0  ;;  %v7126_v12 = vpop.f32.mrb[253].mxu1  ;;  %v14286_v57 = vunpack.i.h.bf16 %v18412_v10  ;;  %v14285_v51 = vunpack.i.l.bf16 %v18412_v10 }
 0x71c   : > { %v13219_v0 = vpack.c.bf16 %v7901_v60, %v7885_v13  ;;  %v14269_v45 = vpop.permute.xlu1 %14268  ;;  %13170 = vmatprep.subr.bf16.mxu1 %v13169_v24  ;;  %v7912_v61 = vmax.f32 %v7126_v12, 0.0 }
 0x71d   : > { %v13217_v33 = vpack.c.bf16 %v7902_v9, %v7886_v18  ;;  %v7463_v31 = vpop.f32.mrb[28].mxu0  ;;  %v14271_v50 = vunpack.i.h.bf16 %v14269_v45  ;;  %v14270_v46 = vunpack.i.l.bf16 %v14269_v45  ;;  %13172 = vmatpush1.bf16.msra.mxu1 %v13171_v54  ;;  %v8683_v14 = vsel %vm322_vm1, %v14285_v51, %v14286_v57 }
 0x71e   : > { %v18414_v34 = vpop.permute.xlu0 %14293  ;;  %v7465_v5 = vpop.f32.mrb[29].mxu0  ;;  %v7917_v19 = vmax.f32 %v7463_v31, 0.0 }
 0x71f   : > { %v14295_v1 = vunpack.i.l.bf16 %v18414_v34  ;;  %13218 = vmatprep.subr.bf16.mxu0 %v13217_v33  ;;  %v7130_v3 = vpop.f32.mrb[254].mxu1  ;;  %v8730_v11 = vsel %vm373_vm0, %v14246_v7, %v14270_v46  ;;  %v14296_v63 = vunpack.i.h.bf16 %v18414_v34  ;;  %v7918_v43 = vmax.f32 %v7465_v5, 0.0 }
 0x720   : > { %13220 = vmatpush1.bf16.msra.mxu0 %v13219_v0  ;;  %v7927_v20 = vmax.f32 %v7130_v3, 0.0  ;;  %v7132_v49 = vpop.f32.mrb[255].mxu1  ;;  %v18425_v30 = vpop.permute.xlu1 %14278  ;;  %v14357_v28 = vpack.i.bf16 %v8730_v11, %v18062_v44  ;;  %v8731_v26 = vsel %vm373_vm0, %v14270_v46, %v14271_v50  ;;  %v8682_v44 = vsel %vm322_vm1, %v14251_v29, %v14285_v51 }
 0x721   : > { %v8732_v55 = vsel %vm373_vm0, %v14271_v50, %v14295_v1  ;;  %v7469_v38 = vpop.f32.mrb[30].mxu0  ;;  %v7928_v58 = vmax.f32 %v7132_v49, 0.0  ;;  %v14367_v29 = vpack.i.bf16 %v8731_v26, %v8682_v44  ;;  %v18462_v0 = vunpack.i.l.bf16 %v18425_v30 }
 0x722   : > { %v18430_v7 = vpop.permute.xlu0 %14303  ;;  %v14372_v62 = vpack.i.bf16 %v8732_v55, %v18218_v48  ;;  %v7471_v17 = vpop.f32.mrb[31].mxu0  ;;  %14358 = vrot.lane.b32.xlu0 %v14357_v28, %s14703_s12  ;;  %v7933_v16 = vmax.f32 %v7469_v38, 0.0  ;;  %v8733_v48 = vsel %vm373_vm0, %v14295_v1, %v14296_v63  ;;  %v13175_v13 = vpack.c.bf16 %v7927_v20, %v7911_v8 }
 0x723   : > { %v7934_v21 = vmax.f32 %v7471_v17, 0.0  ;;  %v7314_v15 = vpop.f32.mrb[0].mxu1  ;;  %v13173_v24 = vpack.c.bf16 %v7928_v58, %v7912_v61  ;;  %v14377_v45 = vpack.i.bf16 %v8733_v48, %v8683_v14  ;;  %v14305_v50 = vunpack.i.l.bf16 %v18430_v7 }
 0x724   : > { %14373 = vrot.lane.b32.xlu1 %v14372_v62, %s14703_s12  ;;  %v7316_v35 = vpop.f32.mrb[1].mxu1  ;;  %v18447_v6 = vpop.permute.xlu1 %14288  ;;  %v13223_v18 = vpack.c.bf16 %v7933_v16, %v7917_v19  ;;  %v7819_v9 = vmax.f32 %v7314_v15, 0.0 }
 0x725   : > { %v13221_v39 = vpack.c.bf16 %v7934_v21, %v7918_v43  ;;  %v7653_v42 = vpop.f32.mrb[32].mxu0  ;;  %v18450_v54 = vunpack.i.l.bf16 %v18447_v6  ;;  %v7820_v33 = vmax.f32 %v7316_v35, 0.0  ;;  %v14291_v3 = vunpack.i.h.bf16 %v18447_v6  ;;  %13174 = vmatprep.subr.bf16.mxu1 %v13173_v24 }
 0x726   : > { %v18452_v60 = vpop.permute.xlu0 %8780  ;;  %v7655_v37 = vpop.f32.mrb[33].mxu0  ;;  %14368 = vrot.lane.b32.xlu0 %v14367_v29, %s14703_s12  ;;  %v7825_v46 = vmax.f32 %v7653_v42, 0.0  ;;  %13176 = vmatpush1.bf16.msra.mxu1 %v13175_v13  ;;  %v18492_v16 = vsel %vm531_vm2, %v14275_v59, %v14305_v50  ;;  %v14265_v6 = vunpack.i.l.bf16 %v18406_v2 }
 0x727   : > { %v8806_v12 = vsel %vm373_vm0, %v18373_v27, %v18452_v60  ;;  %13222 = vmatprep.subr.bf16.mxu0 %v13221_v39  ;;  %v7320_v31 = vpop.f32.mrb[2].mxu1  ;;  %v18473_v1 = vsel %vm531_vm2, %v18434_v22, %v18450_v54  ;;  %v7826_v11 = vmax.f32 %v7655_v37, 0.0  ;;  %v18507_v59 = vsel %vm531_vm2, %v18462_v0, %v14291_v3 }
 0x728   : > { %8953 = vrot.lane.b32.xlu1 %v8806_v12, %s14703_s12  ;;  %13224 = vmatpush1.bf16.msra.mxu0 %v13223_v18  ;;  %v7835_v5 = vmax.f32 %v7320_v31, 0.0  ;;  %v7322_v51 = vpop.f32.mrb[3].mxu1  ;;  %v18476_v27 = vpop.permute.xlu1 %14298  ;;  %v13291_v49 = vpack.c.bf16 %v18473_v1, %v18459_v52 }
 0x729   : > { %v7659_v8 = vpop.f32.mrb[34].mxu0  ;;  %v7836_v20 = vmax.f32 %v7322_v51, 0.0  ;;  %12142 = vmatmul.mubr.msk.f32.vlgmr.msra.gmra.mrb[48].mxu1 %vm1709_vm4, %v18379_v36 }
 0x72a   : > { %v18480_v55 = vpop.permute.xlu0 %14313  ;;  %v7841_v28 = vmax.f32 %v7659_v8, 0.0  ;;  %v7661_v19 = vpop.f32.mrb[35].mxu0  ;;  %v13195_v43 = vpack.c.bf16 %v7835_v5, %v7819_v9  ;;  %14378 = vrot.lane.b32.xlu0 %v14377_v45, %s14703_s12  ;;  %8088 = vmatprep.mubr.f32.mxu1 %v14704_v47 }
 0x72b   : > { %v14315_v38 = vunpack.i.l.bf16 %v18480_v55  ;;  %v7842_v26 = vmax.f32 %v7661_v19, 0.0  ;;  %v13193_v62 = vpack.c.bf16 %v7836_v20, %v7820_v33  ;;  %v7326_v17 = vpop.f32.mrb[4].mxu1  ;;  %12148 = vmatmul.mubr.msk.f32.vlgmr.msra.gmra.mrb[56].mxu0 %vm1709_vm4, %v18379_v36 }
 0x72c   : > { %v13243_v61 = vpack.c.bf16 %v7841_v28, %v7825_v46  ;;  %v7328_v44 = vpop.f32.mrb[5].mxu1  ;;  %8319 = vmatprep.mubr.f32.mxu0 %v14704_v47  ;;  %v18499_v15 = vpop.permute.xlu1 %14308 }
 0x72d   : > { %v8684_v21 = vsel %vm322_vm1, %v14286_v57, %v14315_v38  ;;  %v13241_v14 = vpack.c.bf16 %v7842_v26, %v7826_v11  ;;  %v7665_v48 = vpop.f32.mrb[36].mxu0  ;;  %13194 = vmatprep.subr.bf16.mxu1 %v13193_v62  ;;  %v7851_v57 = vmax.f32 %v7326_v17, 0.0  ;;  %v7852_v35 = vmax.f32 %v7328_v44, 0.0  ;;  %12143 = vmatmul.mubr.msk.f32.gmra.mrb[50].mxu1 %vm1709_vm4, %v18401_v41 }
 0x72e   : > { %v18509_v13 = vpop.permute.xlu0 %8943  ;;  %v14382_v10 = vpack.i.bf16 %v8684_v21, %v18221_v40  ;;  %v7667_v58 = vpop.f32.mrb[37].mxu0  ;;  %13196 = vmatpush1.bf16.msra.mxu1 %v13195_v43  ;;  %v7857_v18 = vmax.f32 %v7665_v48, 0.0  ;;  %v13295_v40 = vpack.c.bf16 %v18492_v16, %v18507_v59  ;;  %8236 = vmatprep.mubr.f32.mxu1 %v14704_v47  ;;  %v14311_v51 = vunpack.i.h.bf16 %v18499_v15 }
 0x72f   : > { %13242 = vmatprep.subr.bf16.mxu0 %v13241_v14  ;;  %v7332_v29 = vpop.f32.mrb[6].mxu1  ;;  %12149 = vmatmul.mubr.msk.f32.gmra.mrb[58].mxu0 %vm1709_vm4, %v18401_v41  ;;  %v7858_v24 = vmax.f32 %v7667_v58, 0.0  ;;  %v14306_v26 = vunpack.i.h.bf16 %v18430_v7 }
 0x730   : > { %14383 = vrot.lane.b32.xlu1 %v14382_v10, %s14703_s12  ;;  %13244 = vmatpush1.bf16.msra.mxu0 %v13243_v61  ;;  %v7867_v39 = vmax.f32 %v7332_v29, 0.0  ;;  %v7334_v42 = vpop.f32.mrb[7].mxu1  ;;  %v8783_v37 = vpop.permute.xlu1 %8782  ;;  %v18540_v14 = vsel %vm531_vm2, %v14305_v50, %v14311_v51 }
 0x731   : > { %v7671_v9 = vpop.f32.mrb[38].mxu0  ;;  %v7868_v12 = vmax.f32 %v7334_v42, 0.0  ;;  %8467 = vmatprep.mubr.f32.mxu0 %v14704_v47  ;;  %v8807_v33 = vsel %vm373_vm0, %v18452_v60, %v8783_v37  ;;  %v18551_v50 = vsel %vm531_vm2, %v18450_v54, %v14306_v26 }
 0x732   : > { %v18521_v45 = vpop.permute.xlu0 %8784  ;;  %v7873_v31 = vmax.f32 %v7671_v9, 0.0  ;;  %v7673_v46 = vpop.f32.mrb[39].mxu0  ;;  %v13199_v5 = vpack.c.bf16 %v7867_v39, %v7851_v57  ;;  %8955 = vrot.lane.b32.xlu0 %v8807_v33, %s14703_s12  ;;  %v14316_v57 = vunpack.i.h.bf16 %v18480_v55 }
 0x733   : > { %v7874_v11 = vmax.f32 %v7673_v46, 0.0  ;;  %v13197_v8 = vpack.c.bf16 %v7868_v12, %v7852_v35  ;;  %v7338_v20 = vpop.f32.mrb[8].mxu1  ;;  %v8808_v43 = vsel %vm373_vm0, %v8783_v37, %v18521_v45 }
 0x734   : > { %v13247_v28 = vpack.c.bf16 %v7873_v31, %v7857_v18  ;;  %v7340_v19 = vpop.f32.mrb[9].mxu1  ;;  %v18531_v60 = vpop.permute.xlu1 %8941  ;;  %v7883_v21 = vmax.f32 %v7338_v20, 0.0 }
 0x735   : > { %v13245_v62 = vpack.c.bf16 %v7874_v11, %v7858_v24  ;;  %v7677_v17 = vpop.f32.mrb[40].mxu0  ;;  %13198 = vmatprep.subr.bf16.mxu1 %v13197_v8  ;;  %v7884_v10 = vmax.f32 %v7340_v19, 0.0  ;;  %v14255_v11 = vunpack.i.l.bf16 %v18398_v56  ;;  %v14260_v8 = vunpack.i.l.bf16 %v18410_v32 }
 0x736   : > { %v18533_v61 = vpop.permute.xlu0 %14318  ;;  %v7679_v44 = vpop.f32.mrb[41].mxu0  ;;  %13200 = vmatpush1.bf16.msra.mxu1 %v13199_v5  ;;  %8957 = vrot.lane.b32.xlu0 %v8808_v43, %s14703_s12  ;;  %v7889_v35 = vmax.f32 %v7677_v17, 0.0 }
 0x737   : > { %v14320_v48 = vunpack.i.l.bf16 %v18533_v61  ;;  %13246 = vmatprep.subr.bf16.mxu0 %v13245_v62  ;;  %v7344_v58 = vpop.f32.mrb[10].mxu1  ;;  %v7890_v42 = vmax.f32 %v7679_v44, 0.0  ;;  %v14266_v44 = vunpack.i.h.bf16 %v18406_v2 }
 0x738   : > { %13248 = vmatpush1.bf16.msra.mxu0 %v13247_v28  ;;  %v7899_v29 = vmax.f32 %v7344_v58, 0.0  ;;  %v7346_v18 = vpop.f32.mrb[11].mxu1  ;;  %v18545_v39 = vpop.permute.xlu1 %8939 }
 0x739   : > { %v7683_v37 = vpop.f32.mrb[42].mxu0  ;;  %v7900_v24 = vmax.f32 %v7346_v18, 0.0  ;;  %v18558_v9 = vsel %vm531_vm2, %v14291_v3, %v14320_v48  ;;  %v8685_v3 = vsel %vm322_vm1, %v14315_v38, %v14316_v57 }
 0x73a   : > { %v18560_v12 = vpop.permute.xlu0 %14328  ;;  %v7905_v33 = vmax.f32 %v7683_v37, 0.0  ;;  %v7685_v31 = vpop.f32.mrb[43].mxu0  ;;  %v13203_v46 = vpack.c.bf16 %v7899_v29, %v7883_v21  ;;  %v13293_v5 = vpack.c.bf16 %v18540_v14, %v18558_v9  ;;  %v14392_v2 = vpack.i.bf16 %v8685_v3, %v18270_v53 }
 0x73b   : > { %v7906_v20 = vmax.f32 %v7685_v31, 0.0  ;;  %v13201_v28 = vpack.c.bf16 %v7900_v24, %v7884_v10  ;;  %v7350_v19 = vpop.f32.mrb[12].mxu1  ;;  %v8990_v24 = vsel %vm531_vm2, %v14260_v8, %v18434_v22  ;;  %v14281_v53 = vunpack.i.h.bf16 %v18425_v30 }
 0x73c   : > { %v13251_v43 = vpack.c.bf16 %v7905_v33, %v7889_v35  ;;  %v7352_v62 = vpop.f32.mrb[13].mxu1  ;;  %v18575_v21 = vpop.permute.xlu1 %8786  ;;  %v7915_v18 = vmax.f32 %v7350_v19, 0.0  ;;  %v18592_v33 = vsel %vm531_vm2, %v14265_v6, %v14255_v11 }
 0x73d   : > { %v13249_v32 = vpack.c.bf16 %v7906_v20, %v7890_v42  ;;  %v7689_v10 = vpop.f32.mrb[44].mxu0  ;;  %13202 = vmatprep.subr.bf16.mxu1 %v13201_v28  ;;  %v8809_v38 = vsel %vm373_vm0, %v18521_v45, %v18575_v21  ;;  %v7916_v35 = vmax.f32 %v7352_v62, 0.0  ;;  %v18587_v42 = vsel %vm531_vm2, %v14255_v11, %v14256_v23 }
 0x73e   : > { %v18577_v58 = vpop.permute.xlu0 %14338  ;;  %v7691_v29 = vpop.f32.mrb[45].mxu0  ;;  %13204 = vmatpush1.bf16.msra.mxu1 %v13203_v46  ;;  %8959 = vrot.lane.b32.xlu1 %v8809_v38, %s14703_s12  ;;  %v14276_v45 = vunpack.i.h.bf16 %v18408_v4  ;;  %v7921_v31 = vmax.f32 %v7689_v10, 0.0  ;;  %v18596_v28 = vsel %vm531_vm2, %v14266_v44, %v14260_v8  ;;  %v13273_v4 = vpack.c.bf16 %v8990_v24, %v18587_v42 }
 0x73f   : > { %13250 = vmatprep.subr.bf16.mxu0 %v13249_v32  ;;  %v7356_v37 = vpop.f32.mrb[14].mxu1  ;;  %v7922_v56 = vmax.f32 %v7691_v29, 0.0  ;;  %v14331_v24 = vunpack.i.h.bf16 %v18560_v12 }
 0x740   : > { %13252 = vmatpush1.bf16.msra.mxu0 %v13251_v43  ;;  %v7931_v46 = vmax.f32 %v7356_v37, 0.0  ;;  %v7358_v20 = vpop.f32.mrb[15].mxu1  ;;  %v18599_v19 = vpop.permute.xlu1 %14323  ;;  %v14330_v43 = vunpack.i.l.bf16 %v18560_v12 }
 0x741   : > { %v7695_v23 = vpop.f32.mrb[46].mxu0  ;;  %v7932_v3 = vmax.f32 %v7358_v20, 0.0  ;;  %v14325_v10 = vunpack.i.l.bf16 %v18599_v19 }
 0x742   : > { %v7937_v62 = vmax.f32 %v7695_v23, 0.0  ;;  %v7697_v32 = vpop.f32.mrb[47].mxu0  ;;  %v13207_v11 = vpack.c.bf16 %v7931_v46, %v7915_v18  ;;  %v18601_v6 = vpop.permute.xlu0 %14348  ;;  %14393 = vrot.lane.b32.xlu1 %v14392_v2, %s14703_s12  ;;  %v13275_v18 = vpack.c.bf16 %v18596_v28, %v18592_v33  ;;  %v14340_v2 = vunpack.i.l.bf16 %v18577_v58 }
 0x743   : > { %v7938_v8 = vmax.f32 %v7697_v32, 0.0  ;;  %v13205_v44 = vpack.c.bf16 %v7932_v3, %v7916_v35  ;;  %v7540_v30 = vpop.f32.mrb[16].mxu1  ;;  %v14351_v38 = vunpack.i.h.bf16 %v18601_v6  ;;  %v19888_v37 = vunpack.i.l.bf16 %v18601_v6 }
 0x744   : > { %v13255_v29 = vpack.c.bf16 %v7937_v62, %v7921_v31  ;;  %v7542_v46 = vpop.f32.mrb[17].mxu1  ;;  %v18612_v23 = vpop.permute.xlu1 %14333  ;;  %v18615_v32 = vsel %vm531_vm2, %v14281_v53, %v14276_v45  ;;  %v7823_v35 = vmax.f32 %v7540_v30, 0.0  ;;  %v18627_v53 = vsel %vm531_vm2, %v14306_v26, %v14325_v10  ;;  %v14513_v30 = vld [vmem:[%s14907_s26 + $0x268] sm:$0xff] }
 0x745   : > { %v13253_v20 = vpack.c.bf16 %v7938_v8, %v7922_v56  ;;  %13206 = vmatprep.subr.bf16.mxu1 %v13205_v44  ;;  %v14336_v31 = vunpack.i.h.bf16 %v18612_v23  ;;  %v14335_v3 = vunpack.i.l.bf16 %v18612_v23  ;;  %v7824_v33 = vmax.f32 %v7542_v46, 0.0 }
 0x746   : > { %v18620_v62 = vpop.permute.xlu0 %8945  ;;  %13208 = vmatpush1.bf16.msra.mxu1 %v13207_v11  ;;  %v7546_v28 = vpop.f32.mrb[18].mxu1  ;;  %v9006_v56 = vsel %vm531_vm2, %v14276_v45, %v18462_v0  ;;  %v18636_v11 = vsel %vm531_vm2, %v14320_v48, %v14330_v43  ;;  %v18646_v45 = vsel %vm531_vm2, %v14340_v2, %v19888_v37  ;;  %v18653_v48 = vsel %vm531_vm2, %v14331_v24, %v14351_v38 }
 0x747   : > { %13254 = vmatprep.subr.bf16.mxu0 %v13253_v20  ;;  %v7839_v8 = vmax.f32 %v7546_v28, 0.0  ;;  %v7548_v44 = vpop.f32.mrb[19].mxu1  ;;  %v8734_v7 = vsel %vm373_vm0, %v14296_v63, %v14335_v3  ;;  %v8735_v34 = vsel %vm373_vm0, %v14335_v3, %v14336_v31  ;;  %v18763_v12 = vpack.c.bf16 %v18627_v53, %v18540_v14 }
 0x748   : > { %13256 = vmatpush1.bf16.msra.mxu0 %v13255_v29  ;;  %v7840_v26 = vmax.f32 %v7548_v44, 0.0  ;;  %v14344_v63 = vpop.permute.xlu1 %14343  ;;  %v14387_v29 = vpack.i.bf16 %v8734_v7, %v14513_v30  ;;  %v14300_v7 = vunpack.i.l.bf16 %v18476_v27 }
 0x749   : > { %13274 = vmatprep.subr.bf16.mxu0 %v13273_v4  ;;  %12146 = vmatmul.mubr.msk.f32.vlgmr.msra.gmra.mrb[52].mxu1 %vm1709_vm4, %v18379_v36  ;;  %v13227_v46 = vpack.c.bf16 %v7839_v8, %v7823_v35  ;;  %v18661_v20 = vunpack.i.h.bf16 %v14344_v63  ;;  %v14345_v28 = vunpack.i.l.bf16 %v14344_v63  ;;  %v14301_v4 = vunpack.i.h.bf16 %v18476_v27 }
 0x74a   : > { %v18663_v44 = vpop.permute.xlu0 %8867  ;;  %v13225_v37 = vpack.c.bf16 %v7840_v26, %v7824_v33  ;;  %8242 = vmatprep.mubr.f32.mxu1 %v14704_v47  ;;  %v7552_v17 = vpop.f32.mrb[20].mxu1  ;;  %14388 = vrot.lane.b32.xlu0 %v14387_v29, %s14703_s12  ;;  %v13277_v35 = vpack.c.bf16 %v18459_v52, %v9006_v56  ;;  %v13297_v33 = vpack.c.bf16 %v18636_v11, %v18627_v53 }
 0x74b   : > { %12152 = vmatmul.mubr.msk.f32.vlgmr.msra.gmra.mrb[60].mxu0 %vm1709_vm4, %v18379_v36  ;;  %v7554_v8 = vpop.f32.mrb[21].mxu1  ;;  %v8686_v26 = vsel %vm322_vm1, %v14316_v57, %v14345_v28  ;;  %v13279_v27 = vpack.c.bf16 %v18587_v42, %v18615_v32  ;;  %v13281_v56 = vpack.c.bf16 %v18507_v59, %v18473_v1  ;;  %v7855_v30 = vmax.f32 %v7552_v17, 0.0 }
 0x74c   : > { %13276 = vmatpush1.bf16.msra.mxu0 %v13275_v18  ;;  %8473 = vmatprep.mubr.f32.mxu0 %v14704_v47  ;;  %v18682_v63 = vpop.permute.xlu1 %14353  ;;  %v14397_v36 = vpack.i.bf16 %v8735_v34, %v8686_v26  ;;  %v8687_v55 = vsel %vm322_vm1, %v14345_v28, %v18661_v20  ;;  %v7856_v42 = vmax.f32 %v7554_v8, 0.0  ;;  %v9022_v34 = vsel %vm531_vm2, %v14300_v7, %v18434_v22 }
 0x74d   : > { %13278 = vmatprep.subr.bf16.mxu0 %v13277_v35  ;;  %12147 = vmatmul.mubr.msk.f32.gmra.mrb[54].mxu1 %vm1709_vm4, %v18401_v41  ;;  %v14356_v57 = vunpack.i.h.bf16 %v18682_v63  ;;  %v14355_v18 = vunpack.i.l.bf16 %v18682_v63  ;;  %v9025_v17 = vsel %vm531_vm2, %v14301_v4, %v18462_v0  ;;  %v14310_v35 = vunpack.i.l.bf16 %v18499_v15 }
 0x74e   : > { %v8791_v29 = vpop.permute.xlu0 %8790  ;;  %13226 = vmatprep.subr.bf16.mxu1 %v13225_v37  ;;  %v7558_v32 = vpop.f32.mrb[22].mxu1  ;;  %8390 = vmatprep.mubr.f32.mxu1 %v14704_v47  ;;  %v9031_v15 = vsel %vm531_vm2, %v18545_v39, %v18531_v60  ;;  %v19899_v53 = vpack.c.bf16 %v18558_v9, %v18551_v50 }
 0x74f   : > { %14398 = vrot.lane.b32.xlu0 %v14397_v36, %s14703_s12  ;;  %12153 = vmatmul.mubr.msk.f32.gmra.mrb[62].mxu0 %vm1709_vm4, %v18401_v41  ;;  %v7871_v28 = vmax.f32 %v7558_v32, 0.0  ;;  %v7560_v26 = vpop.f32.mrb[23].mxu1  ;;  %v8736_v37 = vsel %vm373_vm0, %v14336_v31, %v14355_v18  ;;  %v8737_v22 = vsel %vm373_vm0, %v14355_v18, %v14356_v57  ;;  %v13283_v32 = vpack.c.bf16 %v9025_v17, %v9022_v34 }
 0x750   : > { %13280 = vmatpush1.bf16.msra.mxu0 %v13279_v27  ;;  %9185 = vmatprep.mubr.f32.mxu0 %v14704_v47  ;;  %v7872_v0 = vmax.f32 %v7560_v26, 0.0  ;;  %v18708_v4 = vpop.permute.xlu1 %8947  ;;  %v14402_v7 = vpack.i.bf16 %v8736_v37, %v18347_v25  ;;  %v14407_v8 = vpack.i.bf16 %v8737_v22, %v8687_v55  ;;  %v9028_v18 = vsel %vm531_vm2, %v14310_v35, %v18450_v54 }
 0x751   : > { %13282 = vmatprep.subr.bf16.mxu0 %v13281_v56  ;;  %13228 = vmatpush1.bf16.msra.mxu1 %v13227_v46  ;;  %v13231_v36 = vpack.c.bf16 %v7871_v28, %v7855_v30  ;;  %v18719_v27 = vpack.c.bf16 %v18551_v50, %v18492_v16  ;;  %v14326_v46 = vunpack.i.h.bf16 %v18599_v19  ;;  %v14321_v56 = vunpack.i.h.bf16 %v18533_v61 }
 0x752   : > { %v18711_v23 = vpop.permute.xlu0 %8949  ;;  %v13229_v31 = vpack.c.bf16 %v7872_v0, %v7856_v42  ;;  %v7564_v3 = vpop.f32.mrb[24].mxu1  ;;  %14403 = vrot.lane.b32.xlu1 %v14402_v7, %s14703_s12  ;;  %v13287_v34 = vpack.c.bf16 %v9028_v18, %v18459_v52  ;;  %v9010_v19 = vsel %vm531_vm2, %v14330_v43, %v14340_v2  ;;  %v18765_v43 = vld [vmem:[#allocation7] sm:$0xff]  ;;  %v19900_v50 = vunpack.i.l.bf16 %v18601_v6 }
 0x753   : > { %14408 = vrot.lane.b32.xlu0 %v14407_v8, %s14703_s12  ;;  %v7566_v25 = vpop.f32.mrb[25].mxu1  ;;  %v7887_v55 = vmax.f32 %v7564_v3, 0.0  ;;  %v9032_v3 = vsel %vm531_vm2, %v18531_v60, %v18509_v13  ;;  %v8994_v37 = vsel %vm531_vm2, %v14325_v10, %v14326_v46  ;;  %v8978_v7 = vsel %vm531_vm2, %v14311_v51, %v14321_v56  ;;  %v14514_v51 = vld [vmem:[%s14907_s26 + $0x280] sm:$0xff] }
 0x754   : > { %13284 = vmatpush1.bf16.msra.mxu0 %v13283_v32  ;;  %13230 = vmatprep.subr.bf16.mxu1 %v13229_v31  ;;  %v8789_v30 = vpop.permute.xlu1 %8788  ;;  %v7888_v35 = vmax.f32 %v7566_v25, 0.0  ;;  %v18758_v18 = vpack.c.bf16 %v8994_v37, %v8978_v7 }
 0x755   : > { %13286 = vmatprep.subr.bf16.mxu0 %v18719_v27  ;;  %13232 = vmatpush1.bf16.msra.mxu1 %v13231_v36  ;;  %v8810_v54 = vsel %vm373_vm0, %v18575_v21, %v8789_v30  ;;  %v8811_v42 = vsel %vm373_vm0, %v8789_v30, %v8791_v29  ;;  %v14516_v30 = vld [vmem:[%s14907_s26 + $0x288] sm:$0xff] }
 0x756   : > { %v8793_v17 = vpop.permute.xlu0 %8792  ;;  %v7570_v28 = vpop.f32.mrb[26].mxu1  ;;  %8961 = vrot.lane.b32.xlu1 %v8810_v54, %s14703_s12 }
 0x757   : > { %8963 = vrot.lane.b32.xlu0 %v8811_v42, %s14703_s12  ;;  %v7903_v61 = vmax.f32 %v7570_v28, 0.0  ;;  %v7572_v26 = vpop.f32.mrb[27].mxu1  ;;  %v8812_v21 = vsel %vm373_vm0, %v8791_v29, %v8793_v17  ;;  %v8979_v29 = vsel %vm531_vm2, %v14321_v56, %v14331_v24  ;;  %v14341_v24 = vunpack.i.h.bf16 %v18577_v58  ;;  %v18779_v28 = vld [vmem:[#allocation7 + $0x8] sm:$0xff] }
 0x758   : > { %13288 = vmatpush1.bf16.msra.mxu0 %v13287_v34  ;;  %v7904_v22 = vmax.f32 %v7572_v26, 0.0  ;;  %v18737_v0 = vpop.permute.xlu1 %8739  ;;  %v13309_v39 = vpack.c.bf16 %v8979_v29, %v9010_v19  ;;  %v13311_v42 = vpack.c.bf16 %v8978_v7, %v18636_v11 }
 0x759   : > { %9137 = vmatprep.subr.mxu0 %v9032_v3  ;;  %v13235_v8 = vpack.c.bf16 %v7903_v61, %v7887_v55  ;;  %v8741_v36 = vsel %vm322_vm1, %v18661_v20, %v18737_v0  ;;  %v8995_v34 = vsel %vm531_vm2, %v14326_v46, %v14341_v24  ;;  %v18787_v3 = vld [vmem:[%s14907_s26 + $0x290] sm:$0xff] }
 0x75a   : > { %v13233_v10 = vpack.c.bf16 %v7904_v22, %v7888_v35  ;;  %v7576_v32 = vpop.f32.mrb[28].mxu1  ;;  %v14412_v31 = vpack.i.bf16 %v8741_v36, %v14514_v51  ;;  %v13313_v26 = vpack.c.bf16 %v18646_v45, %v8995_v34  ;;  %v18791_v22 = vsel %vm531_vm2, %v14341_v24, %v18663_v44  ;;  %v18799_v36 = vld [vmem:[#allocation7 + $0x10] sm:$0xff]  ;;  %v18823_v51 = vld [vmem:[#allocation7 + $0x18] sm:$0xff] }
 0x75b   : > { %8965 = vrot.lane.b32.xlu0 %v8812_v21, %s14703_s12  ;;  %v7578_v25 = vpop.f32.mrb[29].mxu1  ;;  %v7919_v2 = vmax.f32 %v7576_v32, 0.0  ;;  %v18854_v24 = vld [vmem:[#allocation7 + $0x38] sm:$0xff] }
 0x75c   : > { %9138 = vmatpush1.msra.mxu0 %v9031_v15  ;;  %13234 = vmatprep.subr.bf16.mxu1 %v13233_v10  ;;  %v18770_v60 = vpop.permute.xlu1 %8951  ;;  %v7920_v58 = vmax.f32 %v7578_v25, 0.0  ;;  %v8624_v10 = vld [vmem:[%s14907_s26 + $0x298] sm:$0xff]  ;;  %v18819_v15 = vld [vmem:[#allocation9] sm:$0xff]  ;;  %v18849_v25 = vld [vmem:[#allocation7 + $0x30] sm:$0xff] }
 0x75d   : > { %12156 = vmatmul.mubr.msk.f32.vlgmr.msra.gmra.mrb[64].mxu0 %vm652_vm3, %v18765_v43  ;;  %13306 = vmatprep.subr.bf16.mxu0 %v18758_v18  ;;  %v9036_v32 = vsel %vm531_vm2, %v18711_v23, %v18770_v60 }
 0x75e   : > { %14413 = vrot.lane.b32.xlu1 %v14412_v31, %s14703_s12  ;;  %13308 = vmatpush1.bf16.msra.mxu0 %v18763_v12  ;;  %v7582_v56 = vpop.f32.mrb[30].mxu1  ;;  %v18838_v31 = vld [vmem:[#allocation7 + $0x20] sm:$0xff] }
 0x75f   : > { %13310 = vmatprep.subr.bf16.mxu0 %v13309_v39  ;;  %8721 = vrot.lane.b32.xlu0 %v14516_v30, %s14701_s22  ;;  %v7935_v55 = vmax.f32 %v7582_v56, 0.0  ;;  %v7584_v54 = vpop.f32.mrb[31].mxu1 }
 0x760   : > { %9191 = vmatprep.mubr.f32.mxu0 %v14704_v47  ;;  %13236 = vmatpush1.bf16.msra.mxu1 %v13235_v8  ;;  %v7936_v35 = vmax.f32 %v7584_v54, 0.0  ;;  %v13315_v8 = vpack.c.bf16 %v9010_v19, %v8994_v37  ;;  %v14422_v37 = vpack.i.bf16 %v18737_v0, %v14516_v30  ;;  %v18813_v19 = vpack.c.bf16 %v8995_v34, %v8979_v29 }
 0x761   : > { %12157 = vmatmul.mubr.msk.f32.gmra.mrb[66].mxu0 %vm652_vm3, %v18779_v28  ;;  %v18783_v61 = vpop.permute.xlu1 %8794  ;;  %v13239_v21 = vpack.c.bf16 %v7935_v55, %v7919_v2  ;;  %v9035_v29 = vsel %vm531_vm2, %v18708_v4, %v18711_v23  ;;  %v18844_v23 = vld [vmem:[#allocation7 + $0x28] sm:$0xff] }
 0x762   : > { %v8813_v46 = vsel %vm373_vm0, %v8793_v17, %v18783_v61  ;;  %13312 = vmatpush1.bf16.msra.mxu0 %v13311_v42  ;;  %9197 = vmatprep.mubr.f32.mxu0 %v14704_v47  ;;  %v13237_v7 = vpack.c.bf16 %v7936_v35, %v7920_v58  ;;  %v18805_v17 = vpack.c.bf16 %v18791_v22, %v18653_v48 }
 0x763   : > { %13314 = vmatprep.subr.bf16.mxu0 %v13313_v26  ;;  %8967 = vrot.lane.b32.xlu1 %v8813_v46, %s14703_s12 }
 0x764   : > { %8746 = vrot.lane.b32.xlu0 %v18787_v3, %s14702_s24  ;;  %13238 = vmatprep.subr.bf16.mxu1 %v13237_v7 }
 0x765   : > { %12158 = vmatmul.mubr.msk.f32.gmra.mrb[68].mxu0 %vm652_vm3, %v18799_v36  ;;  %13240 = vmatpush1.bf16.msra.mxu1 %v13239_v21 }
 0x766   : > { %13316 = vmatpush1.bf16.msra.mxu0 %v13315_v8  ;;  %9203 = vmatprep.mubr.f32.mxu0 %v14704_v47 }
 0x767   : > { %13318 = vmatprep.subr.bf16.mxu0 %v18805_v17  ;;  %8743 = vrot.lane.b32.xlu1 %v18787_v3, %s14701_s22 }
 0x768   : > { %8798 = vrot.lane.b32.xlu0 %v8624_v10, %s14701_s22  ;;  %12150 = vmatmul.mubr.msk.f32.vlgmr.msra.gmra.mrb[56].mxu1 %vm1709_vm4, %v18819_v15 }
 0x769   : > { %12159 = vmatmul.mubr.msk.f32.gmra.mrb[70].mxu0 %vm652_vm3, %v18823_v51  ;;  %8396 = vmatprep.mubr.f32.mxu1 %v14704_v47 }
 0x76a   : > { %13320 = vmatpush1.bf16.msra.mxu0 %v18813_v19  ;;  %9209 = vmatprep.mubr.f32.mxu0 %v14704_v47 }
 0x76b   : > { %8796 = vrot.lane.b32.xlu1 %v18787_v3, %s14701_s22  ;;  %9363 = vmatprep.subr.mxu0 %v9036_v32 }
 0x76c   : > { %14423 = vrot.lane.b32.xlu0 %v14422_v37, %s14703_s12  ;;  %12151 = vmatmul.mubr.msk.f32.gmra.mrb[58].mxu1 %vm1709_vm4, %v18401_v41 }
 0x76d   : > { %12160 = vmatmul.mubr.msk.f32.gmra.mrb[72].mxu0 %vm652_vm3, %v18838_v31  ;;  %8544 = vmatprep.mubr.f32.mxu1 %v14704_v47 }
 0x76e   : > { %9215 = vmatprep.mubr.f32.mxu0 %v14704_v47  ;;  %9364 = vmatpush1.msra.mxu0 %v9035_v29 }
 0x771   : > { %12161 = vmatmul.mubr.msk.f32.gmra.mrb[74].mxu0 %vm652_vm3, %v18844_v23 }
 0x772   : > { %9221 = vmatprep.mubr.f32.mxu0 %v14704_v47 }
 0x775   : > { %12162 = vmatmul.mubr.msk.f32.gmra.mrb[76].mxu0 %vm652_vm3, %v18849_v25 }
 0x776   : > { %9227 = vmatprep.mubr.f32.mxu0 %v14704_v47 }
 0x777   : > { %v7766_v41 = vpop.f32.mrb[32].mxu1 }
 0x778   : > { %v7768_v39 = vpop.f32.mrb[33].mxu1  ;;  %v7827_v58 = vmax.f32 %v7766_v41, 0.0 }
 0x779   : > { %12163 = vmatmul.mubr.msk.f32.gmra.mrb[78].mxu0 %vm652_vm3, %v18854_v24  ;;  %v7828_v55 = vmax.f32 %v7768_v39, 0.0 }
 0x77a   : > { %9411 = vmatprep.mubr.f32.mxu0 %v14704_v47 }
 0x77b   : > { %v7772_v2 = vpop.f32.mrb[34].mxu1 }
 0x77c   : > { %v7843_v56 = vmax.f32 %v7772_v2, 0.0  ;;  %v7774_v30 = vpop.f32.mrb[35].mxu1 }
 0x77d   : > { %12172 = vmatmul.mubr.msk.f32.vlgmr.msra.gmra.mrb[80].mxu0 %vm652_vm3, %v18765_v43  ;;  %v7844_v54 = vmax.f32 %v7774_v30, 0.0 }
 0x77e   : > { %9417 = vmatprep.mubr.f32.mxu0 %v14704_v47  ;;  %v13259_v42 = vpack.c.bf16 %v7843_v56, %v7827_v58 }
 0x77f   : > { %v13257_v34 = vpack.c.bf16 %v7844_v54, %v7828_v55  ;;  %v7778_v35 = vpop.f32.mrb[36].mxu1 }
 0x780   : > { %v7780_v26 = vpop.f32.mrb[37].mxu1  ;;  %v7859_v46 = vmax.f32 %v7778_v35, 0.0 }
 0x781   : > { %12173 = vmatmul.mubr.msk.f32.gmra.mrb[82].mxu0 %vm652_vm3, %v18779_v28  ;;  %13258 = vmatprep.subr.bf16.mxu1 %v13257_v34  ;;  %v7860_v10 = vmax.f32 %v7780_v26, 0.0 }
 0x782   : > { %9423 = vmatprep.mubr.f32.mxu0 %v14704_v47  ;;  %13260 = vmatpush1.bf16.msra.mxu1 %v13259_v42 }
 0x783   : > { %v7784_v21 = vpop.f32.mrb[38].mxu1 }
 0x784   : > { %v7875_v7 = vmax.f32 %v7784_v21, 0.0  ;;  %v7786_v8 = vpop.f32.mrb[39].mxu1  ;;  %v14364_v21 = vpop.permute.xlu1 %14363 }
 0x785   : > { %12174 = vmatmul.mubr.msk.f32.gmra.mrb[84].mxu0 %vm652_vm3, %v18799_v36  ;;  %v7876_v37 = vmax.f32 %v7786_v8, 0.0 }
 0x786   : > { %9429 = vmatprep.mubr.f32.mxu0 %v14704_v47  ;;  %v13263_v32 = vpack.c.bf16 %v7875_v7, %v7859_v46 }
 0x787   : > { %v13261_v29 = vpack.c.bf16 %v7876_v37, %v7860_v10  ;;  %v7790_v41 = vpop.f32.mrb[40].mxu1 }
 0x788   : > { %v7792_v39 = vpop.f32.mrb[41].mxu1  ;;  %v7891_v58 = vmax.f32 %v7790_v41, 0.0 }
 0x789   : > { %12175 = vmatmul.mubr.msk.f32.gmra.mrb[86].mxu0 %vm652_vm3, %v18823_v51  ;;  %13262 = vmatprep.subr.bf16.mxu1 %v13261_v29  ;;  %v7892_v55 = vmax.f32 %v7792_v39, 0.0 }
 0x78a   : > { %9435 = vmatprep.mubr.f32.mxu0 %v14704_v47  ;;  %13264 = vmatpush1.bf16.msra.mxu1 %v13263_v32 }
 0x78b   : > { %v7796_v2 = vpop.f32.mrb[42].mxu1 }
 0x78c   : > { %v7907_v56 = vmax.f32 %v7796_v2, 0.0  ;;  %v7798_v30 = vpop.f32.mrb[43].mxu1 }
 0x78d   : > { %12176 = vmatmul.mubr.msk.f32.gmra.mrb[88].mxu0 %vm652_vm3, %v18838_v31  ;;  %v7908_v54 = vmax.f32 %v7798_v30, 0.0  ;;  %v14366_v30 = vunpack.i.h.bf16 %v14364_v21 }
 0x78e   : > { %9441 = vmatprep.mubr.f32.mxu0 %v14704_v47  ;;  %v13267_v42 = vpack.c.bf16 %v7907_v56, %v7891_v58 }
 0x78f   : > { %v13265_v34 = vpack.c.bf16 %v7908_v54, %v7892_v55  ;;  %v7802_v35 = vpop.f32.mrb[44].mxu1  ;;  %v14365_v54 = vunpack.i.l.bf16 %v14364_v21 }
 0x790   : > { %v7804_v26 = vpop.f32.mrb[45].mxu1  ;;  %v7923_v7 = vmax.f32 %v7802_v35, 0.0 }
 0x791   : > { %12177 = vmatmul.mubr.msk.f32.gmra.mrb[90].mxu0 %vm652_vm3, %v18844_v23  ;;  %13266 = vmatprep.subr.bf16.mxu1 %v13265_v34  ;;  %v7924_v32 = vmax.f32 %v7804_v26, 0.0 }
 0x792   : > { %9447 = vmatprep.mubr.f32.mxu0 %v14704_v47  ;;  %13268 = vmatpush1.bf16.msra.mxu1 %v13267_v42 }
 0x793   : > { %v7808_v46 = vpop.f32.mrb[46].mxu1 }
 0x794   : > { %v7939_v8 = vmax.f32 %v7808_v46, 0.0  ;;  %v18877_v10 = vpop.permute.xlu0 %14358  ;;  %v7810_v37 = vpop.f32.mrb[47].mxu1 }
 0x795   : > { %12178 = vmatmul.mubr.msk.f32.gmra.mrb[92].mxu0 %vm652_vm3, %v18849_v25  ;;  %v7940_v29 = vmax.f32 %v7810_v37, 0.0  ;;  %v14360_v39 = vunpack.i.l.bf16 %v18877_v10  ;;  %v14361_v37 = vunpack.i.h.bf16 %v18877_v10 }
 0x796   : > { %9453 = vmatprep.mubr.f32.mxu0 %v14704_v47  ;;  %v13271_v41 = vpack.c.bf16 %v7939_v8, %v7923_v7  ;;  %v14374_v2 = vpop.permute.xlu1 %14373  ;;  %v18897_v8 = vsel %vm531_vm2, %v18663_v44, %v14366_v30 }
 0x797   : > { %v13269_v58 = vpack.c.bf16 %v7940_v29, %v7924_v32  ;;  %v14376_v56 = vunpack.i.h.bf16 %v14374_v2  ;;  %v14375_v42 = vunpack.i.l.bf16 %v14374_v2  ;;  %v18889_v26 = vsel %vm531_vm2, %v14351_v38, %v14360_v39 }
 0x798   : > { %v14369_v55 = vpop.permute.xlu0 %14368  ;;  %v8982_v46 = vsel %vm531_vm2, %v14360_v39, %v14365_v54  ;;  %v18906_v38 = vpack.c.bf16 %v18897_v8, %v18889_v26  ;;  %v9012_v9 = vsel %vm531_vm2, %v19900_v50, %v14361_v37 }
 0x799   : > { %12179 = vmatmul.mubr.msk.f32.gmra.mrb[94].mxu0 %vm652_vm3, %v18854_v24  ;;  %v14371_v34 = vunpack.i.h.bf16 %v14369_v55  ;;  %v14370_v35 = vunpack.i.l.bf16 %v14369_v55  ;;  %13270 = vmatprep.subr.bf16.mxu1 %v13269_v58  ;;  %v8983_v44 = vsel %vm531_vm2, %v14365_v54, %v14375_v42 }
 0x79a   : > { %9637 = vmatprep.mubr.f32.mxu0 %v14704_v47  ;;  %13272 = vmatpush1.bf16.msra.mxu1 %v13271_v41 }
 0x79b   : > { %13290 = vmatprep.subr.bf16.mxu1 %v18719_v27  ;;  %v8998_v7 = vsel %vm531_vm2, %v14366_v30, %v14370_v35  ;;  %v9014_v21 = vsel %vm531_vm2, %v14371_v34, %v14376_v56  ;;  %v18908_v27 = vpop.permute.xlu1 %8953  ;;  %v9013_v10 = vsel %vm531_vm2, %v14361_v37, %v14371_v34 }
 0x79c   : > { %v18900_v32 = vpop.permute.xlu0 %14378  ;;  %v18902_v29 = vpack.c.bf16 %v8998_v7, %v8982_v46  ;;  %v13341_v2 = vpack.c.bf16 %v8983_v44, %v9014_v21  ;;  %v13343_v52 = vpack.c.bf16 %v8982_v46, %v9013_v10  ;;  %v13347_v59 = vpack.c.bf16 %v9014_v21, %v8998_v7 }
 0x79d   : > { %v14381_v41 = vunpack.i.h.bf16 %v18900_v32  ;;  %v14380_v39 = vunpack.i.l.bf16 %v18900_v32  ;;  %12154 = vmatmul.mubr.msk.f32.vlgmr.msra.gmra.mrb[60].mxu1 %vm1709_vm4, %v18819_v15  ;;  %v9037_v7 = vsel %vm531_vm2, %v18770_v60, %v18908_v27 }
 0x79e   : > { %13292 = vmatpush1.bf16.msra.mxu1 %v13291_v49  ;;  %13338 = vmatprep.subr.bf16.mxu0 %v18902_v29  ;;  %v14525_v49 = vld [vmem:[#allocation9 + $0x8] sm:$0xff] }
 0x79f   : > { %13294 = vmatprep.subr.bf16.mxu1 %v13293_v5  ;;  %13340 = vmatpush1.bf16.msra.mxu0 %v18906_v38  ;;  %v8999_v58 = vsel %vm531_vm2, %v14370_v35, %v14380_v39  ;;  %v18928_v15 = vsel %vm531_vm2, %v14376_v56, %v14381_v41 }
 0x7a0   : > { %13342 = vmatprep.subr.bf16.mxu0 %v13341_v2  ;;  %8550 = vmatprep.mubr.f32.mxu1 %v14704_v47  ;;  %v13345_v56 = vpack.c.bf16 %v18928_v15, %v8999_v58  ;;  %v18963_v11 = vpack.c.bf16 %v8999_v58, %v8983_v44 }
 0x7a1   : > { %12155 = vmatmul.mubr.msk.f32.gmra.mrb[62].mxu1 %vm1709_vm4, %v14525_v49 }
 0x7a2   : > { %v18931_v1 = vpop.permute.xlu1 %14383  ;;  %13296 = vmatpush1.bf16.msra.mxu1 %v13295_v40  ;;  %9298 = vmatprep.mubr.f32.mxu1 %v14704_v47 }
 0x7a3   : > { %v14386_v14 = vunpack.i.h.bf16 %v18931_v1  ;;  %v14385_v5 = vunpack.i.l.bf16 %v18931_v1  ;;  %13298 = vmatprep.subr.bf16.mxu1 %v13297_v33  ;;  %13344 = vmatpush1.bf16.msra.mxu0 %v13343_v52  ;;  %v9034_v33 = vsel %vm531_vm2, %v18620_v62, %v18708_v4  ;;  %v13325_v4 = vpack.c.bf16 %v18889_v26, %v9012_v9 }
 0x7a4   : > { %13346 = vmatprep.subr.bf16.mxu0 %v13345_v56  ;;  %v8956_v55 = vpop.permute.xlu0 %8955 }
 0x7a5   : > { %v18947_v30 = vsel %vm531_vm2, %v14375_v42, %v14385_v5  ;;  %v18952_v16 = vsel %vm531_vm2, %v14380_v39, %v14386_v14  ;;  %v9038_v42 = vsel %vm531_vm2, %v18908_v27, %v8956_v55 }
 0x7a6   : > { %v18956_v40 = vpack.c.bf16 %v18952_v16, %v18947_v30  ;;  %13300 = vmatpush1.bf16.msra.mxu1 %v19899_v53 }
 0x7a7   : > { %13302 = vmatprep.subr.bf16.mxu1 %v18758_v18  ;;  %13348 = vmatpush1.bf16.msra.mxu0 %v13347_v59  ;;  %v9033_v18 = vsel %vm531_vm2, %v18509_v13, %v18620_v62  ;;  %v13329_v62 = vpack.c.bf16 %v9013_v10, %v18897_v8 }
 0x7a8   : > { %13350 = vmatprep.subr.bf16.mxu0 %v18956_v40 }
 0x7aa   : > { %13304 = vmatpush1.bf16.msra.mxu1 %v18763_v12  ;;  %v8958_v12 = vpop.permute.xlu0 %8957 }
 0x7ab   : > { %9250 = vmatprep.subr.mxu1 %v9034_v33  ;;  %13352 = vmatpush1.bf16.msra.mxu0 %v18963_v11  ;;  %v9039_v54 = vsel %vm531_vm2, %v8956_v55, %v8958_v12 }
 0x7ae   : > { %9251 = vmatpush1.msra.mxu1 %v9033_v18 }
 0x7af   : > { %12164 = vmatmul.mubr.msk.f32.vlgmr.msra.gmra.mrb[64].mxu1 %vm652_vm3, %v18765_v43  ;;  %13322 = vmatprep.subr.bf16.mxu1 %v18805_v17  ;;  %v19901_v17 = vpack.c.bf16 %v18653_v48, %v18646_v45 }
 0x7b0   : > { %13324 = vmatpush1.bf16.msra.mxu1 %v18813_v19  ;;  %9304 = vmatprep.mubr.f32.mxu1 %v14704_v47  ;;  %v18982_v6 = vpop.permute.xlu1 %8959  ;;  %v13331_v19 = vpack.c.bf16 %v9012_v9, %v18791_v22 }
 0x7b1   : > { %13326 = vmatprep.subr.bf16.mxu1 %v13325_v4  ;;  %v9040_v13 = vsel %vm531_vm2, %v8958_v12, %v18982_v6 }
 0x7b2   : > { %9589 = vmatprep.subr.mxu0 %v9040_v13 }
 0x7b3   : > { %12165 = vmatmul.mubr.msk.f32.gmra.mrb[66].mxu1 %vm652_vm3, %v18779_v28  ;;  %9590 = vmatpush1.msra.mxu0 %v9039_v54 }
 0x7b4   : > { %13328 = vmatpush1.bf16.msra.mxu1 %v19901_v17  ;;  %9310 = vmatprep.mubr.f32.mxu1 %v14704_v47  ;;  %v14394_v45 = vpop.permute.xlu1 %14393 }
 0x7b5   : > { %13330 = vmatprep.subr.bf16.mxu1 %v13329_v62  ;;  %12188 = vmatmul.mubr.msk.f32.vlgmr.msra.gmra.mrb[96].mxu0 %vm652_vm3, %v18765_v43  ;;  %v14396_v34 = vunpack.i.h.bf16 %v14394_v45  ;;  %v14395_v35 = vunpack.i.l.bf16 %v14394_v45 }
 0x7b6   : > { %9643 = vmatprep.mubr.f32.mxu0 %v14704_v47 }
 0x7b7   : > { %12166 = vmatmul.mubr.msk.f32.gmra.mrb[68].mxu1 %vm652_vm3, %v18799_v36  ;;  %v19026_v37 = vsel %vm531_vm2, %v14386_v14, %v14396_v34 }
 0x7b8   : > { %13332 = vmatpush1.bf16.msra.mxu1 %v13331_v19  ;;  %9316 = vmatprep.mubr.f32.mxu1 %v14704_v47 }
 0x7b9   : > { %13334 = vmatprep.subr.bf16.mxu1 %v18902_v29  ;;  %12189 = vmatmul.mubr.msk.f32.gmra.mrb[98].mxu0 %vm652_vm3, %v18779_v28 }
 0x7ba   : > { %9649 = vmatprep.mubr.f32.mxu0 %v14704_v47 }
 0x7bb   : > { %12167 = vmatmul.mubr.msk.f32.gmra.mrb[70].mxu1 %vm652_vm3, %v18823_v51 }
 0x7bc   : > { %v19007_v48 = vpop.permute.xlu0 %14388  ;;  %13336 = vmatpush1.bf16.msra.mxu1 %v18906_v38  ;;  %9322 = vmatprep.mubr.f32.mxu1 %v14704_v47 }
 0x7bd   : > { %v8007_v22 = vpop.f32.mrb[48].mxu0  ;;  %v14390_v26 = vunpack.i.l.bf16 %v19007_v48  ;;  %9476 = vmatprep.subr.mxu1 %v9038_v42  ;;  %12190 = vmatmul.mubr.msk.f32.gmra.mrb[100].mxu0 %vm652_vm3, %v18799_v36  ;;  %v14391_v10 = vunpack.i.h.bf16 %v19007_v48 }
 0x7be   : > { %8557 = vst [vmem:[#allocation2 + $0x180] sm:$0xff] %v8007_v22  ;;  %v8009_v46 = vpop.f32.mrb[49].mxu0  ;;  %9655 = vmatprep.mubr.f32.mxu0 %v14704_v47  ;;  %v13359_v22 = vpack.c.bf16 %v18947_v30, %v18928_v15 }
 0x7bf   : > { %8558 = vst [vmem:[#allocation2 + $0x188] sm:$0xff] %v8009_v46  ;;  %12168 = vmatmul.mubr.msk.f32.gmra.mrb[72].mxu1 %vm652_vm3, %v18838_v31  ;;  %v8985_v29 = vsel %vm531_vm2, %v14385_v5, %v14390_v26  ;;  %v8986_v27 = vsel %vm531_vm2, %v14390_v26, %v14395_v35  ;;  %v9016_v62 = vsel %vm531_vm2, %v14381_v41, %v14391_v10 }
 0x7c0   : > { %9477 = vmatpush1.msra.mxu1 %v9037_v7  ;;  %9328 = vmatprep.mubr.f32.mxu1 %v14704_v47  ;;  %v19041_v2 = vpack.c.bf16 %v19026_v37, %v8985_v29  ;;  %v13357_v19 = vpack.c.bf16 %v8985_v29, %v9016_v62  ;;  %v13363_v26 = vpack.c.bf16 %v9016_v62, %v18952_v16  ;;  %v11244_v62 = vld [vmem:[#allocation2 + $0x4d] ss:$8 sm:$0xf0] }
 0x7c1   : > { %v14399_v21 = vpop.permute.xlu0 %14398  ;;  %v8013_v8 = vpop.f32.mrb[50].mxu0  ;;  %13354 = vmatprep.subr.bf16.mxu1 %v18956_v40  ;;  %12191 = vmatmul.mubr.msk.f32.gmra.mrb[102].mxu0 %vm652_vm3, %v18823_v51 }
 0x7c2   : > { %v14400_v38 = vunpack.i.l.bf16 %v14399_v21  ;;  %8573 = vst [vmem:[#allocation2 + $0x400] sm:$0xff] %v8013_v8  ;;  %v8015_v60 = vpop.f32.mrb[51].mxu0  ;;  %v14401_v39 = vunpack.i.h.bf16 %v14399_v21  ;;  %9661 = vmatprep.mubr.f32.mxu0 %v14704_v47 }
 0x7c3   : > { %8574 = vst [vmem:[#allocation2 + $0x408] sm:$0xff] %v8015_v60  ;;  %12169 = vmatmul.mubr.msk.f32.gmra.mrb[74].mxu1 %vm652_vm3, %v18844_v23  ;;  %v10843_v60 = vld [vmem:[#allocation2 + $0x41] ss:$8 sm:$0xf] }
 0x7c4   : > { %v9002_v44 = vsel %vm531_vm2, %v14396_v34, %v14400_v38  ;;  %v14404_v58 = vpop.permute.xlu1 %14403  ;;  %9334 = vmatprep.mubr.f32.mxu1 %v14704_v47  ;;  %v9017_v59 = vsel %vm531_vm2, %v14391_v10, %v14401_v39 }
 0x7c5   : > { %v19043_v52 = vpop.permute.xlu0 %14408  ;;  %v19046_v1 = vpack.c.bf16 %v9002_v44, %v8986_v27  ;;  %v14406_v49 = vunpack.i.h.bf16 %v14404_v58  ;;  %v14405_v14 = vunpack.i.l.bf16 %v14404_v58  ;;  %12192 = vmatmul.mubr.msk.f32.gmra.mrb[104].mxu0 %vm652_vm3, %v18838_v31  ;;  %v13375_v18 = vpack.c.bf16 %v8986_v27, %v9017_v59  ;;  %v10839_v58 = vld [vmem:[#allocation2 + $0x1] ss:$8 sm:$0xf] }
 0x7c6   : > { %v14411_v5 = vunpack.i.h.bf16 %v19043_v52  ;;  %v19050_v56 = vunpack.i.l.bf16 %v19043_v52  ;;  %9667 = vmatprep.mubr.f32.mxu0 %v14704_v47 }
 0x7c7   : > { %13370 = vmatprep.subr.bf16.mxu0 %v19046_v1  ;;  %12170 = vmatmul.mubr.msk.f32.gmra.mrb[76].mxu1 %vm652_vm3, %v18849_v25  ;;  %v8987_v40 = vsel %vm531_vm2, %v14395_v35, %v14405_v14  ;;  %v9018_v53 = vsel %vm531_vm2, %v14401_v39, %v14406_v49  ;;  %v10844_v39 = vld [vmem:[#allocation2 + $0x41] ss:$8 sm:$0xf0] }
 0x7c8   : > { %13372 = vmatpush1.bf16.msra.mxu0 %v19041_v2  ;;  %v9003_v33 = vsel %vm531_vm2, %v14400_v38, %v19050_v56  ;;  %9340 = vmatprep.mubr.f32.mxu1 %v14704_v47  ;;  %v13373_v50 = vpack.c.bf16 %v8987_v40, %v9018_v53  ;;  %v19070_v9 = vsel %vm531_vm2, %v14406_v49, %v14411_v5  ;;  %v19072_v4 = vpop.permute.xlu1 %8961 }
 0x7c9   : > { %v19064_v55 = vpop.permute.xlu0 %8963  ;;  %v13377_v12 = vpack.c.bf16 %v19070_v9, %v9003_v33  ;;  %12193 = vmatmul.mubr.msk.f32.gmra.mrb[106].mxu0 %vm652_vm3, %v18844_v23  ;;  %v13379_v54 = vpack.c.bf16 %v9018_v53, %v9002_v44  ;;  %v19121_v30 = vpack.c.bf16 %v9003_v33, %v8987_v40  ;;  %v9041_v10 = vsel %vm531_vm2, %v18982_v6, %v19072_v4  ;;  %v10962_v6 = vld [vmem:[#allocation2 + $0x42] ss:$8 sm:$0xf0] }
 0x7ca   : > { %13374 = vmatprep.subr.bf16.mxu0 %v13373_v50  ;;  %9673 = vmatprep.mubr.f32.mxu0 %v14704_v47  ;;  %v9042_v38 = vsel %vm531_vm2, %v19072_v4, %v19064_v55  ;;  %v10845_v49 = vor.u32 %v10844_v39, %v10843_v60  ;;  %v10957_v53 = vld [vmem:[#allocation2 + $0x2] ss:$8 sm:$0xf]  ;;  %v11127_v50 = vld [vmem:[#allocation2 + $0x4c] ss:$8 sm:$0xf0] }
 0x7cb   : > { %12171 = vmatmul.mubr.msk.f32.gmra.mrb[78].mxu1 %vm652_vm3, %v18854_v24  ;;  %v10958_v33 = vld [vmem:[#allocation2 + $0x2] ss:$8 sm:$0xf0]  ;;  %v11122_v4 = vld [vmem:[#allocation2 + $0xc] ss:$8 sm:$0xf] }
 0x7cc   : > { %13376 = vmatpush1.bf16.msra.mxu0 %v13375_v18  ;;  %9524 = vmatprep.mubr.f32.mxu1 %v14704_v47  ;;  %v10959_v18 = vor.u32 %v10958_v33, %v10957_v53  ;;  %v10848_v60 = vld [vmem:[#allocation2 + $0x81] ss:$8 sm:$0xf0]  ;;  %v10970_v39 = vld [vmem:[#allocation2 + $0xc2] ss:$8 sm:$0xf0] }
 0x7cd   : > { %v8966_v13 = vpop.permute.xlu0 %8965  ;;  %13378 = vmatprep.subr.bf16.mxu0 %v13377_v12  ;;  %12194 = vmatmul.mubr.msk.f32.gmra.mrb[108].mxu0 %vm652_vm3, %v18849_v25  ;;  %v11126_v12 = vld [vmem:[#allocation2 + $0x4c] ss:$8 sm:$0xf]  ;;  %v11252_v33 = vld [vmem:[#allocation2 + $0xcd] ss:$8 sm:$0xf0] }
 0x7ce   : > { %9679 = vmatprep.mubr.f32.mxu0 %v14704_v47  ;;  %v9043_v7 = vsel %vm531_vm2, %v19064_v55, %v8966_v13 }
 0x7cf   : > { %12180 = vmatmul.mubr.msk.f32.vlgmr.msra.gmra.mrb[80].mxu1 %vm652_vm3, %v18765_v43 }
 0x7d0   : > { %v19087_v17 = vpop.permute.xlu1 %14413  ;;  %13380 = vmatpush1.bf16.msra.mxu0 %v13379_v54  ;;  %13356 = vmatpush1.bf16.msra.mxu1 %v18963_v11  ;;  %v11123_v54 = vld [vmem:[#allocation2 + $0xc] ss:$8 sm:$0xf0] }
 0x7d1   : > { %v19092_v45 = vunpack.i.h.bf16 %v19087_v17  ;;  %v14415_v32 = vunpack.i.l.bf16 %v19087_v17  ;;  %v8722_v41 = vpop.permute.xlu0 %8721  ;;  %9530 = vmatprep.mubr.f32.mxu1 %v14704_v47  ;;  %13358 = vmatprep.subr.bf16.mxu1 %v13357_v19  ;;  %v11124_v19 = vor.u32 %v11123_v54, %v11122_v4  ;;  %v11248_v4 = vld [vmem:[#allocation2 + $0x8d] ss:$8 sm:$0xf0] }
 0x7d2   : > { %v8738_v48 = vsel %vm373_vm0, %v14356_v57, %v8722_v41  ;;  %12195 = vmatmul.mubr.msk.f32.gmra.mrb[110].mxu0 %vm652_vm3, %v18854_v24  ;;  %v13361_v57 = vpack.c.bf16 %v9017_v59, %v19026_v37 }
 0x7d3   : > { %v19107_v42 = vsel %vm531_vm2, %v14405_v14, %v14415_v32  ;;  %v14417_v11 = vpack.i.bf16 %v8738_v48, %v18661_v20  ;;  %v19113_v63 = vsel %vm531_vm2, %v19050_v56, %v19092_v45  ;;  %9863 = vmatprep.mubr.f32.mxu0 %v14704_v47  ;;  %12181 = vmatmul.mubr.msk.f32.gmra.mrb[82].mxu1 %vm652_vm3, %v18779_v28  ;;  %v10961_v14 = vld [vmem:[#allocation2 + $0x42] ss:$8 sm:$0xf]  ;;  %v11243_v48 = vld [vmem:[#allocation2 + $0x4d] ss:$8 sm:$0xf] }
 0x7d4   : > { %v13381_v15 = vpack.c.bf16 %v19113_v63, %v19107_v42  ;;  %13360 = vmatpush1.bf16.msra.mxu1 %v13359_v22  ;;  %9536 = vmatprep.mubr.f32.mxu1 %v14704_v47  ;;  %v10963_v55 = vor.u32 %v10962_v6, %v10961_v14  ;;  %v11240_v22 = vld [vmem:[#allocation2 + $0xd] ss:$8 sm:$0xf0]  ;;  %v13391_v52 = vpack.c.bf16 %v19107_v42, %v19070_v9 }
 0x7d5   : > { %v19123_v34 = vpop.permute.xlu1 %8967  ;;  %14418 = vrot.lane.b32.xlu1 %v14417_v11, %s14703_s12  ;;  %13362 = vmatprep.subr.bf16.mxu1 %v13361_v57  ;;  %v11245_v11 = vor.u32 %v11244_v62, %v11243_v48  ;;  %v11409_v57 = vld [vmem:[#allocation2 + $0x57] ss:$8 sm:$0xf0] }
 0x7d6   : > { %v8747_v20 = vpop.permute.xlu0 %8746  ;;  %13382 = vmatprep.subr.bf16.mxu0 %v13381_v15  ;;  %v9044_v35 = vsel %vm531_vm2, %v8966_v13, %v19123_v34  ;;  %v11128_v13 = vor.u32 %v11127_v50, %v11126_v12  ;;  %v11251_v12 = vld [vmem:[#allocation2 + $0xcd] ss:$8 sm:$0xf]  ;;  %v11412_v48 = vld [vmem:[#allocation2 + $0x97] ss:$8 sm:$0xf] }
 0x7d7   : > { %v8748_v46 = vsel %vm322_vm1, %v18737_v0, %v8747_v20  ;;  %13384 = vmatpush1.bf16.msra.mxu0 %v19121_v30  ;;  %12182 = vmatmul.mubr.msk.f32.gmra.mrb[84].mxu1 %vm652_vm3, %v18799_v36 }
 0x7d8   : > { %v14432_v21 = vpack.i.bf16 %v8747_v20, %v8748_v46  ;;  %9815 = vmatprep.subr.mxu0 %v9044_v35  ;;  %13364 = vmatpush1.bf16.msra.mxu1 %v13363_v26  ;;  %v11404_v20 = vld [vmem:[#allocation2 + $0x17] ss:$8 sm:$0xf] }
 0x7d9   : > { %v8744_v8 = vpop.permute.xlu1 %8743  ;;  %9542 = vmatprep.mubr.f32.mxu1 %v14704_v47  ;;  %13366 = vmatprep.subr.bf16.mxu1 %v19046_v1  ;;  %v10840_v1 = vld [vmem:[#allocation2 + $0x1] ss:$8 sm:$0xf0]  ;;  %v11408_v35 = vld [vmem:[#allocation2 + $0x57] ss:$8 sm:$0xf] }
 0x7da   : > { %v8745_v16 = vsel %vm373_vm0, %v8722_v41, %v8744_v8  ;;  %14433 = vrot.lane.b32.xlu0 %v14432_v21, %s14703_s12  ;;  %v8799_v37 = vpop.permute.xlu0 %8798  ;;  %v10841_v40 = vor.u32 %v10840_v1, %v10839_v58  ;;  %v11239_v41 = vld [vmem:[#allocation2 + $0xd] ss:$8 sm:$0xf]  ;;  %v11405_v26 = vld [vmem:[#allocation2 + $0x17] ss:$8 sm:$0xf0]  ;;  %v11410_v46 = vor.u32 %v11409_v57, %v11408_v35 }
 0x7db   : > { %v14427_v0 = vpack.i.bf16 %v18787_v3, %v8745_v16  ;;  %9816 = vmatpush1.msra.mxu0 %v9043_v7  ;;  %12183 = vmatmul.mubr.msk.f32.gmra.mrb[86].mxu1 %vm652_vm3, %v18823_v51  ;;  %v11241_v15 = vor.u32 %v11240_v22, %v11239_v41  ;;  %v11526_v7 = vld [vmem:[#allocation2 + $0x2d0] ss:$8 sm:$0xf0]  ;;  %v11406_v21 = vor.u32 %v11405_v26, %v11404_v20  ;;  %v11135_v58 = vld [vmem:[#allocation2 + $0xcc] ss:$8 sm:$0xf0] }
 0x7dc   : > { %12204 = vmatmul.mubr.msk.f32.vlgmr.msra.gmra.mrb[112].mxu0 %vm652_vm3, %v18765_v43  ;;  %13368 = vmatpush1.bf16.msra.mxu1 %v19041_v2  ;;  %v11521_v8 = vld [vmem:[#allocation2 + $0x290] ss:$8 sm:$0xf]  ;;  %v11130_v1 = vld [vmem:[#allocation2 + $0x8c] ss:$8 sm:$0xf] }
 0x7dd   : > { %v8797_v29 = vpop.permute.xlu1 %8796  ;;  %14428 = vrot.lane.b32.xlu1 %v14427_v0, %s14703_s12  ;;  %v8161_v27 = vpop.f32.mrb[52].mxu0  ;;  %9702 = vmatprep.subr.mxu1 %v9042_v38  ;;  %v11522_v16 = vld [vmem:[#allocation2 + $0x290] ss:$8 sm:$0xf0] }
 0x7de   : > { %v8815_v3 = vsel %vm373_vm0, %v8797_v29, %v8799_v37  ;;  %9548 = vmatprep.mubr.f32.mxu1 %v14704_v47  ;;  %8561 = vst [vmem:[#allocation2 + $0x1a0] sm:$0xff] %v8161_v27  ;;  %v8163_v44 = vpop.f32.mrb[53].mxu0  ;;  %9869 = vmatprep.mubr.f32.mxu0 %v14704_v47  ;;  %v8814_v2 = vsel %vm373_vm0, %v18783_v61, %v8797_v29  ;;  %v10851_v37 = vld [vmem:[#allocation2 + $0xc1] ss:$8 sm:$0xf] }
 0x7df   : > { %8971 = vrot.lane.b32.xlu0 %v8815_v3, %s14703_s12  ;;  %8562 = vst [vmem:[#allocation2 + $0x1a8] sm:$0xff] %v8163_v44  ;;  %12184 = vmatmul.mubr.msk.f32.gmra.mrb[88].mxu1 %vm652_vm3, %v18838_v31  ;;  %v10852_v29 = vld [vmem:[#allocation2 + $0xc1] ss:$8 sm:$0xf0]  ;;  %v11523_v38 = vor.u32 %v11522_v16, %v11521_v8 }
 0x7e0   : > { %12205 = vmatmul.mubr.msk.f32.gmra.mrb[114].mxu0 %vm652_vm3, %v18779_v28  ;;  %9703 = vmatpush1.msra.mxu1 %v9041_v10  ;;  %v10853_v27 = vor.u32 %v10852_v29, %v10851_v37  ;;  %v10969_v3 = vld [vmem:[#allocation2 + $0xc2] ss:$8 sm:$0xf]  ;;  %v11413_v22 = vld [vmem:[#allocation2 + $0x97] ss:$8 sm:$0xf0] }
 0x7e1   : > { %8969 = vrot.lane.b32.xlu1 %v8814_v2, %s14703_s12  ;;  %v8167_v59 = vpop.f32.mrb[54].mxu0  ;;  %9554 = vmatprep.mubr.f32.mxu1 %v14704_v47  ;;  %v10966_v10 = vld [vmem:[#allocation2 + $0x82] ss:$8 sm:$0xf0]  ;;  %v10971_v2 = vor.u32 %v10970_v39, %v10969_v3 }
 0x7e2   : > { %9875 = vmatprep.mubr.f32.mxu0 %v14704_v47  ;;  %8577 = vst [vmem:[#allocation2 + $0x420] sm:$0xff] %v8167_v59  ;;  %v8169_v61 = vpop.f32.mrb[55].mxu0  ;;  %v11131_v59 = vld [vmem:[#allocation2 + $0x8c] ss:$8 sm:$0xf0] }
 0x7e3   : > { %10888 = vrot.lane.b32.xlu0 %v10845_v49, %s14702_s24  ;;  %8578 = vst [vmem:[#allocation2 + $0x428] sm:$0xff] %v8169_v61  ;;  %12185 = vmatmul.mubr.msk.f32.gmra.mrb[90].mxu1 %vm652_vm3, %v18844_v23  ;;  %v11534_v57 = vld [vmem:[#allocation2 + $0x350] ss:$8 sm:$0xf0] }
 0x7e4   : > { %12206 = vmatmul.mubr.msk.f32.gmra.mrb[116].mxu0 %vm652_vm3, %v18799_v36  ;;  %9560 = vmatprep.mubr.f32.mxu1 %v14704_v47  ;;  %v11529_v20 = vld [vmem:[#allocation2 + $0x310] ss:$8 sm:$0xf]  ;;  %v10859_v8 = vld [vmem:[#allocation2 + $0x141] ss:$8 sm:$0xf] }
 0x7e5   : > { %10886 = vrot.lane.b32.xlu1 %v10841_v40, %s14702_s24  ;;  %9881 = vmatprep.mubr.f32.mxu0 %v14704_v47  ;;  %v11533_v35 = vld [vmem:[#allocation2 + $0x350] ss:$8 sm:$0xf]  ;;  %v10973_v37 = vld [vmem:[#allocation2 + $0x102] ss:$8 sm:$0xf] }
 0x7e6   : > { %v11530_v26 = vld [vmem:[#allocation2 + $0x310] ss:$8 sm:$0xf0]  ;;  %v10977_v29 = vld [vmem:[#allocation2 + $0x142] ss:$8 sm:$0xf] }
 0x7e7   : > { %11006 = vrot.lane.b32.xlu0 %v10963_v55, %s14701_s22  ;;  %12186 = vmatmul.mubr.msk.f32.gmra.mrb[92].mxu1 %vm652_vm3, %v18849_v25  ;;  %v11247_v55 = vld [vmem:[#allocation2 + $0x8d] ss:$8 sm:$0xf]  ;;  %v11138_v3 = vld [vmem:[#allocation2 + $0x10c] ss:$8 sm:$0xf] }
 0x7e8   : > { %12207 = vmatmul.mubr.msk.f32.gmra.mrb[118].mxu0 %vm652_vm3, %v18823_v51  ;;  %9566 = vmatprep.mubr.f32.mxu1 %v14704_v47  ;;  %v11249_v41 = vor.u32 %v11248_v4, %v11247_v55  ;;  %v11142_v39 = vld [vmem:[#allocation2 + $0x14c] ss:$8 sm:$0xf] }
 0x7e9   : > { %11004 = vrot.lane.b32.xlu1 %v10959_v18, %s14701_s22  ;;  %9887 = vmatprep.mubr.f32.mxu0 %v14704_v47  ;;  %v11132_v18 = vor.u32 %v11131_v59, %v11130_v1  ;;  %v11256_v1 = vld [vmem:[#allocation2 + $0x10d] ss:$8 sm:$0xf0] }
 0x7eb   : > { %11171 = vrot.lane.b32.xlu0 %v11128_v13, %s14702_s24  ;;  %12187 = vmatmul.mubr.msk.f32.gmra.mrb[94].mxu1 %vm652_vm3, %v18854_v24  ;;  %v11253_v13 = vor.u32 %v11252_v33, %v11251_v12  ;;  %v11421_v33 = vld [vmem:[#allocation2 + $0x117] ss:$8 sm:$0xf0]  ;;  %v11542_v12 = vld [vmem:[#allocation2 + $0x3d0] ss:$8 sm:$0xf0] }
 0x7ec   : > { %12208 = vmatmul.mubr.msk.f32.gmra.mrb[120].mxu0 %vm652_vm3, %v18838_v31  ;;  %9750 = vmatprep.mubr.f32.mxu1 %v14704_v47 }
 0x7ed   : > { %11169 = vrot.lane.b32.xlu1 %v11124_v19, %s14702_s24  ;;  %9893 = vmatprep.mubr.f32.mxu0 %v14704_v47  ;;  %v11417_v19 = vld [vmem:[#allocation2 + $0xd7] ss:$8 sm:$0xf0] }
 0x7ef   : > { %11288 = vrot.lane.b32.xlu0 %v11245_v11, %s14701_s22  ;;  %12196 = vmatmul.mubr.msk.f32.vlgmr.msra.gmra.mrb[96].mxu1 %vm652_vm3, %v18765_v43  ;;  %v11525_v43 = vld [vmem:[#allocation2 + $0x2d0] ss:$8 sm:$0xf] }
 0x7f0   : > { %12209 = vmatmul.mubr.msk.f32.gmra.mrb[122].mxu0 %vm652_vm3, %v18844_v23  ;;  %9756 = vmatprep.mubr.f32.mxu1 %v14704_v47  ;;  %v11527_v0 = vor.u32 %v11526_v7, %v11525_v43  ;;  %v11531_v7 = vor.u32 %v11530_v26, %v11529_v20  ;;  %v10856_v43 = vld [vmem:[#allocation2 + $0x101] ss:$8 sm:$0xf0] }
 0x7f1   : > { %11286 = vrot.lane.b32.xlu1 %v11241_v15, %s14701_s22  ;;  %9899 = vmatprep.mubr.f32.mxu0 %v14704_v47  ;;  %v11414_v15 = vor.u32 %v11413_v22, %v11412_v48  ;;  %v11538_v48 = vld [vmem:[#allocation2 + $0x390] ss:$8 sm:$0xf0] }
 0x7f3   : > { %11453 = vrot.lane.b32.xlu0 %v11410_v46, %s14702_s24  ;;  %12197 = vmatmul.mubr.msk.f32.gmra.mrb[98].mxu1 %vm652_vm3, %v18779_v28  ;;  %v10847_v28 = vld [vmem:[#allocation2 + $0x81] ss:$8 sm:$0xf] }
 0x7f4   : > { %12210 = vmatmul.mubr.msk.f32.gmra.mrb[124].mxu0 %vm652_vm3, %v18849_v25  ;;  %9762 = vmatprep.mubr.f32.mxu1 %v14704_v47  ;;  %v10849_v44 = vor.u32 %v10848_v60, %v10847_v28  ;;  %v10860_v46 = vld [vmem:[#allocation2 + $0x141] ss:$8 sm:$0xf0]  ;;  %v11143_v60 = vld [vmem:[#allocation2 + $0x14c] ss:$8 sm:$0xf0] }
 0x7f5   : > { %11451 = vrot.lane.b32.xlu1 %v11406_v21, %s14702_s24  ;;  %9905 = vmatprep.mubr.f32.mxu0 %v14704_v47  ;;  %v10855_v21 = vld [vmem:[#allocation2 + $0x101] ss:$8 sm:$0xf]  ;;  %v10861_v16 = vor.u32 %v10860_v46, %v10859_v8 }
 0x7f7   : > { %11570 = vrot.lane.b32.xlu0 %v11527_v0, %s14701_s22  ;;  %12198 = vmatmul.mubr.msk.f32.gmra.mrb[100].mxu1 %vm652_vm3, %v18799_v36  ;;  %v10965_v36 = vld [vmem:[#allocation2 + $0x82] ss:$8 sm:$0xf] }
 0x7f8   : > { %12211 = vmatmul.mubr.msk.f32.gmra.mrb[126].mxu0 %vm652_vm3, %v18854_v24  ;;  %9768 = vmatprep.mubr.f32.mxu1 %v14704_v47  ;;  %v10967_v14 = vor.u32 %v10966_v10, %v10965_v36  ;;  %v10978_v0 = vld [vmem:[#allocation2 + $0x142] ss:$8 sm:$0xf0]  ;;  %v11144_v36 = vor.u32 %v11143_v60, %v11142_v39  ;;  %v11260_v10 = vld [vmem:[#allocation2 + $0x14d] ss:$8 sm:$0xf0] }
 0x7f9   : > { %11568 = vrot.lane.b32.xlu1 %v11523_v38, %s14701_s22  ;;  %10217 = vmatprep.mubr.f32.mxu0 %v14704_v47  ;;  %v10974_v38 = vld [vmem:[#allocation2 + $0x102] ss:$8 sm:$0xf0]  ;;  %v10979_v28 = vor.u32 %v10978_v0, %v10977_v29 }
 0x7fb   : > { %10892 = vrot.lane.b32.xlu0 %v10853_v27, %s14702_s24  ;;  %12199 = vmatmul.mubr.msk.f32.gmra.mrb[102].mxu1 %vm652_vm3, %v18823_v51  ;;  %v11134_v51 = vld [vmem:[#allocation2 + $0xcc] ss:$8 sm:$0xf]  ;;  %v10975_v27 = vor.u32 %v10974_v38, %v10973_v37 }
 0x7fc   : > { %9774 = vmatprep.mubr.f32.mxu1 %v14704_v47  ;;  %v8084_v61 = vpop.f32.mrb[48].mxu1  ;;  %v11136_v40 = vor.u32 %v11135_v58, %v11134_v51  ;;  %v11255_v58 = vld [vmem:[#allocation2 + $0x10d] ss:$8 sm:$0xf] }
 0x7fd   : > { %10890 = vrot.lane.b32.xlu1 %v10849_v44, %s14702_s24  ;;  %8559 = vst [vmem:[#allocation2 + $0x190] sm:$0xff] %v8084_v61  ;;  %v8086_v53 = vpop.f32.mrb[49].mxu1  ;;  %v11139_v44 = vld [vmem:[#allocation2 + $0x10c] ss:$8 sm:$0xf0] }
 0x7fe   : > { %v8315_v49 = vpop.f32.mrb[56].mxu0  ;;  %8560 = vst [vmem:[#allocation2 + $0x198] sm:$0xff] %v8086_v53  ;;  %v11425_v51 = vld [vmem:[#allocation2 + $0x157] ss:$8 sm:$0xf0]  ;;  %v11257_v53 = vor.u32 %v11256_v1, %v11255_v58 }
 0x7ff   : > { %11010 = vrot.lane.b32.xlu0 %v10971_v2, %s14701_s22  ;;  %8565 = vst [vmem:[#allocation2 + $0x1c0] sm:$0xff] %v8315_v49  ;;  %v8317_v6 = vpop.f32.mrb[57].mxu0  ;;  %12200 = vmatmul.mubr.msk.f32.gmra.mrb[104].mxu1 %vm652_vm3, %v18838_v31  ;;  %v11140_v2 = vor.u32 %v11139_v44, %v11138_v3  ;;  %v11259_v49 = vld [vmem:[#allocation2 + $0x14d] ss:$8 sm:$0xf] }
 0x800   : > { %8566 = vst [vmem:[#allocation2 + $0x1c8] sm:$0xff] %v8317_v6  ;;  %9780 = vmatprep.mubr.f32.mxu1 %v14704_v47  ;;  %v8090_v54 = vpop.f32.mrb[50].mxu1  ;;  %v11261_v59 = vor.u32 %v11260_v10, %v11259_v49  ;;  %v11420_v61 = vld [vmem:[#allocation2 + $0x117] ss:$8 sm:$0xf] }
 0x801   : > { %11008 = vrot.lane.b32.xlu1 %v10967_v14, %s14701_s22  ;;  %8575 = vst [vmem:[#allocation2 + $0x410] sm:$0xff] %v8090_v54  ;;  %v8092_v62 = vpop.f32.mrb[51].mxu1 }
 0x802   : > { %v8321_v50 = vpop.f32.mrb[58].mxu0  ;;  %8576 = vst [vmem:[#allocation2 + $0x418] sm:$0xff] %v8092_v62  ;;  %v11537_v62 = vld [vmem:[#allocation2 + $0x390] ss:$8 sm:$0xf] }
 0x803   : > { %11175 = vrot.lane.b32.xlu0 %v11136_v40, %s14702_s24  ;;  %8581 = vst [vmem:[#allocation2 + $0x440] sm:$0xff] %v8321_v50  ;;  %v8323_v31 = vpop.f32.mrb[59].mxu0  ;;  %12201 = vmatmul.mubr.msk.f32.gmra.mrb[106].mxu1 %vm652_vm3, %v18844_v23  ;;  %v11416_v23 = vld [vmem:[#allocation2 + $0xd7] ss:$8 sm:$0xf] }
 0x804   : > { %8582 = vst [vmem:[#allocation2 + $0x448] sm:$0xff] %v8323_v31  ;;  %9786 = vmatprep.mubr.f32.mxu1 %v14704_v47  ;;  %v11418_v11 = vor.u32 %v11417_v19, %v11416_v23  ;;  %v11424_v50 = vld [vmem:[#allocation2 + $0x157] ss:$8 sm:$0xf] }
 0x805   : > { %11173 = vrot.lane.b32.xlu1 %v11132_v18, %s14702_s24  ;;  %v11426_v4 = vor.u32 %v11425_v51, %v11424_v50  ;;  %v10863_v22 = vld [vmem:[#allocation2 + $0x181] ss:$8 sm:$0xf]  ;;  %v10981_v20 = vld [vmem:[#allocation2 + $0x182] ss:$8 sm:$0xf] }
 0x806   : > { %v11428_v29 = vld [vmem:[#allocation2 + $0x197] ss:$8 sm:$0xf] }
 0x807   : > { %11292 = vrot.lane.b32.xlu0 %v11253_v13, %s14701_s22  ;;  %12202 = vmatmul.mubr.msk.f32.gmra.mrb[108].mxu1 %vm652_vm3, %v18849_v25  ;;  %v11535_v25 = vor.u32 %v11534_v57, %v11533_v35  ;;  %v11422_v13 = vor.u32 %v11421_v33, %v11420_v61  ;;  %v11539_v57 = vor.u32 %v11538_v48, %v11537_v62 }
 0x808   : > { %9792 = vmatprep.mubr.f32.mxu1 %v14704_v47 }
 0x809   : > { %11290 = vrot.lane.b32.xlu1 %v11249_v41, %s14701_s22  ;;  %v11541_v41 = vld [vmem:[#allocation2 + $0x3d0] ss:$8 sm:$0xf] }
 0x80a   : > { %v11543_v23 = vor.u32 %v11542_v12, %v11541_v41  ;;  %v11545_v58 = vld [vmem:[#allocation2 + $0x410] ss:$8 sm:$0xf] }
 0x80b   : > { %11457 = vrot.lane.b32.xlu0 %v11418_v11, %s14702_s24  ;;  %12203 = vmatmul.mubr.msk.f32.gmra.mrb[110].mxu1 %vm652_vm3, %v18854_v24  ;;  %v10857_v24 = vor.u32 %v10856_v43, %v10855_v21  ;;  %v11263_v43 = vld [vmem:[#allocation2 + $0x18d] ss:$8 sm:$0xf] }
 0x80c   : > { %9976 = vmatprep.mubr.f32.mxu1 %v14704_v47 }
 0x80d   : > { %11455 = vrot.lane.b32.xlu1 %v11414_v15, %s14702_s24 }
 0x80f   : > { %11574 = vrot.lane.b32.xlu0 %v11535_v25, %s14701_s22  ;;  %v11146_v25 = vld [vmem:[#allocation2 + $0x18c] ss:$8 sm:$0xf] }
 0x811   : > { %11572 = vrot.lane.b32.xlu1 %v11531_v7, %s14701_s22 }
 0x813   : > { %10896 = vrot.lane.b32.xlu0 %v10861_v16, %s14702_s24 }
 0x815   : > { %10894 = vrot.lane.b32.xlu1 %v10857_v24, %s14702_s24 }
 0x817   : > { %11014 = vrot.lane.b32.xlu0 %v10979_v28, %s14701_s22 }
 0x819   : > { %11012 = vrot.lane.b32.xlu1 %v10975_v27, %s14701_s22 }
 0x81b   : > { %11179 = vrot.lane.b32.xlu0 %v11144_v36, %s14702_s24 }
 0x81c   : > { %v8238_v14 = vpop.f32.mrb[52].mxu1 }
 0x81d   : > { %11177 = vrot.lane.b32.xlu1 %v11140_v2, %s14702_s24  ;;  %8563 = vst [vmem:[#allocation2 + $0x1b0] sm:$0xff] %v8238_v14  ;;  %v8240_v6 = vpop.f32.mrb[53].mxu1 }
 0x81e   : > { %8564 = vst [vmem:[#allocation2 + $0x1b8] sm:$0xff] %v8240_v6  ;;  %v8469_v40 = vpop.f32.mrb[60].mxu0 }
 0x81f   : > { %11296 = vrot.lane.b32.xlu0 %v11261_v59, %s14701_s22  ;;  %8569 = vst [vmem:[#allocation2 + $0x1e0] sm:$0xff] %v8469_v40  ;;  %v8471_v55 = vpop.f32.mrb[61].mxu0 }
 0x820   : > { %v8244_v18 = vpop.f32.mrb[54].mxu1  ;;  %8570 = vst [vmem:[#allocation2 + $0x1e8] sm:$0xff] %v8471_v55 }
 0x821   : > { %11294 = vrot.lane.b32.xlu1 %v11257_v53, %s14701_s22  ;;  %8579 = vst [vmem:[#allocation2 + $0x430] sm:$0xff] %v8244_v18  ;;  %v8246_v31 = vpop.f32.mrb[55].mxu1 }
 0x822   : > { %8580 = vst [vmem:[#allocation2 + $0x438] sm:$0xff] %v8246_v31  ;;  %v8475_v54 = vpop.f32.mrb[62].mxu0 }
 0x823   : > { %11461 = vrot.lane.b32.xlu0 %v11426_v4, %s14702_s24  ;;  %8585 = vst [vmem:[#allocation2 + $0x460] sm:$0xff] %v8475_v54  ;;  %v8477_v19 = vpop.f32.mrb[63].mxu0 }
 0x824   : > { %8586 = vst [vmem:[#allocation2 + $0x468] sm:$0xff] %v8477_v19  ;;  %v14424_v19 = vpop.permute.xlu0 %14423 }
 0x825   : > { %11459 = vrot.lane.b32.xlu1 %v11422_v13, %s14702_s24  ;;  %v10864_v11 = vld [vmem:[#allocation2 + $0x181] ss:$8 sm:$0xf0]  ;;  %v10982_v35 = vld [vmem:[#allocation2 + $0x182] ss:$8 sm:$0xf0] }
 0x826   : > { %v10865_v15 = vor.u32 %v10864_v11, %v10863_v22  ;;  %v10983_v26 = vor.u32 %v10982_v35, %v10981_v20  ;;  %v11147_v46 = vld [vmem:[#allocation2 + $0x18c] ss:$8 sm:$0xf0]  ;;  %v11264_v0 = vld [vmem:[#allocation2 + $0x18d] ss:$8 sm:$0xf0] }
 0x827   : > { %11578 = vrot.lane.b32.xlu0 %v11543_v23, %s14701_s22  ;;  %v11148_v21 = vor.u32 %v11147_v46, %v11146_v25  ;;  %v11429_v60 = vld [vmem:[#allocation2 + $0x197] ss:$8 sm:$0xf0]  ;;  %v11265_v3 = vor.u32 %v11264_v0, %v11263_v43 }
 0x828   : > { %v11430_v10 = vor.u32 %v11429_v60, %v11428_v29 }
 0x829   : > { %11576 = vrot.lane.b32.xlu1 %v11539_v57, %s14701_s22  ;;  %v11546_v1 = vld [vmem:[#allocation2 + $0x410] ss:$8 sm:$0xf0]  ;;  %v14425_v57 = vunpack.i.l.bf16 %v14424_v19 }
 0x82a   : > { %v11547_v61 = vor.u32 %v11546_v1, %v11545_v58 }
 0x82d   : > { %10898 = vrot.lane.b32.xlu1 %v10865_v15, %s14702_s24 }
 0x830   : > { %v9187_v7 = vpop.f32.mrb[64].mxu0 }
 0x831   : > { %11016 = vrot.lane.b32.xlu1 %v10983_v26, %s14701_s22  ;;  %v9189_v8 = vpop.f32.mrb[65].mxu0  ;;  %v10025_v16 = vmax.f32 %v9187_v7, 0.0 }
 0x832   : > { %v10026_v24 = vmax.f32 %v9189_v8, 0.0 }
 0x834   : > { %v9193_v37 = vpop.f32.mrb[66].mxu0 }
 0x835   : > { %11181 = vrot.lane.b32.xlu1 %v11148_v21, %s14702_s24  ;;  %v10041_v38 = vmax.f32 %v9193_v37, 0.0  ;;  %v9195_v28 = vpop.f32.mrb[67].mxu0 }
 0x836   : > { %v10042_v27 = vmax.f32 %v9195_v28, 0.0 }
 0x837   : > { %v13403_v39 = vpack.c.bf16 %v10041_v38, %v10025_v16  ;;  %v14426_v38 = vunpack.i.h.bf16 %v14424_v19 }
 0x838   : > { %v13401_v44 = vpack.c.bf16 %v10042_v27, %v10026_v24  ;;  %v9199_v36 = vpop.f32.mrb[68].mxu0  ;;  %v9021_v24 = vsel %vm531_vm2, %v14415_v32, %v14425_v57 }
 0x839   : > { %11298 = vrot.lane.b32.xlu1 %v11265_v3, %s14701_s22  ;;  %v9201_v2 = vpop.f32.mrb[69].mxu0  ;;  %v10057_v49 = vmax.f32 %v9199_v36, 0.0 }
 0x83a   : > { %13402 = vmatprep.subr.bf16.mxu0 %v13401_v44  ;;  %v10058_v59 = vmax.f32 %v9201_v2, 0.0  ;;  %v9024_v2 = vsel %vm531_vm2, %v19092_v45, %v14426_v38 }
 0x83b   : > { %13404 = vmatpush1.bf16.msra.mxu0 %v13403_v39  ;;  %v8392_v14 = vpop.f32.mrb[56].mxu1 }
 0x83c   : > { %v9205_v6 = vpop.f32.mrb[70].mxu0  ;;  %8567 = vst [vmem:[#allocation2 + $0x1d0] sm:$0xff] %v8392_v14  ;;  %v8394_v51 = vpop.f32.mrb[57].mxu1 }
 0x83d   : > { %11463 = vrot.lane.b32.xlu1 %v11430_v10, %s14702_s24  ;;  %v10073_v40 = vmax.f32 %v9205_v6, 0.0  ;;  %v9207_v53 = vpop.f32.mrb[71].mxu0  ;;  %8568 = vst [vmem:[#allocation2 + $0x1d8] sm:$0xff] %v8394_v51 }
 0x83e   : > { %v10074_v33 = vmax.f32 %v9207_v53, 0.0 }
 0x83f   : > { %v13407_v55 = vpack.c.bf16 %v10073_v40, %v10057_v49  ;;  %v8398_v50 = vpop.f32.mrb[58].mxu1 }
 0x840   : > { %v13405_v18 = vpack.c.bf16 %v10074_v33, %v10058_v59  ;;  %v9211_v4 = vpop.f32.mrb[72].mxu0  ;;  %8583 = vst [vmem:[#allocation2 + $0x450] sm:$0xff] %v8398_v50  ;;  %v8400_v31 = vpop.f32.mrb[59].mxu1 }
 0x841   : > { %11580 = vrot.lane.b32.xlu1 %v11547_v61, %s14701_s22  ;;  %v9213_v12 = vpop.f32.mrb[73].mxu0  ;;  %8584 = vst [vmem:[#allocation2 + $0x458] sm:$0xff] %v8400_v31  ;;  %v10089_v54 = vmax.f32 %v9211_v4, 0.0  ;;  %v10801_v31 = vld [vmem:[#allocation2] ss:$8 sm:$0xf] }
 0x842   : > { %13406 = vmatprep.subr.bf16.mxu0 %v13405_v18  ;;  %v10090_v13 = vmax.f32 %v9213_v12, 0.0 }
 0x843   : > { %13408 = vmatpush1.bf16.msra.mxu0 %v13407_v55  ;;  %v19282_v55 = vld [vmem:[#allocation9] sm:$0xff] }
 0x844   : > { %v9217_v62 = vpop.f32.mrb[74].mxu0 }
 0x845   : > { %v10105_v41 = vmax.f32 %v9217_v62, 0.0  ;;  %v9219_v48 = vpop.f32.mrb[75].mxu0  ;;  %v10802_v62 = vld [vmem:[#allocation2] ss:$8 sm:$0xf0] }
 0x846   : > { %v10106_v23 = vmax.f32 %v9219_v48, 0.0 }
 0x847   : > { %v14419_v22 = vpop.permute.xlu1 %14418  ;;  %v13411_v11 = vpack.c.bf16 %v10105_v41, %v10089_v54 }
 0x848   : > { %v14421_v15 = vunpack.i.h.bf16 %v14419_v22  ;;  %v14420_v20 = vunpack.i.l.bf16 %v14419_v22  ;;  %v13409_v35 = vpack.c.bf16 %v10106_v23, %v10090_v13  ;;  %v9223_v26 = vpop.f32.mrb[76].mxu0  ;;  %v19293_v23 = vld [vmem:[#allocation9 + $0x8] sm:$0xff] }
 0x849   : > { %v9225_v25 = vpop.f32.mrb[77].mxu0  ;;  %v10121_v21 = vmax.f32 %v9223_v26, 0.0  ;;  %v10803_v26 = vor.u32 %v10802_v62, %v10801_v31  ;;  %v14530_v31 = vld [vmem:[#allocation7 + $0x10] sm:$0xff] }
 0x84a   : > { %v9004_v46 = vsel %vm531_vm2, %v19050_v56, %v14420_v20  ;;  %13410 = vmatprep.subr.bf16.mxu0 %v13409_v35  ;;  %v9020_v7 = vsel %vm531_vm2, %v14411_v5, %v14421_v15  ;;  %v10122_v43 = vmax.f32 %v9225_v25, 0.0  ;;  %v11075_v20 = vld [vmem:[#allocation2 + $0xb] ss:$8 sm:$0xf0] }
 0x84b   : > { %v13385_v8 = vpack.c.bf16 %v9004_v46, %v19107_v42  ;;  %13412 = vmatpush1.bf16.msra.mxu0 %v13411_v11  ;;  %v13389_v56 = vpack.c.bf16 %v9021_v24, %v9020_v7  ;;  %v13395_v49 = vpack.c.bf16 %v9020_v7, %v19113_v63  ;;  %v11074_v11 = vld [vmem:[#allocation2 + $0xb] ss:$8 sm:$0xf] }
 0x84c   : > { %v14434_v16 = vpop.permute.xlu0 %14433  ;;  %v9229_v0 = vpop.f32.mrb[78].mxu0 }
 0x84d   : > { %v10137_v37 = vmax.f32 %v9229_v0, 0.0  ;;  %v9231_v29 = vpop.f32.mrb[79].mxu0  ;;  %13386 = vmatprep.subr.bf16.mxu1 %v13385_v8  ;;  %v14436_v5 = vunpack.i.h.bf16 %v14434_v16  ;;  %v14435_v3 = vunpack.i.l.bf16 %v14434_v16 }
 0x84e   : > { %v10138_v28 = vmax.f32 %v9231_v29, 0.0  ;;  %13388 = vmatpush1.bf16.msra.mxu1 %v19121_v30 }
 0x84f   : > { %v13415_v60 = vpack.c.bf16 %v10137_v37, %v10121_v21  ;;  %v14429_v27 = vpop.permute.xlu1 %14428  ;;  %13390 = vmatprep.subr.bf16.mxu1 %v13389_v56  ;;  %v9030_v14 = vsel %vm531_vm2, %v14435_v3, %v14436_v5  ;;  %v9029_v51 = vsel %vm531_vm2, %v19092_v45, %v14435_v3 }
 0x850   : > { %v13413_v39 = vpack.c.bf16 %v10138_v28, %v10122_v43  ;;  %v14431_v17 = vunpack.i.h.bf16 %v14429_v27  ;;  %v14430_v44 = vunpack.i.l.bf16 %v14429_v27  ;;  %v9413_v32 = vpop.f32.mrb[80].mxu0  ;;  %v13399_v45 = vpack.c.bf16 %v9029_v51, %v9021_v24 }
 0x851   : > { %v8972_v36 = vpop.permute.xlu0 %8971  ;;  %v9415_v10 = vpop.f32.mrb[81].mxu0  ;;  %v10029_v1 = vmax.f32 %v9413_v32, 0.0  ;;  %v11076_v28 = vor.u32 %v11075_v20, %v11074_v11 }
 0x852   : > { %13414 = vmatprep.subr.bf16.mxu0 %v13413_v39  ;;  %13392 = vmatpush1.bf16.msra.mxu1 %v13391_v52  ;;  %v9026_v30 = vsel %vm531_vm2, %v14421_v15, %v14430_v44  ;;  %v9027_v9 = vsel %vm531_vm2, %v14425_v57, %v14431_v17  ;;  %v10030_v59 = vmax.f32 %v9415_v10, 0.0  ;;  %v14528_v52 = vld [vmem:[#allocation7] sm:$0xff] }
 0x853   : > { %13416 = vmatpush1.bf16.msra.mxu0 %v13415_v60  ;;  %v8970_v42 = vpop.permute.xlu1 %8969  ;;  %v13393_v58 = vpack.c.bf16 %v9026_v30, %v9024_v2  ;;  %v13397_v40 = vpack.c.bf16 %v9030_v14, %v9027_v9  ;;  %v11356_v10 = vld [vmem:[#allocation2 + $0x16] ss:$8 sm:$0xf] }
 0x854   : > { %v9419_v6 = vpop.f32.mrb[82].mxu0  ;;  %v9046_v22 = vsel %vm531_vm2, %v8970_v42, %v8972_v36  ;;  %v9045_v8 = vsel %vm531_vm2, %v19123_v34, %v8970_v42  ;;  %v11357_v9 = vld [vmem:[#allocation2 + $0x16] ss:$8 sm:$0xf0] }
 0x855   : > { %13394 = vmatprep.subr.bf16.mxu1 %v13393_v58  ;;  %v19280_v61 = vpop.permute.xlu0 %10888  ;;  %v10045_v53 = vmax.f32 %v9419_v6, 0.0  ;;  %v9421_v33 = vpop.f32.mrb[83].mxu0  ;;  %v14529_v42 = vld [vmem:[#allocation7 + $0x8] sm:$0xff] }
 0x856   : > { %12220 = vmatmul.mubr.msk.f32.vlgmr.msra.gmra.mrb[128].mxu0 %vm1709_vm4, %v19282_v55  ;;  %13396 = vmatpush1.bf16.msra.mxu1 %v13395_v49  ;;  %v10046_v63 = vmax.f32 %v9421_v33, 0.0  ;;  %v10907_v4 = vrot.slane %v19280_v61, 1 }
 0x857   : > { %13398 = vmatprep.subr.bf16.mxu1 %v13397_v40  ;;  %v10887_v50 = vpop.permute.xlu1 %10886  ;;  %10223 = vmatprep.mubr.f32.mxu0 %v14704_v47  ;;  %v13435_v18 = vpack.c.bf16 %v10045_v53, %v10029_v1 }
 0x858   : > { %v10906_v12 = vrot.slane %v10887_v50, 1  ;;  %v13433_v54 = vpack.c.bf16 %v10046_v63, %v10030_v59  ;;  %v9425_v13 = vpop.f32.mrb[84].mxu0 }
 0x859   : > { %v19288_v19 = vpop.permute.xlu0 %11006  ;;  %v9427_v41 = vpop.f32.mrb[85].mxu0  ;;  %v10061_v35 = vmax.f32 %v9425_v13, 0.0 }
 0x85a   : > { %v10917_v48 = vsel %vm10916_vm5, %v10906_v12, %v10907_v4  ;;  %12221 = vmatmul.mubr.msk.f32.gmra.mrb[130].mxu0 %vm1709_vm4, %v19293_v23  ;;  %13400 = vmatpush1.bf16.msra.mxu1 %v13399_v45  ;;  %v11025_v25 = vrot.slane %v19288_v19, 1  ;;  %v10062_v7 = vmax.f32 %v9427_v41, 0.0  ;;  %v11358_v45 = vor.u32 %v11357_v9, %v11356_v10 }
 0x85b   : > { %v10918_v57 = vsel %vm322_vm1, %v10887_v50, %v10917_v48  ;;  %9928 = vmatprep.subr.mxu1 %v9046_v22  ;;  %v11005_v15 = vpop.permute.xlu1 %11004  ;;  %13434 = vmatprep.subr.bf16.mxu0 %v13433_v54 }
 0x85c   : > { %v11024_v46 = vrot.slane %v11005_v15, 1  ;;  %13436 = vmatpush1.bf16.msra.mxu0 %v13435_v18  ;;  %v9431_v21 = vpop.f32.mrb[86].mxu0  ;;  %10371 = vmatprep.mubr.f32.mxu0 %v14704_v47  ;;  %v10946_v24 = vadd.f32 %v10918_v57, %v10803_v26  ;;  %v14531_v26 = vld [vmem:[#allocation7 + $0x18] sm:$0xff] }
 0x85d   : > { %v19303_v43 = vpop.permute.xlu0 %11171  ;;  %v10077_v16 = vmax.f32 %v9431_v21, 0.0  ;;  %v9433_v0 = vpop.f32.mrb[87].mxu0 }
 0x85e   : > { %v11034_v37 = vsel %vm10916_vm5, %v11024_v46, %v11025_v25  ;;  %9929 = vmatpush1.msra.mxu1 %v9045_v8  ;;  %v10078_v29 = vmax.f32 %v9433_v0, 0.0  ;;  %v11190_v60 = vrot.slane %v19303_v43, 1 }
 0x85f   : > { %v11035_v56 = vsel %vm373_vm0, %v11005_v15, %v11034_v37  ;;  %v11170_v38 = vpop.permute.xlu1 %11169  ;;  %12212 = vmatmul.mubr.msk.f32.vlgmr.msra.gmra.mrb[112].mxu1 %vm652_vm3, %v14528_v52  ;;  %v13439_v5 = vpack.c.bf16 %v10077_v16, %v10061_v35 }
 0x860   : > { %v11063_v34 = vadd.f32 %v11035_v56, %v10946_v24  ;;  %v11189_v27 = vrot.slane %v11170_v38, 1  ;;  %9982 = vmatprep.mubr.f32.mxu1 %v14704_v47  ;;  %v13437_v3 = vpack.c.bf16 %v10078_v29, %v10062_v7  ;;  %v9437_v39 = vpop.f32.mrb[88].mxu0 }
 0x861   : > { %v19312_v17 = vpop.permute.xlu0 %11288  ;;  %v9439_v44 = vpop.f32.mrb[89].mxu0  ;;  %v10093_v58 = vmax.f32 %v9437_v39, 0.0 }
 0x862   : > { %v11111_v32 = vadd.f32 %v11076_v28, %v11063_v34  ;;  %v11199_v36 = vsel %vm10916_vm5, %v11189_v27, %v11190_v60  ;;  %13438 = vmatprep.subr.bf16.mxu0 %v13437_v3  ;;  %v11307_v1 = vrot.slane %v19312_v17, 1  ;;  %v10094_v14 = vmax.f32 %v9439_v44, 0.0  ;;  %v10806_v34 = vld [vmem:[#allocation2 + $0x40] ss:$8 sm:$0xf0] }
 0x863   : > { %v11200_v2 = vsel %vm322_vm1, %v11170_v38, %v11199_v36  ;;  %v11287_v30 = vpop.permute.xlu1 %11286  ;;  %12213 = vmatmul.mubr.msk.f32.gmra.mrb[114].mxu1 %vm652_vm3, %v14529_v42  ;;  %13440 = vmatpush1.bf16.msra.mxu0 %v13439_v5  ;;  %v19347_v28 = vstv %s19327_s25  ;;  %v10805_v5 = vld [vmem:[#allocation2 + $0x40] ss:$8 sm:$0xf] }
 0x864   : > { %v11306_v49 = vrot.slane %v11287_v30, 1  ;;  %9988 = vmatprep.mubr.f32.mxu1 %v14704_v47  ;;  %v9443_v59 = vpop.f32.mrb[90].mxu0  ;;  %v11228_v53 = vadd.f32 %v11200_v2, %v11111_v32  ;;  %v14532_v3 = vld [vmem:[#allocation7 + $0x20] sm:$0xff] }
 0x865   : > { %v19321_v6 = vpop.permute.xlu0 %11453  ;;  %v10109_v51 = vmax.f32 %v9443_v59, 0.0  ;;  %v9445_v40 = vpop.f32.mrb[91].mxu0  ;;  %v10809_v36 = vld [vmem:[#allocation2 + $0x80] ss:$8 sm:$0xf] }
 0x866   : > { %v11316_v33 = vsel %vm10916_vm5, %v11306_v49, %v11307_v1  ;;  %v10110_v63 = vmax.f32 %v9445_v40, 0.0  ;;  %v11472_v13 = vrot.slane %v19321_v6, 1  ;;  %v11079_v40 = vld [vmem:[#allocation2 + $0x4b] ss:$8 sm:$0xf0] }
 0x867   : > { %v11317_v50 = vsel %vm373_vm0, %v11287_v30, %v11316_v33  ;;  %v11452_v18 = vpop.permute.xlu1 %11451  ;;  %12214 = vmatmul.mubr.msk.f32.gmra.mrb[116].mxu1 %vm652_vm3, %v14530_v31  ;;  %v13443_v12 = vpack.c.bf16 %v10109_v51, %v10093_v58  ;;  %v10810_v30 = vld [vmem:[#allocation2 + $0x80] ss:$8 sm:$0xf0]  ;;  %v11078_v51 = vld [vmem:[#allocation2 + $0x4b] ss:$8 sm:$0xf] }
 0x868   : > { %v11345_v54 = vadd.f32 %v11317_v50, %v11228_v53  ;;  %v11471_v62 = vrot.slane %v11452_v18, 1  ;;  %9994 = vmatprep.mubr.f32.mxu1 %v14704_v47  ;;  %v13441_v41 = vpack.c.bf16 %v10110_v63, %v10094_v14  ;;  %v9449_v48 = vpop.f32.mrb[92].mxu0  ;;  %v10807_v53 = vor.u32 %v10806_v34, %v10805_v5 }
 0x869   : > { %v19332_v22 = vpop.permute.xlu0 %11570  ;;  %v9451_v11 = vpop.f32.mrb[93].mxu0  ;;  %v10125_v46 = vmax.f32 %v9449_v48, 0.0 }
 0x86a   : > { %v11393_v57 = vadd.f32 %v11358_v45, %v11345_v54  ;;  %v11481_v15 = vsel %vm10916_vm5, %v11471_v62, %v11472_v13  ;;  %13442 = vmatprep.subr.bf16.mxu0 %v13441_v41  ;;  %v11589_v7 = vrot.slane %v19332_v22, 1  ;;  %v10126_v8 = vmax.f32 %v9451_v11, 0.0  ;;  %v11083_v45 = vld [vmem:[#allocation2 + $0x8b] ss:$8 sm:$0xf0] }
 0x86b   : > { %v11482_v20 = vsel %vm322_vm1, %v11452_v18, %v11481_v15  ;;  %v11569_v35 = vpop.permute.xlu1 %11568  ;;  %12215 = vmatmul.mubr.msk.f32.gmra.mrb[118].mxu1 %vm652_vm3, %v14531_v26  ;;  %13444 = vmatpush1.bf16.msra.mxu0 %v13443_v12  ;;  %v11082_v18 = vld [vmem:[#allocation2 + $0x8b] ss:$8 sm:$0xf]  ;;  %v10811_v12 = vor.u32 %v10810_v30, %v10809_v36  ;;  %v11364_v30 = vld [vmem:[#allocation2 + $0x96] ss:$8 sm:$0xf] }
 0x86c   : > { %v11588_v21 = vrot.slane %v11569_v35, 1  ;;  %10000 = vmatprep.mubr.f32.mxu1 %v14704_v47  ;;  %v9455_v16 = vpop.f32.mrb[94].mxu0  ;;  %v11510_v29 = vadd.f32 %v11482_v20, %v11393_v57 }
 0x86d   : > { %v19341_v0 = vpop.permute.xlu0 %10892  ;;  %v10141_v24 = vmax.f32 %v9455_v16, 0.0  ;;  %v9457_v37 = vpop.f32.mrb[95].mxu0  ;;  %v14534_v16 = vld [vmem:[#allocation7 + $0x30] sm:$0xff] }
 0x86e   : > { %v11598_v56 = vsel %vm10916_vm5, %v11588_v21, %v11589_v7  ;;  %v10142_v38 = vmax.f32 %v9457_v37, 0.0  ;;  %v10909_v32 = vrot.slane %v19341_v0, 1 }
 0x86f   : > { %v11599_v52 = vsel %vm373_vm0, %v11569_v35, %v11598_v56  ;;  %v10891_v27 = vpop.permute.xlu1 %10890  ;;  %12216 = vmatmul.mubr.msk.f32.gmra.mrb[120].mxu1 %vm652_vm3, %v14532_v3  ;;  %v13447_v39 = vpack.c.bf16 %v10141_v24, %v10125_v46 }
 0x870   : > { %v11627_v44 = vadd.f32 %v11599_v52, %v11510_v29  ;;  %v10908_v10 = vrot.slane %v10891_v27, 1  ;;  %10006 = vmatprep.mubr.f32.mxu1 %v14704_v47  ;;  %v13445_v2 = vpack.c.bf16 %v10142_v38, %v10126_v8  ;;  %v8546_v9 = vpop.f32.mrb[60].mxu1  ;;  %v11084_v8 = vor.u32 %v11083_v45, %v11082_v18 }
 0x871   : > { %v19353_v42 = vpop.permute.xlu0 %11010  ;;  %8571 = vst [vmem:[#allocation2 + $0x1f0] sm:$0xff] %v8546_v9  ;;  %v8548_v59 = vpop.f32.mrb[61].mxu1  ;;  %v11365_v9 = vld [vmem:[#allocation2 + $0x96] ss:$8 sm:$0xf0] }
 0x872   : > { %v11639_v58 = vadd.f32 %v19347_v28, %v11627_v44  ;;  %v10919_v49 = vsel %vm10916_vm5, %v10907_v4, %v10908_v10  ;;  %v10921_v14 = vsel %vm10916_vm5, %v10908_v10, %v10909_v32  ;;  %13446 = vmatprep.subr.bf16.mxu0 %v13445_v2  ;;  %8572 = vst [vmem:[#allocation2 + $0x1f8] sm:$0xff] %v8548_v59  ;;  %v14533_v4 = vld [vmem:[#allocation7 + $0x28] sm:$0xff]  ;;  %v11027_v54 = vrot.slane %v19353_v42, 1 }
 0x873   : > { %v10920_v33 = vsel %vm322_vm1, %v19280_v61, %v10919_v49  ;;  %v10922_v63 = vsel %vm322_vm1, %v10891_v27, %v10921_v14  ;;  %v11009_v50 = vpop.permute.xlu1 %11008  ;;  %12217 = vmatmul.mubr.msk.f32.gmra.mrb[122].mxu1 %vm652_vm3, %v14533_v4  ;;  %13448 = vmatpush1.bf16.msra.mxu0 %v13447_v39  ;;  %v11080_v61 = vor.u32 %v11079_v40, %v11078_v51  ;;  %v10867_v27 = vld [vmem:[#allocation2 + $0x1c1] ss:$8 sm:$0xf]  ;;  %v11360_v39 = vld [vmem:[#allocation2 + $0x56] ss:$8 sm:$0xf] }
 0x874   : > { %v12236_v31 = vmul.f32 -1.442695, %v11639_v58  ;;  %v11026_v62 = vrot.slane %v11009_v50, 1  ;;  %10012 = vmatprep.mubr.f32.mxu1 %v14704_v47  ;;  %v10947_v41 = vadd.f32 %v10920_v33, %v10807_v53  ;;  %v8552_v11 = vpop.f32.mrb[62].mxu1  ;;  %v10948_v57 = vadd.f32 %v10922_v63, %v10811_v12 }
 0x875   : > { %v19368_v48 = vpop.permute.xlu0 %11175  ;;  %8587 = vst [vmem:[#allocation2 + $0x470] sm:$0xff] %v8552_v11  ;;  %v8554_v35 = vpop.f32.mrb[63].mxu1  ;;  %v10985_v63 = vld [vmem:[#allocation2 + $0x1c2] ss:$8 sm:$0xf]  ;;  %v11366_v4 = vor.u32 %v11365_v9, %v11364_v30 }
 0x876   : > { %14437 = vpow2.f32 %v12236_v31  ;;  %v11036_v15 = vsel %vm10916_vm5, %v11025_v25, %v11026_v62  ;;  %v11038_v20 = vsel %vm10916_vm5, %v11026_v62, %v11027_v54  ;;  %12224 = vmatmul.mubr.msk.f32.vlgmr.msra.gmra.mrb[132].mxu0 %vm1709_vm4, %v19282_v55  ;;  %8588 = vst [vmem:[#allocation2 + $0x478] sm:$0xff] %v8554_v35  ;;  %v11192_v37 = vrot.slane %v19368_v48, 1  ;;  %v19424_v35 = vld [vmem:[#allocation2 + $0xd6] ss:$8 sm:$0xf0] }
 0x877   : > { %v11037_v26 = vsel %vm373_vm0, %v19288_v19, %v11036_v15  ;;  %v11039_v46 = vsel %vm373_vm0, %v11009_v50, %v11038_v20  ;;  %v11174_v21 = vpop.permute.xlu1 %11173  ;;  %12218 = vmatmul.mubr.msk.f32.gmra.mrb[124].mxu1 %vm652_vm3, %v14534_v16  ;;  %10377 = vmatprep.mubr.f32.mxu0 %v14704_v47  ;;  %v11361_v19 = vld [vmem:[#allocation2 + $0x56] ss:$8 sm:$0xf0]  ;;  %v19419_v15 = vld [vmem:[#allocation2 + $0xcb] ss:$8 sm:$0xf0] }
 0x878   : > { %v11064_v25 = vadd.f32 %v11037_v26, %v10947_v41  ;;  %v11065_v24 = vadd.f32 %v11039_v46, %v10948_v57  ;;  %v11191_v29 = vrot.slane %v11174_v21, 1  ;;  %10018 = vmatprep.mubr.f32.mxu1 %v14704_v47  ;;  %v11362_v59 = vor.u32 %v11361_v19, %v11360_v39  ;;  %v19417_v57 = vld [vmem:[#allocation2 + $0xc0] ss:$8 sm:$0xf0] }
 0x879   : > { %v19385_v56 = vpop.permute.xlu0 %11292  ;;  %v10868_v3 = vld [vmem:[#allocation2 + $0x1c1] ss:$8 sm:$0xf0]  ;;  %v10986_v14 = vld [vmem:[#allocation2 + $0x1c2] ss:$8 sm:$0xf0] }
 0x87a   : > { %v11112_v38 = vadd.f32 %v11080_v61, %v11064_v25  ;;  %v11113_v52 = vadd.f32 %v11084_v8, %v11065_v24  ;;  %v11201_v5 = vsel %vm10916_vm5, %v11190_v60, %v11191_v29  ;;  %v11203_v34 = vsel %vm10916_vm5, %v11191_v29, %v11192_v37  ;;  %12225 = vmatmul.mubr.msk.f32.gmra.mrb[134].mxu0 %vm1709_vm4, %v19293_v23  ;;  %v14535_v60 = vld [vmem:[#allocation7 + $0x38] sm:$0xff] }
 0x87b   : > { %v11202_v44 = vsel %vm322_vm1, %v19303_v43, %v11201_v5  ;;  %v11204_v36 = vsel %vm322_vm1, %v11174_v21, %v11203_v34  ;;  %v11291_v10 = vpop.permute.xlu1 %11290  ;;  %v10869_v2 = vor.u32 %v10868_v3, %v10867_v27  ;;  %12219 = vmatmul.mubr.msk.f32.gmra.mrb[126].mxu1 %vm652_vm3, %v14535_v60  ;;  %10525 = vmatprep.mubr.f32.mxu0 %v14704_v47  ;;  %v11309_v58 = vrot.slane %v19385_v56, 1  ;;  %v10817_v16 = vld [vmem:[#allocation2 + $0x100] ss:$8 sm:$0xf] }
 0x87c   : > { %v11308_v49 = vrot.slane %v11291_v10, 1  ;;  %10294 = vmatprep.mubr.f32.mxu1 %v14704_v47  ;;  %v11229_v51 = vadd.f32 %v11202_v44, %v11112_v38  ;;  %v11230_v40 = vadd.f32 %v11204_v36, %v11113_v52  ;;  %v10987_v31 = vor.u32 %v10986_v14, %v10985_v63  ;;  %v10818_v25 = vld [vmem:[#allocation2 + $0x100] ss:$8 sm:$0xf0] }
 0x87d   : > { %10900 = vrot.lane.b32.xlu0 %v10869_v2, %s14702_s24  ;;  %v19403_v43 = vpop.permute.xlu0 %11457  ;;  %v19432_v24 = vld [vmem:[#allocation2 + $0xcb] ss:$8 sm:$0xf]  ;;  %v19434_v29 = vld [vmem:[#allocation2 + $0xd6] ss:$8 sm:$0xf] }
 0x87e   : > { %v11318_v53 = vsel %vm10916_vm5, %v11307_v1, %v11308_v49  ;;  %v11320_v33 = vsel %vm10916_vm5, %v11308_v49, %v11309_v58  ;;  %v11474_v61 = vrot.slane %v19403_v43, 1  ;;  %v19415_v1 = vld [vmem:[#allocation2 + $0xc0] ss:$8 sm:$0xf]  ;;  %v11370_v2 = vor.u32 %v19424_v35, %v19434_v29 }
 0x87f   : > { %v11319_v50 = vsel %vm373_vm0, %v19312_v17, %v11318_v53  ;;  %v11321_v18 = vsel %vm373_vm0, %v11291_v10, %v11320_v33  ;;  %v11456_v45 = vpop.permute.xlu1 %11455  ;;  %v19439_v34 = vld [vmem:[#allocation2 + $0x10b] ss:$8 sm:$0xf]  ;;  %v10815_v36 = vor.u32 %v19417_v57, %v19415_v1  ;;  %v10819_v10 = vor.u32 %v10818_v25, %v10817_v16  ;;  %v19458_v14 = vld [vmem:[#allocation2 + $0x116] ss:$8 sm:$0xf] }
 0x880   : > { %v14438_v12 = vpop.eup %14437  ;;  %v11346_v62 = vadd.f32 %v11319_v50, %v11229_v51  ;;  %v11347_v41 = vadd.f32 %v11321_v18, %v11230_v40  ;;  %v11473_v11 = vrot.slane %v11456_v45, 1  ;;  %v19442_v39 = vld [vmem:[#allocation2 + $0x10b] ss:$8 sm:$0xf0] }
 0x881   : > { %v11679_v20 = vadd.f32 1.0, %v14438_v12  ;;  %11018 = vrot.lane.b32.xlu0 %v10987_v31, %s14701_s22  ;;  %v19422_v17 = vpop.permute.xlu0 %11574 }
 0x882   : > { %v11394_v26 = vadd.f32 %v11362_v59, %v11346_v62  ;;  %v11395_v46 = vadd.f32 %v11366_v4, %v11347_v41  ;;  %v11483_v21 = vsel %vm10916_vm5, %v11472_v13, %v11473_v11  ;;  %v11485_v8 = vsel %vm10916_vm5, %v11473_v11, %v11474_v61  ;;  %v9300_v5 = vpop.f32.mrb[64].mxu1  ;;  %v19460_v59 = vld [vmem:[#allocation2 + $0x116] ss:$8 sm:$0xf0] }
 0x883   : > { %14439 = vrcp.f32 %v11679_v20  ;;  %v11484_v19 = vsel %vm322_vm1, %v19321_v6, %v11483_v21  ;;  %v11486_v38 = vsel %vm322_vm1, %v11456_v45, %v11485_v8  ;;  %v11573_v52 = vpop.permute.xlu1 %11572  ;;  %v11591_v13 = vrot.slane %v19422_v17, 1  ;;  %v9302_v3 = vpop.f32.mrb[65].mxu1 }
 0x884   : > { %v11590_v27 = vrot.slane %v11573_v52, 1  ;;  %v11088_v6 = vor.u32 %v19419_v15, %v19432_v24  ;;  %v11511_v30 = vadd.f32 %v11484_v19, %v11394_v26  ;;  %v11512_v9 = vadd.f32 %v11486_v38, %v11395_v46 }
 0x885   : > { %v19444_v44 = vpop.permute.xlu0 %10896  ;;  %v10027_v12 = vmax.f32 %v9300_v5, 0.0  ;;  %v10028_v62 = vmax.f32 %v9302_v3, 0.0 }
 0x886   : > { %v11600_v60 = vsel %vm10916_vm5, %v11589_v7, %v11590_v27  ;;  %v11602_v49 = vsel %vm10916_vm5, %v11590_v27, %v11591_v13  ;;  %v10911_v53 = vrot.slane %v19444_v44, 1  ;;  %v9306_v63 = vpop.f32.mrb[66].mxu1  ;;  %v11092_v7 = vor.u32 %v19442_v39, %v19439_v34 }
 0x887   : > { %v11601_v51 = vsel %vm373_vm0, %v19332_v22, %v11600_v60  ;;  %v11603_v40 = vsel %vm373_vm0, %v11573_v52, %v11602_v49  ;;  %v10895_v33 = vpop.permute.xlu1 %10894  ;;  %v10043_v4 = vmax.f32 %v9306_v63, 0.0  ;;  %v9308_v31 = vpop.f32.mrb[67].mxu1  ;;  %v11374_v22 = vor.u32 %v19460_v59, %v19458_v14 }
 0x888   : > { %v11628_v50 = vadd.f32 %v11601_v51, %v11511_v30  ;;  %v11629_v18 = vadd.f32 %v11603_v40, %v11512_v9  ;;  %v10910_v45 = vrot.slane %v10895_v33, 1  ;;  %v10044_v41 = vmax.f32 %v9308_v31, 0.0  ;;  %v9639_v1 = vpop.f32.mrb[96].mxu0 }
 0x889   : > { %v19469_v11 = vpop.permute.xlu0 %11014  ;;  %v19481_v21 = vpop.f32.mrb[97].mxu0  ;;  %v13419_v25 = vpack.c.bf16 %v10043_v4, %v10027_v12 }
 0x88a   : > { %v11640_v57 = vadd.f32 %v19347_v28, %v11628_v50  ;;  %v11641_v20 = vadd.f32 %v19347_v28, %v11629_v18  ;;  %v10923_v26 = vsel %vm10916_vm5, %v10909_v32, %v10910_v45  ;;  %v10925_v46 = vsel %vm10916_vm5, %v10910_v45, %v10911_v53  ;;  %v9312_v52 = vpop.f32.mrb[68].mxu1 }
 0x88b   : > { %v10924_v8 = vsel %vm322_vm1, %v19341_v0, %v10923_v26  ;;  %v10926_v16 = vsel %vm322_vm1, %v10895_v33, %v10925_v46  ;;  %v13417_v19 = vpack.c.bf16 %v10044_v41, %v10028_v62  ;;  %v11013_v38 = vpop.permute.xlu1 %11012  ;;  %v9314_v30 = vpop.f32.mrb[69].mxu1  ;;  %v11029_v60 = vrot.slane %v19469_v11, 1 }
 0x88c   : > { %v12237_v5 = vmul.f32 -1.442695, %v11640_v57  ;;  %v12238_v27 = vmul.f32 -1.442695, %v11641_v20  ;;  %v10949_v3 = vadd.f32 %v10924_v8, %v10815_v36  ;;  %v10950_v32 = vadd.f32 %v10926_v16, %v10819_v10  ;;  %v9645_v33 = vpop.f32.mrb[98].mxu0 }
 0x88d   : > { %v14440_v9 = vpop.eup %14439  ;;  %v11028_v49 = vrot.slane %v11013_v38, 1  ;;  %v19487_v51 = vpop.permute.xlu0 %11179  ;;  %v10059_v40 = vmax.f32 %v9312_v52, 0.0  ;;  %13418 = vmatprep.subr.bf16.mxu1 %v13417_v19  ;;  %v10060_v0 = vmax.f32 %v9314_v30, 0.0  ;;  %v10033_v10 = vmax.f32 %v9639_v1, 0.0 }
 0x88e   : > { %11709 = vst [vmem:[%s19491_s5] sm:$0xff] %v14440_v9  ;;  %14441 = vpow2.f32 %v12237_v5  ;;  %v11194_v36 = vrot.slane %v19487_v51, 1  ;;  %13420 = vmatpush1.bf16.msra.mxu1 %v13419_v25  ;;  %v10034_v63 = vmax.f32 %v19481_v21, 0.0  ;;  %v9647_v50 = vpop.f32.mrb[99].mxu0  ;;  %v9318_v31 = vpop.f32.mrb[70].mxu1  ;;  %v10049_v12 = vmax.f32 %v9645_v33, 0.0 }
 0x88f   : > { %14443 = vpow2.f32 %v12238_v27  ;;  %v11040_v18 = vsel %vm10916_vm5, %v11027_v54, %v11028_v49  ;;  %v11042_v45 = vsel %vm10916_vm5, %v11028_v49, %v11029_v60  ;;  %v11178_v4 = vpop.permute.xlu1 %11177  ;;  %v10075_v57 = vmax.f32 %v9318_v31, 0.0  ;;  %v9320_v20 = vpop.f32.mrb[71].mxu1 }
 0x890   : > { %v11041_v62 = vsel %vm373_vm0, %v19353_v42, %v11040_v18  ;;  %v11043_v41 = vsel %vm373_vm0, %v11013_v38, %v11042_v45  ;;  %v11193_v1 = vrot.slane %v11178_v4, 1  ;;  %v10076_v21 = vmax.f32 %v9320_v20, 0.0  ;;  %v9651_v16 = vpop.f32.mrb[100].mxu0 }
 0x891   : > { %v11066_v26 = vadd.f32 %v11041_v62, %v10949_v3  ;;  %v11067_v46 = vadd.f32 %v11043_v41, %v10950_v32  ;;  %v19505_v8 = vpop.permute.xlu0 %11296  ;;  %v13467_v54 = vpack.c.bf16 %v10049_v12, %v10033_v10  ;;  %v13423_v19 = vpack.c.bf16 %v10075_v57, %v10059_v40  ;;  %v19514_v52 = vpop.f32.mrb[101].mxu0 }
 0x892   : > { %v11205_v25 = vsel %vm10916_vm5, %v11192_v37, %v11193_v1  ;;  %v11207_v42 = vsel %vm10916_vm5, %v11193_v1, %v11194_v36  ;;  %v11311_v38 = vrot.slane %v19505_v8, 1  ;;  %v9324_v30 = vpop.f32.mrb[72].mxu1  ;;  %v13421_v9 = vpack.c.bf16 %v10076_v21, %v10060_v0 }
 0x893   : > { %v11114_v5 = vadd.f32 %v11088_v6, %v11066_v26  ;;  %v11115_v27 = vadd.f32 %v11092_v7, %v11067_v46  ;;  %v11206_v37 = vsel %vm322_vm1, %v19368_v48, %v11205_v25  ;;  %v11208_v3 = vsel %vm322_vm1, %v11178_v4, %v11207_v42  ;;  %v11295_v32 = vpop.permute.xlu1 %11294  ;;  %v9326_v33 = vpop.f32.mrb[73].mxu1 }
 0x894   : > { %v11310_v49 = vrot.slane %v11295_v32, 1  ;;  %v10091_v40 = vmax.f32 %v9324_v30, 0.0  ;;  %v10050_v10 = vmax.f32 %v9647_v50, 0.0  ;;  %v10092_v24 = vmax.f32 %v9326_v33, 0.0  ;;  %v9657_v34 = vpop.f32.mrb[102].mxu0  ;;  %13422 = vmatprep.subr.bf16.mxu1 %v13421_v9 }
 0x895   : > { %v11231_v18 = vadd.f32 %v11206_v37, %v11114_v5  ;;  %v11232_v45 = vadd.f32 %v11208_v3, %v11115_v27  ;;  %v19525_v15 = vpop.permute.xlu0 %11461  ;;  %v10065_v6 = vmax.f32 %v9651_v16, 0.0  ;;  %v9659_v50 = vpop.f32.mrb[103].mxu0  ;;  %13424 = vmatpush1.bf16.msra.mxu1 %v13423_v19  ;;  %v10066_v41 = vmax.f32 %v19514_v52, 0.0 }
 0x896   : > { %v11322_v48 = vsel %vm10916_vm5, %v11309_v58, %v11310_v49  ;;  %v11324_v39 = vsel %vm10916_vm5, %v11310_v49, %v11311_v38  ;;  %v11476_v7 = vrot.slane %v19525_v15, 1  ;;  %v13465_v0 = vpack.c.bf16 %v10050_v10, %v10034_v63  ;;  %v9330_v62 = vpop.f32.mrb[74].mxu1 }
 0x897   : > { %v11323_v4 = vsel %vm373_vm0, %v19385_v56, %v11322_v48  ;;  %v11325_v31 = vsel %vm373_vm0, %v11295_v32, %v11324_v39  ;;  %v11460_v12 = vpop.permute.xlu1 %11459  ;;  %v10081_v58 = vmax.f32 %v9657_v34, 0.0  ;;  %v10107_v46 = vmax.f32 %v9330_v62, 0.0  ;;  %v9332_v21 = vpop.f32.mrb[75].mxu1 }
 0x898   : > { %v14442_v1 = vpop.eup %14441  ;;  %v11348_v57 = vadd.f32 %v11323_v4, %v11231_v18  ;;  %v11349_v20 = vadd.f32 %v11325_v31, %v11232_v45  ;;  %v11475_v26 = vrot.slane %v11460_v12, 1  ;;  %13466 = vmatprep.subr.bf16.mxu0 %v13465_v0  ;;  %v10108_v25 = vmax.f32 %v9332_v21, 0.0  ;;  %v9663_v5 = vpop.f32.mrb[104].mxu0  ;;  %v10821_v21 = vld [vmem:[#allocation2 + $0x140] ss:$8 sm:$0xf] }
 0x899   : > { %v14444_v63 = vpop.eup %14443  ;;  %v11680_v16 = vadd.f32 1.0, %v14442_v1  ;;  %v13471_v42 = vpack.c.bf16 %v10081_v58, %v10065_v6  ;;  %13468 = vmatpush1.bf16.msra.mxu0 %v13467_v54  ;;  %v10082_v56 = vmax.f32 %v9659_v50, 0.0  ;;  %v19547_v3 = vpop.permute.xlu0 %11578  ;;  %v13427_v29 = vpack.c.bf16 %v10107_v46, %v10091_v40 }
 0x89a   : > { %v11681_v19 = vadd.f32 1.0, %v14444_v63  ;;  %v11396_v52 = vadd.f32 %v11370_v2, %v11348_v57  ;;  %v11397_v27 = vadd.f32 %v11374_v22, %v11349_v20  ;;  %v11487_v37 = vsel %vm10916_vm5, %v11474_v61, %v11475_v26  ;;  %v9665_v32 = vpop.f32.mrb[105].mxu0  ;;  %v9336_v30 = vpop.f32.mrb[76].mxu1  ;;  %v10822_v57 = vld [vmem:[#allocation2 + $0x140] ss:$8 sm:$0xf0] }
 0x89b   : > { %14445 = vrcp.f32 %v11680_v16  ;;  %v11488_v54 = vsel %vm322_vm1, %v19403_v43, %v11487_v37  ;;  %v11489_v35 = vsel %vm10916_vm5, %v11475_v26, %v11476_v7  ;;  %v11577_v2 = vpop.permute.xlu1 %11576  ;;  %v13425_v22 = vpack.c.bf16 %v10108_v25, %v10092_v24  ;;  %v9338_v61 = vpop.f32.mrb[77].mxu1  ;;  %v11095_v37 = vld [vmem:[#allocation2 + $0x14b] ss:$8 sm:$0xf0] }
 0x89c   : > { %14447 = vrcp.f32 %v11681_v19  ;;  %v11490_v14 = vsel %vm322_vm1, %v11460_v12, %v11489_v35  ;;  %v11513_v59 = vadd.f32 %v11488_v54, %v11396_v52  ;;  %v11593_v49 = vrot.slane %v19547_v3, 1  ;;  %v9669_v18 = vpop.f32.mrb[106].mxu0  ;;  %v11094_v35 = vld [vmem:[#allocation2 + $0x14b] ss:$8 sm:$0xf] }
 0x89d   : > { %v11514_v9 = vadd.f32 %v11490_v14, %v11397_v27  ;;  %v11592_v33 = vrot.slane %v11577_v2, 1  ;;  %v10123_v10 = vmax.f32 %v9336_v30, 0.0  ;;  %13426 = vmatprep.subr.bf16.mxu1 %v13425_v22  ;;  %v10124_v43 = vmax.f32 %v9338_v61, 0.0  ;;  %v9671_v40 = vpop.f32.mrb[107].mxu0 }
 0x89e   : > { %v13469_v45 = vpack.c.bf16 %v10082_v56, %v10066_v41  ;;  %v10097_v6 = vmax.f32 %v9663_v5, 0.0  ;;  %v10098_v34 = vmax.f32 %v9665_v32, 0.0  ;;  %13428 = vmatpush1.bf16.msra.mxu1 %v13427_v29  ;;  %v9342_v0 = vpop.f32.mrb[78].mxu1  ;;  %v10113_v50 = vmax.f32 %v9669_v18, 0.0 }
 0x89f   : > { %v11604_v48 = vsel %vm10916_vm5, %v11591_v13, %v11592_v33  ;;  %v11606_v24 = vsel %vm10916_vm5, %v11592_v33, %v11593_v49  ;;  %v19562_v39 = vpop.permute.xlu1 %10898  ;;  %v10114_v4 = vmax.f32 %v9671_v40, 0.0  ;;  %v10139_v41 = vmax.f32 %v9342_v0, 0.0  ;;  %v9344_v58 = vpop.f32.mrb[79].mxu1 }
 0x8a0   : > { %v11605_v31 = vsel %vm373_vm0, %v19422_v17, %v11604_v48  ;;  %v11607_v12 = vsel %vm373_vm0, %v11577_v2, %v11606_v24  ;;  %v10912_v62 = vrot.slane %v19562_v39, 1  ;;  %13470 = vmatprep.subr.bf16.mxu0 %v13469_v45  ;;  %v10140_v20 = vmax.f32 %v9344_v58, 0.0  ;;  %v9675_v46 = vpop.f32.mrb[108].mxu0 }
 0x8a1   : > { %v11630_v13 = vadd.f32 %v11605_v31, %v11513_v59  ;;  %v11631_v1 = vadd.f32 %v11607_v12, %v11514_v9  ;;  %v13475_v26 = vpack.c.bf16 %v10113_v50, %v10097_v6  ;;  %13472 = vmatpush1.bf16.msra.mxu0 %v13471_v42  ;;  %v13431_v63 = vpack.c.bf16 %v10139_v41, %v10123_v10  ;;  %v9677_v25 = vpop.f32.mrb[109].mxu0 }
 0x8a2   : > { %v10927_v17 = vsel %vm10916_vm5, %v10911_v53, %v10912_v62  ;;  %v13473_v16 = vpack.c.bf16 %v10114_v4, %v10098_v34  ;;  %v13429_v52 = vpack.c.bf16 %v10140_v20, %v10124_v43  ;;  %v9526_v42 = vpop.f32.mrb[80].mxu1  ;;  %v10823_v32 = vor.u32 %v10822_v57, %v10821_v21  ;;  %v11377_v21 = vld [vmem:[#allocation2 + $0x156] ss:$8 sm:$0xf0] }
 0x8a3   : > { %v11642_v56 = vadd.f32 %v19347_v28, %v11630_v13  ;;  %v11643_v5 = vadd.f32 %v19347_v28, %v11631_v1  ;;  %v10928_v19 = vsel %vm322_vm1, %v19444_v44, %v10927_v17  ;;  %v19577_v27 = vpop.permute.xlu1 %11016  ;;  %v9528_v53 = vpop.f32.mrb[81].mxu1  ;;  %v10129_v29 = vmax.f32 %v9675_v46, 0.0  ;;  %v11376_v17 = vld [vmem:[#allocation2 + $0x156] ss:$8 sm:$0xf] }
 0x8a4   : > { %v11030_v54 = vrot.slane %v19577_v27, 1  ;;  %13474 = vmatprep.subr.bf16.mxu0 %v13473_v16  ;;  %13430 = vmatprep.subr.bf16.mxu1 %v13429_v52  ;;  %v10130_v59 = vmax.f32 %v9677_v25, 0.0  ;;  %v10951_v61 = vadd.f32 %v10928_v19, %v10823_v32  ;;  %v11096_v33 = vor.u32 %v11095_v37, %v11094_v35 }
 0x8a5   : > { %v14446_v2 = vpop.eup %14445  ;;  %v12239_v30 = vmul.f32 -1.442695, %v11642_v56  ;;  %v12240_v14 = vmul.f32 -1.442695, %v11643_v5  ;;  %v9681_v44 = vpop.f32.mrb[110].mxu0  ;;  %13476 = vmatpush1.bf16.msra.mxu0 %v13475_v26  ;;  %13432 = vmatpush1.bf16.msra.mxu1 %v13431_v63  ;;  %v10031_v45 = vmax.f32 %v9526_v42, 0.0  ;;  %v11378_v16 = vor.u32 %v11377_v21, %v11376_v17 }
 0x8a6   : > { %v14448_v22 = vpop.eup %14447  ;;  %11710 = vst [vmem:[%s19491_s5 + $0x8] sm:$0xff] %v14446_v2  ;;  %v11044_v9 = vsel %vm10916_vm5, %v11029_v60, %v11030_v54  ;;  %v10145_v10 = vmax.f32 %v9681_v44, 0.0  ;;  %v9683_v18 = vpop.f32.mrb[111].mxu0  ;;  %v10032_v50 = vmax.f32 %v9528_v53, 0.0 }
 0x8a7   : > { %11711 = vst [vmem:[%s19491_s5 + $0x10] sm:$0xff] %v14448_v22  ;;  %14449 = vpow2.f32 %v12239_v30  ;;  %v11045_v43 = vsel %vm373_vm0, %v19469_v11, %v11044_v9  ;;  %v19589_v6 = vpop.permute.xlu1 %11181  ;;  %v9532_v34 = vpop.f32.mrb[82].mxu1  ;;  %v10146_v40 = vmax.f32 %v9683_v18, 0.0 }
 0x8a8   : > { %14451 = vpow2.f32 %v12240_v14  ;;  %v11068_v48 = vadd.f32 %v11045_v43, %v10951_v61  ;;  %v11195_v24 = vrot.slane %v19589_v6, 1  ;;  %v10047_v0 = vmax.f32 %v9532_v34, 0.0  ;;  %v9534_v60 = vpop.f32.mrb[83].mxu1  ;;  %12222 = vmatmul.mubr.msk.f32.vlgmr.msra.gmra.mrb[128].mxu1 %vm1709_vm4, %v19282_v55 }
 0x8a9   : > { %v10048_v4 = vmax.f32 %v9534_v60, 0.0  ;;  %v13479_v31 = vpack.c.bf16 %v10145_v10, %v10129_v29  ;;  %v13477_v12 = vpack.c.bf16 %v10146_v40, %v10130_v59  ;;  %10300 = vmatprep.mubr.f32.mxu1 %v14704_v47 }
 0x8aa   : > { %v11116_v41 = vadd.f32 %v11096_v33, %v11068_v48  ;;  %v11209_v11 = vsel %vm10916_vm5, %v11194_v36, %v11195_v24  ;;  %v13451_v58 = vpack.c.bf16 %v10047_v0, %v10031_v45  ;;  %v9538_v20 = vpop.f32.mrb[84].mxu1 }
 0x8ab   : > { %v11210_v13 = vsel %vm322_vm1, %v19487_v51, %v11209_v11  ;;  %v13449_v1 = vpack.c.bf16 %v10048_v4, %v10032_v50  ;;  %v19602_v57 = vpop.permute.xlu1 %11298  ;;  %13478 = vmatprep.subr.bf16.mxu0 %v13477_v12  ;;  %v9540_v46 = vpop.f32.mrb[85].mxu1  ;;  %v10063_v19 = vmax.f32 %v9538_v20, 0.0 }
 0x8ac   : > { %v11312_v26 = vrot.slane %v19602_v57, 1  ;;  %13480 = vmatpush1.bf16.msra.mxu0 %v13479_v31  ;;  %12223 = vmatmul.mubr.msk.f32.gmra.mrb[130].mxu1 %vm1709_vm4, %v19293_v23  ;;  %v11233_v36 = vadd.f32 %v11210_v13, %v11116_v41  ;;  %v10064_v53 = vmax.f32 %v9540_v46, 0.0 }
 0x8ad   : > { %13450 = vmatprep.subr.bf16.mxu1 %v13449_v1  ;;  %10448 = vmatprep.mubr.f32.mxu1 %v14704_v47 }
 0x8ae   : > { %v11326_v51 = vsel %vm10916_vm5, %v11311_v38, %v11312_v26  ;;  %13452 = vmatpush1.bf16.msra.mxu1 %v13451_v58  ;;  %v9544_v56 = vpop.f32.mrb[86].mxu1 }
 0x8af   : > { %v11327_v63 = vsel %vm373_vm0, %v19505_v8, %v11326_v51  ;;  %v19615_v25 = vpop.permute.xlu1 %11463  ;;  %12228 = vmatmul.mubr.msk.f32.vlgmr.msra.gmra.mrb[136].mxu0 %vm1709_vm4, %v19282_v55  ;;  %v10079_v42 = vmax.f32 %v9544_v56, 0.0  ;;  %v9546_v38 = vpop.f32.mrb[87].mxu1 }
 0x8b0   : > { %v11350_v5 = vadd.f32 %v11327_v63, %v11233_v36  ;;  %v11477_v52 = vrot.slane %v19615_v25, 1  ;;  %v9865_v37 = vpop.f32.mrb[112].mxu0  ;;  %10531 = vmatprep.mubr.f32.mxu0 %v14704_v47  ;;  %v10080_v35 = vmax.f32 %v9546_v38, 0.0 }
 0x8b1   : > { %v14450_v32 = vpop.eup %14449  ;;  %v9867_v8 = vpop.f32.mrb[113].mxu0  ;;  %v13455_v14 = vpack.c.bf16 %v10079_v42, %v10063_v19  ;;  %v10037_v33 = vmax.f32 %v9865_v37, 0.0 }
 0x8b2   : > { %v14452_v29 = vpop.eup %14451  ;;  %v11682_v2 = vadd.f32 1.0, %v14450_v32  ;;  %v11398_v30 = vadd.f32 %v11378_v16, %v11350_v5  ;;  %v11491_v55 = vsel %vm10916_vm5, %v11476_v7, %v11477_v52  ;;  %v13453_v22 = vpack.c.bf16 %v10080_v35, %v10064_v53  ;;  %v9550_v9 = vpop.f32.mrb[88].mxu1 }
 0x8b3   : > { %v11683_v59 = vadd.f32 1.0, %v14452_v29  ;;  %v11492_v44 = vsel %vm322_vm1, %v19525_v15, %v11491_v55  ;;  %v19628_v61 = vpop.permute.xlu1 %11580  ;;  %12229 = vmatmul.mubr.msk.f32.gmra.mrb[138].mxu0 %vm1709_vm4, %v19293_v23  ;;  %v9552_v18 = vpop.f32.mrb[89].mxu1  ;;  %v10038_v43 = vmax.f32 %v9867_v8, 0.0  ;;  %v10095_v31 = vmax.f32 %v9550_v9, 0.0 }
 0x8b4   : > { %14453 = vrcp.f32 %v11682_v2  ;;  %v11594_v10 = vrot.slane %v19628_v61, 1  ;;  %v9871_v45 = vpop.f32.mrb[114].mxu0  ;;  %10679 = vmatprep.mubr.f32.mxu0 %v14704_v47  ;;  %13454 = vmatprep.subr.bf16.mxu1 %v13453_v22  ;;  %v11515_v34 = vadd.f32 %v11492_v44, %v11398_v30  ;;  %v10096_v13 = vmax.f32 %v9552_v18, 0.0 }
 0x8b5   : > { %14455 = vrcp.f32 %v11683_v59  ;;  %v10053_v7 = vmax.f32 %v9871_v45, 0.0  ;;  %v9873_v15 = vpop.f32.mrb[115].mxu0  ;;  %13456 = vmatpush1.bf16.msra.mxu1 %v13455_v14 }
 0x8b6   : > { %v11608_v40 = vsel %vm10916_vm5, %v11593_v49, %v11594_v10  ;;  %v10054_v23 = vmax.f32 %v9873_v15, 0.0  ;;  %v9556_v0 = vpop.f32.mrb[90].mxu1 }
 0x8b7   : > { %v11609_v48 = vsel %vm373_vm0, %v19547_v3, %v11608_v40  ;;  %v13499_v60 = vpack.c.bf16 %v10053_v7, %v10037_v33  ;;  %v9877_v50 = vpop.f32.mrb[116].mxu0  ;;  %v10111_v12 = vmax.f32 %v9556_v0, 0.0  ;;  %v9558_v41 = vpop.f32.mrb[91].mxu1 }
 0x8b8   : > { %v11632_v4 = vadd.f32 %v11609_v48, %v11515_v34  ;;  %v13497_v11 = vpack.c.bf16 %v10054_v23, %v10038_v43  ;;  %v9879_v58 = vpop.f32.mrb[117].mxu0  ;;  %v10112_v1 = vmax.f32 %v9558_v41, 0.0  ;;  %v10069_v49 = vmax.f32 %v9877_v50, 0.0 }
 0x8b9   : > { %v13459_v46 = vpack.c.bf16 %v10111_v12, %v10095_v31  ;;  %v10070_v3 = vmax.f32 %v9879_v58, 0.0 }
 0x8ba   : > { %v11644_v20 = vadd.f32 %v19347_v28, %v11632_v4  ;;  %13498 = vmatprep.subr.bf16.mxu0 %v13497_v11  ;;  %v13457_v21 = vpack.c.bf16 %v10112_v1, %v10096_v13  ;;  %v9562_v36 = vpop.f32.mrb[92].mxu1  ;;  %v19644_v11 = vld [vmem:[#allocation9] sm:$0xff] }
 0x8bb   : > { %v9883_v51 = vpop.f32.mrb[118].mxu0  ;;  %13500 = vmatpush1.bf16.msra.mxu0 %v13499_v60  ;;  %v9564_v63 = vpop.f32.mrb[93].mxu1  ;;  %v10127_v35 = vmax.f32 %v9562_v36, 0.0 }
 0x8bc   : > { %v12241_v17 = vmul.f32 -1.442695, %v11644_v20  ;;  %v10085_v16 = vmax.f32 %v9883_v51, 0.0  ;;  %v9885_v56 = vpop.f32.mrb[119].mxu0  ;;  %13458 = vmatprep.subr.bf16.mxu1 %v13457_v21  ;;  %v10128_v30 = vmax.f32 %v9564_v63, 0.0  ;;  %v19649_v51 = vld [vmem:[#allocation9 + $0x8] sm:$0xff] }
 0x8bd   : > { %v10086_v5 = vmax.f32 %v9885_v56, 0.0  ;;  %13460 = vmatpush1.bf16.msra.mxu1 %v13459_v46 }
 0x8be   : > { %v14454_v19 = vpop.eup %14453  ;;  %14457 = vpow2.f32 %v12241_v17  ;;  %v13503_v42 = vpack.c.bf16 %v10085_v16, %v10069_v49  ;;  %v9568_v37 = vpop.f32.mrb[94].mxu1 }
 0x8bf   : > { %v14456_v38 = vpop.eup %14455  ;;  %11712 = vst [vmem:[%s19491_s5 + $0x18] sm:$0xff] %v14454_v19  ;;  %v13501_v32 = vpack.c.bf16 %v10086_v5, %v10070_v3  ;;  %v9889_v53 = vpop.f32.mrb[120].mxu0  ;;  %v10143_v8 = vmax.f32 %v9568_v37, 0.0 }
 0x8c0   : > { %11713 = vst [vmem:[%s19491_s5 + $0x20] sm:$0xff] %v14456_v38  ;;  %v9570_v29 = vpop.f32.mrb[95].mxu1  ;;  %v9891_v2 = vpop.f32.mrb[121].mxu0  ;;  %v10101_v59 = vmax.f32 %v9889_v53, 0.0 }
 0x8c1   : > { %v10144_v55 = vmax.f32 %v9570_v29, 0.0  ;;  %13502 = vmatprep.subr.bf16.mxu0 %v13501_v32  ;;  %v13463_v14 = vpack.c.bf16 %v10143_v8, %v10127_v35  ;;  %v10102_v9 = vmax.f32 %v9891_v2, 0.0 }
 0x8c2   : > { %13504 = vmatpush1.bf16.msra.mxu0 %v13503_v42  ;;  %v9752_v22 = vpop.f32.mrb[96].mxu1 }
 0x8c3   : > { %v13461_v44 = vpack.c.bf16 %v10144_v55, %v10128_v30  ;;  %v9895_v33 = vpop.f32.mrb[122].mxu0  ;;  %v9754_v18 = vpop.f32.mrb[97].mxu1  ;;  %v10035_v0 = vmax.f32 %v9752_v22, 0.0 }
 0x8c4   : > { %v10117_v43 = vmax.f32 %v9895_v33, 0.0  ;;  %v9897_v45 = vpop.f32.mrb[123].mxu0  ;;  %v10036_v12 = vmax.f32 %v9754_v18, 0.0 }
 0x8c5   : > { %13462 = vmatprep.subr.bf16.mxu1 %v13461_v44  ;;  %v10118_v7 = vmax.f32 %v9897_v45, 0.0 }
 0x8c6   : > { %13464 = vmatpush1.bf16.msra.mxu1 %v13463_v14  ;;  %v13507_v15 = vpack.c.bf16 %v10117_v43, %v10101_v59  ;;  %v9758_v34 = vpop.f32.mrb[98].mxu1 }
 0x8c7   : > { %v13505_v40 = vpack.c.bf16 %v10118_v7, %v10102_v9  ;;  %v9901_v23 = vpop.f32.mrb[124].mxu0  ;;  %v10051_v60 = vmax.f32 %v9758_v34, 0.0  ;;  %v9760_v50 = vpop.f32.mrb[99].mxu1 }
 0x8c8   : > { %v14458_v48 = vpop.eup %14457  ;;  %v9903_v4 = vpop.f32.mrb[125].mxu0  ;;  %v10052_v41 = vmax.f32 %v9760_v50, 0.0  ;;  %v10133_v13 = vmax.f32 %v9901_v23, 0.0 }
 0x8c9   : > { %v11684_v31 = vadd.f32 1.0, %v14458_v48  ;;  %12226 = vmatmul.mubr.msk.f32.vlgmr.msra.gmra.mrb[132].mxu1 %vm1709_vm4, %v19644_v11  ;;  %13506 = vmatprep.subr.bf16.mxu0 %v13505_v40  ;;  %v13483_v58 = vpack.c.bf16 %v10051_v60, %v10035_v0  ;;  %v10134_v46 = vmax.f32 %v9903_v4, 0.0 }
 0x8ca   : > { %10454 = vmatprep.mubr.f32.mxu1 %v14704_v47  ;;  %13508 = vmatpush1.bf16.msra.mxu0 %v13507_v15  ;;  %v13481_v1 = vpack.c.bf16 %v10052_v41, %v10036_v12  ;;  %v9764_v20 = vpop.f32.mrb[100].mxu1 }
 0x8cb   : > { %14459 = vrcp.f32 %v11684_v31  ;;  %v9907_v49 = vpop.f32.mrb[126].mxu0  ;;  %v9766_v21 = vpop.f32.mrb[101].mxu1  ;;  %v10067_v5 = vmax.f32 %v9764_v20, 0.0  ;;  %v11150_v31 = vld [vmem:[#allocation2 + $0x1cc] ss:$8 sm:$0xf] }
 0x8cc   : > { %v10149_v36 = vmax.f32 %v9907_v49, 0.0  ;;  %v9909_v3 = vpop.f32.mrb[127].mxu0  ;;  %13482 = vmatprep.subr.bf16.mxu1 %v13481_v1  ;;  %v10068_v38 = vmax.f32 %v9766_v21, 0.0  ;;  %v11267_v20 = vld [vmem:[#allocation2 + $0x1cd] ss:$8 sm:$0xf] }
 0x8cd   : > { %12227 = vmatmul.mubr.msk.f32.gmra.mrb[134].mxu1 %vm1709_vm4, %v19649_v51  ;;  %v10150_v17 = vmax.f32 %v9909_v3, 0.0 }
 0x8ce   : > { %13484 = vmatpush1.bf16.msra.mxu1 %v13483_v58  ;;  %v13511_v63 = vpack.c.bf16 %v10149_v36, %v10133_v13  ;;  %10602 = vmatprep.mubr.f32.mxu1 %v14704_v47  ;;  %v9770_v16 = vpop.f32.mrb[102].mxu1 }
 0x8cf   : > { %v13509_v56 = vpack.c.bf16 %v10150_v17, %v10134_v46  ;;  %v10083_v19 = vmax.f32 %v9770_v16, 0.0  ;;  %v9772_v42 = vpop.f32.mrb[103].mxu1 }
 0x8d0   : > { %v10084_v37 = vmax.f32 %v9772_v42, 0.0 }
 0x8d1   : > { %13510 = vmatprep.subr.bf16.mxu0 %v13509_v56  ;;  %v13487_v32 = vpack.c.bf16 %v10083_v19, %v10067_v5  ;;  %v11432_v56 = vld [vmem:[#allocation2 + $0x1d7] ss:$8 sm:$0xf] }
 0x8d2   : > { %13512 = vmatpush1.bf16.msra.mxu0 %v13511_v63  ;;  %v13485_v53 = vpack.c.bf16 %v10084_v37, %v10068_v38  ;;  %v9776_v35 = vpop.f32.mrb[104].mxu1 }
 0x8d3   : > { %v9778_v8 = vpop.f32.mrb[105].mxu1  ;;  %v10099_v30 = vmax.f32 %v9776_v35, 0.0 }
 0x8d4   : > { %13486 = vmatprep.subr.bf16.mxu1 %v13485_v53  ;;  %v10100_v59 = vmax.f32 %v9778_v8, 0.0  ;;  %v11549_v53 = vld [vmem:[#allocation2 + $0x450] ss:$8 sm:$0xf] }
 0x8d5   : > { %v14460_v29 = vpop.eup %14459  ;;  %12232 = vmatmul.mubr.msk.f32.vlgmr.msra.gmra.mrb[140].mxu0 %vm1709_vm4, %v19644_v11  ;;  %13488 = vmatpush1.bf16.msra.mxu1 %v13487_v32 }
 0x8d6   : > { %11714 = vst [vmem:[%s19491_s5 + $0x28] sm:$0xff] %v14460_v29  ;;  %10685 = vmatprep.mubr.f32.mxu0 %v14704_v47  ;;  %v9782_v2 = vpop.f32.mrb[106].mxu1 }
 0x8d7   : > { %v10115_v55 = vmax.f32 %v9782_v2, 0.0  ;;  %v9784_v14 = vpop.f32.mrb[107].mxu1 }
 0x8d8   : > { %v10116_v44 = vmax.f32 %v9784_v14, 0.0 }
 0x8d9   : > { %12233 = vmatmul.mubr.msk.f32.gmra.mrb[142].mxu0 %vm1709_vm4, %v19649_v51  ;;  %v13491_v22 = vpack.c.bf16 %v10115_v55, %v10099_v30 }
 0x8da   : > { %v13489_v9 = vpack.c.bf16 %v10116_v44, %v10100_v59  ;;  %v9788_v33 = vpop.f32.mrb[108].mxu1 }
 0x8db   : > { %v9790_v18 = vpop.f32.mrb[109].mxu1  ;;  %v10131_v45 = vmax.f32 %v9788_v33, 0.0 }
 0x8dc   : > { %13490 = vmatprep.subr.bf16.mxu1 %v13489_v9  ;;  %v10132_v34 = vmax.f32 %v9790_v18, 0.0 }
 0x8dd   : > { %13492 = vmatpush1.bf16.msra.mxu1 %v13491_v22 }
 0x8de   : > { %v9794_v43 = vpop.f32.mrb[110].mxu1 }
 0x8df   : > { %v10147_v7 = vmax.f32 %v9794_v43, 0.0  ;;  %v9796_v15 = vpop.f32.mrb[111].mxu1 }
 0x8e0   : > { %v10148_v40 = vmax.f32 %v9796_v15, 0.0 }
 0x8e1   : > { %v13495_v23 = vpack.c.bf16 %v10147_v7, %v10131_v45 }
 0x8e2   : > { %v13493_v48 = vpack.c.bf16 %v10148_v40, %v10132_v34 }
 0x8e4   : > { %13494 = vmatprep.subr.bf16.mxu1 %v13493_v48 }
 0x8e5   : > { %13496 = vmatpush1.bf16.msra.mxu1 %v13495_v23 }
 0x8e8   : > { %12230 = vmatmul.mubr.msk.f32.vlgmr.msra.gmra.mrb[136].mxu1 %vm1709_vm4, %v19644_v11 }
 0x8e9   : > { %10608 = vmatprep.mubr.f32.mxu1 %v14704_v47 }
 0x8ec   : > { %12231 = vmatmul.mubr.msk.f32.gmra.mrb[138].mxu1 %vm1709_vm4, %v19649_v51 }
 0x8ed   : > { %10756 = vmatprep.mubr.f32.mxu1 %v14704_v47 }
 0x929   : > { %v10219_v0 = vpop.f32.mrb[128].mxu0 }
 0x92a   : > { %10769 = vst [vmem:[#allocation2 + $0x200] sm:$0xff] %v10219_v0  ;;  %v10221_v60 = vpop.f32.mrb[129].mxu0 }
 0x92b   : > { %10770 = vst [vmem:[#allocation2 + $0x208] sm:$0xff] %v10221_v60 }
 0x92d   : > { %v10225_v50 = vpop.f32.mrb[130].mxu0 }
 0x92e   : > { %10785 = vst [vmem:[#allocation2 + $0x480] sm:$0xff] %v10225_v50  ;;  %v10227_v4 = vpop.f32.mrb[131].mxu0 }
 0x92f   : > { %10786 = vst [vmem:[#allocation2 + $0x488] sm:$0xff] %v10227_v4 }
 0x931   : > { %v11151_v12 = vld [vmem:[#allocation2 + $0x1cc] ss:$8 sm:$0xf0]  ;;  %v11268_v13 = vld [vmem:[#allocation2 + $0x1cd] ss:$8 sm:$0xf0] }
 0x932   : > { %v11152_v41 = vor.u32 %v11151_v12, %v11150_v31  ;;  %v9978_v58 = vpop.f32.mrb[112].mxu1  ;;  %v11269_v49 = vor.u32 %v11268_v13, %v11267_v20  ;;  %v11433_v3 = vld [vmem:[#allocation2 + $0x1d7] ss:$8 sm:$0xf0] }
 0x933   : > { %v9980_v1 = vpop.f32.mrb[113].mxu1  ;;  %v10039_v46 = vmax.f32 %v9978_v58, 0.0  ;;  %v11434_v19 = vor.u32 %v11433_v3, %v11432_v56 }
 0x934   : > { %11183 = vrot.lane.b32.xlu0 %v11152_v41, %s14702_s24  ;;  %v10040_v21 = vmax.f32 %v9980_v1, 0.0 }
 0x936   : > { %v9984_v36 = vpop.f32.mrb[114].mxu1  ;;  %v11550_v37 = vld [vmem:[#allocation2 + $0x450] ss:$8 sm:$0xf0] }
 0x937   : > { %v10055_v17 = vmax.f32 %v9984_v36, 0.0  ;;  %v9986_v63 = vpop.f32.mrb[115].mxu1  ;;  %v11551_v8 = vor.u32 %v11550_v37, %v11549_v53 }
 0x938   : > { %11300 = vrot.lane.b32.xlu0 %v11269_v49, %s14701_s22  ;;  %v10056_v16 = vmax.f32 %v9986_v63, 0.0 }
 0x939   : > { %v13515_v5 = vpack.c.bf16 %v10055_v17, %v10039_v46 }
 0x93a   : > { %v13513_v42 = vpack.c.bf16 %v10056_v16, %v10040_v21  ;;  %v9990_v38 = vpop.f32.mrb[116].mxu1 }
 0x93b   : > { %v9992_v32 = vpop.f32.mrb[117].mxu1  ;;  %v10071_v35 = vmax.f32 %v9990_v38, 0.0  ;;  %v10825_v38 = vld [vmem:[#allocation2 + $0x180] ss:$8 sm:$0xf] }
 0x93c   : > { %11465 = vrot.lane.b32.xlu0 %v11434_v19, %s14702_s24  ;;  %13514 = vmatprep.subr.bf16.mxu1 %v13513_v42  ;;  %v10072_v29 = vmax.f32 %v9992_v32, 0.0  ;;  %v10826_v32 = vld [vmem:[#allocation2 + $0x180] ss:$8 sm:$0xf0] }
 0x93d   : > { %13516 = vmatpush1.bf16.msra.mxu1 %v13515_v5 }
 0x93e   : > { %v9996_v2 = vpop.f32.mrb[118].mxu1 }
 0x93f   : > { %v10087_v30 = vmax.f32 %v9996_v2, 0.0  ;;  %v9998_v55 = vpop.f32.mrb[119].mxu1  ;;  %v10827_v2 = vor.u32 %v10826_v32, %v10825_v38 }
 0x940   : > { %11582 = vrot.lane.b32.xlu0 %v11551_v8, %s14701_s22  ;;  %v10088_v14 = vmax.f32 %v9998_v55, 0.0 }
 0x941   : > { %v13519_v59 = vpack.c.bf16 %v10087_v30, %v10071_v35 }
 0x942   : > { %v13517_v44 = vpack.c.bf16 %v10088_v14, %v10072_v29  ;;  %v10002_v22 = vpop.f32.mrb[120].mxu1 }
 0x943   : > { %v10004_v9 = vpop.f32.mrb[121].mxu1  ;;  %v10103_v33 = vmax.f32 %v10002_v22, 0.0 }
 0x944   : > { %13518 = vmatprep.subr.bf16.mxu1 %v13517_v44  ;;  %v10104_v18 = vmax.f32 %v10004_v9, 0.0  ;;  %v11099_v44 = vld [vmem:[#allocation2 + $0x18b] ss:$8 sm:$0xf0] }
 0x945   : > { %13520 = vmatpush1.bf16.msra.mxu1 %v13519_v59  ;;  %v11098_v59 = vld [vmem:[#allocation2 + $0x18b] ss:$8 sm:$0xf] }
 0x946   : > { %v10008_v43 = vpop.f32.mrb[122].mxu1 }
 0x947   : > { %v10119_v45 = vmax.f32 %v10008_v43, 0.0  ;;  %v10010_v7 = vpop.f32.mrb[123].mxu1  ;;  %v11100_v43 = vor.u32 %v11099_v44, %v11098_v59 }
 0x948   : > { %v10120_v15 = vmax.f32 %v10010_v7, 0.0 }
 0x949   : > { %v13523_v34 = vpack.c.bf16 %v10119_v45, %v10103_v33  ;;  %v10373_v40 = vpop.f32.mrb[132].mxu0 }
 0x94a   : > { %v13521_v23 = vpack.c.bf16 %v10120_v15, %v10104_v18  ;;  %v10014_v48 = vpop.f32.mrb[124].mxu1  ;;  %10773 = vst [vmem:[#allocation2 + $0x220] sm:$0xff] %v10373_v40  ;;  %v10375_v0 = vpop.f32.mrb[133].mxu0 }
 0x94b   : > { %v10016_v60 = vpop.f32.mrb[125].mxu1  ;;  %10774 = vst [vmem:[#allocation2 + $0x228] sm:$0xff] %v10375_v0  ;;  %v10135_v50 = vmax.f32 %v10014_v48, 0.0 }
 0x94c   : > { %13522 = vmatprep.subr.bf16.mxu1 %v13521_v23  ;;  %v10136_v31 = vmax.f32 %v10016_v60, 0.0  ;;  %v11380_v23 = vld [vmem:[#allocation2 + $0x196] ss:$8 sm:$0xf] }
 0x94d   : > { %13524 = vmatpush1.bf16.msra.mxu1 %v13523_v34  ;;  %v10379_v4 = vpop.f32.mrb[134].mxu0 }
 0x94e   : > { %v10020_v12 = vpop.f32.mrb[126].mxu1  ;;  %10789 = vst [vmem:[#allocation2 + $0x4a0] sm:$0xff] %v10379_v4  ;;  %v10381_v41 = vpop.f32.mrb[135].mxu0 }
 0x94f   : > { %v10151_v58 = vmax.f32 %v10020_v12, 0.0  ;;  %v10022_v13 = vpop.f32.mrb[127].mxu1  ;;  %10790 = vst [vmem:[#allocation2 + $0x4a8] sm:$0xff] %v10381_v41 }
 0x950   : > { %v10152_v1 = vmax.f32 %v10022_v13, 0.0 }
 0x951   : > { %v13527_v20 = vpack.c.bf16 %v10151_v58, %v10135_v50  ;;  %v11381_v50 = vld [vmem:[#allocation2 + $0x196] ss:$8 sm:$0xf0] }
 0x952   : > { %v13525_v46 = vpack.c.bf16 %v10152_v1, %v10136_v31 }
 0x954   : > { %13526 = vmatprep.subr.bf16.mxu1 %v13525_v46 }
 0x955   : > { %13528 = vmatpush1.bf16.msra.mxu1 %v13527_v20  ;;  %v11382_v20 = vor.u32 %v11381_v50, %v11380_v23 }
 0x958   : > { %12234 = vmatmul.mubr.msk.f32.vlgmr.msra.gmra.mrb[140].mxu1 %vm1709_vm4, %v19644_v11 }
 0x959   : > { %10762 = vmatprep.mubr.f32.mxu1 %v14704_v47  ;;  %v19675_v47 = vpop.permute.xlu0 %10900 }
 0x95c   : > { %12235 = vmatmul.mubr.msk.f32.gmra.mrb[142].mxu1 %vm1709_vm4, %v19649_v51  ;;  %v10913_v51 = vrot.slane %v19675_v47, 1 }
 0x95d   : > { %v19677_v56 = vpop.permute.xlu0 %11018 }
 0x95e   : > { %v11031_v19 = vrot.slane %v19677_v56, 1  ;;  %v10929_v37 = vsel %vm10916_vm5, %v10912_v62, %v10913_v51 }
 0x95f   : > { %v10930_v29 = vsel %vm322_vm1, %v19562_v39, %v10929_v37 }
 0x960   : > { %v11046_v35 = vsel %vm10916_vm5, %v11030_v54, %v11031_v19  ;;  %v10952_v55 = vadd.f32 %v10930_v29, %v10827_v2 }
 0x961   : > { %v11047_v30 = vsel %vm373_vm0, %v19577_v27, %v11046_v35 }
 0x962   : > { %v11069_v33 = vadd.f32 %v11047_v30, %v10952_v55 }
 0x964   : > { %v11117_v48 = vadd.f32 %v11100_v43, %v11069_v33 }
 0x97b   : > { %v10296_v49 = vpop.f32.mrb[128].mxu1 }
 0x97c   : > { %10771 = vst [vmem:[#allocation2 + $0x210] sm:$0xff] %v10296_v49  ;;  %v10298_v21 = vpop.f32.mrb[129].mxu1 }
 0x97d   : > { %10772 = vst [vmem:[#allocation2 + $0x218] sm:$0xff] %v10298_v21 }
 0x97f   : > { %v10302_v36 = vpop.f32.mrb[130].mxu1 }
 0x980   : > { %10787 = vst [vmem:[#allocation2 + $0x490] sm:$0xff] %v10302_v36  ;;  %v10304_v3 = vpop.f32.mrb[131].mxu1 }
 0x981   : > { %10788 = vst [vmem:[#allocation2 + $0x498] sm:$0xff] %v10304_v3 }
 0x982   : > { %v10527_v17 = vpop.f32.mrb[136].mxu0 }
 0x983   : > { %10777 = vst [vmem:[#allocation2 + $0x240] sm:$0xff] %v10527_v17  ;;  %v10529_v63 = vpop.f32.mrb[137].mxu0 }
 0x984   : > { %10778 = vst [vmem:[#allocation2 + $0x248] sm:$0xff] %v10529_v63  ;;  %v10871_v62 = vld [vmem:[#allocation2 + $0x201] ss:$8 sm:$0xf] }
 0x985   : > { %v10989_v45 = vld [vmem:[#allocation2 + $0x202] ss:$8 sm:$0xf]  ;;  %v11154_v31 = vld [vmem:[#allocation2 + $0x20c] ss:$8 sm:$0xf] }
 0x986   : > { %v10533_v16 = vpop.f32.mrb[138].mxu0  ;;  %v11271_v36 = vld [vmem:[#allocation2 + $0x20d] ss:$8 sm:$0xf] }
 0x987   : > { %10793 = vst [vmem:[#allocation2 + $0x4c0] sm:$0xff] %v10533_v16  ;;  %v10535_v11 = vpop.f32.mrb[139].mxu0  ;;  %v11436_v63 = vld [vmem:[#allocation2 + $0x217] ss:$8 sm:$0xf] }
 0x988   : > { %10794 = vst [vmem:[#allocation2 + $0x4c8] sm:$0xff] %v10535_v11  ;;  %v11553_v37 = vld [vmem:[#allocation2 + $0x490] ss:$8 sm:$0xf] }
 0x99c   : > { %v10450_v5 = vpop.f32.mrb[132].mxu1 }
 0x99d   : > { %10775 = vst [vmem:[#allocation2 + $0x230] sm:$0xff] %v10450_v5  ;;  %v10452_v42 = vpop.f32.mrb[133].mxu1 }
 0x99e   : > { %10776 = vst [vmem:[#allocation2 + $0x238] sm:$0xff] %v10452_v42 }
 0x9a0   : > { %v10456_v53 = vpop.f32.mrb[134].mxu1 }
 0x9a1   : > { %10791 = vst [vmem:[#allocation2 + $0x4b0] sm:$0xff] %v10456_v53  ;;  %v10458_v8 = vpop.f32.mrb[135].mxu1 }
 0x9a2   : > { %10792 = vst [vmem:[#allocation2 + $0x4b8] sm:$0xff] %v10458_v8 }
 0x9a5   : > { %v10872_v14 = vld [vmem:[#allocation2 + $0x201] ss:$8 sm:$0xf0]  ;;  %v10990_v18 = vld [vmem:[#allocation2 + $0x202] ss:$8 sm:$0xf0] }
 0x9a6   : > { %v19695_v22 = vpop.permute.xlu0 %11183  ;;  %v10873_v9 = vor.u32 %v10872_v14, %v10871_v62  ;;  %v10991_v40 = vor.u32 %v10990_v18, %v10989_v45  ;;  %v11155_v60 = vld [vmem:[#allocation2 + $0x20c] ss:$8 sm:$0xf0]  ;;  %v11272_v49 = vld [vmem:[#allocation2 + $0x20d] ss:$8 sm:$0xf0] }
 0x9a7   : > { %v11196_v54 = vrot.slane %v19695_v22, 1  ;;  %v11156_v13 = vor.u32 %v11155_v60, %v11154_v31  ;;  %v11273_v17 = vor.u32 %v11272_v49, %v11271_v36  ;;  %v11437_v11 = vld [vmem:[#allocation2 + $0x217] ss:$8 sm:$0xf0] }
 0x9a8   : > { %10902 = vrot.lane.b32.xlu1 %v10873_v9, %s14702_s24  ;;  %v10681_v39 = vpop.f32.mrb[140].mxu0  ;;  %v11103_v60 = vld [vmem:[#allocation2 + $0x1cb] ss:$8 sm:$0xf0] }
 0x9a9   : > { %v11211_v27 = vsel %vm10916_vm5, %v11195_v24, %v11196_v54  ;;  %10781 = vst [vmem:[#allocation2 + $0x260] sm:$0xff] %v10681_v39  ;;  %v10683_v7 = vpop.f32.mrb[141].mxu0  ;;  %v11554_v32 = vld [vmem:[#allocation2 + $0x490] ss:$8 sm:$0xf0] }
 0x9aa   : > { %v11212_v15 = vsel %vm322_vm1, %v19589_v6, %v11211_v27  ;;  %v19706_v34 = vpop.permute.xlu0 %11300  ;;  %10782 = vst [vmem:[#allocation2 + $0x268] sm:$0xff] %v10683_v7  ;;  %v11555_v35 = vor.u32 %v11554_v32, %v11553_v37  ;;  %v10830_v27 = vld [vmem:[#allocation2 + $0x1c0] ss:$8 sm:$0xf0] }
 0x9ab   : > { %v11313_v0 = vrot.slane %v19706_v34, 1  ;;  %v11234_v24 = vadd.f32 %v11212_v15, %v11117_v48  ;;  %v10829_v7 = vld [vmem:[#allocation2 + $0x1c0] ss:$8 sm:$0xf] }
 0x9ac   : > { %11020 = vrot.lane.b32.xlu1 %v10991_v40, %s14701_s22  ;;  %v10687_v4 = vpop.f32.mrb[142].mxu0  ;;  %v10831_v23 = vor.u32 %v10830_v27, %v10829_v7  ;;  %v11384_v36 = vld [vmem:[#allocation2 + $0x1d6] ss:$8 sm:$0xf] }
 0x9ad   : > { %v11328_v6 = vsel %vm10916_vm5, %v11312_v26, %v11313_v0  ;;  %10797 = vst [vmem:[#allocation2 + $0x4e0] sm:$0xff] %v10687_v4  ;;  %v10689_v12 = vpop.f32.mrb[143].mxu0 }
 0x9ae   : > { %v11329_v41 = vsel %vm373_vm0, %v19602_v57, %v11328_v6  ;;  %v19717_v58 = vpop.permute.xlu0 %11465  ;;  %10798 = vst [vmem:[#allocation2 + $0x4e8] sm:$0xff] %v10689_v12  ;;  %v11102_v6 = vld [vmem:[#allocation2 + $0x1cb] ss:$8 sm:$0xf] }
 0x9af   : > { %v11351_v1 = vadd.f32 %v11329_v41, %v11234_v24  ;;  %v11478_v46 = vrot.slane %v19717_v58, 1  ;;  %v11104_v12 = vor.u32 %v11103_v60, %v11102_v6 }
 0x9b0   : > { %11185 = vrot.lane.b32.xlu1 %v11156_v13, %s14702_s24 }
 0x9b1   : > { %v11399_v21 = vadd.f32 %v11382_v20, %v11351_v1  ;;  %v11493_v26 = vsel %vm10916_vm5, %v11477_v52, %v11478_v46 }
 0x9b2   : > { %v11494_v57 = vsel %vm322_vm1, %v19615_v25, %v11493_v26  ;;  %v19728_v3 = vpop.permute.xlu0 %11582  ;;  %v11438_v25 = vor.u32 %v11437_v11, %v11436_v63 }
 0x9b3   : > { %v11595_v16 = vrot.slane %v19728_v3, 1  ;;  %v11516_v5 = vadd.f32 %v11494_v57, %v11399_v21 }
 0x9b4   : > { %11302 = vrot.lane.b32.xlu1 %v11273_v17, %s14701_s22 }
 0x9b5   : > { %v11610_v52 = vsel %vm10916_vm5, %v11594_v10, %v11595_v16 }
 0x9b6   : > { %v11611_v42 = vsel %vm373_vm0, %v19628_v61, %v11610_v52 }
 0x9b7   : > { %v11633_v38 = vadd.f32 %v11611_v42, %v11516_v5 }
 0x9b8   : > { %11467 = vrot.lane.b32.xlu1 %v11438_v25, %s14702_s24 }
 0x9b9   : > { %v11645_v53 = vadd.f32 %v19347_v28, %v11633_v38 }
 0x9bb   : > { %v12242_v8 = vmul.f32 -1.442695, %v11645_v53  ;;  %v10604_v29 = vpop.f32.mrb[136].mxu1 }
 0x9bc   : > { %11584 = vrot.lane.b32.xlu1 %v11555_v35, %s14701_s22  ;;  %10779 = vst [vmem:[#allocation2 + $0x250] sm:$0xff] %v10604_v29  ;;  %v10606_v2 = vpop.f32.mrb[137].mxu1 }
 0x9bd   : > { %14461 = vpow2.f32 %v12242_v8  ;;  %10780 = vst [vmem:[#allocation2 + $0x258] sm:$0xff] %v10606_v2  ;;  %v10834_v2 = vld [vmem:[#allocation2 + $0x200] ss:$8 sm:$0xf0] }
 0x9bf   : > { %v10610_v10 = vpop.f32.mrb[138].mxu1 }
 0x9c0   : > { %10795 = vst [vmem:[#allocation2 + $0x4d0] sm:$0xff] %v10610_v10  ;;  %v10612_v61 = vpop.f32.mrb[139].mxu1 }
 0x9c1   : > { %10796 = vst [vmem:[#allocation2 + $0x4d8] sm:$0xff] %v10612_v61 }
 0x9c4   : > { %v10875_v30 = vld [vmem:[#allocation2 + $0x241] ss:$8 sm:$0xf]  ;;  %v10993_v14 = vld [vmem:[#allocation2 + $0x242] ss:$8 sm:$0xf] }
 0x9c5   : > { %10904 = vrot.lane.b32.xlu0 %v10875_v30, %s14702_s24  ;;  %v11158_v59 = vld [vmem:[#allocation2 + $0x24c] ss:$8 sm:$0xf]  ;;  %v11275_v44 = vld [vmem:[#allocation2 + $0x24d] ss:$8 sm:$0xf] }
 0x9c6   : > { %v11440_v33 = vld [vmem:[#allocation2 + $0x257] ss:$8 sm:$0xf]  ;;  %v10833_v30 = vld [vmem:[#allocation2 + $0x200] ss:$8 sm:$0xf] }
 0x9c7   : > { %v14462_v55 = vpop.eup %14461  ;;  %v11110_v60 = vld [vmem:[#allocation2 + $0x24b] ss:$8 sm:$0x7] }
 0x9c8   : > { %v11685_v62 = vadd.f32 1.0, %v14462_v55  ;;  %v11557_v18 = vld [vmem:[#allocation2 + $0x4d0] ss:$8 sm:$0xf] }
 0x9c9   : > { %11022 = vrot.lane.b32.xlu0 %v10993_v14, %s14701_s22  ;;  %v10837_v14 = vld [vmem:[#allocation2 + $0x240] ss:$8 sm:$0x7] }
 0x9ca   : > { %14463 = vrcp.f32 %v11685_v62 }
 0x9cd   : > { %11187 = vrot.lane.b32.xlu0 %v11158_v59, %s14702_s24 }
 0x9d1   : > { %11304 = vrot.lane.b32.xlu0 %v11275_v44, %s14701_s22  ;;  %v11107_v44 = vld [vmem:[#allocation2 + $0x20b] ss:$8 sm:$0xf0] }
 0x9d4   : > { %v14464_v9 = vpop.eup %14463 }
 0x9d5   : > { %11715 = vst [vmem:[%s19491_s5 + $0x30] sm:$0xff] %v14464_v9  ;;  %11469 = vrot.lane.b32.xlu0 %v11440_v33, %s14702_s24 }
 0x9d9   : > { %11586 = vrot.lane.b32.xlu0 %v11557_v18, %s14701_s22 }
 0xa1a   : > { %v10903_v39 = vpop.permute.xlu1 %10902 }
 0xa1b   : > { %v10914_v43 = vrot.slane %v10903_v39, 1 }
 0xa1d   : > { %v10931_v45 = vsel %vm10916_vm5, %v10913_v51, %v10914_v43 }
 0xa1e   : > { %v10932_v15 = vsel %vm322_vm1, %v19675_v47, %v10931_v45  ;;  %v11021_v40 = vpop.permute.xlu1 %11020 }
 0xa1f   : > { %v11032_v48 = vrot.slane %v11021_v40, 1  ;;  %v10953_v50 = vadd.f32 %v10932_v15, %v10831_v23 }
 0xa21   : > { %v11048_v4 = vsel %vm10916_vm5, %v11031_v19, %v11032_v48 }
 0xa22   : > { %v11049_v24 = vsel %vm373_vm0, %v19677_v56, %v11048_v4  ;;  %v19759_v31 = vpop.permute.xlu1 %11185  ;;  %v11385_v56 = vld [vmem:[#allocation2 + $0x1d6] ss:$8 sm:$0xf0] }
 0xa23   : > { %v11070_v51 = vadd.f32 %v11049_v24, %v10953_v50  ;;  %v11197_v41 = vrot.slane %v19759_v31, 1 }
 0xa25   : > { %v11118_v47 = vadd.f32 %v11104_v12, %v11070_v51  ;;  %v11213_v13 = vsel %vm10916_vm5, %v11196_v54, %v11197_v41 }
 0xa26   : > { %v11214_v1 = vsel %vm322_vm1, %v19695_v22, %v11213_v13  ;;  %v19767_v20 = vpop.permute.xlu1 %11302  ;;  %v11386_v22 = vor.u32 %v11385_v56, %v11384_v36  ;;  %v11389_v56 = vld [vmem:[#allocation2 + $0x216] ss:$8 sm:$0xf0] }
 0xa27   : > { %v11314_v19 = vrot.slane %v19767_v20, 1  ;;  %v11235_v49 = vadd.f32 %v11214_v1, %v11118_v47  ;;  %v11388_v1 = vld [vmem:[#allocation2 + $0x216] ss:$8 sm:$0xf] }
 0xa29   : > { %v11330_v21 = vsel %vm10916_vm5, %v11313_v0, %v11314_v19 }
 0xa2a   : > { %v11331_v26 = vsel %vm373_vm0, %v19706_v34, %v11330_v21  ;;  %v19777_v54 = vpop.permute.xlu1 %11467 }
 0xa2b   : > { %v11352_v57 = vadd.f32 %v11331_v26, %v11235_v49  ;;  %v11479_v17 = vrot.slane %v19777_v54, 1  ;;  %v10758_v63 = vpop.f32.mrb[140].mxu1 }
 0xa2c   : > { %v10760_v11 = vpop.f32.mrb[141].mxu1  ;;  %v11392_v63 = vld [vmem:[#allocation2 + $0x256] ss:$8 sm:$0x7] }
 0xa2d   : > { %v11400_v5 = vadd.f32 %v11386_v22, %v11352_v57  ;;  %v11495_v52 = vsel %vm10916_vm5, %v11478_v46, %v11479_v17 }
 0xa2e   : > { %v11496_v0 = vsel %vm322_vm1, %v19717_v58, %v11495_v52  ;;  %v19787_v34 = vpop.permute.xlu1 %11584 }
 0xa2f   : > { %v11596_v42 = vrot.slane %v19787_v34, 1  ;;  %v10764_v25 = vpop.f32.mrb[142].mxu1  ;;  %v11517_v37 = vadd.f32 %v11496_v0, %v11400_v5 }
 0xa30   : > { %v10766_v38 = vpop.f32.mrb[143].mxu1 }
 0xa31   : > { %v11612_v32 = vsel %vm10916_vm5, %v11595_v16, %v11596_v42  ;;  %v10835_v16 = vor.u32 %v10834_v2, %v10833_v30 }
 0xa32   : > { %v11613_v53 = vsel %vm373_vm0, %v19728_v3, %v11612_v32 }
 0xa33   : > { %v11634_v46 = vadd.f32 %v11613_v53, %v11517_v37 }
 0xa35   : > { %v11646_v35 = vadd.f32 %v19347_v28, %v11634_v46 }
 0xa37   : > { %v12243_v58 = vmul.f32 -1.442695, %v11646_v35  ;;  %v10905_v8 = vpop.permute.xlu0 %10904 }
 0xa38   : > { %v10915_v29 = vrot.slane %v10905_v8, 1 }
 0xa39   : > { %14465 = vpow2.f32 %v12243_v58 }
 0xa3a   : > { %v10933_v10 = vsel %vm10916_vm5, %v10914_v43, %v10915_v29  ;;  %v10935_v61 = vsel %vm322_vm1, %v10905_v8, %v10915_v29  ;;  %v11106_v43 = vld [vmem:[#allocation2 + $0x20b] ss:$8 sm:$0xf] }
 0xa3b   : > { %v10934_v55 = vsel %vm322_vm1, %v10903_v39, %v10933_v10  ;;  %v11023_v62 = vpop.permute.xlu0 %11022  ;;  %v10955_v3 = vadd.f32 %v10935_v61, %v10837_v14  ;;  %v11108_v23 = vor.u32 %v11107_v44, %v11106_v43 }
 0xa3c   : > { %v11033_v59 = vrot.slane %v11023_v62, 1  ;;  %v10954_v9 = vadd.f32 %v10934_v55, %v10835_v16  ;;  %v11718_v55 = vlaneseq }
 0xa3e   : > { %v11050_v33 = vsel %vm10916_vm5, %v11032_v48, %v11033_v59  ;;  %v11052_v18 = vsel %vm373_vm0, %v11023_v62, %v11033_v59  ;;  %vm11720_vm6 = vcmp.lt.s32.totalorder %v11718_v55, 384 }
 0xa3f   : > { %v11051_v27 = vsel %vm373_vm0, %v11021_v40, %v11050_v33  ;;  %v11072_v45 = vadd.f32 %v11052_v18, %v10955_v3  ;;  %v11188_v7 = vpop.permute.xlu0 %11187 }
 0xa40   : > { %v11071_v15 = vadd.f32 %v11051_v27, %v10954_v9  ;;  %v11198_v39 = vrot.slane %v11188_v7, 1 }
 0xa41   : > { %v11120_v50 = vadd.f32 %v11110_v60, %v11072_v45 }
 0xa42   : > { %v11119_v24 = vadd.f32 %v11108_v23, %v11071_v15  ;;  %v11215_v6 = vsel %vm10916_vm5, %v11197_v41, %v11198_v39  ;;  %v11217_v51 = vsel %vm322_vm1, %v11188_v7, %v11198_v39 }
 0xa43   : > { %v14466_v4 = vpop.eup %14465  ;;  %v11216_v48 = vsel %vm322_vm1, %v19759_v31, %v11215_v6  ;;  %v11305_v47 = vpop.permute.xlu0 %11304  ;;  %v11237_v13 = vadd.f32 %v11217_v51, %v11120_v50  ;;  %v11390_v31 = vor.u32 %v11389_v56, %v11388_v1 }
 0xa44   : > { %v11686_v12 = vadd.f32 1.0, %v14466_v4  ;;  %v11315_v40 = vrot.slane %v11305_v47, 1  ;;  %v11236_v49 = vadd.f32 %v11216_v48, %v11119_v24 }
 0xa46   : > { %14467 = vrcp.f32 %v11686_v12  ;;  %v11332_v21 = vsel %vm10916_vm5, %v11314_v19, %v11315_v40  ;;  %v11334_v26 = vsel %vm373_vm0, %v11305_v47, %v11315_v40 }
 0xa47   : > { %v11333_v41 = vsel %vm373_vm0, %v19767_v20, %v11332_v21  ;;  %v11354_v36 = vadd.f32 %v11334_v26, %v11237_v13  ;;  %v11470_v57 = vpop.permute.xlu0 %11469 }
 0xa48   : > { %v11353_v22 = vadd.f32 %v11333_v41, %v11236_v49  ;;  %v11480_v11 = vrot.slane %v11470_v57, 1 }
 0xa49   : > { %v11402_v5 = vadd.f32 %v11392_v63, %v11354_v36 }
 0xa4a   : > { %v11401_v52 = vadd.f32 %v11390_v31, %v11353_v22  ;;  %v11497_v0 = vsel %vm10916_vm5, %v11479_v17, %v11480_v11  ;;  %v11499_v19 = vsel %vm322_vm1, %v11470_v57, %v11480_v11 }
 0xa4b   : > { %v11498_v25 = vsel %vm322_vm1, %v19777_v54, %v11497_v0  ;;  %v11587_v38 = vpop.permute.xlu0 %11586  ;;  %v11519_v37 = vadd.f32 %v11499_v19, %v11402_v5 }
 0xa4c   : > { %v11597_v20 = vrot.slane %v11587_v38, 1  ;;  %v11518_v32 = vadd.f32 %v11498_v25, %v11401_v52 }
 0xa4e   : > { %v11614_v53 = vsel %vm10916_vm5, %v11596_v42, %v11597_v20  ;;  %v11616_v46 = vsel %vm373_vm0, %v11587_v38, %v11597_v20 }
 0xa4f   : > { %v11615_v58 = vsel %vm373_vm0, %v19787_v34, %v11614_v53  ;;  %v11636_v17 = vadd.f32 %v11616_v46, %v11519_v37 }
 0xa50   : > { %v14468_v35 = vpop.eup %14467  ;;  %v11635_v8 = vadd.f32 %v11615_v58, %v11518_v32 }
 0xa51   : > { %11716 = vst [vmem:[%s19491_s5 + $0x38] sm:$0xff] %v14468_v35  ;;  %v11648_v54 = vadd.f32 %v19347_v28, %v11636_v17 }
 0xa52   : > { %v11647_v29 = vadd.f32 %v19347_v28, %v11635_v8 }
 0xa53   : > { %v12245_v2 = vmul.f32 -1.442695, %v11648_v54 }
 0xa54   : > { %v12244_v10 = vmul.f32 -1.442695, %v11647_v29 }
 0xa55   : > { %14469 = vpow2.f32 %v12245_v2 }
 0xa56   : > { %14471 = vpow2.f32 %v12244_v10 }
 0xa5f   : > { %v14470_v42 = vpop.eup %14469 }
 0xa60   : > { %v14472_v61 = vpop.eup %14471  ;;  %v11688_v30 = vadd.f32 1.0, %v14470_v42 }
 0xa61   : > { %v11687_v34 = vadd.f32 1.0, %v14472_v61 }
 0xa62   : > { %14473 = vrcp.f32 %v11688_v30 }
 0xa63   : > { %14475 = vrcp.f32 %v11687_v34 }
 0xa6c   : > { %v14474_v62 = vpop.eup %14473 }
 0xa6d   : > { %v14476_v28 = vpop.eup %14475  ;;  %11722 = vst.msk [vmem:[%s19491_s5 + $0x48] sm:$0x7] %vm11720_vm6, %v14474_v62 }
 0xa6e   : > { %11717 = vst [vmem:[%s19491_s5 + $0x40] sm:$0xff] %v14476_v28 }
 0xa6f   : > { %14637 = shalt.err (!%p14634_p2)
}
 0xa70   : > { %s14638_s21 = scalar_lea.hbm %s19834_s15, 1200  ;;  %s14642_s22 = scalar_lea.hbm %s19884_s4, 2400 }
 0xa71   : > { %p14639_p13 = scmp.ne.s32.totalorder %s19834_s15, %s14638_s21  ;;  %p14643_p4 = scmp.lt.u32.totalorder %s19834_s15, %s19884_s4 }
 0xa72   : > { %p14644_p5 = scmp.lt.u32.totalorder %s14642_s22, %s14638_s21  ;;  %p14646_p11 = scmp.lt.u32.totalorder %s14638_s21, %s19834_s15 }
 0xa73   : > { %p14640_p6 = pnand %p14639_p13, %p19902_p0 }
 0xa74   : > { %p14645_p8 = por %p14644_p5, %p14643_p4 }
 0xa75   : > { %p14641_p10 = pneg %p14640_p6 }
 0xa76   : > { %p14647_p1 = por %p14646_p11, %p14645_p8 }
 0xa78   : > { %p14648_p3 = pnand %p14647_p1, %p14641_p10 }
 0xa7a   : > { %14651 = shalt.err (!%p14648_p3)
}
 0xa7b   : > { %13544 = dma.vmem_to_hbm [thread:$0]  (%p19902_p0), %s19836_s8, 1200, %s19834_s15, %s11724_s16  }
 0xa7c PF: > { %s11750_s25 = sand.u32 1, %s14682_s17   ;;  %p19903_p7 = scmp.ne.s32.totalorder %s19890_s23, 0 }
 0xa7d   : > { %p19904_p9 = scmp.ge.s32.totalorder %s14694_s20, 2  ;;  %s11751_s30 = scalar_lea.sflag [#allocation6], %s11750_s25 }
 0xa7f   : > { %p13558_p12 = pnand %p19904_p9, %p19903_p7 }
 0xa81   : > { %14677 = dma.done.wait (!%p13558_p12), %s11751_s30, 1200  }
 0xa82   : > { %14679 = vsyncadd (!%p13558_p12), %s11751_s30, 4294966096  ;;  %p19_p2 = scmp.ge.s32.totalorder %s14844_s9, 4   ;;  %s19905_s17 = smov %s14686_s18 }
 0xa83   : > { %s19906_s18 = smov %s14690_s19  ;;  %s19907_s19 = smov %s14860_s14 }
 0xa84   : > { %s19908_s20 = smov %s14844_s9  ;;  %21 = sbr.rel (!%p19_p2) target bundleno = 8 (0x8), region = 178 }
 0xa8b   :  { %11756 = vsyncpa [#allocation5], 1 }
 0xa8c   :  { %11758 = vsyncpa [#allocation5 + $0x1], 1 }
 0xa8d   :  { %11759 = vsyncpa [#allocation8], 1 }
 0xa8e   :  { %11760 = vsyncpa [#allocation6], 1 }
 0xa8f   :  { %11762 = vsyncpa [#allocation6 + $0x1], 1 }

</bundles_post_ra>
